<compile_context>
chip_gen: v7x
topology: tpu7x:2x2x1
jax: 0.10.0
libtpu: 0.0.40
codegen_flags: <defaults>
</compile_context>

<pallas_src>
import jax
import jax.numpy as jnp
from jax.experimental import pallas as pl
from jax.experimental.pallas import tpu as pltpu

BATCH_SIZE = 2
D_LATENT = 32
FC_OUT = 2592
UNFLAT = (6, 8, 54)
N_CHANNELS = 10        # 8 + (2-1) + (2-1)
CENTRAL_RANGE = 60     # 54 + (4-1) + (4-1)

KH, KW = 2, 4
CIN1, COUT1 = 6, 3
CIN2, COUT2 = 3, 1
H0, W0 = UNFLAT[1], UNFLAT[2]          # 8, 54
OH1, OW1 = H0 + KH - 1, W0 + KW - 1    # 9, 57
OH2, OW2 = OH1 + KH - 1, OW1 + KW - 1  # 10, 60


# ----------------------------- fused Pallas kernel -----------------------------

def fused_decoder_kernel(z_ref, fcw_ref, fcb_ref,
                         dc1w_ref, dc1b_ref, dc2w_ref, dc2b_ref, logsig_ref,
                         loc_ref, scale_ref, xp1_ref, xp2_ref):
    # z_ref    : (B, D_latent)                VMEM
    # fcw_ref  : (6, 8, D_latent, 54)         VMEM   (pre-permuted fc weight)
    # fcb_ref  : (6, 8, 1, 54)                VMEM   (pre-reshaped fc bias)
    # dc1w_ref : (144,)  dc1b_ref : (3,)      SMEM   (flat ConvT weights / biases)
    # dc2w_ref : (24,)   dc2b_ref : (1,)      SMEM
    # logsig_ref / loc_ref / scale_ref        VMEM   (B, 1, 10, 60)
    # xp1_ref  : (B, 6, 10, 60)  VMEM scratch (zero-padded FC output)
    # xp2_ref  : (B, 3, 11, 63)  VMEM scratch (zero-padded deconv1 output)
    B = z_ref.shape[0]

    # ---- in-kernel zero padding (replaces jnp.pad in the wrapper) ----
    xp1_ref[...] = jnp.zeros_like(xp1_ref)
    xp2_ref[...] = jnp.zeros_like(xp2_ref)

    # ---- dec_fc + bias + ReLU, written directly in NCHW layout into xp1 interior ----
    z = z_ref[...]                                           # (B, D_latent)
    for ic in range(CIN1):
        for h in range(H0):
            w_tile = fcw_ref[ic, h, :, :]                    # (D_latent, 54) natural tile
            row = jnp.dot(z, w_tile, preferred_element_type=jnp.float32)   # (B, 54)
            row = jnp.maximum(row + fcb_ref[ic, h, :, :], 0.0)
            xp1_ref[:, ic, h + (KH - 1), (KW - 1):(KW - 1) + W0] = row

    # ---- dec_dropout p=0.1: identity (eval mode) ----
    # TODO(synk): training-mode dropout RNG (torch) not replicated; eval semantics used.

    # ---- dec_deconv_1 (6->3, k=(2,4)) + ReLU ----
    # gather form: out[b,o,y,x] = b[o] + sum_{i,a,c} xp[b,i,y+a,x+c] * W[i,o,kh-1-a,kw-1-c]
    acc1 = [jnp.zeros((B, OH1, OW1), jnp.float32) + dc1b_ref[oc] for oc in range(COUT1)]
    for ic in range(CIN1):
        for a in range(KH):
            for c in range(KW):
                shifted = xp1_ref[:, ic, a:a + OH1, c:c + OW1]   # hoisted out of oc loop
                for oc in range(COUT1):
                    widx = ((ic * COUT1 + oc) * KH + (KH - 1 - a)) * KW + (KW - 1 - c)
                    acc1[oc] = acc1[oc] + shifted * dc1w_ref[widx]
    for oc in range(COUT1):
        xp2_ref[:, oc, (KH - 1):(KH - 1) + OH1, (KW - 1):(KW - 1) + OW1] = \
            jnp.maximum(acc1[oc], 0.0)

    # ---- dec_deconv_2 (3->1, k=(2,4)), no ReLU ----
    acc2 = jnp.zeros((B, OH2, OW2), jnp.float32) + dc2b_ref[0]
    for ic in range(CIN2):
        for a in range(KH):
            for c in range(KW):
                shifted = xp2_ref[:, ic, a:a + OH2, c:c + OW2]
                widx = ((ic * COUT2 + 0) * KH + (KH - 1 - a)) * KW + (KW - 1 - c)
                acc2 = acc2 + shifted * dc2w_ref[widx]
    loc_ref[:, 0, :, :] = acc2

    # ---- Laplace scale = exp(log_sig) (parameter-only; EUP slot is otherwise idle) ----
    scale_ref[...] = jnp.exp(logsig_ref[...])


# ----------------------------- wrapper -----------------------------------------

def _vmem():
    return pl.BlockSpec(memory_space=pltpu.MemorySpace.VMEM)


def _smem():
    return pl.BlockSpec(memory_space=pltpu.MemorySpace.SMEM)


@jax.jit
def conv_decoder_forward(z, params):
    """Returns (loc, scale) of the Laplace distribution p(x|z) — one fused Pallas kernel."""
    B = z.shape[0]
    loc, scale = pl.pallas_call(
        fused_decoder_kernel,
        out_shape=(
            jax.ShapeDtypeStruct((B, 1, OH2, OW2), jnp.float32),
            jax.ShapeDtypeStruct(params["log_sig"].shape, jnp.float32),
        ),
        in_specs=[_vmem(), _vmem(), _vmem(),          # z, fcw_k, fcb_k
                  _smem(), _smem(), _smem(), _smem(),  # dc1w_k, dc1_b, dc2w_k, dc2_b
                  _vmem()],                            # log_sig
        out_specs=(_vmem(), _vmem()),
        scratch_shapes=[
            pltpu.VMEM((B, CIN1, H0 + 2 * (KH - 1), W0 + 2 * (KW - 1)), jnp.float32),   # (B,6,10,60)
            pltpu.VMEM((B, CIN2, OH1 + 2 * (KH - 1), OW1 + 2 * (KW - 1)), jnp.float32),  # (B,3,11,63)
        ],
    )(z, params["fcw_k"], params["fcb_k"],
      params["dc1w_k"], params["dc1_b"], params["dc2w_k"], params["dc2_b"],
      params["log_sig"])
    return loc, scale


# ----------------------------- pure-JAX reference -------------------------------

def _ref_deconv(x, w, b):
    # scatter formulation (independent of the kernel's gather formulation)
    Bn, cin, H, W = x.shape
    cout, kh, kw = w.shape[1], w.shape[2], w.shape[3]
    out = jnp.zeros((Bn, cout, H + kh - 1, W + kw - 1), jnp.float32) + b[None, :, None, None]
    for ky in range(kh):
        for kx in range(kw):
            out = out.at[:, :, ky:ky + H, kx:kx + W].add(
                jnp.einsum("bihw,io->bohw", x, w[:, :, ky, kx]))
    return out


def reference_forward(z, p):
    B = z.shape[0]
    s = jnp.maximum(z @ p["fc_w"].T + p["fc_b"], 0.0).reshape(B, *UNFLAT)
    s = jnp.maximum(_ref_deconv(s, p["dc1_w"], p["dc1_b"]), 0.0)
    s = _ref_deconv(s, p["dc2_w"], p["dc2_b"])
    return s.reshape(-1, 1, N_CHANNELS, CENTRAL_RANGE), jnp.exp(p["log_sig"])


# ----------------------------- params ------------------------------------------

def init_params(key):
    ks = jax.random.split(key, 6)
    bfc = 1.0 / jnp.sqrt(D_LATENT)
    b1 = 1.0 / jnp.sqrt(CIN1 * KH * KW)
    b2 = 1.0 / jnp.sqrt(CIN2 * KH * KW)
    p = {
        "fc_w": jax.random.uniform(ks[0], (FC_OUT, D_LATENT), jnp.float32, -bfc, bfc),
        "fc_b": jax.random.uniform(ks[1], (FC_OUT,), jnp.float32, -bfc, bfc),
        "dc1_w": jax.random.uniform(ks[2], (CIN1, COUT1, KH, KW), jnp.float32, -b1, b1),
        "dc1_b": jax.random.uniform(ks[3], (COUT1,), jnp.float32, -b1, b1),
        "dc2_w": jax.random.uniform(ks[4], (CIN2, COUT2, KH, KW), jnp.float32, -b2, b2),
        "dc2_b": jax.random.uniform(ks[5], (COUT2,), jnp.float32, -b2, b2),
        "log_sig": jnp.zeros((BATCH_SIZE, 1, N_CHANNELS, CENTRAL_RANGE), jnp.float32),
    }
    # Kernel-layout copies, prepared ONCE here (not per forward call):
    #   fcw_k[ic, h, k, w] = fc_w[ic*432 + h*54 + w, k]   -> (6, 8, D_latent, 54)
    p["fcw_k"] = p["fc_w"].T.reshape(D_LATENT, *UNFLAT).transpose(1, 2, 0, 3)
    p["fcb_k"] = p["fc_b"].reshape(*UNFLAT)[:, :, None, :]   # (6, 8, 1, 54)
    p["dc1w_k"] = p["dc1_w"].reshape(-1)                     # (144,) row-major (cin,cout,kh,kw)
    p["dc2w_k"] = p["dc2_w"].reshape(-1)                     # (24,)
    return p


# ----------------------------- main ---------------------------------------------

if __name__ == "__main__":
    key = jax.random.PRNGKey(0)
    pkey, zkey = jax.random.split(key)
    params = init_params(pkey)
    z = jax.random.normal(zkey, (BATCH_SIZE, D_LATENT), jnp.float32)

    loc, scale = jax.block_until_ready(conv_decoder_forward(z, params))

    loc_ref, scale_ref = reference_forward(z, params)
    assert loc.shape == (BATCH_SIZE, 1, N_CHANNELS, CENTRAL_RANGE)
    assert scale.shape == (BATCH_SIZE, 1, N_CHANNELS, CENTRAL_RANGE)
    assert jnp.allclose(loc, loc_ref, atol=1e-4, rtol=1e-4)
    assert jnp.allclose(scale, scale_ref, atol=1e-6, rtol=1e-6)

    print("KERNEL_OK")
</pallas_src>

<mosaic_0001>
module attributes {stable_mosaic.version = 11 : i64} {
  func.func @fused_decoder_kernel(%arg0: memref<2x32xf32, #tpu.memory_space<vmem>>, %arg1: memref<6x8x32x54xf32, #tpu.memory_space<vmem>>, %arg2: memref<6x8x1x54xf32, #tpu.memory_space<vmem>>, %arg3: memref<144xf32, #tpu.memory_space<smem>>, %arg4: memref<3xf32, #tpu.memory_space<smem>>, %arg5: memref<24xf32, #tpu.memory_space<smem>>, %arg6: memref<1xf32, #tpu.memory_space<smem>>, %arg7: memref<2x1x10x60xf32, #tpu.memory_space<vmem>>, %arg8: memref<2x1x10x60xf32, #tpu.memory_space<vmem>>, %arg9: memref<2x1x10x60xf32, #tpu.memory_space<vmem>>, %arg10: memref<2x6x10x60xf32, #tpu.memory_space<vmem>>, %arg11: memref<2x3x11x63xf32, #tpu.memory_space<vmem>>) attributes {dimension_semantics = [], scalar_prefetch = 0 : i64, scratch_operands = 2 : i64, tpu.core_type = #tpu.core_type<tc>} {
    %cst = arith.constant 0.000000e+00 : f32
    %0 = vector.broadcast %cst : f32 to vector<2x6x10x60xf32>
    %c0 = arith.constant 0 : index
    %c0_0 = arith.constant 0 : index
    %c0_1 = arith.constant 0 : index
    %c0_2 = arith.constant 0 : index
    %1 = vector.load %arg10[%c0, %c0_0, %c0_1, %c0_2] : memref<2x6x10x60xf32, #tpu.memory_space<vmem>>, vector<2x6x10x60xf32>
    tpu.vector_store %arg10[%c0, %c0_0, %c0_1, %c0_2], %0 {strides = array<i32>} : memref<2x6x10x60xf32, #tpu.memory_space<vmem>>, vector<2x6x10x60xf32>,
    %cst_3 = arith.constant 0.000000e+00 : f32
    %2 = vector.broadcast %cst_3 : f32 to vector<2x3x11x63xf32>
    %c0_4 = arith.constant 0 : index
    %c0_5 = arith.constant 0 : index
    %c0_6 = arith.constant 0 : index
    %c0_7 = arith.constant 0 : index
    %3 = vector.load %arg11[%c0_4, %c0_5, %c0_6, %c0_7] : memref<2x3x11x63xf32, #tpu.memory_space<vmem>>, vector<2x3x11x63xf32>
    tpu.vector_store %arg11[%c0_4, %c0_5, %c0_6, %c0_7], %2 {strides = array<i32>} : memref<2x3x11x63xf32, #tpu.memory_space<vmem>>, vector<2x3x11x63xf32>,
    %c0_8 = arith.constant 0 : index
    %c0_9 = arith.constant 0 : index
    %4 = vector.load %arg0[%c0_8, %c0_9] : memref<2x32xf32, #tpu.memory_space<vmem>>, vector<2x32xf32>
    %c0_10 = arith.constant 0 : index
    %c0_11 = arith.constant 0 : index
    %c0_12 = arith.constant 0 : index
    %c0_13 = arith.constant 0 : index
    %5 = vector.load %arg1[%c0_10, %c0_11, %c0_12, %c0_13] : memref<6x8x32x54xf32, #tpu.memory_space<vmem>>, vector<1x1x32x54xf32>
    %6 = vector.shape_cast %5 : vector<1x1x32x54xf32> to vector<32x54xf32>
    %cst_14 = arith.constant dense<0.000000e+00> : vector<2x54xf32>
    %7 = tpu.matmul %4, %6, %cst_14 {dimension_numbers = #tpu.dot_dimension_numbers<[1], [0], [0], [1], [0, 0, 1, 1], [], []>} : vector<2x32xf32>, vector<32x54xf32>, vector<2x54xf32> -> vector<2x54xf32>
    %c0_15 = arith.constant 0 : index
    %c0_16 = arith.constant 0 : index
    %c0_17 = arith.constant 0 : index
    %c0_18 = arith.constant 0 : index
    %8 = vector.load %arg2[%c0_15, %c0_16, %c0_17, %c0_18] : memref<6x8x1x54xf32, #tpu.memory_space<vmem>>, vector<1x1x1x54xf32>
    %9 = vector.shape_cast %8 : vector<1x1x1x54xf32> to vector<1x54xf32>
    %10 = vector.broadcast %9 : vector<1x54xf32> to vector<2x54xf32>
    %11 = arith.addf %7, %10 : vector<2x54xf32>
    %cst_19 = arith.constant 0.000000e+00 : f32
    %12 = vector.broadcast %cst_19 : f32 to vector<2x54xf32>
    %13 = arith.maximumf %11, %12 : vector<2x54xf32>
    %c0_20 = arith.constant 0 : index
    %c0_21 = arith.constant 0 : index
    %c1 = arith.constant 1 : index
    %c3 = arith.constant 3 : index
    %14 = vector.load %arg10[%c0_20, %c0_21, %c1, %c3] : memref<2x6x10x60xf32, #tpu.memory_space<vmem>>, vector<2x1x1x54xf32>
    %15 = vector.shape_cast %14 : vector<2x1x1x54xf32> to vector<2x54xf32>
    %16 = vector.shape_cast %13 : vector<2x54xf32> to vector<2x1x1x54xf32>
    tpu.vector_store %arg10[%c0_20, %c0_21, %c1, %c3], %16 {strides = array<i32>} : memref<2x6x10x60xf32, #tpu.memory_space<vmem>>, vector<2x1x1x54xf32>,
    %c0_22 = arith.constant 0 : index
    %c1_23 = arith.constant 1 : index
    %c0_24 = arith.constant 0 : index
    %c0_25 = arith.constant 0 : index
    %17 = vector.load %arg1[%c0_22, %c1_23, %c0_24, %c0_25] : memref<6x8x32x54xf32, #tpu.memory_space<vmem>>, vector<1x1x32x54xf32>
    %18 = vector.shape_cast %17 : vector<1x1x32x54xf32> to vector<32x54xf32>
    %cst_26 = arith.constant dense<0.000000e+00> : vector<2x54xf32>
    %19 = tpu.matmul %4, %18, %cst_26 {dimension_numbers = #tpu.dot_dimension_numbers<[1], [0], [0], [1], [0, 0, 1, 1], [], []>} : vector<2x32xf32>, vector<32x54xf32>, vector<2x54xf32> -> vector<2x54xf32>
    %c0_27 = arith.constant 0 : index
    %c1_28 = arith.constant 1 : index
    %c0_29 = arith.constant 0 : index
    %c0_30 = arith.constant 0 : index
    %20 = vector.load %arg2[%c0_27, %c1_28, %c0_29, %c0_30] : memref<6x8x1x54xf32, #tpu.memory_space<vmem>>, vector<1x1x1x54xf32>
    %21 = vector.shape_cast %20 : vector<1x1x1x54xf32> to vector<1x54xf32>
    %22 = vector.broadcast %21 : vector<1x54xf32> to vector<2x54xf32>
    %23 = arith.addf %19, %22 : vector<2x54xf32>
    %cst_31 = arith.constant 0.000000e+00 : f32
    %24 = vector.broadcast %cst_31 : f32 to vector<2x54xf32>
    %25 = arith.maximumf %23, %24 : vector<2x54xf32>
    %c0_32 = arith.constant 0 : index
    %c0_33 = arith.constant 0 : index
    %c2 = arith.constant 2 : index
    %c3_34 = arith.constant 3 : index
    %26 = vector.load %arg10[%c0_32, %c0_33, %c2, %c3_34] : memref<2x6x10x60xf32, #tpu.memory_space<vmem>>, vector<2x1x1x54xf32>
    %27 = vector.shape_cast %26 : vector<2x1x1x54xf32> to vector<2x54xf32>
    %28 = vector.shape_cast %25 : vector<2x54xf32> to vector<2x1x1x54xf32>
    tpu.vector_store %arg10[%c0_32, %c0_33, %c2, %c3_34], %28 {strides = array<i32>} : memref<2x6x10x60xf32, #tpu.memory_space<vmem>>, vector<2x1x1x54xf32>,
    %c0_35 = arith.constant 0 : index
    %c2_36 = arith.constant 2 : index
    %c0_37 = arith.constant 0 : index
    %c0_38 = arith.constant 0 : index
    %29 = vector.load %arg1[%c0_35, %c2_36, %c0_37, %c0_38] : memref<6x8x32x54xf32, #tpu.memory_space<vmem>>, vector<1x1x32x54xf32>
    %30 = vector.shape_cast %29 : vector<1x1x32x54xf32> to vector<32x54xf32>
    %cst_39 = arith.constant dense<0.000000e+00> : vector<2x54xf32>
    %31 = tpu.matmul %4, %30, %cst_39 {dimension_numbers = #tpu.dot_dimension_numbers<[1], [0], [0], [1], [0, 0, 1, 1], [], []>} : vector<2x32xf32>, vector<32x54xf32>, vector<2x54xf32> -> vector<2x54xf32>
    %c0_40 = arith.constant 0 : index
    %c2_41 = arith.constant 2 : index
    %c0_42 = arith.constant 0 : index
    %c0_43 = arith.constant 0 : index
    %32 = vector.load %arg2[%c0_40, %c2_41, %c0_42, %c0_43] : memref<6x8x1x54xf32, #tpu.memory_space<vmem>>, vector<1x1x1x54xf32>
    %33 = vector.shape_cast %32 : vector<1x1x1x54xf32> to vector<1x54xf32>
    %34 = vector.broadcast %33 : vector<1x54xf32> to vector<2x54xf32>
    %35 = arith.addf %31, %34 : vector<2x54xf32>
    %cst_44 = arith.constant 0.000000e+00 : f32
    %36 = vector.broadcast %cst_44 : f32 to vector<2x54xf32>
    %37 = arith.maximumf %35, %36 : vector<2x54xf32>
    %c0_45 = arith.constant 0 : index
    %c0_46 = arith.constant 0 : index
    %c3_47 = arith.constant 3 : index
    %c3_48 = arith.constant 3 : index
    %38 = vector.load %arg10[%c0_45, %c0_46, %c3_47, %c3_48] : memref<2x6x10x60xf32, #tpu.memory_space<vmem>>, vector<2x1x1x54xf32>
    %39 = vector.shape_cast %38 : vector<2x1x1x54xf32> to vector<2x54xf32>
    %40 = vector.shape_cast %37 : vector<2x54xf32> to vector<2x1x1x54xf32>
    tpu.vector_store %arg10[%c0_45, %c0_46, %c3_47, %c3_48], %40 {strides = array<i32>} : memref<2x6x10x60xf32, #tpu.memory_space<vmem>>, vector<2x1x1x54xf32>,
    %c0_49 = arith.constant 0 : index
    %c3_50 = arith.constant 3 : index
    %c0_51 = arith.constant 0 : index
    %c0_52 = arith.constant 0 : index
    %41 = vector.load %arg1[%c0_49, %c3_50, %c0_51, %c0_52] : memref<6x8x32x54xf32, #tpu.memory_space<vmem>>, vector<1x1x32x54xf32>
    %42 = vector.shape_cast %41 : vector<1x1x32x54xf32> to vector<32x54xf32>
    %cst_53 = arith.constant dense<0.000000e+00> : vector<2x54xf32>
    %43 = tpu.matmul %4, %42, %cst_53 {dimension_numbers = #tpu.dot_dimension_numbers<[1], [0], [0], [1], [0, 0, 1, 1], [], []>} : vector<2x32xf32>, vector<32x54xf32>, vector<2x54xf32> -> vector<2x54xf32>
    %c0_54 = arith.constant 0 : index
    %c3_55 = arith.constant 3 : index
    %c0_56 = arith.constant 0 : index
    %c0_57 = arith.constant 0 : index
    %44 = vector.load %arg2[%c0_54, %c3_55, %c0_56, %c0_57] : memref<6x8x1x54xf32, #tpu.memory_space<vmem>>, vector<1x1x1x54xf32>
    %45 = vector.shape_cast %44 : vector<1x1x1x54xf32> to vector<1x54xf32>
    %46 = vector.broadcast %45 : vector<1x54xf32> to vector<2x54xf32>
    %47 = arith.addf %43, %46 : vector<2x54xf32>
    %cst_58 = arith.constant 0.000000e+00 : f32
    %48 = vector.broadcast %cst_58 : f32 to vector<2x54xf32>
    %49 = arith.maximumf %47, %48 : vector<2x54xf32>
    %c0_59 = arith.constant 0 : index
    %c0_60 = arith.constant 0 : index
    %c4 = arith.constant 4 : index
    %c3_61 = arith.constant 3 : index
    %50 = vector.load %arg10[%c0_59, %c0_60, %c4, %c3_61] : memref<2x6x10x60xf32, #tpu.memory_space<vmem>>, vector<2x1x1x54xf32>
    %51 = vector.shape_cast %50 : vector<2x1x1x54xf32> to vector<2x54xf32>
    %52 = vector.shape_cast %49 : vector<2x54xf32> to vector<2x1x1x54xf32>
    tpu.vector_store %arg10[%c0_59, %c0_60, %c4, %c3_61], %52 {strides = array<i32>} : memref<2x6x10x60xf32, #tpu.memory_space<vmem>>, vector<2x1x1x54xf32>,
    %c0_62 = arith.constant 0 : index
    %c4_63 = arith.constant 4 : index
    %c0_64 = arith.constant 0 : index
    %c0_65 = arith.constant 0 : index
    %53 = vector.load %arg1[%c0_62, %c4_63, %c0_64, %c0_65] : memref<6x8x32x54xf32, #tpu.memory_space<vmem>>, vector<1x1x32x54xf32>
    %54 = vector.shape_cast %53 : vector<1x1x32x54xf32> to vector<32x54xf32>
    %cst_66 = arith.constant dense<0.000000e+00> : vector<2x54xf32>
    %55 = tpu.matmul %4, %54, %cst_66 {dimension_numbers = #tpu.dot_dimension_numbers<[1], [0], [0], [1], [0, 0, 1, 1], [], []>} : vector<2x32xf32>, vector<32x54xf32>, vector<2x54xf32> -> vector<2x54xf32>
    %c0_67 = arith.constant 0 : index
    %c4_68 = arith.constant 4 : index
    %c0_69 = arith.constant 0 : index
    %c0_70 = arith.constant 0 : index
    %56 = vector.load %arg2[%c0_67, %c4_68, %c0_69, %c0_70] : memref<6x8x1x54xf32, #tpu.memory_space<vmem>>, vector<1x1x1x54xf32>
    %57 = vector.shape_cast %56 : vector<1x1x1x54xf32> to vector<1x54xf32>
    %58 = vector.broadcast %57 : vector<1x54xf32> to vector<2x54xf32>
    %59 = arith.addf %55, %58 : vector<2x54xf32>
    %cst_71 = arith.constant 0.000000e+00 : f32
    %60 = vector.broadcast %cst_71 : f32 to vector<2x54xf32>
    %61 = arith.maximumf %59, %60 : vector<2x54xf32>
    %c0_72 = arith.constant 0 : index
    %c0_73 = arith.constant 0 : index
    %c5 = arith.constant 5 : index
    %c3_74 = arith.constant 3 : index
    %62 = vector.load %arg10[%c0_72, %c0_73, %c5, %c3_74] : memref<2x6x10x60xf32, #tpu.memory_space<vmem>>, vector<2x1x1x54xf32>
    %63 = vector.shape_cast %62 : vector<2x1x1x54xf32> to vector<2x54xf32>
    %64 = vector.shape_cast %61 : vector<2x54xf32> to vector<2x1x1x54xf32>
    tpu.vector_store %arg10[%c0_72, %c0_73, %c5, %c3_74], %64 {strides = array<i32>} : memref<2x6x10x60xf32, #tpu.memory_space<vmem>>, vector<2x1x1x54xf32>,
    %c0_75 = arith.constant 0 : index
    %c5_76 = arith.constant 5 : index
    %c0_77 = arith.constant 0 : index
    %c0_78 = arith.constant 0 : index
    %65 = vector.load %arg1[%c0_75, %c5_76, %c0_77, %c0_78] : memref<6x8x32x54xf32, #tpu.memory_space<vmem>>, vector<1x1x32x54xf32>
    %66 = vector.shape_cast %65 : vector<1x1x32x54xf32> to vector<32x54xf32>
    %cst_79 = arith.constant dense<0.000000e+00> : vector<2x54xf32>
    %67 = tpu.matmul %4, %66, %cst_79 {dimension_numbers = #tpu.dot_dimension_numbers<[1], [0], [0], [1], [0, 0, 1, 1], [], []>} : vector<2x32xf32>, vector<32x54xf32>, vector<2x54xf32> -> vector<2x54xf32>
    %c0_80 = arith.constant 0 : index
    %c5_81 = arith.constant 5 : index
    %c0_82 = arith.constant 0 : index
    %c0_83 = arith.constant 0 : index
    %68 = vector.load %arg2[%c0_80, %c5_81, %c0_82, %c0_83] : memref<6x8x1x54xf32, #tpu.memory_space<vmem>>, vector<1x1x1x54xf32>
    %69 = vector.shape_cast %68 : vector<1x1x1x54xf32> to vector<1x54xf32>
    %70 = vector.broadcast %69 : vector<1x54xf32> to vector<2x54xf32>
    %71 = arith.addf %67, %70 : vector<2x54xf32>
    %cst_84 = arith.constant 0.000000e+00 : f32
    %72 = vector.broadcast %cst_84 : f32 to vector<2x54xf32>
    %73 = arith.maximumf %71, %72 : vector<2x54xf32>
    %c0_85 = arith.constant 0 : index
    %c0_86 = arith.constant 0 : index
    %c6 = arith.constant 6 : index
    %c3_87 = arith.constant 3 : index
    %74 = vector.load %arg10[%c0_85, %c0_86, %c6, %c3_87] : memref<2x6x10x60xf32, #tpu.memory_space<vmem>>, vector<2x1x1x54xf32>
    %75 = vector.shape_cast %74 : vector<2x1x1x54xf32> to vector<2x54xf32>
    %76 = vector.shape_cast %73 : vector<2x54xf32> to vector<2x1x1x54xf32>
    tpu.vector_store %arg10[%c0_85, %c0_86, %c6, %c3_87], %76 {strides = array<i32>} : memref<2x6x10x60xf32, #tpu.memory_space<vmem>>, vector<2x1x1x54xf32>,
    %c0_88 = arith.constant 0 : index
    %c6_89 = arith.constant 6 : index
    %c0_90 = arith.constant 0 : index
    %c0_91 = arith.constant 0 : index
    %77 = vector.load %arg1[%c0_88, %c6_89, %c0_90, %c0_91] : memref<6x8x32x54xf32, #tpu.memory_space<vmem>>, vector<1x1x32x54xf32>
    %78 = vector.shape_cast %77 : vector<1x1x32x54xf32> to vector<32x54xf32>
    %cst_92 = arith.constant dense<0.000000e+00> : vector<2x54xf32>
    %79 = tpu.matmul %4, %78, %cst_92 {dimension_numbers = #tpu.dot_dimension_numbers<[1], [0], [0], [1], [0, 0, 1, 1], [], []>} : vector<2x32xf32>, vector<32x54xf32>, vector<2x54xf32> -> vector<2x54xf32>
    %c0_93 = arith.constant 0 : index
    %c6_94 = arith.constant 6 : index
    %c0_95 = arith.constant 0 : index
    %c0_96 = arith.constant 0 : index
    %80 = vector.load %arg2[%c0_93, %c6_94, %c0_95, %c0_96] : memref<6x8x1x54xf32, #tpu.memory_space<vmem>>, vector<1x1x1x54xf32>
    %81 = vector.shape_cast %80 : vector<1x1x1x54xf32> to vector<1x54xf32>
    %82 = vector.broadcast %81 : vector<1x54xf32> to vector<2x54xf32>
    %83 = arith.addf %79, %82 : vector<2x54xf32>
    %cst_97 = arith.constant 0.000000e+00 : f32
    %84 = vector.broadcast %cst_97 : f32 to vector<2x54xf32>
    %85 = arith.maximumf %83, %84 : vector<2x54xf32>
    %c0_98 = arith.constant 0 : index
    %c0_99 = arith.constant 0 : index
    %c7 = arith.constant 7 : index
    %c3_100 = arith.constant 3 : index
    %86 = vector.load %arg10[%c0_98, %c0_99, %c7, %c3_100] : memref<2x6x10x60xf32, #tpu.memory_space<vmem>>, vector<2x1x1x54xf32>
    %87 = vector.shape_cast %86 : vector<2x1x1x54xf32> to vector<2x54xf32>
    %88 = vector.shape_cast %85 : vector<2x54xf32> to vector<2x1x1x54xf32>
    tpu.vector_store %arg10[%c0_98, %c0_99, %c7, %c3_100], %88 {strides = array<i32>} : memref<2x6x10x60xf32, #tpu.memory_space<vmem>>, vector<2x1x1x54xf32>,
    %c0_101 = arith.constant 0 : index
    %c7_102 = arith.constant 7 : index
    %c0_103 = arith.constant 0 : index
    %c0_104 = arith.constant 0 : index
    %89 = vector.load %arg1[%c0_101, %c7_102, %c0_103, %c0_104] : memref<6x8x32x54xf32, #tpu.memory_space<vmem>>, vector<1x1x32x54xf32>
    %90 = vector.shape_cast %89 : vector<1x1x32x54xf32> to vector<32x54xf32>
    %cst_105 = arith.constant dense<0.000000e+00> : vector<2x54xf32>
    %91 = tpu.matmul %4, %90, %cst_105 {dimension_numbers = #tpu.dot_dimension_numbers<[1], [0], [0], [1], [0, 0, 1, 1], [], []>} : vector<2x32xf32>, vector<32x54xf32>, vector<2x54xf32> -> vector<2x54xf32>
    %c0_106 = arith.constant 0 : index
    %c7_107 = arith.constant 7 : index
    %c0_108 = arith.constant 0 : index
    %c0_109 = arith.constant 0 : index
    %92 = vector.load %arg2[%c0_106, %c7_107, %c0_108, %c0_109] : memref<6x8x1x54xf32, #tpu.memory_space<vmem>>, vector<1x1x1x54xf32>
    %93 = vector.shape_cast %92 : vector<1x1x1x54xf32> to vector<1x54xf32>
    %94 = vector.broadcast %93 : vector<1x54xf32> to vector<2x54xf32>
    %95 = arith.addf %91, %94 : vector<2x54xf32>
    %cst_110 = arith.constant 0.000000e+00 : f32
    %96 = vector.broadcast %cst_110 : f32 to vector<2x54xf32>
    %97 = arith.maximumf %95, %96 : vector<2x54xf32>
    %c0_111 = arith.constant 0 : index
    %c0_112 = arith.constant 0 : index
    %c8 = arith.constant 8 : index
    %c3_113 = arith.constant 3 : index
    %98 = vector.load %arg10[%c0_111, %c0_112, %c8, %c3_113] : memref<2x6x10x60xf32, #tpu.memory_space<vmem>>, vector<2x1x1x54xf32>
    %99 = vector.shape_cast %98 : vector<2x1x1x54xf32> to vector<2x54xf32>
    %100 = vector.shape_cast %97 : vector<2x54xf32> to vector<2x1x1x54xf32>
    tpu.vector_store %arg10[%c0_111, %c0_112, %c8, %c3_113], %100 {strides = array<i32>} : memref<2x6x10x60xf32, #tpu.memory_space<vmem>>, vector<2x1x1x54xf32>,
    %c1_114 = arith.constant 1 : index
    %c0_115 = arith.constant 0 : index
    %c0_116 = arith.constant 0 : index
    %c0_117 = arith.constant 0 : index
    %101 = vector.load %arg1[%c1_114, %c0_115, %c0_116, %c0_117] : memref<6x8x32x54xf32, #tpu.memory_space<vmem>>, vector<1x1x32x54xf32>
    %102 = vector.shape_cast %101 : vector<1x1x32x54xf32> to vector<32x54xf32>
    %cst_118 = arith.constant dense<0.000000e+00> : vector<2x54xf32>
    %103 = tpu.matmul %4, %102, %cst_118 {dimension_numbers = #tpu.dot_dimension_numbers<[1], [0], [0], [1], [0, 0, 1, 1], [], []>} : vector<2x32xf32>, vector<32x54xf32>, vector<2x54xf32> -> vector<2x54xf32>
    %c1_119 = arith.constant 1 : index
    %c0_120 = arith.constant 0 : index
    %c0_121 = arith.constant 0 : index
    %c0_122 = arith.constant 0 : index
    %104 = vector.load %arg2[%c1_119, %c0_120, %c0_121, %c0_122] : memref<6x8x1x54xf32, #tpu.memory_space<vmem>>, vector<1x1x1x54xf32>
    %105 = vector.shape_cast %104 : vector<1x1x1x54xf32> to vector<1x54xf32>
    %106 = vector.broadcast %105 : vector<1x54xf32> to vector<2x54xf32>
    %107 = arith.addf %103, %106 : vector<2x54xf32>
    %cst_123 = arith.constant 0.000000e+00 : f32
    %108 = vector.broadcast %cst_123 : f32 to vector<2x54xf32>
    %109 = arith.maximumf %107, %108 : vector<2x54xf32>
    %c0_124 = arith.constant 0 : index
    %c1_125 = arith.constant 1 : index
    %c1_126 = arith.constant 1 : index
    %c3_127 = arith.constant 3 : index
    %110 = vector.load %arg10[%c0_124, %c1_125, %c1_126, %c3_127] : memref<2x6x10x60xf32, #tpu.memory_space<vmem>>, vector<2x1x1x54xf32>
    %111 = vector.shape_cast %110 : vector<2x1x1x54xf32> to vector<2x54xf32>
    %112 = vector.shape_cast %109 : vector<2x54xf32> to vector<2x1x1x54xf32>
    tpu.vector_store %arg10[%c0_124, %c1_125, %c1_126, %c3_127], %112 {strides = array<i32>} : memref<2x6x10x60xf32, #tpu.memory_space<vmem>>, vector<2x1x1x54xf32>,
    %c1_128 = arith.constant 1 : index
    %c1_129 = arith.constant 1 : index
    %c0_130 = arith.constant 0 : index
    %c0_131 = arith.constant 0 : index
    %113 = vector.load %arg1[%c1_128, %c1_129, %c0_130, %c0_131] : memref<6x8x32x54xf32, #tpu.memory_space<vmem>>, vector<1x1x32x54xf32>
    %114 = vector.shape_cast %113 : vector<1x1x32x54xf32> to vector<32x54xf32>
    %cst_132 = arith.constant dense<0.000000e+00> : vector<2x54xf32>
    %115 = tpu.matmul %4, %114, %cst_132 {dimension_numbers = #tpu.dot_dimension_numbers<[1], [0], [0], [1], [0, 0, 1, 1], [], []>} : vector<2x32xf32>, vector<32x54xf32>, vector<2x54xf32> -> vector<2x54xf32>
    %c1_133 = arith.constant 1 : index
    %c1_134 = arith.constant 1 : index
    %c0_135 = arith.constant 0 : index
    %c0_136 = arith.constant 0 : index
    %116 = vector.load %arg2[%c1_133, %c1_134, %c0_135, %c0_136] : memref<6x8x1x54xf32, #tpu.memory_space<vmem>>, vector<1x1x1x54xf32>
    %117 = vector.shape_cast %116 : vector<1x1x1x54xf32> to vector<1x54xf32>
    %118 = vector.broadcast %117 : vector<1x54xf32> to vector<2x54xf32>
    %119 = arith.addf %115, %118 : vector<2x54xf32>
    %cst_137 = arith.constant 0.000000e+00 : f32
    %120 = vector.broadcast %cst_137 : f32 to vector<2x54xf32>
    %121 = arith.maximumf %119, %120 : vector<2x54xf32>
    %c0_138 = arith.constant 0 : index
    %c1_139 = arith.constant 1 : index
    %c2_140 = arith.constant 2 : index
    %c3_141 = arith.constant 3 : index
    %122 = vector.load %arg10[%c0_138, %c1_139, %c2_140, %c3_141] : memref<2x6x10x60xf32, #tpu.memory_space<vmem>>, vector<2x1x1x54xf32>
    %123 = vector.shape_cast %122 : vector<2x1x1x54xf32> to vector<2x54xf32>
    %124 = vector.shape_cast %121 : vector<2x54xf32> to vector<2x1x1x54xf32>
    tpu.vector_store %arg10[%c0_138, %c1_139, %c2_140, %c3_141], %124 {strides = array<i32>} : memref<2x6x10x60xf32, #tpu.memory_space<vmem>>, vector<2x1x1x54xf32>,
    %c1_142 = arith.constant 1 : index
    %c2_143 = arith.constant 2 : index
    %c0_144 = arith.constant 0 : index
    %c0_145 = arith.constant 0 : index
    %125 = vector.load %arg1[%c1_142, %c2_143, %c0_144, %c0_145] : memref<6x8x32x54xf32, #tpu.memory_space<vmem>>, vector<1x1x32x54xf32>
    %126 = vector.shape_cast %125 : vector<1x1x32x54xf32> to vector<32x54xf32>
    %cst_146 = arith.constant dense<0.000000e+00> : vector<2x54xf32>
    %127 = tpu.matmul %4, %126, %cst_146 {dimension_numbers = #tpu.dot_dimension_numbers<[1], [0], [0], [1], [0, 0, 1, 1], [], []>} : vector<2x32xf32>, vector<32x54xf32>, vector<2x54xf32> -> vector<2x54xf32>
    %c1_147 = arith.constant 1 : index
    %c2_148 = arith.constant 2 : index
    %c0_149 = arith.constant 0 : index
    %c0_150 = arith.constant 0 : index
    %128 = vector.load %arg2[%c1_147, %c2_148, %c0_149, %c0_150] : memref<6x8x1x54xf32, #tpu.memory_space<vmem>>, vector<1x1x1x54xf32>
    %129 = vector.shape_cast %128 : vector<1x1x1x54xf32> to vector<1x54xf32>
    %130 = vector.broadcast %129 : vector<1x54xf32> to vector<2x54xf32>
    %131 = arith.addf %127, %130 : vector<2x54xf32>
    %cst_151 = arith.constant 0.000000e+00 : f32
    %132 = vector.broadcast %cst_151 : f32 to vector<2x54xf32>
    %133 = arith.maximumf %131, %132 : vector<2x54xf32>
    %c0_152 = arith.constant 0 : index
    %c1_153 = arith.constant 1 : index
    %c3_154 = arith.constant 3 : index
    %c3_155 = arith.constant 3 : index
    %134 = vector.load %arg10[%c0_152, %c1_153, %c3_154, %c3_155] : memref<2x6x10x60xf32, #tpu.memory_space<vmem>>, vector<2x1x1x54xf32>
    %135 = vector.shape_cast %134 : vector<2x1x1x54xf32> to vector<2x54xf32>
    %136 = vector.shape_cast %133 : vector<2x54xf32> to vector<2x1x1x54xf32>
    tpu.vector_store %arg10[%c0_152, %c1_153, %c3_154, %c3_155], %136 {strides = array<i32>} : memref<2x6x10x60xf32, #tpu.memory_space<vmem>>, vector<2x1x1x54xf32>,
    %c1_156 = arith.constant 1 : index
    %c3_157 = arith.constant 3 : index
    %c0_158 = arith.constant 0 : index
    %c0_159 = arith.constant 0 : index
    %137 = vector.load %arg1[%c1_156, %c3_157, %c0_158, %c0_159] : memref<6x8x32x54xf32, #tpu.memory_space<vmem>>, vector<1x1x32x54xf32>
    %138 = vector.shape_cast %137 : vector<1x1x32x54xf32> to vector<32x54xf32>
    %cst_160 = arith.constant dense<0.000000e+00> : vector<2x54xf32>
    %139 = tpu.matmul %4, %138, %cst_160 {dimension_numbers = #tpu.dot_dimension_numbers<[1], [0], [0], [1], [0, 0, 1, 1], [], []>} : vector<2x32xf32>, vector<32x54xf32>, vector<2x54xf32> -> vector<2x54xf32>
    %c1_161 = arith.constant 1 : index
    %c3_162 = arith.constant 3 : index
    %c0_163 = arith.constant 0 : index
    %c0_164 = arith.constant 0 : index
    %140 = vector.load %arg2[%c1_161, %c3_162, %c0_163, %c0_164] : memref<6x8x1x54xf32, #tpu.memory_space<vmem>>, vector<1x1x1x54xf32>
    %141 = vector.shape_cast %140 : vector<1x1x1x54xf32> to vector<1x54xf32>
    %142 = vector.broadcast %141 : vector<1x54xf32> to vector<2x54xf32>
    %143 = arith.addf %139, %142 : vector<2x54xf32>
    %cst_165 = arith.constant 0.000000e+00 : f32
    %144 = vector.broadcast %cst_165 : f32 to vector<2x54xf32>
    %145 = arith.maximumf %143, %144 : vector<2x54xf32>
    %c0_166 = arith.constant 0 : index
    %c1_167 = arith.constant 1 : index
    %c4_168 = arith.constant 4 : index
    %c3_169 = arith.constant 3 : index
    %146 = vector.load %arg10[%c0_166, %c1_167, %c4_168, %c3_169] : memref<2x6x10x60xf32, #tpu.memory_space<vmem>>, vector<2x1x1x54xf32>
    %147 = vector.shape_cast %146 : vector<2x1x1x54xf32> to vector<2x54xf32>
    %148 = vector.shape_cast %145 : vector<2x54xf32> to vector<2x1x1x54xf32>
    tpu.vector_store %arg10[%c0_166, %c1_167, %c4_168, %c3_169], %148 {strides = array<i32>} : memref<2x6x10x60xf32, #tpu.memory_space<vmem>>, vector<2x1x1x54xf32>,
    %c1_170 = arith.constant 1 : index
    %c4_171 = arith.constant 4 : index
    %c0_172 = arith.constant 0 : index
    %c0_173 = arith.constant 0 : index
    %149 = vector.load %arg1[%c1_170, %c4_171, %c0_172, %c0_173] : memref<6x8x32x54xf32, #tpu.memory_space<vmem>>, vector<1x1x32x54xf32>
    %150 = vector.shape_cast %149 : vector<1x1x32x54xf32> to vector<32x54xf32>
    %cst_174 = arith.constant dense<0.000000e+00> : vector<2x54xf32>
    %151 = tpu.matmul %4, %150, %cst_174 {dimension_numbers = #tpu.dot_dimension_numbers<[1], [0], [0], [1], [0, 0, 1, 1], [], []>} : vector<2x32xf32>, vector<32x54xf32>, vector<2x54xf32> -> vector<2x54xf32>
    %c1_175 = arith.constant 1 : index
    %c4_176 = arith.constant 4 : index
    %c0_177 = arith.constant 0 : index
    %c0_178 = arith.constant 0 : index
    %152 = vector.load %arg2[%c1_175, %c4_176, %c0_177, %c0_178] : memref<6x8x1x54xf32, #tpu.memory_space<vmem>>, vector<1x1x1x54xf32>
    %153 = vector.shape_cast %152 : vector<1x1x1x54xf32> to vector<1x54xf32>
    %154 = vector.broadcast %153 : vector<1x54xf32> to vector<2x54xf32>
    %155 = arith.addf %151, %154 : vector<2x54xf32>
    %cst_179 = arith.constant 0.000000e+00 : f32
    %156 = vector.broadcast %cst_179 : f32 to vector<2x54xf32>
    %157 = arith.maximumf %155, %156 : vector<2x54xf32>
    %c0_180 = arith.constant 0 : index
    %c1_181 = arith.constant 1 : index
    %c5_182 = arith.constant 5 : index
    %c3_183 = arith.constant 3 : index
    %158 = vector.load %arg10[%c0_180, %c1_181, %c5_182, %c3_183] : memref<2x6x10x60xf32, #tpu.memory_space<vmem>>, vector<2x1x1x54xf32>
    %159 = vector.shape_cast %158 : vector<2x1x1x54xf32> to vector<2x54xf32>
    %160 = vector.shape_cast %157 : vector<2x54xf32> to vector<2x1x1x54xf32>
    tpu.vector_store %arg10[%c0_180, %c1_181, %c5_182, %c3_183], %160 {strides = array<i32>} : memref<2x6x10x60xf32, #tpu.memory_space<vmem>>, vector<2x1x1x54xf32>,
    %c1_184 = arith.constant 1 : index
    %c5_185 = arith.constant 5 : index
    %c0_186 = arith.constant 0 : index
    %c0_187 = arith.constant 0 : index
    %161 = vector.load %arg1[%c1_184, %c5_185, %c0_186, %c0_187] : memref<6x8x32x54xf32, #tpu.memory_space<vmem>>, vector<1x1x32x54xf32>
    %162 = vector.shape_cast %161 : vector<1x1x32x54xf32> to vector<32x54xf32>
    %cst_188 = arith.constant dense<0.000000e+00> : vector<2x54xf32>
    %163 = tpu.matmul %4, %162, %cst_188 {dimension_numbers = #tpu.dot_dimension_numbers<[1], [0], [0], [1], [0, 0, 1, 1], [], []>} : vector<2x32xf32>, vector<32x54xf32>, vector<2x54xf32> -> vector<2x54xf32>
    %c1_189 = arith.constant 1 : index
    %c5_190 = arith.constant 5 : index
    %c0_191 = arith.constant 0 : index
    %c0_192 = arith.constant 0 : index
    %164 = vector.load %arg2[%c1_189, %c5_190, %c0_191, %c0_192] : memref<6x8x1x54xf32, #tpu.memory_space<vmem>>, vector<1x1x1x54xf32>
    %165 = vector.shape_cast %164 : vector<1x1x1x54xf32> to vector<1x54xf32>
    %166 = vector.broadcast %165 : vector<1x54xf32> to vector<2x54xf32>
    %167 = arith.addf %163, %166 : vector<2x54xf32>
    %cst_193 = arith.constant 0.000000e+00 : f32
    %168 = vector.broadcast %cst_193 : f32 to vector<2x54xf32>
    %169 = arith.maximumf %167, %168 : vector<2x54xf32>
    %c0_194 = arith.constant 0 : index
    %c1_195 = arith.constant 1 : index
    %c6_196 = arith.constant 6 : index
    %c3_197 = arith.constant 3 : index
    %170 = vector.load %arg10[%c0_194, %c1_195, %c6_196, %c3_197] : memref<2x6x10x60xf32, #tpu.memory_space<vmem>>, vector<2x1x1x54xf32>
    %171 = vector.shape_cast %170 : vector<2x1x1x54xf32> to vector<2x54xf32>
    %172 = vector.shape_cast %169 : vector<2x54xf32> to vector<2x1x1x54xf32>
    tpu.vector_store %arg10[%c0_194, %c1_195, %c6_196, %c3_197], %172 {strides = array<i32>} : memref<2x6x10x60xf32, #tpu.memory_space<vmem>>, vector<2x1x1x54xf32>,
    %c1_198 = arith.constant 1 : index
    %c6_199 = arith.constant 6 : index
    %c0_200 = arith.constant 0 : index
    %c0_201 = arith.constant 0 : index
    %173 = vector.load %arg1[%c1_198, %c6_199, %c0_200, %c0_201] : memref<6x8x32x54xf32, #tpu.memory_space<vmem>>, vector<1x1x32x54xf32>
    %174 = vector.shape_cast %173 : vector<1x1x32x54xf32> to vector<32x54xf32>
    %cst_202 = arith.constant dense<0.000000e+00> : vector<2x54xf32>
    %175 = tpu.matmul %4, %174, %cst_202 {dimension_numbers = #tpu.dot_dimension_numbers<[1], [0], [0], [1], [0, 0, 1, 1], [], []>} : vector<2x32xf32>, vector<32x54xf32>, vector<2x54xf32> -> vector<2x54xf32>
    %c1_203 = arith.constant 1 : index
    %c6_204 = arith.constant 6 : index
    %c0_205 = arith.constant 0 : index
    %c0_206 = arith.constant 0 : index
    %176 = vector.load %arg2[%c1_203, %c6_204, %c0_205, %c0_206] : memref<6x8x1x54xf32, #tpu.memory_space<vmem>>, vector<1x1x1x54xf32>
    %177 = vector.shape_cast %176 : vector<1x1x1x54xf32> to vector<1x54xf32>
    %178 = vector.broadcast %177 : vector<1x54xf32> to vector<2x54xf32>
    %179 = arith.addf %175, %178 : vector<2x54xf32>
    %cst_207 = arith.constant 0.000000e+00 : f32
    %180 = vector.broadcast %cst_207 : f32 to vector<2x54xf32>
    %181 = arith.maximumf %179, %180 : vector<2x54xf32>
    %c0_208 = arith.constant 0 : index
    %c1_209 = arith.constant 1 : index
    %c7_210 = arith.constant 7 : index
    %c3_211 = arith.constant 3 : index
    %182 = vector.load %arg10[%c0_208, %c1_209, %c7_210, %c3_211] : memref<2x6x10x60xf32, #tpu.memory_space<vmem>>, vector<2x1x1x54xf32>
    %183 = vector.shape_cast %182 : vector<2x1x1x54xf32> to vector<2x54xf32>
    %184 = vector.shape_cast %181 : vector<2x54xf32> to vector<2x1x1x54xf32>
    tpu.vector_store %arg10[%c0_208, %c1_209, %c7_210, %c3_211], %184 {strides = array<i32>} : memref<2x6x10x60xf32, #tpu.memory_space<vmem>>, vector<2x1x1x54xf32>,
    %c1_212 = arith.constant 1 : index
    %c7_213 = arith.constant 7 : index
    %c0_214 = arith.constant 0 : index
    %c0_215 = arith.constant 0 : index
    %185 = vector.load %arg1[%c1_212, %c7_213, %c0_214, %c0_215] : memref<6x8x32x54xf32, #tpu.memory_space<vmem>>, vector<1x1x32x54xf32>
    %186 = vector.shape_cast %185 : vector<1x1x32x54xf32> to vector<32x54xf32>
    %cst_216 = arith.constant dense<0.000000e+00> : vector<2x54xf32>
    %187 = tpu.matmul %4, %186, %cst_216 {dimension_numbers = #tpu.dot_dimension_numbers<[1], [0], [0], [1], [0, 0, 1, 1], [], []>} : vector<2x32xf32>, vector<32x54xf32>, vector<2x54xf32> -> vector<2x54xf32>
    %c1_217 = arith.constant 1 : index
    %c7_218 = arith.constant 7 : index
    %c0_219 = arith.constant 0 : index
    %c0_220 = arith.constant 0 : index
    %188 = vector.load %arg2[%c1_217, %c7_218, %c0_219, %c0_220] : memref<6x8x1x54xf32, #tpu.memory_space<vmem>>, vector<1x1x1x54xf32>
    %189 = vector.shape_cast %188 : vector<1x1x1x54xf32> to vector<1x54xf32>
    %190 = vector.broadcast %189 : vector<1x54xf32> to vector<2x54xf32>
    %191 = arith.addf %187, %190 : vector<2x54xf32>
    %cst_221 = arith.constant 0.000000e+00 : f32
    %192 = vector.broadcast %cst_221 : f32 to vector<2x54xf32>
    %193 = arith.maximumf %191, %192 : vector<2x54xf32>
    %c0_222 = arith.constant 0 : index
    %c1_223 = arith.constant 1 : index
    %c8_224 = arith.constant 8 : index
    %c3_225 = arith.constant 3 : index
    %194 = vector.load %arg10[%c0_222, %c1_223, %c8_224, %c3_225] : memref<2x6x10x60xf32, #tpu.memory_space<vmem>>, vector<2x1x1x54xf32>
    %195 = vector.shape_cast %194 : vector<2x1x1x54xf32> to vector<2x54xf32>
    %196 = vector.shape_cast %193 : vector<2x54xf32> to vector<2x1x1x54xf32>
    tpu.vector_store %arg10[%c0_222, %c1_223, %c8_224, %c3_225], %196 {strides = array<i32>} : memref<2x6x10x60xf32, #tpu.memory_space<vmem>>, vector<2x1x1x54xf32>,
    %c2_226 = arith.constant 2 : index
    %c0_227 = arith.constant 0 : index
    %c0_228 = arith.constant 0 : index
    %c0_229 = arith.constant 0 : index
    %197 = vector.load %arg1[%c2_226, %c0_227, %c0_228, %c0_229] : memref<6x8x32x54xf32, #tpu.memory_space<vmem>>, vector<1x1x32x54xf32>
    %198 = vector.shape_cast %197 : vector<1x1x32x54xf32> to vector<32x54xf32>
    %cst_230 = arith.constant dense<0.000000e+00> : vector<2x54xf32>
    %199 = tpu.matmul %4, %198, %cst_230 {dimension_numbers = #tpu.dot_dimension_numbers<[1], [0], [0], [1], [0, 0, 1, 1], [], []>} : vector<2x32xf32>, vector<32x54xf32>, vector<2x54xf32> -> vector<2x54xf32>
    %c2_231 = arith.constant 2 : index
    %c0_232 = arith.constant 0 : index
    %c0_233 = arith.constant 0 : index
    %c0_234 = arith.constant 0 : index
    %200 = vector.load %arg2[%c2_231, %c0_232, %c0_233, %c0_234] : memref<6x8x1x54xf32, #tpu.memory_space<vmem>>, vector<1x1x1x54xf32>
    %201 = vector.shape_cast %200 : vector<1x1x1x54xf32> to vector<1x54xf32>
    %202 = vector.broadcast %201 : vector<1x54xf32> to vector<2x54xf32>
    %203 = arith.addf %199, %202 : vector<2x54xf32>
    %cst_235 = arith.constant 0.000000e+00 : f32
    %204 = vector.broadcast %cst_235 : f32 to vector<2x54xf32>
    %205 = arith.maximumf %203, %204 : vector<2x54xf32>
    %c0_236 = arith.constant 0 : index
    %c2_237 = arith.constant 2 : index
    %c1_238 = arith.constant 1 : index
    %c3_239 = arith.constant 3 : index
    %206 = vector.load %arg10[%c0_236, %c2_237, %c1_238, %c3_239] : memref<2x6x10x60xf32, #tpu.memory_space<vmem>>, vector<2x1x1x54xf32>
    %207 = vector.shape_cast %206 : vector<2x1x1x54xf32> to vector<2x54xf32>
    %208 = vector.shape_cast %205 : vector<2x54xf32> to vector<2x1x1x54xf32>
    tpu.vector_store %arg10[%c0_236, %c2_237, %c1_238, %c3_239], %208 {strides = array<i32>} : memref<2x6x10x60xf32, #tpu.memory_space<vmem>>, vector<2x1x1x54xf32>,
    %c2_240 = arith.constant 2 : index
    %c1_241 = arith.constant 1 : index
    %c0_242 = arith.constant 0 : index
    %c0_243 = arith.constant 0 : index
    %209 = vector.load %arg1[%c2_240, %c1_241, %c0_242, %c0_243] : memref<6x8x32x54xf32, #tpu.memory_space<vmem>>, vector<1x1x32x54xf32>
    %210 = vector.shape_cast %209 : vector<1x1x32x54xf32> to vector<32x54xf32>
    %cst_244 = arith.constant dense<0.000000e+00> : vector<2x54xf32>
    %211 = tpu.matmul %4, %210, %cst_244 {dimension_numbers = #tpu.dot_dimension_numbers<[1], [0], [0], [1], [0, 0, 1, 1], [], []>} : vector<2x32xf32>, vector<32x54xf32>, vector<2x54xf32> -> vector<2x54xf32>
    %c2_245 = arith.constant 2 : index
    %c1_246 = arith.constant 1 : index
    %c0_247 = arith.constant 0 : index
    %c0_248 = arith.constant 0 : index
    %212 = vector.load %arg2[%c2_245, %c1_246, %c0_247, %c0_248] : memref<6x8x1x54xf32, #tpu.memory_space<vmem>>, vector<1x1x1x54xf32>
    %213 = vector.shape_cast %212 : vector<1x1x1x54xf32> to vector<1x54xf32>
    %214 = vector.broadcast %213 : vector<1x54xf32> to vector<2x54xf32>
    %215 = arith.addf %211, %214 : vector<2x54xf32>
    %cst_249 = arith.constant 0.000000e+00 : f32
    %216 = vector.broadcast %cst_249 : f32 to vector<2x54xf32>
    %217 = arith.maximumf %215, %216 : vector<2x54xf32>
    %c0_250 = arith.constant 0 : index
    %c2_251 = arith.constant 2 : index
    %c2_252 = arith.constant 2 : index
    %c3_253 = arith.constant 3 : index
    %218 = vector.load %arg10[%c0_250, %c2_251, %c2_252, %c3_253] : memref<2x6x10x60xf32, #tpu.memory_space<vmem>>, vector<2x1x1x54xf32>
    %219 = vector.shape_cast %218 : vector<2x1x1x54xf32> to vector<2x54xf32>
    %220 = vector.shape_cast %217 : vector<2x54xf32> to vector<2x1x1x54xf32>
    tpu.vector_store %arg10[%c0_250, %c2_251, %c2_252, %c3_253], %220 {strides = array<i32>} : memref<2x6x10x60xf32, #tpu.memory_space<vmem>>, vector<2x1x1x54xf32>,
    %c2_254 = arith.constant 2 : index
    %c2_255 = arith.constant 2 : index
    %c0_256 = arith.constant 0 : index
    %c0_257 = arith.constant 0 : index
    %221 = vector.load %arg1[%c2_254, %c2_255, %c0_256, %c0_257] : memref<6x8x32x54xf32, #tpu.memory_space<vmem>>, vector<1x1x32x54xf32>
    %222 = vector.shape_cast %221 : vector<1x1x32x54xf32> to vector<32x54xf32>
    %cst_258 = arith.constant dense<0.000000e+00> : vector<2x54xf32>
    %223 = tpu.matmul %4, %222, %cst_258 {dimension_numbers = #tpu.dot_dimension_numbers<[1], [0], [0], [1], [0, 0, 1, 1], [], []>} : vector<2x32xf32>, vector<32x54xf32>, vector<2x54xf32> -> vector<2x54xf32>
    %c2_259 = arith.constant 2 : index
    %c2_260 = arith.constant 2 : index
    %c0_261 = arith.constant 0 : index
    %c0_262 = arith.constant 0 : index
    %224 = vector.load %arg2[%c2_259, %c2_260, %c0_261, %c0_262] : memref<6x8x1x54xf32, #tpu.memory_space<vmem>>, vector<1x1x1x54xf32>
    %225 = vector.shape_cast %224 : vector<1x1x1x54xf32> to vector<1x54xf32>
    %226 = vector.broadcast %225 : vector<1x54xf32> to vector<2x54xf32>
    %227 = arith.addf %223, %226 : vector<2x54xf32>
    %cst_263 = arith.constant 0.000000e+00 : f32
    %228 = vector.broadcast %cst_263 : f32 to vector<2x54xf32>
    %229 = arith.maximumf %227, %228 : vector<2x54xf32>
    %c0_264 = arith.constant 0 : index
    %c2_265 = arith.constant 2 : index
    %c3_266 = arith.constant 3 : index
    %c3_267 = arith.constant 3 : index
    %230 = vector.load %arg10[%c0_264, %c2_265, %c3_266, %c3_267] : memref<2x6x10x60xf32, #tpu.memory_space<vmem>>, vector<2x1x1x54xf32>
    %231 = vector.shape_cast %230 : vector<2x1x1x54xf32> to vector<2x54xf32>
    %232 = vector.shape_cast %229 : vector<2x54xf32> to vector<2x1x1x54xf32>
    tpu.vector_store %arg10[%c0_264, %c2_265, %c3_266, %c3_267], %232 {strides = array<i32>} : memref<2x6x10x60xf32, #tpu.memory_space<vmem>>, vector<2x1x1x54xf32>,
    %c2_268 = arith.constant 2 : index
    %c3_269 = arith.constant 3 : index
    %c0_270 = arith.constant 0 : index
    %c0_271 = arith.constant 0 : index
    %233 = vector.load %arg1[%c2_268, %c3_269, %c0_270, %c0_271] : memref<6x8x32x54xf32, #tpu.memory_space<vmem>>, vector<1x1x32x54xf32>
    %234 = vector.shape_cast %233 : vector<1x1x32x54xf32> to vector<32x54xf32>
    %cst_272 = arith.constant dense<0.000000e+00> : vector<2x54xf32>
    %235 = tpu.matmul %4, %234, %cst_272 {dimension_numbers = #tpu.dot_dimension_numbers<[1], [0], [0], [1], [0, 0, 1, 1], [], []>} : vector<2x32xf32>, vector<32x54xf32>, vector<2x54xf32> -> vector<2x54xf32>
    %c2_273 = arith.constant 2 : index
    %c3_274 = arith.constant 3 : index
    %c0_275 = arith.constant 0 : index
    %c0_276 = arith.constant 0 : index
    %236 = vector.load %arg2[%c2_273, %c3_274, %c0_275, %c0_276] : memref<6x8x1x54xf32, #tpu.memory_space<vmem>>, vector<1x1x1x54xf32>
    %237 = vector.shape_cast %236 : vector<1x1x1x54xf32> to vector<1x54xf32>
    %238 = vector.broadcast %237 : vector<1x54xf32> to vector<2x54xf32>
    %239 = arith.addf %235, %238 : vector<2x54xf32>
    %cst_277 = arith.constant 0.000000e+00 : f32
    %240 = vector.broadcast %cst_277 : f32 to vector<2x54xf32>
    %241 = arith.maximumf %239, %240 : vector<2x54xf32>
    %c0_278 = arith.constant 0 : index
    %c2_279 = arith.constant 2 : index
    %c4_280 = arith.constant 4 : index
    %c3_281 = arith.constant 3 : index
    %242 = vector.load %arg10[%c0_278, %c2_279, %c4_280, %c3_281] : memref<2x6x10x60xf32, #tpu.memory_space<vmem>>, vector<2x1x1x54xf32>
    %243 = vector.shape_cast %242 : vector<2x1x1x54xf32> to vector<2x54xf32>
    %244 = vector.shape_cast %241 : vector<2x54xf32> to vector<2x1x1x54xf32>
    tpu.vector_store %arg10[%c0_278, %c2_279, %c4_280, %c3_281], %244 {strides = array<i32>} : memref<2x6x10x60xf32, #tpu.memory_space<vmem>>, vector<2x1x1x54xf32>,
    %c2_282 = arith.constant 2 : index
    %c4_283 = arith.constant 4 : index
    %c0_284 = arith.constant 0 : index
    %c0_285 = arith.constant 0 : index
    %245 = vector.load %arg1[%c2_282, %c4_283, %c0_284, %c0_285] : memref<6x8x32x54xf32, #tpu.memory_space<vmem>>, vector<1x1x32x54xf32>
    %246 = vector.shape_cast %245 : vector<1x1x32x54xf32> to vector<32x54xf32>
    %cst_286 = arith.constant dense<0.000000e+00> : vector<2x54xf32>
    %247 = tpu.matmul %4, %246, %cst_286 {dimension_numbers = #tpu.dot_dimension_numbers<[1], [0], [0], [1], [0, 0, 1, 1], [], []>} : vector<2x32xf32>, vector<32x54xf32>, vector<2x54xf32> -> vector<2x54xf32>
    %c2_287 = arith.constant 2 : index
    %c4_288 = arith.constant 4 : index
    %c0_289 = arith.constant 0 : index
    %c0_290 = arith.constant 0 : index
    %248 = vector.load %arg2[%c2_287, %c4_288, %c0_289, %c0_290] : memref<6x8x1x54xf32, #tpu.memory_space<vmem>>, vector<1x1x1x54xf32>
    %249 = vector.shape_cast %248 : vector<1x1x1x54xf32> to vector<1x54xf32>
    %250 = vector.broadcast %249 : vector<1x54xf32> to vector<2x54xf32>
    %251 = arith.addf %247, %250 : vector<2x54xf32>
    %cst_291 = arith.constant 0.000000e+00 : f32
    %252 = vector.broadcast %cst_291 : f32 to vector<2x54xf32>
    %253 = arith.maximumf %251, %252 : vector<2x54xf32>
    %c0_292 = arith.constant 0 : index
    %c2_293 = arith.constant 2 : index
    %c5_294 = arith.constant 5 : index
    %c3_295 = arith.constant 3 : index
    %254 = vector.load %arg10[%c0_292, %c2_293, %c5_294, %c3_295] : memref<2x6x10x60xf32, #tpu.memory_space<vmem>>, vector<2x1x1x54xf32>
    %255 = vector.shape_cast %254 : vector<2x1x1x54xf32> to vector<2x54xf32>
    %256 = vector.shape_cast %253 : vector<2x54xf32> to vector<2x1x1x54xf32>
    tpu.vector_store %arg10[%c0_292, %c2_293, %c5_294, %c3_295], %256 {strides = array<i32>} : memref<2x6x10x60xf32, #tpu.memory_space<vmem>>, vector<2x1x1x54xf32>,
    %c2_296 = arith.constant 2 : index
    %c5_297 = arith.constant 5 : index
    %c0_298 = arith.constant 0 : index
    %c0_299 = arith.constant 0 : index
    %257 = vector.load %arg1[%c2_296, %c5_297, %c0_298, %c0_299] : memref<6x8x32x54xf32, #tpu.memory_space<vmem>>, vector<1x1x32x54xf32>
    %258 = vector.shape_cast %257 : vector<1x1x32x54xf32> to vector<32x54xf32>
    %cst_300 = arith.constant dense<0.000000e+00> : vector<2x54xf32>
    %259 = tpu.matmul %4, %258, %cst_300 {dimension_numbers = #tpu.dot_dimension_numbers<[1], [0], [0], [1], [0, 0, 1, 1], [], []>} : vector<2x32xf32>, vector<32x54xf32>, vector<2x54xf32> -> vector<2x54xf32>
    %c2_301 = arith.constant 2 : index
    %c5_302 = arith.constant 5 : index
    %c0_303 = arith.constant 0 : index
    %c0_304 = arith.constant 0 : index
    %260 = vector.load %arg2[%c2_301, %c5_302, %c0_303, %c0_304] : memref<6x8x1x54xf32, #tpu.memory_space<vmem>>, vector<1x1x1x54xf32>
    %261 = vector.shape_cast %260 : vector<1x1x1x54xf32> to vector<1x54xf32>
    %262 = vector.broadcast %261 : vector<1x54xf32> to vector<2x54xf32>
    %263 = arith.addf %259, %262 : vector<2x54xf32>
    %cst_305 = arith.constant 0.000000e+00 : f32
    %264 = vector.broadcast %cst_305 : f32 to vector<2x54xf32>
    %265 = arith.maximumf %263, %264 : vector<2x54xf32>
    %c0_306 = arith.constant 0 : index
    %c2_307 = arith.constant 2 : index
    %c6_308 = arith.constant 6 : index
    %c3_309 = arith.constant 3 : index
    %266 = vector.load %arg10[%c0_306, %c2_307, %c6_308, %c3_309] : memref<2x6x10x60xf32, #tpu.memory_space<vmem>>, vector<2x1x1x54xf32>
    %267 = vector.shape_cast %266 : vector<2x1x1x54xf32> to vector<2x54xf32>
    %268 = vector.shape_cast %265 : vector<2x54xf32> to vector<2x1x1x54xf32>
    tpu.vector_store %arg10[%c0_306, %c2_307, %c6_308, %c3_309], %268 {strides = array<i32>} : memref<2x6x10x60xf32, #tpu.memory_space<vmem>>, vector<2x1x1x54xf32>,
    %c2_310 = arith.constant 2 : index
    %c6_311 = arith.constant 6 : index
    %c0_312 = arith.constant 0 : index
    %c0_313 = arith.constant 0 : index
    %269 = vector.load %arg1[%c2_310, %c6_311, %c0_312, %c0_313] : memref<6x8x32x54xf32, #tpu.memory_space<vmem>>, vector<1x1x32x54xf32>
    %270 = vector.shape_cast %269 : vector<1x1x32x54xf32> to vector<32x54xf32>
    %cst_314 = arith.constant dense<0.000000e+00> : vector<2x54xf32>
    %271 = tpu.matmul %4, %270, %cst_314 {dimension_numbers = #tpu.dot_dimension_numbers<[1], [0], [0], [1], [0, 0, 1, 1], [], []>} : vector<2x32xf32>, vector<32x54xf32>, vector<2x54xf32> -> vector<2x54xf32>
    %c2_315 = arith.constant 2 : index
    %c6_316 = arith.constant 6 : index
    %c0_317 = arith.constant 0 : index
    %c0_318 = arith.constant 0 : index
    %272 = vector.load %arg2[%c2_315, %c6_316, %c0_317, %c0_318] : memref<6x8x1x54xf32, #tpu.memory_space<vmem>>, vector<1x1x1x54xf32>
    %273 = vector.shape_cast %272 : vector<1x1x1x54xf32> to vector<1x54xf32>
    %274 = vector.broadcast %273 : vector<1x54xf32> to vector<2x54xf32>
    %275 = arith.addf %271, %274 : vector<2x54xf32>
    %cst_319 = arith.constant 0.000000e+00 : f32
    %276 = vector.broadcast %cst_319 : f32 to vector<2x54xf32>
    %277 = arith.maximumf %275, %276 : vector<2x54xf32>
    %c0_320 = arith.constant 0 : index
    %c2_321 = arith.constant 2 : index
    %c7_322 = arith.constant 7 : index
    %c3_323 = arith.constant 3 : index
    %278 = vector.load %arg10[%c0_320, %c2_321, %c7_322, %c3_323] : memref<2x6x10x60xf32, #tpu.memory_space<vmem>>, vector<2x1x1x54xf32>
    %279 = vector.shape_cast %278 : vector<2x1x1x54xf32> to vector<2x54xf32>
    %280 = vector.shape_cast %277 : vector<2x54xf32> to vector<2x1x1x54xf32>
    tpu.vector_store %arg10[%c0_320, %c2_321, %c7_322, %c3_323], %280 {strides = array<i32>} : memref<2x6x10x60xf32, #tpu.memory_space<vmem>>, vector<2x1x1x54xf32>,
    %c2_324 = arith.constant 2 : index
    %c7_325 = arith.constant 7 : index
    %c0_326 = arith.constant 0 : index
    %c0_327 = arith.constant 0 : index
    %281 = vector.load %arg1[%c2_324, %c7_325, %c0_326, %c0_327] : memref<6x8x32x54xf32, #tpu.memory_space<vmem>>, vector<1x1x32x54xf32>
    %282 = vector.shape_cast %281 : vector<1x1x32x54xf32> to vector<32x54xf32>
    %cst_328 = arith.constant dense<0.000000e+00> : vector<2x54xf32>
    %283 = tpu.matmul %4, %282, %cst_328 {dimension_numbers = #tpu.dot_dimension_numbers<[1], [0], [0], [1], [0, 0, 1, 1], [], []>} : vector<2x32xf32>, vector<32x54xf32>, vector<2x54xf32> -> vector<2x54xf32>
    %c2_329 = arith.constant 2 : index
    %c7_330 = arith.constant 7 : index
    %c0_331 = arith.constant 0 : index
    %c0_332 = arith.constant 0 : index
    %284 = vector.load %arg2[%c2_329, %c7_330, %c0_331, %c0_332] : memref<6x8x1x54xf32, #tpu.memory_space<vmem>>, vector<1x1x1x54xf32>
    %285 = vector.shape_cast %284 : vector<1x1x1x54xf32> to vector<1x54xf32>
    %286 = vector.broadcast %285 : vector<1x54xf32> to vector<2x54xf32>
    %287 = arith.addf %283, %286 : vector<2x54xf32>
    %cst_333 = arith.constant 0.000000e+00 : f32
    %288 = vector.broadcast %cst_333 : f32 to vector<2x54xf32>
    %289 = arith.maximumf %287, %288 : vector<2x54xf32>
    %c0_334 = arith.constant 0 : index
    %c2_335 = arith.constant 2 : index
    %c8_336 = arith.constant 8 : index
    %c3_337 = arith.constant 3 : index
    %290 = vector.load %arg10[%c0_334, %c2_335, %c8_336, %c3_337] : memref<2x6x10x60xf32, #tpu.memory_space<vmem>>, vector<2x1x1x54xf32>
    %291 = vector.shape_cast %290 : vector<2x1x1x54xf32> to vector<2x54xf32>
    %292 = vector.shape_cast %289 : vector<2x54xf32> to vector<2x1x1x54xf32>
    tpu.vector_store %arg10[%c0_334, %c2_335, %c8_336, %c3_337], %292 {strides = array<i32>} : memref<2x6x10x60xf32, #tpu.memory_space<vmem>>, vector<2x1x1x54xf32>,
    %c3_338 = arith.constant 3 : index
    %c0_339 = arith.constant 0 : index
    %c0_340 = arith.constant 0 : index
    %c0_341 = arith.constant 0 : index
    %293 = vector.load %arg1[%c3_338, %c0_339, %c0_340, %c0_341] : memref<6x8x32x54xf32, #tpu.memory_space<vmem>>, vector<1x1x32x54xf32>
    %294 = vector.shape_cast %293 : vector<1x1x32x54xf32> to vector<32x54xf32>
    %cst_342 = arith.constant dense<0.000000e+00> : vector<2x54xf32>
    %295 = tpu.matmul %4, %294, %cst_342 {dimension_numbers = #tpu.dot_dimension_numbers<[1], [0], [0], [1], [0, 0, 1, 1], [], []>} : vector<2x32xf32>, vector<32x54xf32>, vector<2x54xf32> -> vector<2x54xf32>
    %c3_343 = arith.constant 3 : index
    %c0_344 = arith.constant 0 : index
    %c0_345 = arith.constant 0 : index
    %c0_346 = arith.constant 0 : index
    %296 = vector.load %arg2[%c3_343, %c0_344, %c0_345, %c0_346] : memref<6x8x1x54xf32, #tpu.memory_space<vmem>>, vector<1x1x1x54xf32>
    %297 = vector.shape_cast %296 : vector<1x1x1x54xf32> to vector<1x54xf32>
    %298 = vector.broadcast %297 : vector<1x54xf32> to vector<2x54xf32>
    %299 = arith.addf %295, %298 : vector<2x54xf32>
    %cst_347 = arith.constant 0.000000e+00 : f32
    %300 = vector.broadcast %cst_347 : f32 to vector<2x54xf32>
    %301 = arith.maximumf %299, %300 : vector<2x54xf32>
    %c0_348 = arith.constant 0 : index
    %c3_349 = arith.constant 3 : index
    %c1_350 = arith.constant 1 : index
    %c3_351 = arith.constant 3 : index
    %302 = vector.load %arg10[%c0_348, %c3_349, %c1_350, %c3_351] : memref<2x6x10x60xf32, #tpu.memory_space<vmem>>, vector<2x1x1x54xf32>
    %303 = vector.shape_cast %302 : vector<2x1x1x54xf32> to vector<2x54xf32>
    %304 = vector.shape_cast %301 : vector<2x54xf32> to vector<2x1x1x54xf32>
    tpu.vector_store %arg10[%c0_348, %c3_349, %c1_350, %c3_351], %304 {strides = array<i32>} : memref<2x6x10x60xf32, #tpu.memory_space<vmem>>, vector<2x1x1x54xf32>,
    %c3_352 = arith.constant 3 : index
    %c1_353 = arith.constant 1 : index
    %c0_354 = arith.constant 0 : index
    %c0_355 = arith.constant 0 : index
    %305 = vector.load %arg1[%c3_352, %c1_353, %c0_354, %c0_355] : memref<6x8x32x54xf32, #tpu.memory_space<vmem>>, vector<1x1x32x54xf32>
    %306 = vector.shape_cast %305 : vector<1x1x32x54xf32> to vector<32x54xf32>
    %cst_356 = arith.constant dense<0.000000e+00> : vector<2x54xf32>
    %307 = tpu.matmul %4, %306, %cst_356 {dimension_numbers = #tpu.dot_dimension_numbers<[1], [0], [0], [1], [0, 0, 1, 1], [], []>} : vector<2x32xf32>, vector<32x54xf32>, vector<2x54xf32> -> vector<2x54xf32>
    %c3_357 = arith.constant 3 : index
    %c1_358 = arith.constant 1 : index
    %c0_359 = arith.constant 0 : index
    %c0_360 = arith.constant 0 : index
    %308 = vector.load %arg2[%c3_357, %c1_358, %c0_359, %c0_360] : memref<6x8x1x54xf32, #tpu.memory_space<vmem>>, vector<1x1x1x54xf32>
    %309 = vector.shape_cast %308 : vector<1x1x1x54xf32> to vector<1x54xf32>
    %310 = vector.broadcast %309 : vector<1x54xf32> to vector<2x54xf32>
    %311 = arith.addf %307, %310 : vector<2x54xf32>
    %cst_361 = arith.constant 0.000000e+00 : f32
    %312 = vector.broadcast %cst_361 : f32 to vector<2x54xf32>
    %313 = arith.maximumf %311, %312 : vector<2x54xf32>
    %c0_362 = arith.constant 0 : index
    %c3_363 = arith.constant 3 : index
    %c2_364 = arith.constant 2 : index
    %c3_365 = arith.constant 3 : index
    %314 = vector.load %arg10[%c0_362, %c3_363, %c2_364, %c3_365] : memref<2x6x10x60xf32, #tpu.memory_space<vmem>>, vector<2x1x1x54xf32>
    %315 = vector.shape_cast %314 : vector<2x1x1x54xf32> to vector<2x54xf32>
    %316 = vector.shape_cast %313 : vector<2x54xf32> to vector<2x1x1x54xf32>
    tpu.vector_store %arg10[%c0_362, %c3_363, %c2_364, %c3_365], %316 {strides = array<i32>} : memref<2x6x10x60xf32, #tpu.memory_space<vmem>>, vector<2x1x1x54xf32>,
    %c3_366 = arith.constant 3 : index
    %c2_367 = arith.constant 2 : index
    %c0_368 = arith.constant 0 : index
    %c0_369 = arith.constant 0 : index
    %317 = vector.load %arg1[%c3_366, %c2_367, %c0_368, %c0_369] : memref<6x8x32x54xf32, #tpu.memory_space<vmem>>, vector<1x1x32x54xf32>
    %318 = vector.shape_cast %317 : vector<1x1x32x54xf32> to vector<32x54xf32>
    %cst_370 = arith.constant dense<0.000000e+00> : vector<2x54xf32>
    %319 = tpu.matmul %4, %318, %cst_370 {dimension_numbers = #tpu.dot_dimension_numbers<[1], [0], [0], [1], [0, 0, 1, 1], [], []>} : vector<2x32xf32>, vector<32x54xf32>, vector<2x54xf32> -> vector<2x54xf32>
    %c3_371 = arith.constant 3 : index
    %c2_372 = arith.constant 2 : index
    %c0_373 = arith.constant 0 : index
    %c0_374 = arith.constant 0 : index
    %320 = vector.load %arg2[%c3_371, %c2_372, %c0_373, %c0_374] : memref<6x8x1x54xf32, #tpu.memory_space<vmem>>, vector<1x1x1x54xf32>
    %321 = vector.shape_cast %320 : vector<1x1x1x54xf32> to vector<1x54xf32>
    %322 = vector.broadcast %321 : vector<1x54xf32> to vector<2x54xf32>
    %323 = arith.addf %319, %322 : vector<2x54xf32>
    %cst_375 = arith.constant 0.000000e+00 : f32
    %324 = vector.broadcast %cst_375 : f32 to vector<2x54xf32>
    %325 = arith.maximumf %323, %324 : vector<2x54xf32>
    %c0_376 = arith.constant 0 : index
    %c3_377 = arith.constant 3 : index
    %c3_378 = arith.constant 3 : index
    %c3_379 = arith.constant 3 : index
    %326 = vector.load %arg10[%c0_376, %c3_377, %c3_378, %c3_379] : memref<2x6x10x60xf32, #tpu.memory_space<vmem>>, vector<2x1x1x54xf32>
    %327 = vector.shape_cast %326 : vector<2x1x1x54xf32> to vector<2x54xf32>
    %328 = vector.shape_cast %325 : vector<2x54xf32> to vector<2x1x1x54xf32>
    tpu.vector_store %arg10[%c0_376, %c3_377, %c3_378, %c3_379], %328 {strides = array<i32>} : memref<2x6x10x60xf32, #tpu.memory_space<vmem>>, vector<2x1x1x54xf32>,
    %c3_380 = arith.constant 3 : index
    %c3_381 = arith.constant 3 : index
    %c0_382 = arith.constant 0 : index
    %c0_383 = arith.constant 0 : index
    %329 = vector.load %arg1[%c3_380, %c3_381, %c0_382, %c0_383] : memref<6x8x32x54xf32, #tpu.memory_space<vmem>>, vector<1x1x32x54xf32>
    %330 = vector.shape_cast %329 : vector<1x1x32x54xf32> to vector<32x54xf32>
    %cst_384 = arith.constant dense<0.000000e+00> : vector<2x54xf32>
    %331 = tpu.matmul %4, %330, %cst_384 {dimension_numbers = #tpu.dot_dimension_numbers<[1], [0], [0], [1], [0, 0, 1, 1], [], []>} : vector<2x32xf32>, vector<32x54xf32>, vector<2x54xf32> -> vector<2x54xf32>
    %c3_385 = arith.constant 3 : index
    %c3_386 = arith.constant 3 : index
    %c0_387 = arith.constant 0 : index
    %c0_388 = arith.constant 0 : index
    %332 = vector.load %arg2[%c3_385, %c3_386, %c0_387, %c0_388] : memref<6x8x1x54xf32, #tpu.memory_space<vmem>>, vector<1x1x1x54xf32>
    %333 = vector.shape_cast %332 : vector<1x1x1x54xf32> to vector<1x54xf32>
    %334 = vector.broadcast %333 : vector<1x54xf32> to vector<2x54xf32>
    %335 = arith.addf %331, %334 : vector<2x54xf32>
    %cst_389 = arith.constant 0.000000e+00 : f32
    %336 = vector.broadcast %cst_389 : f32 to vector<2x54xf32>
    %337 = arith.maximumf %335, %336 : vector<2x54xf32>
    %c0_390 = arith.constant 0 : index
    %c3_391 = arith.constant 3 : index
    %c4_392 = arith.constant 4 : index
    %c3_393 = arith.constant 3 : index
    %338 = vector.load %arg10[%c0_390, %c3_391, %c4_392, %c3_393] : memref<2x6x10x60xf32, #tpu.memory_space<vmem>>, vector<2x1x1x54xf32>
    %339 = vector.shape_cast %338 : vector<2x1x1x54xf32> to vector<2x54xf32>
    %340 = vector.shape_cast %337 : vector<2x54xf32> to vector<2x1x1x54xf32>
    tpu.vector_store %arg10[%c0_390, %c3_391, %c4_392, %c3_393], %340 {strides = array<i32>} : memref<2x6x10x60xf32, #tpu.memory_space<vmem>>, vector<2x1x1x54xf32>,
    %c3_394 = arith.constant 3 : index
    %c4_395 = arith.constant 4 : index
    %c0_396 = arith.constant 0 : index
    %c0_397 = arith.constant 0 : index
    %341 = vector.load %arg1[%c3_394, %c4_395, %c0_396, %c0_397] : memref<6x8x32x54xf32, #tpu.memory_space<vmem>>, vector<1x1x32x54xf32>
    %342 = vector.shape_cast %341 : vector<1x1x32x54xf32> to vector<32x54xf32>
    %cst_398 = arith.constant dense<0.000000e+00> : vector<2x54xf32>
    %343 = tpu.matmul %4, %342, %cst_398 {dimension_numbers = #tpu.dot_dimension_numbers<[1], [0], [0], [1], [0, 0, 1, 1], [], []>} : vector<2x32xf32>, vector<32x54xf32>, vector<2x54xf32> -> vector<2x54xf32>
    %c3_399 = arith.constant 3 : index
    %c4_400 = arith.constant 4 : index
    %c0_401 = arith.constant 0 : index
    %c0_402 = arith.constant 0 : index
    %344 = vector.load %arg2[%c3_399, %c4_400, %c0_401, %c0_402] : memref<6x8x1x54xf32, #tpu.memory_space<vmem>>, vector<1x1x1x54xf32>
    %345 = vector.shape_cast %344 : vector<1x1x1x54xf32> to vector<1x54xf32>
    %346 = vector.broadcast %345 : vector<1x54xf32> to vector<2x54xf32>
    %347 = arith.addf %343, %346 : vector<2x54xf32>
    %cst_403 = arith.constant 0.000000e+00 : f32
    %348 = vector.broadcast %cst_403 : f32 to vector<2x54xf32>
    %349 = arith.maximumf %347, %348 : vector<2x54xf32>
    %c0_404 = arith.constant 0 : index
    %c3_405 = arith.constant 3 : index
    %c5_406 = arith.constant 5 : index
    %c3_407 = arith.constant 3 : index
    %350 = vector.load %arg10[%c0_404, %c3_405, %c5_406, %c3_407] : memref<2x6x10x60xf32, #tpu.memory_space<vmem>>, vector<2x1x1x54xf32>
    %351 = vector.shape_cast %350 : vector<2x1x1x54xf32> to vector<2x54xf32>
    %352 = vector.shape_cast %349 : vector<2x54xf32> to vector<2x1x1x54xf32>
    tpu.vector_store %arg10[%c0_404, %c3_405, %c5_406, %c3_407], %352 {strides = array<i32>} : memref<2x6x10x60xf32, #tpu.memory_space<vmem>>, vector<2x1x1x54xf32>,
    %c3_408 = arith.constant 3 : index
    %c5_409 = arith.constant 5 : index
    %c0_410 = arith.constant 0 : index
    %c0_411 = arith.constant 0 : index
    %353 = vector.load %arg1[%c3_408, %c5_409, %c0_410, %c0_411] : memref<6x8x32x54xf32, #tpu.memory_space<vmem>>, vector<1x1x32x54xf32>
    %354 = vector.shape_cast %353 : vector<1x1x32x54xf32> to vector<32x54xf32>
    %cst_412 = arith.constant dense<0.000000e+00> : vector<2x54xf32>
    %355 = tpu.matmul %4, %354, %cst_412 {dimension_numbers = #tpu.dot_dimension_numbers<[1], [0], [0], [1], [0, 0, 1, 1], [], []>} : vector<2x32xf32>, vector<32x54xf32>, vector<2x54xf32> -> vector<2x54xf32>
    %c3_413 = arith.constant 3 : index
    %c5_414 = arith.constant 5 : index
    %c0_415 = arith.constant 0 : index
    %c0_416 = arith.constant 0 : index
    %356 = vector.load %arg2[%c3_413, %c5_414, %c0_415, %c0_416] : memref<6x8x1x54xf32, #tpu.memory_space<vmem>>, vector<1x1x1x54xf32>
    %357 = vector.shape_cast %356 : vector<1x1x1x54xf32> to vector<1x54xf32>
    %358 = vector.broadcast %357 : vector<1x54xf32> to vector<2x54xf32>
    %359 = arith.addf %355, %358 : vector<2x54xf32>
    %cst_417 = arith.constant 0.000000e+00 : f32
    %360 = vector.broadcast %cst_417 : f32 to vector<2x54xf32>
    %361 = arith.maximumf %359, %360 : vector<2x54xf32>
    %c0_418 = arith.constant 0 : index
    %c3_419 = arith.constant 3 : index
    %c6_420 = arith.constant 6 : index
    %c3_421 = arith.constant 3 : index
    %362 = vector.load %arg10[%c0_418, %c3_419, %c6_420, %c3_421] : memref<2x6x10x60xf32, #tpu.memory_space<vmem>>, vector<2x1x1x54xf32>
    %363 = vector.shape_cast %362 : vector<2x1x1x54xf32> to vector<2x54xf32>
    %364 = vector.shape_cast %361 : vector<2x54xf32> to vector<2x1x1x54xf32>
    tpu.vector_store %arg10[%c0_418, %c3_419, %c6_420, %c3_421], %364 {strides = array<i32>} : memref<2x6x10x60xf32, #tpu.memory_space<vmem>>, vector<2x1x1x54xf32>,
    %c3_422 = arith.constant 3 : index
    %c6_423 = arith.constant 6 : index
    %c0_424 = arith.constant 0 : index
    %c0_425 = arith.constant 0 : index
    %365 = vector.load %arg1[%c3_422, %c6_423, %c0_424, %c0_425] : memref<6x8x32x54xf32, #tpu.memory_space<vmem>>, vector<1x1x32x54xf32>
    %366 = vector.shape_cast %365 : vector<1x1x32x54xf32> to vector<32x54xf32>
    %cst_426 = arith.constant dense<0.000000e+00> : vector<2x54xf32>
    %367 = tpu.matmul %4, %366, %cst_426 {dimension_numbers = #tpu.dot_dimension_numbers<[1], [0], [0], [1], [0, 0, 1, 1], [], []>} : vector<2x32xf32>, vector<32x54xf32>, vector<2x54xf32> -> vector<2x54xf32>
    %c3_427 = arith.constant 3 : index
    %c6_428 = arith.constant 6 : index
    %c0_429 = arith.constant 0 : index
    %c0_430 = arith.constant 0 : index
    %368 = vector.load %arg2[%c3_427, %c6_428, %c0_429, %c0_430] : memref<6x8x1x54xf32, #tpu.memory_space<vmem>>, vector<1x1x1x54xf32>
    %369 = vector.shape_cast %368 : vector<1x1x1x54xf32> to vector<1x54xf32>
    %370 = vector.broadcast %369 : vector<1x54xf32> to vector<2x54xf32>
    %371 = arith.addf %367, %370 : vector<2x54xf32>
    %cst_431 = arith.constant 0.000000e+00 : f32
    %372 = vector.broadcast %cst_431 : f32 to vector<2x54xf32>
    %373 = arith.maximumf %371, %372 : vector<2x54xf32>
    %c0_432 = arith.constant 0 : index
    %c3_433 = arith.constant 3 : index
    %c7_434 = arith.constant 7 : index
    %c3_435 = arith.constant 3 : index
    %374 = vector.load %arg10[%c0_432, %c3_433, %c7_434, %c3_435] : memref<2x6x10x60xf32, #tpu.memory_space<vmem>>, vector<2x1x1x54xf32>
    %375 = vector.shape_cast %374 : vector<2x1x1x54xf32> to vector<2x54xf32>
    %376 = vector.shape_cast %373 : vector<2x54xf32> to vector<2x1x1x54xf32>
    tpu.vector_store %arg10[%c0_432, %c3_433, %c7_434, %c3_435], %376 {strides = array<i32>} : memref<2x6x10x60xf32, #tpu.memory_space<vmem>>, vector<2x1x1x54xf32>,
    %c3_436 = arith.constant 3 : index
    %c7_437 = arith.constant 7 : index
    %c0_438 = arith.constant 0 : index
    %c0_439 = arith.constant 0 : index
    %377 = vector.load %arg1[%c3_436, %c7_437, %c0_438, %c0_439] : memref<6x8x32x54xf32, #tpu.memory_space<vmem>>, vector<1x1x32x54xf32>
    %378 = vector.shape_cast %377 : vector<1x1x32x54xf32> to vector<32x54xf32>
    %cst_440 = arith.constant dense<0.000000e+00> : vector<2x54xf32>
    %379 = tpu.matmul %4, %378, %cst_440 {dimension_numbers = #tpu.dot_dimension_numbers<[1], [0], [0], [1], [0, 0, 1, 1], [], []>} : vector<2x32xf32>, vector<32x54xf32>, vector<2x54xf32> -> vector<2x54xf32>
    %c3_441 = arith.constant 3 : index
    %c7_442 = arith.constant 7 : index
    %c0_443 = arith.constant 0 : index
    %c0_444 = arith.constant 0 : index
    %380 = vector.load %arg2[%c3_441, %c7_442, %c0_443, %c0_444] : memref<6x8x1x54xf32, #tpu.memory_space<vmem>>, vector<1x1x1x54xf32>
    %381 = vector.shape_cast %380 : vector<1x1x1x54xf32> to vector<1x54xf32>
    %382 = vector.broadcast %381 : vector<1x54xf32> to vector<2x54xf32>
    %383 = arith.addf %379, %382 : vector<2x54xf32>
    %cst_445 = arith.constant 0.000000e+00 : f32
    %384 = vector.broadcast %cst_445 : f32 to vector<2x54xf32>
    %385 = arith.maximumf %383, %384 : vector<2x54xf32>
    %c0_446 = arith.constant 0 : index
    %c3_447 = arith.constant 3 : index
    %c8_448 = arith.constant 8 : index
    %c3_449 = arith.constant 3 : index
    %386 = vector.load %arg10[%c0_446, %c3_447, %c8_448, %c3_449] : memref<2x6x10x60xf32, #tpu.memory_space<vmem>>, vector<2x1x1x54xf32>
    %387 = vector.shape_cast %386 : vector<2x1x1x54xf32> to vector<2x54xf32>
    %388 = vector.shape_cast %385 : vector<2x54xf32> to vector<2x1x1x54xf32>
    tpu.vector_store %arg10[%c0_446, %c3_447, %c8_448, %c3_449], %388 {strides = array<i32>} : memref<2x6x10x60xf32, #tpu.memory_space<vmem>>, vector<2x1x1x54xf32>,
    %c4_450 = arith.constant 4 : index
    %c0_451 = arith.constant 0 : index
    %c0_452 = arith.constant 0 : index
    %c0_453 = arith.constant 0 : index
    %389 = vector.load %arg1[%c4_450, %c0_451, %c0_452, %c0_453] : memref<6x8x32x54xf32, #tpu.memory_space<vmem>>, vector<1x1x32x54xf32>
    %390 = vector.shape_cast %389 : vector<1x1x32x54xf32> to vector<32x54xf32>
    %cst_454 = arith.constant dense<0.000000e+00> : vector<2x54xf32>
    %391 = tpu.matmul %4, %390, %cst_454 {dimension_numbers = #tpu.dot_dimension_numbers<[1], [0], [0], [1], [0, 0, 1, 1], [], []>} : vector<2x32xf32>, vector<32x54xf32>, vector<2x54xf32> -> vector<2x54xf32>
    %c4_455 = arith.constant 4 : index
    %c0_456 = arith.constant 0 : index
    %c0_457 = arith.constant 0 : index
    %c0_458 = arith.constant 0 : index
    %392 = vector.load %arg2[%c4_455, %c0_456, %c0_457, %c0_458] : memref<6x8x1x54xf32, #tpu.memory_space<vmem>>, vector<1x1x1x54xf32>
    %393 = vector.shape_cast %392 : vector<1x1x1x54xf32> to vector<1x54xf32>
    %394 = vector.broadcast %393 : vector<1x54xf32> to vector<2x54xf32>
    %395 = arith.addf %391, %394 : vector<2x54xf32>
    %cst_459 = arith.constant 0.000000e+00 : f32
    %396 = vector.broadcast %cst_459 : f32 to vector<2x54xf32>
    %397 = arith.maximumf %395, %396 : vector<2x54xf32>
    %c0_460 = arith.constant 0 : index
    %c4_461 = arith.constant 4 : index
    %c1_462 = arith.constant 1 : index
    %c3_463 = arith.constant 3 : index
    %398 = vector.load %arg10[%c0_460, %c4_461, %c1_462, %c3_463] : memref<2x6x10x60xf32, #tpu.memory_space<vmem>>, vector<2x1x1x54xf32>
    %399 = vector.shape_cast %398 : vector<2x1x1x54xf32> to vector<2x54xf32>
    %400 = vector.shape_cast %397 : vector<2x54xf32> to vector<2x1x1x54xf32>
    tpu.vector_store %arg10[%c0_460, %c4_461, %c1_462, %c3_463], %400 {strides = array<i32>} : memref<2x6x10x60xf32, #tpu.memory_space<vmem>>, vector<2x1x1x54xf32>,
    %c4_464 = arith.constant 4 : index
    %c1_465 = arith.constant 1 : index
    %c0_466 = arith.constant 0 : index
    %c0_467 = arith.constant 0 : index
    %401 = vector.load %arg1[%c4_464, %c1_465, %c0_466, %c0_467] : memref<6x8x32x54xf32, #tpu.memory_space<vmem>>, vector<1x1x32x54xf32>
    %402 = vector.shape_cast %401 : vector<1x1x32x54xf32> to vector<32x54xf32>
    %cst_468 = arith.constant dense<0.000000e+00> : vector<2x54xf32>
    %403 = tpu.matmul %4, %402, %cst_468 {dimension_numbers = #tpu.dot_dimension_numbers<[1], [0], [0], [1], [0, 0, 1, 1], [], []>} : vector<2x32xf32>, vector<32x54xf32>, vector<2x54xf32> -> vector<2x54xf32>
    %c4_469 = arith.constant 4 : index
    %c1_470 = arith.constant 1 : index
    %c0_471 = arith.constant 0 : index
    %c0_472 = arith.constant 0 : index
    %404 = vector.load %arg2[%c4_469, %c1_470, %c0_471, %c0_472] : memref<6x8x1x54xf32, #tpu.memory_space<vmem>>, vector<1x1x1x54xf32>
    %405 = vector.shape_cast %404 : vector<1x1x1x54xf32> to vector<1x54xf32>
    %406 = vector.broadcast %405 : vector<1x54xf32> to vector<2x54xf32>
    %407 = arith.addf %403, %406 : vector<2x54xf32>
    %cst_473 = arith.constant 0.000000e+00 : f32
    %408 = vector.broadcast %cst_473 : f32 to vector<2x54xf32>
    %409 = arith.maximumf %407, %408 : vector<2x54xf32>
    %c0_474 = arith.constant 0 : index
    %c4_475 = arith.constant 4 : index
    %c2_476 = arith.constant 2 : index
    %c3_477 = arith.constant 3 : index
    %410 = vector.load %arg10[%c0_474, %c4_475, %c2_476, %c3_477] : memref<2x6x10x60xf32, #tpu.memory_space<vmem>>, vector<2x1x1x54xf32>
    %411 = vector.shape_cast %410 : vector<2x1x1x54xf32> to vector<2x54xf32>
    %412 = vector.shape_cast %409 : vector<2x54xf32> to vector<2x1x1x54xf32>
    tpu.vector_store %arg10[%c0_474, %c4_475, %c2_476, %c3_477], %412 {strides = array<i32>} : memref<2x6x10x60xf32, #tpu.memory_space<vmem>>, vector<2x1x1x54xf32>,
    %c4_478 = arith.constant 4 : index
    %c2_479 = arith.constant 2 : index
    %c0_480 = arith.constant 0 : index
    %c0_481 = arith.constant 0 : index
    %413 = vector.load %arg1[%c4_478, %c2_479, %c0_480, %c0_481] : memref<6x8x32x54xf32, #tpu.memory_space<vmem>>, vector<1x1x32x54xf32>
    %414 = vector.shape_cast %413 : vector<1x1x32x54xf32> to vector<32x54xf32>
    %cst_482 = arith.constant dense<0.000000e+00> : vector<2x54xf32>
    %415 = tpu.matmul %4, %414, %cst_482 {dimension_numbers = #tpu.dot_dimension_numbers<[1], [0], [0], [1], [0, 0, 1, 1], [], []>} : vector<2x32xf32>, vector<32x54xf32>, vector<2x54xf32> -> vector<2x54xf32>
    %c4_483 = arith.constant 4 : index
    %c2_484 = arith.constant 2 : index
    %c0_485 = arith.constant 0 : index
    %c0_486 = arith.constant 0 : index
    %416 = vector.load %arg2[%c4_483, %c2_484, %c0_485, %c0_486] : memref<6x8x1x54xf32, #tpu.memory_space<vmem>>, vector<1x1x1x54xf32>
    %417 = vector.shape_cast %416 : vector<1x1x1x54xf32> to vector<1x54xf32>
    %418 = vector.broadcast %417 : vector<1x54xf32> to vector<2x54xf32>
    %419 = arith.addf %415, %418 : vector<2x54xf32>
    %cst_487 = arith.constant 0.000000e+00 : f32
    %420 = vector.broadcast %cst_487 : f32 to vector<2x54xf32>
    %421 = arith.maximumf %419, %420 : vector<2x54xf32>
    %c0_488 = arith.constant 0 : index
    %c4_489 = arith.constant 4 : index
    %c3_490 = arith.constant 3 : index
    %c3_491 = arith.constant 3 : index
    %422 = vector.load %arg10[%c0_488, %c4_489, %c3_490, %c3_491] : memref<2x6x10x60xf32, #tpu.memory_space<vmem>>, vector<2x1x1x54xf32>
    %423 = vector.shape_cast %422 : vector<2x1x1x54xf32> to vector<2x54xf32>
    %424 = vector.shape_cast %421 : vector<2x54xf32> to vector<2x1x1x54xf32>
    tpu.vector_store %arg10[%c0_488, %c4_489, %c3_490, %c3_491], %424 {strides = array<i32>} : memref<2x6x10x60xf32, #tpu.memory_space<vmem>>, vector<2x1x1x54xf32>,
    %c4_492 = arith.constant 4 : index
    %c3_493 = arith.constant 3 : index
    %c0_494 = arith.constant 0 : index
    %c0_495 = arith.constant 0 : index
    %425 = vector.load %arg1[%c4_492, %c3_493, %c0_494, %c0_495] : memref<6x8x32x54xf32, #tpu.memory_space<vmem>>, vector<1x1x32x54xf32>
    %426 = vector.shape_cast %425 : vector<1x1x32x54xf32> to vector<32x54xf32>
    %cst_496 = arith.constant dense<0.000000e+00> : vector<2x54xf32>
    %427 = tpu.matmul %4, %426, %cst_496 {dimension_numbers = #tpu.dot_dimension_numbers<[1], [0], [0], [1], [0, 0, 1, 1], [], []>} : vector<2x32xf32>, vector<32x54xf32>, vector<2x54xf32> -> vector<2x54xf32>
    %c4_497 = arith.constant 4 : index
    %c3_498 = arith.constant 3 : index
    %c0_499 = arith.constant 0 : index
    %c0_500 = arith.constant 0 : index
    %428 = vector.load %arg2[%c4_497, %c3_498, %c0_499, %c0_500] : memref<6x8x1x54xf32, #tpu.memory_space<vmem>>, vector<1x1x1x54xf32>
    %429 = vector.shape_cast %428 : vector<1x1x1x54xf32> to vector<1x54xf32>
    %430 = vector.broadcast %429 : vector<1x54xf32> to vector<2x54xf32>
    %431 = arith.addf %427, %430 : vector<2x54xf32>
    %cst_501 = arith.constant 0.000000e+00 : f32
    %432 = vector.broadcast %cst_501 : f32 to vector<2x54xf32>
    %433 = arith.maximumf %431, %432 : vector<2x54xf32>
    %c0_502 = arith.constant 0 : index
    %c4_503 = arith.constant 4 : index
    %c4_504 = arith.constant 4 : index
    %c3_505 = arith.constant 3 : index
    %434 = vector.load %arg10[%c0_502, %c4_503, %c4_504, %c3_505] : memref<2x6x10x60xf32, #tpu.memory_space<vmem>>, vector<2x1x1x54xf32>
    %435 = vector.shape_cast %434 : vector<2x1x1x54xf32> to vector<2x54xf32>
    %436 = vector.shape_cast %433 : vector<2x54xf32> to vector<2x1x1x54xf32>
    tpu.vector_store %arg10[%c0_502, %c4_503, %c4_504, %c3_505], %436 {strides = array<i32>} : memref<2x6x10x60xf32, #tpu.memory_space<vmem>>, vector<2x1x1x54xf32>,
    %c4_506 = arith.constant 4 : index
    %c4_507 = arith.constant 4 : index
    %c0_508 = arith.constant 0 : index
    %c0_509 = arith.constant 0 : index
    %437 = vector.load %arg1[%c4_506, %c4_507, %c0_508, %c0_509] : memref<6x8x32x54xf32, #tpu.memory_space<vmem>>, vector<1x1x32x54xf32>
    %438 = vector.shape_cast %437 : vector<1x1x32x54xf32> to vector<32x54xf32>
    %cst_510 = arith.constant dense<0.000000e+00> : vector<2x54xf32>
    %439 = tpu.matmul %4, %438, %cst_510 {dimension_numbers = #tpu.dot_dimension_numbers<[1], [0], [0], [1], [0, 0, 1, 1], [], []>} : vector<2x32xf32>, vector<32x54xf32>, vector<2x54xf32> -> vector<2x54xf32>
    %c4_511 = arith.constant 4 : index
    %c4_512 = arith.constant 4 : index
    %c0_513 = arith.constant 0 : index
    %c0_514 = arith.constant 0 : index
    %440 = vector.load %arg2[%c4_511, %c4_512, %c0_513, %c0_514] : memref<6x8x1x54xf32, #tpu.memory_space<vmem>>, vector<1x1x1x54xf32>
    %441 = vector.shape_cast %440 : vector<1x1x1x54xf32> to vector<1x54xf32>
    %442 = vector.broadcast %441 : vector<1x54xf32> to vector<2x54xf32>
    %443 = arith.addf %439, %442 : vector<2x54xf32>
    %cst_515 = arith.constant 0.000000e+00 : f32
    %444 = vector.broadcast %cst_515 : f32 to vector<2x54xf32>
    %445 = arith.maximumf %443, %444 : vector<2x54xf32>
    %c0_516 = arith.constant 0 : index
    %c4_517 = arith.constant 4 : index
    %c5_518 = arith.constant 5 : index
    %c3_519 = arith.constant 3 : index
    %446 = vector.load %arg10[%c0_516, %c4_517, %c5_518, %c3_519] : memref<2x6x10x60xf32, #tpu.memory_space<vmem>>, vector<2x1x1x54xf32>
    %447 = vector.shape_cast %446 : vector<2x1x1x54xf32> to vector<2x54xf32>
    %448 = vector.shape_cast %445 : vector<2x54xf32> to vector<2x1x1x54xf32>
    tpu.vector_store %arg10[%c0_516, %c4_517, %c5_518, %c3_519], %448 {strides = array<i32>} : memref<2x6x10x60xf32, #tpu.memory_space<vmem>>, vector<2x1x1x54xf32>,
    %c4_520 = arith.constant 4 : index
    %c5_521 = arith.constant 5 : index
    %c0_522 = arith.constant 0 : index
    %c0_523 = arith.constant 0 : index
    %449 = vector.load %arg1[%c4_520, %c5_521, %c0_522, %c0_523] : memref<6x8x32x54xf32, #tpu.memory_space<vmem>>, vector<1x1x32x54xf32>
    %450 = vector.shape_cast %449 : vector<1x1x32x54xf32> to vector<32x54xf32>
    %cst_524 = arith.constant dense<0.000000e+00> : vector<2x54xf32>
    %451 = tpu.matmul %4, %450, %cst_524 {dimension_numbers = #tpu.dot_dimension_numbers<[1], [0], [0], [1], [0, 0, 1, 1], [], []>} : vector<2x32xf32>, vector<32x54xf32>, vector<2x54xf32> -> vector<2x54xf32>
    %c4_525 = arith.constant 4 : index
    %c5_526 = arith.constant 5 : index
    %c0_527 = arith.constant 0 : index
    %c0_528 = arith.constant 0 : index
    %452 = vector.load %arg2[%c4_525, %c5_526, %c0_527, %c0_528] : memref<6x8x1x54xf32, #tpu.memory_space<vmem>>, vector<1x1x1x54xf32>
    %453 = vector.shape_cast %452 : vector<1x1x1x54xf32> to vector<1x54xf32>
    %454 = vector.broadcast %453 : vector<1x54xf32> to vector<2x54xf32>
    %455 = arith.addf %451, %454 : vector<2x54xf32>
    %cst_529 = arith.constant 0.000000e+00 : f32
    %456 = vector.broadcast %cst_529 : f32 to vector<2x54xf32>
    %457 = arith.maximumf %455, %456 : vector<2x54xf32>
    %c0_530 = arith.constant 0 : index
    %c4_531 = arith.constant 4 : index
    %c6_532 = arith.constant 6 : index
    %c3_533 = arith.constant 3 : index
    %458 = vector.load %arg10[%c0_530, %c4_531, %c6_532, %c3_533] : memref<2x6x10x60xf32, #tpu.memory_space<vmem>>, vector<2x1x1x54xf32>
    %459 = vector.shape_cast %458 : vector<2x1x1x54xf32> to vector<2x54xf32>
    %460 = vector.shape_cast %457 : vector<2x54xf32> to vector<2x1x1x54xf32>
    tpu.vector_store %arg10[%c0_530, %c4_531, %c6_532, %c3_533], %460 {strides = array<i32>} : memref<2x6x10x60xf32, #tpu.memory_space<vmem>>, vector<2x1x1x54xf32>,
    %c4_534 = arith.constant 4 : index
    %c6_535 = arith.constant 6 : index
    %c0_536 = arith.constant 0 : index
    %c0_537 = arith.constant 0 : index
    %461 = vector.load %arg1[%c4_534, %c6_535, %c0_536, %c0_537] : memref<6x8x32x54xf32, #tpu.memory_space<vmem>>, vector<1x1x32x54xf32>
    %462 = vector.shape_cast %461 : vector<1x1x32x54xf32> to vector<32x54xf32>
    %cst_538 = arith.constant dense<0.000000e+00> : vector<2x54xf32>
    %463 = tpu.matmul %4, %462, %cst_538 {dimension_numbers = #tpu.dot_dimension_numbers<[1], [0], [0], [1], [0, 0, 1, 1], [], []>} : vector<2x32xf32>, vector<32x54xf32>, vector<2x54xf32> -> vector<2x54xf32>
    %c4_539 = arith.constant 4 : index
    %c6_540 = arith.constant 6 : index
    %c0_541 = arith.constant 0 : index
    %c0_542 = arith.constant 0 : index
    %464 = vector.load %arg2[%c4_539, %c6_540, %c0_541, %c0_542] : memref<6x8x1x54xf32, #tpu.memory_space<vmem>>, vector<1x1x1x54xf32>
    %465 = vector.shape_cast %464 : vector<1x1x1x54xf32> to vector<1x54xf32>
    %466 = vector.broadcast %465 : vector<1x54xf32> to vector<2x54xf32>
    %467 = arith.addf %463, %466 : vector<2x54xf32>
    %cst_543 = arith.constant 0.000000e+00 : f32
    %468 = vector.broadcast %cst_543 : f32 to vector<2x54xf32>
    %469 = arith.maximumf %467, %468 : vector<2x54xf32>
    %c0_544 = arith.constant 0 : index
    %c4_545 = arith.constant 4 : index
    %c7_546 = arith.constant 7 : index
    %c3_547 = arith.constant 3 : index
    %470 = vector.load %arg10[%c0_544, %c4_545, %c7_546, %c3_547] : memref<2x6x10x60xf32, #tpu.memory_space<vmem>>, vector<2x1x1x54xf32>
    %471 = vector.shape_cast %470 : vector<2x1x1x54xf32> to vector<2x54xf32>
    %472 = vector.shape_cast %469 : vector<2x54xf32> to vector<2x1x1x54xf32>
    tpu.vector_store %arg10[%c0_544, %c4_545, %c7_546, %c3_547], %472 {strides = array<i32>} : memref<2x6x10x60xf32, #tpu.memory_space<vmem>>, vector<2x1x1x54xf32>,
    %c4_548 = arith.constant 4 : index
    %c7_549 = arith.constant 7 : index
    %c0_550 = arith.constant 0 : index
    %c0_551 = arith.constant 0 : index
    %473 = vector.load %arg1[%c4_548, %c7_549, %c0_550, %c0_551] : memref<6x8x32x54xf32, #tpu.memory_space<vmem>>, vector<1x1x32x54xf32>
    %474 = vector.shape_cast %473 : vector<1x1x32x54xf32> to vector<32x54xf32>
    %cst_552 = arith.constant dense<0.000000e+00> : vector<2x54xf32>
    %475 = tpu.matmul %4, %474, %cst_552 {dimension_numbers = #tpu.dot_dimension_numbers<[1], [0], [0], [1], [0, 0, 1, 1], [], []>} : vector<2x32xf32>, vector<32x54xf32>, vector<2x54xf32> -> vector<2x54xf32>
    %c4_553 = arith.constant 4 : index
    %c7_554 = arith.constant 7 : index
    %c0_555 = arith.constant 0 : index
    %c0_556 = arith.constant 0 : index
    %476 = vector.load %arg2[%c4_553, %c7_554, %c0_555, %c0_556] : memref<6x8x1x54xf32, #tpu.memory_space<vmem>>, vector<1x1x1x54xf32>
    %477 = vector.shape_cast %476 : vector<1x1x1x54xf32> to vector<1x54xf32>
    %478 = vector.broadcast %477 : vector<1x54xf32> to vector<2x54xf32>
    %479 = arith.addf %475, %478 : vector<2x54xf32>
    %cst_557 = arith.constant 0.000000e+00 : f32
    %480 = vector.broadcast %cst_557 : f32 to vector<2x54xf32>
    %481 = arith.maximumf %479, %480 : vector<2x54xf32>
    %c0_558 = arith.constant 0 : index
    %c4_559 = arith.constant 4 : index
    %c8_560 = arith.constant 8 : index
    %c3_561 = arith.constant 3 : index
    %482 = vector.load %arg10[%c0_558, %c4_559, %c8_560, %c3_561] : memref<2x6x10x60xf32, #tpu.memory_space<vmem>>, vector<2x1x1x54xf32>
    %483 = vector.shape_cast %482 : vector<2x1x1x54xf32> to vector<2x54xf32>
    %484 = vector.shape_cast %481 : vector<2x54xf32> to vector<2x1x1x54xf32>
    tpu.vector_store %arg10[%c0_558, %c4_559, %c8_560, %c3_561], %484 {strides = array<i32>} : memref<2x6x10x60xf32, #tpu.memory_space<vmem>>, vector<2x1x1x54xf32>,
    %c5_562 = arith.constant 5 : index
    %c0_563 = arith.constant 0 : index
    %c0_564 = arith.constant 0 : index
    %c0_565 = arith.constant 0 : index
    %485 = vector.load %arg1[%c5_562, %c0_563, %c0_564, %c0_565] : memref<6x8x32x54xf32, #tpu.memory_space<vmem>>, vector<1x1x32x54xf32>
    %486 = vector.shape_cast %485 : vector<1x1x32x54xf32> to vector<32x54xf32>
    %cst_566 = arith.constant dense<0.000000e+00> : vector<2x54xf32>
    %487 = tpu.matmul %4, %486, %cst_566 {dimension_numbers = #tpu.dot_dimension_numbers<[1], [0], [0], [1], [0, 0, 1, 1], [], []>} : vector<2x32xf32>, vector<32x54xf32>, vector<2x54xf32> -> vector<2x54xf32>
    %c5_567 = arith.constant 5 : index
    %c0_568 = arith.constant 0 : index
    %c0_569 = arith.constant 0 : index
    %c0_570 = arith.constant 0 : index
    %488 = vector.load %arg2[%c5_567, %c0_568, %c0_569, %c0_570] : memref<6x8x1x54xf32, #tpu.memory_space<vmem>>, vector<1x1x1x54xf32>
    %489 = vector.shape_cast %488 : vector<1x1x1x54xf32> to vector<1x54xf32>
    %490 = vector.broadcast %489 : vector<1x54xf32> to vector<2x54xf32>
    %491 = arith.addf %487, %490 : vector<2x54xf32>
    %cst_571 = arith.constant 0.000000e+00 : f32
    %492 = vector.broadcast %cst_571 : f32 to vector<2x54xf32>
    %493 = arith.maximumf %491, %492 : vector<2x54xf32>
    %c0_572 = arith.constant 0 : index
    %c5_573 = arith.constant 5 : index
    %c1_574 = arith.constant 1 : index
    %c3_575 = arith.constant 3 : index
    %494 = vector.load %arg10[%c0_572, %c5_573, %c1_574, %c3_575] : memref<2x6x10x60xf32, #tpu.memory_space<vmem>>, vector<2x1x1x54xf32>
    %495 = vector.shape_cast %494 : vector<2x1x1x54xf32> to vector<2x54xf32>
    %496 = vector.shape_cast %493 : vector<2x54xf32> to vector<2x1x1x54xf32>
    tpu.vector_store %arg10[%c0_572, %c5_573, %c1_574, %c3_575], %496 {strides = array<i32>} : memref<2x6x10x60xf32, #tpu.memory_space<vmem>>, vector<2x1x1x54xf32>,
    %c5_576 = arith.constant 5 : index
    %c1_577 = arith.constant 1 : index
    %c0_578 = arith.constant 0 : index
    %c0_579 = arith.constant 0 : index
    %497 = vector.load %arg1[%c5_576, %c1_577, %c0_578, %c0_579] : memref<6x8x32x54xf32, #tpu.memory_space<vmem>>, vector<1x1x32x54xf32>
    %498 = vector.shape_cast %497 : vector<1x1x32x54xf32> to vector<32x54xf32>
    %cst_580 = arith.constant dense<0.000000e+00> : vector<2x54xf32>
    %499 = tpu.matmul %4, %498, %cst_580 {dimension_numbers = #tpu.dot_dimension_numbers<[1], [0], [0], [1], [0, 0, 1, 1], [], []>} : vector<2x32xf32>, vector<32x54xf32>, vector<2x54xf32> -> vector<2x54xf32>
    %c5_581 = arith.constant 5 : index
    %c1_582 = arith.constant 1 : index
    %c0_583 = arith.constant 0 : index
    %c0_584 = arith.constant 0 : index
    %500 = vector.load %arg2[%c5_581, %c1_582, %c0_583, %c0_584] : memref<6x8x1x54xf32, #tpu.memory_space<vmem>>, vector<1x1x1x54xf32>
    %501 = vector.shape_cast %500 : vector<1x1x1x54xf32> to vector<1x54xf32>
    %502 = vector.broadcast %501 : vector<1x54xf32> to vector<2x54xf32>
    %503 = arith.addf %499, %502 : vector<2x54xf32>
    %cst_585 = arith.constant 0.000000e+00 : f32
    %504 = vector.broadcast %cst_585 : f32 to vector<2x54xf32>
    %505 = arith.maximumf %503, %504 : vector<2x54xf32>
    %c0_586 = arith.constant 0 : index
    %c5_587 = arith.constant 5 : index
    %c2_588 = arith.constant 2 : index
    %c3_589 = arith.constant 3 : index
    %506 = vector.load %arg10[%c0_586, %c5_587, %c2_588, %c3_589] : memref<2x6x10x60xf32, #tpu.memory_space<vmem>>, vector<2x1x1x54xf32>
    %507 = vector.shape_cast %506 : vector<2x1x1x54xf32> to vector<2x54xf32>
    %508 = vector.shape_cast %505 : vector<2x54xf32> to vector<2x1x1x54xf32>
    tpu.vector_store %arg10[%c0_586, %c5_587, %c2_588, %c3_589], %508 {strides = array<i32>} : memref<2x6x10x60xf32, #tpu.memory_space<vmem>>, vector<2x1x1x54xf32>,
    %c5_590 = arith.constant 5 : index
    %c2_591 = arith.constant 2 : index
    %c0_592 = arith.constant 0 : index
    %c0_593 = arith.constant 0 : index
    %509 = vector.load %arg1[%c5_590, %c2_591, %c0_592, %c0_593] : memref<6x8x32x54xf32, #tpu.memory_space<vmem>>, vector<1x1x32x54xf32>
    %510 = vector.shape_cast %509 : vector<1x1x32x54xf32> to vector<32x54xf32>
    %cst_594 = arith.constant dense<0.000000e+00> : vector<2x54xf32>
    %511 = tpu.matmul %4, %510, %cst_594 {dimension_numbers = #tpu.dot_dimension_numbers<[1], [0], [0], [1], [0, 0, 1, 1], [], []>} : vector<2x32xf32>, vector<32x54xf32>, vector<2x54xf32> -> vector<2x54xf32>
    %c5_595 = arith.constant 5 : index
    %c2_596 = arith.constant 2 : index
    %c0_597 = arith.constant 0 : index
    %c0_598 = arith.constant 0 : index
    %512 = vector.load %arg2[%c5_595, %c2_596, %c0_597, %c0_598] : memref<6x8x1x54xf32, #tpu.memory_space<vmem>>, vector<1x1x1x54xf32>
    %513 = vector.shape_cast %512 : vector<1x1x1x54xf32> to vector<1x54xf32>
    %514 = vector.broadcast %513 : vector<1x54xf32> to vector<2x54xf32>
    %515 = arith.addf %511, %514 : vector<2x54xf32>
    %cst_599 = arith.constant 0.000000e+00 : f32
    %516 = vector.broadcast %cst_599 : f32 to vector<2x54xf32>
    %517 = arith.maximumf %515, %516 : vector<2x54xf32>
    %c0_600 = arith.constant 0 : index
    %c5_601 = arith.constant 5 : index
    %c3_602 = arith.constant 3 : index
    %c3_603 = arith.constant 3 : index
    %518 = vector.load %arg10[%c0_600, %c5_601, %c3_602, %c3_603] : memref<2x6x10x60xf32, #tpu.memory_space<vmem>>, vector<2x1x1x54xf32>
    %519 = vector.shape_cast %518 : vector<2x1x1x54xf32> to vector<2x54xf32>
    %520 = vector.shape_cast %517 : vector<2x54xf32> to vector<2x1x1x54xf32>
    tpu.vector_store %arg10[%c0_600, %c5_601, %c3_602, %c3_603], %520 {strides = array<i32>} : memref<2x6x10x60xf32, #tpu.memory_space<vmem>>, vector<2x1x1x54xf32>,
    %c5_604 = arith.constant 5 : index
    %c3_605 = arith.constant 3 : index
    %c0_606 = arith.constant 0 : index
    %c0_607 = arith.constant 0 : index
    %521 = vector.load %arg1[%c5_604, %c3_605, %c0_606, %c0_607] : memref<6x8x32x54xf32, #tpu.memory_space<vmem>>, vector<1x1x32x54xf32>
    %522 = vector.shape_cast %521 : vector<1x1x32x54xf32> to vector<32x54xf32>
    %cst_608 = arith.constant dense<0.000000e+00> : vector<2x54xf32>
    %523 = tpu.matmul %4, %522, %cst_608 {dimension_numbers = #tpu.dot_dimension_numbers<[1], [0], [0], [1], [0, 0, 1, 1], [], []>} : vector<2x32xf32>, vector<32x54xf32>, vector<2x54xf32> -> vector<2x54xf32>
    %c5_609 = arith.constant 5 : index
    %c3_610 = arith.constant 3 : index
    %c0_611 = arith.constant 0 : index
    %c0_612 = arith.constant 0 : index
    %524 = vector.load %arg2[%c5_609, %c3_610, %c0_611, %c0_612] : memref<6x8x1x54xf32, #tpu.memory_space<vmem>>, vector<1x1x1x54xf32>
    %525 = vector.shape_cast %524 : vector<1x1x1x54xf32> to vector<1x54xf32>
    %526 = vector.broadcast %525 : vector<1x54xf32> to vector<2x54xf32>
    %527 = arith.addf %523, %526 : vector<2x54xf32>
    %cst_613 = arith.constant 0.000000e+00 : f32
    %528 = vector.broadcast %cst_613 : f32 to vector<2x54xf32>
    %529 = arith.maximumf %527, %528 : vector<2x54xf32>
    %c0_614 = arith.constant 0 : index
    %c5_615 = arith.constant 5 : index
    %c4_616 = arith.constant 4 : index
    %c3_617 = arith.constant 3 : index
    %530 = vector.load %arg10[%c0_614, %c5_615, %c4_616, %c3_617] : memref<2x6x10x60xf32, #tpu.memory_space<vmem>>, vector<2x1x1x54xf32>
    %531 = vector.shape_cast %530 : vector<2x1x1x54xf32> to vector<2x54xf32>
    %532 = vector.shape_cast %529 : vector<2x54xf32> to vector<2x1x1x54xf32>
    tpu.vector_store %arg10[%c0_614, %c5_615, %c4_616, %c3_617], %532 {strides = array<i32>} : memref<2x6x10x60xf32, #tpu.memory_space<vmem>>, vector<2x1x1x54xf32>,
    %c5_618 = arith.constant 5 : index
    %c4_619 = arith.constant 4 : index
    %c0_620 = arith.constant 0 : index
    %c0_621 = arith.constant 0 : index
    %533 = vector.load %arg1[%c5_618, %c4_619, %c0_620, %c0_621] : memref<6x8x32x54xf32, #tpu.memory_space<vmem>>, vector<1x1x32x54xf32>
    %534 = vector.shape_cast %533 : vector<1x1x32x54xf32> to vector<32x54xf32>
    %cst_622 = arith.constant dense<0.000000e+00> : vector<2x54xf32>
    %535 = tpu.matmul %4, %534, %cst_622 {dimension_numbers = #tpu.dot_dimension_numbers<[1], [0], [0], [1], [0, 0, 1, 1], [], []>} : vector<2x32xf32>, vector<32x54xf32>, vector<2x54xf32> -> vector<2x54xf32>
    %c5_623 = arith.constant 5 : index
    %c4_624 = arith.constant 4 : index
    %c0_625 = arith.constant 0 : index
    %c0_626 = arith.constant 0 : index
    %536 = vector.load %arg2[%c5_623, %c4_624, %c0_625, %c0_626] : memref<6x8x1x54xf32, #tpu.memory_space<vmem>>, vector<1x1x1x54xf32>
    %537 = vector.shape_cast %536 : vector<1x1x1x54xf32> to vector<1x54xf32>
    %538 = vector.broadcast %537 : vector<1x54xf32> to vector<2x54xf32>
    %539 = arith.addf %535, %538 : vector<2x54xf32>
    %cst_627 = arith.constant 0.000000e+00 : f32
    %540 = vector.broadcast %cst_627 : f32 to vector<2x54xf32>
    %541 = arith.maximumf %539, %540 : vector<2x54xf32>
    %c0_628 = arith.constant 0 : index
    %c5_629 = arith.constant 5 : index
    %c5_630 = arith.constant 5 : index
    %c3_631 = arith.constant 3 : index
    %542 = vector.load %arg10[%c0_628, %c5_629, %c5_630, %c3_631] : memref<2x6x10x60xf32, #tpu.memory_space<vmem>>, vector<2x1x1x54xf32>
    %543 = vector.shape_cast %542 : vector<2x1x1x54xf32> to vector<2x54xf32>
    %544 = vector.shape_cast %541 : vector<2x54xf32> to vector<2x1x1x54xf32>
    tpu.vector_store %arg10[%c0_628, %c5_629, %c5_630, %c3_631], %544 {strides = array<i32>} : memref<2x6x10x60xf32, #tpu.memory_space<vmem>>, vector<2x1x1x54xf32>,
    %c5_632 = arith.constant 5 : index
    %c5_633 = arith.constant 5 : index
    %c0_634 = arith.constant 0 : index
    %c0_635 = arith.constant 0 : index
    %545 = vector.load %arg1[%c5_632, %c5_633, %c0_634, %c0_635] : memref<6x8x32x54xf32, #tpu.memory_space<vmem>>, vector<1x1x32x54xf32>
    %546 = vector.shape_cast %545 : vector<1x1x32x54xf32> to vector<32x54xf32>
    %cst_636 = arith.constant dense<0.000000e+00> : vector<2x54xf32>
    %547 = tpu.matmul %4, %546, %cst_636 {dimension_numbers = #tpu.dot_dimension_numbers<[1], [0], [0], [1], [0, 0, 1, 1], [], []>} : vector<2x32xf32>, vector<32x54xf32>, vector<2x54xf32> -> vector<2x54xf32>
    %c5_637 = arith.constant 5 : index
    %c5_638 = arith.constant 5 : index
    %c0_639 = arith.constant 0 : index
    %c0_640 = arith.constant 0 : index
    %548 = vector.load %arg2[%c5_637, %c5_638, %c0_639, %c0_640] : memref<6x8x1x54xf32, #tpu.memory_space<vmem>>, vector<1x1x1x54xf32>
    %549 = vector.shape_cast %548 : vector<1x1x1x54xf32> to vector<1x54xf32>
    %550 = vector.broadcast %549 : vector<1x54xf32> to vector<2x54xf32>
    %551 = arith.addf %547, %550 : vector<2x54xf32>
    %cst_641 = arith.constant 0.000000e+00 : f32
    %552 = vector.broadcast %cst_641 : f32 to vector<2x54xf32>
    %553 = arith.maximumf %551, %552 : vector<2x54xf32>
    %c0_642 = arith.constant 0 : index
    %c5_643 = arith.constant 5 : index
    %c6_644 = arith.constant 6 : index
    %c3_645 = arith.constant 3 : index
    %554 = vector.load %arg10[%c0_642, %c5_643, %c6_644, %c3_645] : memref<2x6x10x60xf32, #tpu.memory_space<vmem>>, vector<2x1x1x54xf32>
    %555 = vector.shape_cast %554 : vector<2x1x1x54xf32> to vector<2x54xf32>
    %556 = vector.shape_cast %553 : vector<2x54xf32> to vector<2x1x1x54xf32>
    tpu.vector_store %arg10[%c0_642, %c5_643, %c6_644, %c3_645], %556 {strides = array<i32>} : memref<2x6x10x60xf32, #tpu.memory_space<vmem>>, vector<2x1x1x54xf32>,
    %c5_646 = arith.constant 5 : index
    %c6_647 = arith.constant 6 : index
    %c0_648 = arith.constant 0 : index
    %c0_649 = arith.constant 0 : index
    %557 = vector.load %arg1[%c5_646, %c6_647, %c0_648, %c0_649] : memref<6x8x32x54xf32, #tpu.memory_space<vmem>>, vector<1x1x32x54xf32>
    %558 = vector.shape_cast %557 : vector<1x1x32x54xf32> to vector<32x54xf32>
    %cst_650 = arith.constant dense<0.000000e+00> : vector<2x54xf32>
    %559 = tpu.matmul %4, %558, %cst_650 {dimension_numbers = #tpu.dot_dimension_numbers<[1], [0], [0], [1], [0, 0, 1, 1], [], []>} : vector<2x32xf32>, vector<32x54xf32>, vector<2x54xf32> -> vector<2x54xf32>
    %c5_651 = arith.constant 5 : index
    %c6_652 = arith.constant 6 : index
    %c0_653 = arith.constant 0 : index
    %c0_654 = arith.constant 0 : index
    %560 = vector.load %arg2[%c5_651, %c6_652, %c0_653, %c0_654] : memref<6x8x1x54xf32, #tpu.memory_space<vmem>>, vector<1x1x1x54xf32>
    %561 = vector.shape_cast %560 : vector<1x1x1x54xf32> to vector<1x54xf32>
    %562 = vector.broadcast %561 : vector<1x54xf32> to vector<2x54xf32>
    %563 = arith.addf %559, %562 : vector<2x54xf32>
    %cst_655 = arith.constant 0.000000e+00 : f32
    %564 = vector.broadcast %cst_655 : f32 to vector<2x54xf32>
    %565 = arith.maximumf %563, %564 : vector<2x54xf32>
    %c0_656 = arith.constant 0 : index
    %c5_657 = arith.constant 5 : index
    %c7_658 = arith.constant 7 : index
    %c3_659 = arith.constant 3 : index
    %566 = vector.load %arg10[%c0_656, %c5_657, %c7_658, %c3_659] : memref<2x6x10x60xf32, #tpu.memory_space<vmem>>, vector<2x1x1x54xf32>
    %567 = vector.shape_cast %566 : vector<2x1x1x54xf32> to vector<2x54xf32>
    %568 = vector.shape_cast %565 : vector<2x54xf32> to vector<2x1x1x54xf32>
    tpu.vector_store %arg10[%c0_656, %c5_657, %c7_658, %c3_659], %568 {strides = array<i32>} : memref<2x6x10x60xf32, #tpu.memory_space<vmem>>, vector<2x1x1x54xf32>,
    %c5_660 = arith.constant 5 : index
    %c7_661 = arith.constant 7 : index
    %c0_662 = arith.constant 0 : index
    %c0_663 = arith.constant 0 : index
    %569 = vector.load %arg1[%c5_660, %c7_661, %c0_662, %c0_663] : memref<6x8x32x54xf32, #tpu.memory_space<vmem>>, vector<1x1x32x54xf32>
    %570 = vector.shape_cast %569 : vector<1x1x32x54xf32> to vector<32x54xf32>
    %cst_664 = arith.constant dense<0.000000e+00> : vector<2x54xf32>
    %571 = tpu.matmul %4, %570, %cst_664 {dimension_numbers = #tpu.dot_dimension_numbers<[1], [0], [0], [1], [0, 0, 1, 1], [], []>} : vector<2x32xf32>, vector<32x54xf32>, vector<2x54xf32> -> vector<2x54xf32>
    %c5_665 = arith.constant 5 : index
    %c7_666 = arith.constant 7 : index
    %c0_667 = arith.constant 0 : index
    %c0_668 = arith.constant 0 : index
    %572 = vector.load %arg2[%c5_665, %c7_666, %c0_667, %c0_668] : memref<6x8x1x54xf32, #tpu.memory_space<vmem>>, vector<1x1x1x54xf32>
    %573 = vector.shape_cast %572 : vector<1x1x1x54xf32> to vector<1x54xf32>
    %574 = vector.broadcast %573 : vector<1x54xf32> to vector<2x54xf32>
    %575 = arith.addf %571, %574 : vector<2x54xf32>
    %cst_669 = arith.constant 0.000000e+00 : f32
    %576 = vector.broadcast %cst_669 : f32 to vector<2x54xf32>
    %577 = arith.maximumf %575, %576 : vector<2x54xf32>
    %c0_670 = arith.constant 0 : index
    %c5_671 = arith.constant 5 : index
    %c8_672 = arith.constant 8 : index
    %c3_673 = arith.constant 3 : index
    %578 = vector.load %arg10[%c0_670, %c5_671, %c8_672, %c3_673] : memref<2x6x10x60xf32, #tpu.memory_space<vmem>>, vector<2x1x1x54xf32>
    %579 = vector.shape_cast %578 : vector<2x1x1x54xf32> to vector<2x54xf32>
    %580 = vector.shape_cast %577 : vector<2x54xf32> to vector<2x1x1x54xf32>
    tpu.vector_store %arg10[%c0_670, %c5_671, %c8_672, %c3_673], %580 {strides = array<i32>} : memref<2x6x10x60xf32, #tpu.memory_space<vmem>>, vector<2x1x1x54xf32>,
    %cst_674 = arith.constant 0.000000e+00 : f32
    %581 = vector.broadcast %cst_674 : f32 to vector<2x9x57xf32>
    %c0_675 = arith.constant 0 : index
    %582 = memref.load %arg4[%c0_675] : memref<3xf32, #tpu.memory_space<smem>>
    %583 = vector.broadcast %582 : f32 to vector<2x9x57xf32>
    %584 = arith.addf %581, %583 : vector<2x9x57xf32>
    %cst_676 = arith.constant 0.000000e+00 : f32
    %585 = vector.broadcast %cst_676 : f32 to vector<2x9x57xf32>
    %c1_677 = arith.constant 1 : index
    %586 = memref.load %arg4[%c1_677] : memref<3xf32, #tpu.memory_space<smem>>
    %587 = vector.broadcast %586 : f32 to vector<2x9x57xf32>
    %588 = arith.addf %585, %587 : vector<2x9x57xf32>
    %cst_678 = arith.constant 0.000000e+00 : f32
    %589 = vector.broadcast %cst_678 : f32 to vector<2x9x57xf32>
    %c2_679 = arith.constant 2 : index
    %590 = memref.load %arg4[%c2_679] : memref<3xf32, #tpu.memory_space<smem>>
    %591 = vector.broadcast %590 : f32 to vector<2x9x57xf32>
    %592 = arith.addf %589, %591 : vector<2x9x57xf32>
    %c0_680 = arith.constant 0 : index
    %c0_681 = arith.constant 0 : index
    %c0_682 = arith.constant 0 : index
    %c0_683 = arith.constant 0 : index
    %593 = vector.load %arg10[%c0_680, %c0_681, %c0_682, %c0_683] : memref<2x6x10x60xf32, #tpu.memory_space<vmem>>, vector<2x1x9x57xf32>
    %594 = vector.shape_cast %593 : vector<2x1x9x57xf32> to vector<2x9x57xf32>
    %c7_684 = arith.constant 7 : index
    %595 = memref.load %arg3[%c7_684] : memref<144xf32, #tpu.memory_space<smem>>
    %596 = vector.broadcast %595 : f32 to vector<2x9x57xf32>
    %597 = arith.mulf %594, %596 : vector<2x9x57xf32>
    %598 = arith.addf %584, %597 : vector<2x9x57xf32>
    %c15 = arith.constant 15 : index
    %599 = memref.load %arg3[%c15] : memref<144xf32, #tpu.memory_space<smem>>
    %600 = vector.broadcast %599 : f32 to vector<2x9x57xf32>
    %601 = arith.mulf %594, %600 : vector<2x9x57xf32>
    %602 = arith.addf %588, %601 : vector<2x9x57xf32>
    %c23 = arith.constant 23 : index
    %603 = memref.load %arg3[%c23] : memref<144xf32, #tpu.memory_space<smem>>
    %604 = vector.broadcast %603 : f32 to vector<2x9x57xf32>
    %605 = arith.mulf %594, %604 : vector<2x9x57xf32>
    %606 = arith.addf %592, %605 : vector<2x9x57xf32>
    %c0_685 = arith.constant 0 : index
    %c0_686 = arith.constant 0 : index
    %c0_687 = arith.constant 0 : index
    %c1_688 = arith.constant 1 : index
    %607 = vector.load %arg10[%c0_685, %c0_686, %c0_687, %c1_688] : memref<2x6x10x60xf32, #tpu.memory_space<vmem>>, vector<2x1x9x57xf32>
    %608 = vector.shape_cast %607 : vector<2x1x9x57xf32> to vector<2x9x57xf32>
    %c6_689 = arith.constant 6 : index
    %609 = memref.load %arg3[%c6_689] : memref<144xf32, #tpu.memory_space<smem>>
    %610 = vector.broadcast %609 : f32 to vector<2x9x57xf32>
    %611 = arith.mulf %608, %610 : vector<2x9x57xf32>
    %612 = arith.addf %598, %611 : vector<2x9x57xf32>
    %c14 = arith.constant 14 : index
    %613 = memref.load %arg3[%c14] : memref<144xf32, #tpu.memory_space<smem>>
    %614 = vector.broadcast %613 : f32 to vector<2x9x57xf32>
    %615 = arith.mulf %608, %614 : vector<2x9x57xf32>
    %616 = arith.addf %602, %615 : vector<2x9x57xf32>
    %c22 = arith.constant 22 : index
    %617 = memref.load %arg3[%c22] : memref<144xf32, #tpu.memory_space<smem>>
    %618 = vector.broadcast %617 : f32 to vector<2x9x57xf32>
    %619 = arith.mulf %608, %618 : vector<2x9x57xf32>
    %620 = arith.addf %606, %619 : vector<2x9x57xf32>
    %c0_690 = arith.constant 0 : index
    %c0_691 = arith.constant 0 : index
    %c0_692 = arith.constant 0 : index
    %c2_693 = arith.constant 2 : index
    %621 = vector.load %arg10[%c0_690, %c0_691, %c0_692, %c2_693] : memref<2x6x10x60xf32, #tpu.memory_space<vmem>>, vector<2x1x9x57xf32>
    %622 = vector.shape_cast %621 : vector<2x1x9x57xf32> to vector<2x9x57xf32>
    %c5_694 = arith.constant 5 : index
    %623 = memref.load %arg3[%c5_694] : memref<144xf32, #tpu.memory_space<smem>>
    %624 = vector.broadcast %623 : f32 to vector<2x9x57xf32>
    %625 = arith.mulf %622, %624 : vector<2x9x57xf32>
    %626 = arith.addf %612, %625 : vector<2x9x57xf32>
    %c13 = arith.constant 13 : index
    %627 = memref.load %arg3[%c13] : memref<144xf32, #tpu.memory_space<smem>>
    %628 = vector.broadcast %627 : f32 to vector<2x9x57xf32>
    %629 = arith.mulf %622, %628 : vector<2x9x57xf32>
    %630 = arith.addf %616, %629 : vector<2x9x57xf32>
    %c21 = arith.constant 21 : index
    %631 = memref.load %arg3[%c21] : memref<144xf32, #tpu.memory_space<smem>>
    %632 = vector.broadcast %631 : f32 to vector<2x9x57xf32>
    %633 = arith.mulf %622, %632 : vector<2x9x57xf32>
    %634 = arith.addf %620, %633 : vector<2x9x57xf32>
    %c0_695 = arith.constant 0 : index
    %c0_696 = arith.constant 0 : index
    %c0_697 = arith.constant 0 : index
    %c3_698 = arith.constant 3 : index
    %635 = vector.load %arg10[%c0_695, %c0_696, %c0_697, %c3_698] : memref<2x6x10x60xf32, #tpu.memory_space<vmem>>, vector<2x1x9x57xf32>
    %636 = vector.shape_cast %635 : vector<2x1x9x57xf32> to vector<2x9x57xf32>
    %c4_699 = arith.constant 4 : index
    %637 = memref.load %arg3[%c4_699] : memref<144xf32, #tpu.memory_space<smem>>
    %638 = vector.broadcast %637 : f32 to vector<2x9x57xf32>
    %639 = arith.mulf %636, %638 : vector<2x9x57xf32>
    %640 = arith.addf %626, %639 : vector<2x9x57xf32>
    %c12 = arith.constant 12 : index
    %641 = memref.load %arg3[%c12] : memref<144xf32, #tpu.memory_space<smem>>
    %642 = vector.broadcast %641 : f32 to vector<2x9x57xf32>
    %643 = arith.mulf %636, %642 : vector<2x9x57xf32>
    %644 = arith.addf %630, %643 : vector<2x9x57xf32>
    %c20 = arith.constant 20 : index
    %645 = memref.load %arg3[%c20] : memref<144xf32, #tpu.memory_space<smem>>
    %646 = vector.broadcast %645 : f32 to vector<2x9x57xf32>
    %647 = arith.mulf %636, %646 : vector<2x9x57xf32>
    %648 = arith.addf %634, %647 : vector<2x9x57xf32>
    %c0_700 = arith.constant 0 : index
    %c0_701 = arith.constant 0 : index
    %c1_702 = arith.constant 1 : index
    %c0_703 = arith.constant 0 : index
    %649 = vector.load %arg10[%c0_700, %c0_701, %c1_702, %c0_703] : memref<2x6x10x60xf32, #tpu.memory_space<vmem>>, vector<2x1x9x57xf32>
    %650 = vector.shape_cast %649 : vector<2x1x9x57xf32> to vector<2x9x57xf32>
    %c3_704 = arith.constant 3 : index
    %651 = memref.load %arg3[%c3_704] : memref<144xf32, #tpu.memory_space<smem>>
    %652 = vector.broadcast %651 : f32 to vector<2x9x57xf32>
    %653 = arith.mulf %650, %652 : vector<2x9x57xf32>
    %654 = arith.addf %640, %653 : vector<2x9x57xf32>
    %c11 = arith.constant 11 : index
    %655 = memref.load %arg3[%c11] : memref<144xf32, #tpu.memory_space<smem>>
    %656 = vector.broadcast %655 : f32 to vector<2x9x57xf32>
    %657 = arith.mulf %650, %656 : vector<2x9x57xf32>
    %658 = arith.addf %644, %657 : vector<2x9x57xf32>
    %c19 = arith.constant 19 : index
    %659 = memref.load %arg3[%c19] : memref<144xf32, #tpu.memory_space<smem>>
    %660 = vector.broadcast %659 : f32 to vector<2x9x57xf32>
    %661 = arith.mulf %650, %660 : vector<2x9x57xf32>
    %662 = arith.addf %648, %661 : vector<2x9x57xf32>
    %c0_705 = arith.constant 0 : index
    %c0_706 = arith.constant 0 : index
    %c1_707 = arith.constant 1 : index
    %c1_708 = arith.constant 1 : index
    %663 = vector.load %arg10[%c0_705, %c0_706, %c1_707, %c1_708] : memref<2x6x10x60xf32, #tpu.memory_space<vmem>>, vector<2x1x9x57xf32>
    %664 = vector.shape_cast %663 : vector<2x1x9x57xf32> to vector<2x9x57xf32>
    %c2_709 = arith.constant 2 : index
    %665 = memref.load %arg3[%c2_709] : memref<144xf32, #tpu.memory_space<smem>>
    %666 = vector.broadcast %665 : f32 to vector<2x9x57xf32>
    %667 = arith.mulf %664, %666 : vector<2x9x57xf32>
    %668 = arith.addf %654, %667 : vector<2x9x57xf32>
    %c10 = arith.constant 10 : index
    %669 = memref.load %arg3[%c10] : memref<144xf32, #tpu.memory_space<smem>>
    %670 = vector.broadcast %669 : f32 to vector<2x9x57xf32>
    %671 = arith.mulf %664, %670 : vector<2x9x57xf32>
    %672 = arith.addf %658, %671 : vector<2x9x57xf32>
    %c18 = arith.constant 18 : index
    %673 = memref.load %arg3[%c18] : memref<144xf32, #tpu.memory_space<smem>>
    %674 = vector.broadcast %673 : f32 to vector<2x9x57xf32>
    %675 = arith.mulf %664, %674 : vector<2x9x57xf32>
    %676 = arith.addf %662, %675 : vector<2x9x57xf32>
    %c0_710 = arith.constant 0 : index
    %c0_711 = arith.constant 0 : index
    %c1_712 = arith.constant 1 : index
    %c2_713 = arith.constant 2 : index
    %677 = vector.load %arg10[%c0_710, %c0_711, %c1_712, %c2_713] : memref<2x6x10x60xf32, #tpu.memory_space<vmem>>, vector<2x1x9x57xf32>
    %678 = vector.shape_cast %677 : vector<2x1x9x57xf32> to vector<2x9x57xf32>
    %c1_714 = arith.constant 1 : index
    %679 = memref.load %arg3[%c1_714] : memref<144xf32, #tpu.memory_space<smem>>
    %680 = vector.broadcast %679 : f32 to vector<2x9x57xf32>
    %681 = arith.mulf %678, %680 : vector<2x9x57xf32>
    %682 = arith.addf %668, %681 : vector<2x9x57xf32>
    %c9 = arith.constant 9 : index
    %683 = memref.load %arg3[%c9] : memref<144xf32, #tpu.memory_space<smem>>
    %684 = vector.broadcast %683 : f32 to vector<2x9x57xf32>
    %685 = arith.mulf %678, %684 : vector<2x9x57xf32>
    %686 = arith.addf %672, %685 : vector<2x9x57xf32>
    %c17 = arith.constant 17 : index
    %687 = memref.load %arg3[%c17] : memref<144xf32, #tpu.memory_space<smem>>
    %688 = vector.broadcast %687 : f32 to vector<2x9x57xf32>
    %689 = arith.mulf %678, %688 : vector<2x9x57xf32>
    %690 = arith.addf %676, %689 : vector<2x9x57xf32>
    %c0_715 = arith.constant 0 : index
    %c0_716 = arith.constant 0 : index
    %c1_717 = arith.constant 1 : index
    %c3_718 = arith.constant 3 : index
    %691 = vector.load %arg10[%c0_715, %c0_716, %c1_717, %c3_718] : memref<2x6x10x60xf32, #tpu.memory_space<vmem>>, vector<2x1x9x57xf32>
    %692 = vector.shape_cast %691 : vector<2x1x9x57xf32> to vector<2x9x57xf32>
    %c0_719 = arith.constant 0 : index
    %693 = memref.load %arg3[%c0_719] : memref<144xf32, #tpu.memory_space<smem>>
    %694 = vector.broadcast %693 : f32 to vector<2x9x57xf32>
    %695 = arith.mulf %692, %694 : vector<2x9x57xf32>
    %696 = arith.addf %682, %695 : vector<2x9x57xf32>
    %c8_720 = arith.constant 8 : index
    %697 = memref.load %arg3[%c8_720] : memref<144xf32, #tpu.memory_space<smem>>
    %698 = vector.broadcast %697 : f32 to vector<2x9x57xf32>
    %699 = arith.mulf %692, %698 : vector<2x9x57xf32>
    %700 = arith.addf %686, %699 : vector<2x9x57xf32>
    %c16 = arith.constant 16 : index
    %701 = memref.load %arg3[%c16] : memref<144xf32, #tpu.memory_space<smem>>
    %702 = vector.broadcast %701 : f32 to vector<2x9x57xf32>
    %703 = arith.mulf %692, %702 : vector<2x9x57xf32>
    %704 = arith.addf %690, %703 : vector<2x9x57xf32>
    %c0_721 = arith.constant 0 : index
    %c1_722 = arith.constant 1 : index
    %c0_723 = arith.constant 0 : index
    %c0_724 = arith.constant 0 : index
    %705 = vector.load %arg10[%c0_721, %c1_722, %c0_723, %c0_724] : memref<2x6x10x60xf32, #tpu.memory_space<vmem>>, vector<2x1x9x57xf32>
    %706 = vector.shape_cast %705 : vector<2x1x9x57xf32> to vector<2x9x57xf32>
    %c31 = arith.constant 31 : index
    %707 = memref.load %arg3[%c31] : memref<144xf32, #tpu.memory_space<smem>>
    %708 = vector.broadcast %707 : f32 to vector<2x9x57xf32>
    %709 = arith.mulf %706, %708 : vector<2x9x57xf32>
    %710 = arith.addf %696, %709 : vector<2x9x57xf32>
    %c39 = arith.constant 39 : index
    %711 = memref.load %arg3[%c39] : memref<144xf32, #tpu.memory_space<smem>>
    %712 = vector.broadcast %711 : f32 to vector<2x9x57xf32>
    %713 = arith.mulf %706, %712 : vector<2x9x57xf32>
    %714 = arith.addf %700, %713 : vector<2x9x57xf32>
    %c47 = arith.constant 47 : index
    %715 = memref.load %arg3[%c47] : memref<144xf32, #tpu.memory_space<smem>>
    %716 = vector.broadcast %715 : f32 to vector<2x9x57xf32>
    %717 = arith.mulf %706, %716 : vector<2x9x57xf32>
    %718 = arith.addf %704, %717 : vector<2x9x57xf32>
    %c0_725 = arith.constant 0 : index
    %c1_726 = arith.constant 1 : index
    %c0_727 = arith.constant 0 : index
    %c1_728 = arith.constant 1 : index
    %719 = vector.load %arg10[%c0_725, %c1_726, %c0_727, %c1_728] : memref<2x6x10x60xf32, #tpu.memory_space<vmem>>, vector<2x1x9x57xf32>
    %720 = vector.shape_cast %719 : vector<2x1x9x57xf32> to vector<2x9x57xf32>
    %c30 = arith.constant 30 : index
    %721 = memref.load %arg3[%c30] : memref<144xf32, #tpu.memory_space<smem>>
    %722 = vector.broadcast %721 : f32 to vector<2x9x57xf32>
    %723 = arith.mulf %720, %722 : vector<2x9x57xf32>
    %724 = arith.addf %710, %723 : vector<2x9x57xf32>
    %c38 = arith.constant 38 : index
    %725 = memref.load %arg3[%c38] : memref<144xf32, #tpu.memory_space<smem>>
    %726 = vector.broadcast %725 : f32 to vector<2x9x57xf32>
    %727 = arith.mulf %720, %726 : vector<2x9x57xf32>
    %728 = arith.addf %714, %727 : vector<2x9x57xf32>
    %c46 = arith.constant 46 : index
    %729 = memref.load %arg3[%c46] : memref<144xf32, #tpu.memory_space<smem>>
    %730 = vector.broadcast %729 : f32 to vector<2x9x57xf32>
    %731 = arith.mulf %720, %730 : vector<2x9x57xf32>
    %732 = arith.addf %718, %731 : vector<2x9x57xf32>
    %c0_729 = arith.constant 0 : index
    %c1_730 = arith.constant 1 : index
    %c0_731 = arith.constant 0 : index
    %c2_732 = arith.constant 2 : index
    %733 = vector.load %arg10[%c0_729, %c1_730, %c0_731, %c2_732] : memref<2x6x10x60xf32, #tpu.memory_space<vmem>>, vector<2x1x9x57xf32>
    %734 = vector.shape_cast %733 : vector<2x1x9x57xf32> to vector<2x9x57xf32>
    %c29 = arith.constant 29 : index
    %735 = memref.load %arg3[%c29] : memref<144xf32, #tpu.memory_space<smem>>
    %736 = vector.broadcast %735 : f32 to vector<2x9x57xf32>
    %737 = arith.mulf %734, %736 : vector<2x9x57xf32>
    %738 = arith.addf %724, %737 : vector<2x9x57xf32>
    %c37 = arith.constant 37 : index
    %739 = memref.load %arg3[%c37] : memref<144xf32, #tpu.memory_space<smem>>
    %740 = vector.broadcast %739 : f32 to vector<2x9x57xf32>
    %741 = arith.mulf %734, %740 : vector<2x9x57xf32>
    %742 = arith.addf %728, %741 : vector<2x9x57xf32>
    %c45 = arith.constant 45 : index
    %743 = memref.load %arg3[%c45] : memref<144xf32, #tpu.memory_space<smem>>
    %744 = vector.broadcast %743 : f32 to vector<2x9x57xf32>
    %745 = arith.mulf %734, %744 : vector<2x9x57xf32>
    %746 = arith.addf %732, %745 : vector<2x9x57xf32>
    %c0_733 = arith.constant 0 : index
    %c1_734 = arith.constant 1 : index
    %c0_735 = arith.constant 0 : index
    %c3_736 = arith.constant 3 : index
    %747 = vector.load %arg10[%c0_733, %c1_734, %c0_735, %c3_736] : memref<2x6x10x60xf32, #tpu.memory_space<vmem>>, vector<2x1x9x57xf32>
    %748 = vector.shape_cast %747 : vector<2x1x9x57xf32> to vector<2x9x57xf32>
    %c28 = arith.constant 28 : index
    %749 = memref.load %arg3[%c28] : memref<144xf32, #tpu.memory_space<smem>>
    %750 = vector.broadcast %749 : f32 to vector<2x9x57xf32>
    %751 = arith.mulf %748, %750 : vector<2x9x57xf32>
    %752 = arith.addf %738, %751 : vector<2x9x57xf32>
    %c36 = arith.constant 36 : index
    %753 = memref.load %arg3[%c36] : memref<144xf32, #tpu.memory_space<smem>>
    %754 = vector.broadcast %753 : f32 to vector<2x9x57xf32>
    %755 = arith.mulf %748, %754 : vector<2x9x57xf32>
    %756 = arith.addf %742, %755 : vector<2x9x57xf32>
    %c44 = arith.constant 44 : index
    %757 = memref.load %arg3[%c44] : memref<144xf32, #tpu.memory_space<smem>>
    %758 = vector.broadcast %757 : f32 to vector<2x9x57xf32>
    %759 = arith.mulf %748, %758 : vector<2x9x57xf32>
    %760 = arith.addf %746, %759 : vector<2x9x57xf32>
    %c0_737 = arith.constant 0 : index
    %c1_738 = arith.constant 1 : index
    %c1_739 = arith.constant 1 : index
    %c0_740 = arith.constant 0 : index
    %761 = vector.load %arg10[%c0_737, %c1_738, %c1_739, %c0_740] : memref<2x6x10x60xf32, #tpu.memory_space<vmem>>, vector<2x1x9x57xf32>
    %762 = vector.shape_cast %761 : vector<2x1x9x57xf32> to vector<2x9x57xf32>
    %c27 = arith.constant 27 : index
    %763 = memref.load %arg3[%c27] : memref<144xf32, #tpu.memory_space<smem>>
    %764 = vector.broadcast %763 : f32 to vector<2x9x57xf32>
    %765 = arith.mulf %762, %764 : vector<2x9x57xf32>
    %766 = arith.addf %752, %765 : vector<2x9x57xf32>
    %c35 = arith.constant 35 : index
    %767 = memref.load %arg3[%c35] : memref<144xf32, #tpu.memory_space<smem>>
    %768 = vector.broadcast %767 : f32 to vector<2x9x57xf32>
    %769 = arith.mulf %762, %768 : vector<2x9x57xf32>
    %770 = arith.addf %756, %769 : vector<2x9x57xf32>
    %c43 = arith.constant 43 : index
    %771 = memref.load %arg3[%c43] : memref<144xf32, #tpu.memory_space<smem>>
    %772 = vector.broadcast %771 : f32 to vector<2x9x57xf32>
    %773 = arith.mulf %762, %772 : vector<2x9x57xf32>
    %774 = arith.addf %760, %773 : vector<2x9x57xf32>
    %c0_741 = arith.constant 0 : index
    %c1_742 = arith.constant 1 : index
    %c1_743 = arith.constant 1 : index
    %c1_744 = arith.constant 1 : index
    %775 = vector.load %arg10[%c0_741, %c1_742, %c1_743, %c1_744] : memref<2x6x10x60xf32, #tpu.memory_space<vmem>>, vector<2x1x9x57xf32>
    %776 = vector.shape_cast %775 : vector<2x1x9x57xf32> to vector<2x9x57xf32>
    %c26 = arith.constant 26 : index
    %777 = memref.load %arg3[%c26] : memref<144xf32, #tpu.memory_space<smem>>
    %778 = vector.broadcast %777 : f32 to vector<2x9x57xf32>
    %779 = arith.mulf %776, %778 : vector<2x9x57xf32>
    %780 = arith.addf %766, %779 : vector<2x9x57xf32>
    %c34 = arith.constant 34 : index
    %781 = memref.load %arg3[%c34] : memref<144xf32, #tpu.memory_space<smem>>
    %782 = vector.broadcast %781 : f32 to vector<2x9x57xf32>
    %783 = arith.mulf %776, %782 : vector<2x9x57xf32>
    %784 = arith.addf %770, %783 : vector<2x9x57xf32>
    %c42 = arith.constant 42 : index
    %785 = memref.load %arg3[%c42] : memref<144xf32, #tpu.memory_space<smem>>
    %786 = vector.broadcast %785 : f32 to vector<2x9x57xf32>
    %787 = arith.mulf %776, %786 : vector<2x9x57xf32>
    %788 = arith.addf %774, %787 : vector<2x9x57xf32>
    %c0_745 = arith.constant 0 : index
    %c1_746 = arith.constant 1 : index
    %c1_747 = arith.constant 1 : index
    %c2_748 = arith.constant 2 : index
    %789 = vector.load %arg10[%c0_745, %c1_746, %c1_747, %c2_748] : memref<2x6x10x60xf32, #tpu.memory_space<vmem>>, vector<2x1x9x57xf32>
    %790 = vector.shape_cast %789 : vector<2x1x9x57xf32> to vector<2x9x57xf32>
    %c25 = arith.constant 25 : index
    %791 = memref.load %arg3[%c25] : memref<144xf32, #tpu.memory_space<smem>>
    %792 = vector.broadcast %791 : f32 to vector<2x9x57xf32>
    %793 = arith.mulf %790, %792 : vector<2x9x57xf32>
    %794 = arith.addf %780, %793 : vector<2x9x57xf32>
    %c33 = arith.constant 33 : index
    %795 = memref.load %arg3[%c33] : memref<144xf32, #tpu.memory_space<smem>>
    %796 = vector.broadcast %795 : f32 to vector<2x9x57xf32>
    %797 = arith.mulf %790, %796 : vector<2x9x57xf32>
    %798 = arith.addf %784, %797 : vector<2x9x57xf32>
    %c41 = arith.constant 41 : index
    %799 = memref.load %arg3[%c41] : memref<144xf32, #tpu.memory_space<smem>>
    %800 = vector.broadcast %799 : f32 to vector<2x9x57xf32>
    %801 = arith.mulf %790, %800 : vector<2x9x57xf32>
    %802 = arith.addf %788, %801 : vector<2x9x57xf32>
    %c0_749 = arith.constant 0 : index
    %c1_750 = arith.constant 1 : index
    %c1_751 = arith.constant 1 : index
    %c3_752 = arith.constant 3 : index
    %803 = vector.load %arg10[%c0_749, %c1_750, %c1_751, %c3_752] : memref<2x6x10x60xf32, #tpu.memory_space<vmem>>, vector<2x1x9x57xf32>
    %804 = vector.shape_cast %803 : vector<2x1x9x57xf32> to vector<2x9x57xf32>
    %c24 = arith.constant 24 : index
    %805 = memref.load %arg3[%c24] : memref<144xf32, #tpu.memory_space<smem>>
    %806 = vector.broadcast %805 : f32 to vector<2x9x57xf32>
    %807 = arith.mulf %804, %806 : vector<2x9x57xf32>
    %808 = arith.addf %794, %807 : vector<2x9x57xf32>
    %c32 = arith.constant 32 : index
    %809 = memref.load %arg3[%c32] : memref<144xf32, #tpu.memory_space<smem>>
    %810 = vector.broadcast %809 : f32 to vector<2x9x57xf32>
    %811 = arith.mulf %804, %810 : vector<2x9x57xf32>
    %812 = arith.addf %798, %811 : vector<2x9x57xf32>
    %c40 = arith.constant 40 : index
    %813 = memref.load %arg3[%c40] : memref<144xf32, #tpu.memory_space<smem>>
    %814 = vector.broadcast %813 : f32 to vector<2x9x57xf32>
    %815 = arith.mulf %804, %814 : vector<2x9x57xf32>
    %816 = arith.addf %802, %815 : vector<2x9x57xf32>
    %c0_753 = arith.constant 0 : index
    %c2_754 = arith.constant 2 : index
    %c0_755 = arith.constant 0 : index
    %c0_756 = arith.constant 0 : index
    %817 = vector.load %arg10[%c0_753, %c2_754, %c0_755, %c0_756] : memref<2x6x10x60xf32, #tpu.memory_space<vmem>>, vector<2x1x9x57xf32>
    %818 = vector.shape_cast %817 : vector<2x1x9x57xf32> to vector<2x9x57xf32>
    %c55 = arith.constant 55 : index
    %819 = memref.load %arg3[%c55] : memref<144xf32, #tpu.memory_space<smem>>
    %820 = vector.broadcast %819 : f32 to vector<2x9x57xf32>
    %821 = arith.mulf %818, %820 : vector<2x9x57xf32>
    %822 = arith.addf %808, %821 : vector<2x9x57xf32>
    %c63 = arith.constant 63 : index
    %823 = memref.load %arg3[%c63] : memref<144xf32, #tpu.memory_space<smem>>
    %824 = vector.broadcast %823 : f32 to vector<2x9x57xf32>
    %825 = arith.mulf %818, %824 : vector<2x9x57xf32>
    %826 = arith.addf %812, %825 : vector<2x9x57xf32>
    %c71 = arith.constant 71 : index
    %827 = memref.load %arg3[%c71] : memref<144xf32, #tpu.memory_space<smem>>
    %828 = vector.broadcast %827 : f32 to vector<2x9x57xf32>
    %829 = arith.mulf %818, %828 : vector<2x9x57xf32>
    %830 = arith.addf %816, %829 : vector<2x9x57xf32>
    %c0_757 = arith.constant 0 : index
    %c2_758 = arith.constant 2 : index
    %c0_759 = arith.constant 0 : index
    %c1_760 = arith.constant 1 : index
    %831 = vector.load %arg10[%c0_757, %c2_758, %c0_759, %c1_760] : memref<2x6x10x60xf32, #tpu.memory_space<vmem>>, vector<2x1x9x57xf32>
    %832 = vector.shape_cast %831 : vector<2x1x9x57xf32> to vector<2x9x57xf32>
    %c54 = arith.constant 54 : index
    %833 = memref.load %arg3[%c54] : memref<144xf32, #tpu.memory_space<smem>>
    %834 = vector.broadcast %833 : f32 to vector<2x9x57xf32>
    %835 = arith.mulf %832, %834 : vector<2x9x57xf32>
    %836 = arith.addf %822, %835 : vector<2x9x57xf32>
    %c62 = arith.constant 62 : index
    %837 = memref.load %arg3[%c62] : memref<144xf32, #tpu.memory_space<smem>>
    %838 = vector.broadcast %837 : f32 to vector<2x9x57xf32>
    %839 = arith.mulf %832, %838 : vector<2x9x57xf32>
    %840 = arith.addf %826, %839 : vector<2x9x57xf32>
    %c70 = arith.constant 70 : index
    %841 = memref.load %arg3[%c70] : memref<144xf32, #tpu.memory_space<smem>>
    %842 = vector.broadcast %841 : f32 to vector<2x9x57xf32>
    %843 = arith.mulf %832, %842 : vector<2x9x57xf32>
    %844 = arith.addf %830, %843 : vector<2x9x57xf32>
    %c0_761 = arith.constant 0 : index
    %c2_762 = arith.constant 2 : index
    %c0_763 = arith.constant 0 : index
    %c2_764 = arith.constant 2 : index
    %845 = vector.load %arg10[%c0_761, %c2_762, %c0_763, %c2_764] : memref<2x6x10x60xf32, #tpu.memory_space<vmem>>, vector<2x1x9x57xf32>
    %846 = vector.shape_cast %845 : vector<2x1x9x57xf32> to vector<2x9x57xf32>
    %c53 = arith.constant 53 : index
    %847 = memref.load %arg3[%c53] : memref<144xf32, #tpu.memory_space<smem>>
    %848 = vector.broadcast %847 : f32 to vector<2x9x57xf32>
    %849 = arith.mulf %846, %848 : vector<2x9x57xf32>
    %850 = arith.addf %836, %849 : vector<2x9x57xf32>
    %c61 = arith.constant 61 : index
    %851 = memref.load %arg3[%c61] : memref<144xf32, #tpu.memory_space<smem>>
    %852 = vector.broadcast %851 : f32 to vector<2x9x57xf32>
    %853 = arith.mulf %846, %852 : vector<2x9x57xf32>
    %854 = arith.addf %840, %853 : vector<2x9x57xf32>
    %c69 = arith.constant 69 : index
    %855 = memref.load %arg3[%c69] : memref<144xf32, #tpu.memory_space<smem>>
    %856 = vector.broadcast %855 : f32 to vector<2x9x57xf32>
    %857 = arith.mulf %846, %856 : vector<2x9x57xf32>
    %858 = arith.addf %844, %857 : vector<2x9x57xf32>
    %c0_765 = arith.constant 0 : index
    %c2_766 = arith.constant 2 : index
    %c0_767 = arith.constant 0 : index
    %c3_768 = arith.constant 3 : index
    %859 = vector.load %arg10[%c0_765, %c2_766, %c0_767, %c3_768] : memref<2x6x10x60xf32, #tpu.memory_space<vmem>>, vector<2x1x9x57xf32>
    %860 = vector.shape_cast %859 : vector<2x1x9x57xf32> to vector<2x9x57xf32>
    %c52 = arith.constant 52 : index
    %861 = memref.load %arg3[%c52] : memref<144xf32, #tpu.memory_space<smem>>
    %862 = vector.broadcast %861 : f32 to vector<2x9x57xf32>
    %863 = arith.mulf %860, %862 : vector<2x9x57xf32>
    %864 = arith.addf %850, %863 : vector<2x9x57xf32>
    %c60 = arith.constant 60 : index
    %865 = memref.load %arg3[%c60] : memref<144xf32, #tpu.memory_space<smem>>
    %866 = vector.broadcast %865 : f32 to vector<2x9x57xf32>
    %867 = arith.mulf %860, %866 : vector<2x9x57xf32>
    %868 = arith.addf %854, %867 : vector<2x9x57xf32>
    %c68 = arith.constant 68 : index
    %869 = memref.load %arg3[%c68] : memref<144xf32, #tpu.memory_space<smem>>
    %870 = vector.broadcast %869 : f32 to vector<2x9x57xf32>
    %871 = arith.mulf %860, %870 : vector<2x9x57xf32>
    %872 = arith.addf %858, %871 : vector<2x9x57xf32>
    %c0_769 = arith.constant 0 : index
    %c2_770 = arith.constant 2 : index
    %c1_771 = arith.constant 1 : index
    %c0_772 = arith.constant 0 : index
    %873 = vector.load %arg10[%c0_769, %c2_770, %c1_771, %c0_772] : memref<2x6x10x60xf32, #tpu.memory_space<vmem>>, vector<2x1x9x57xf32>
    %874 = vector.shape_cast %873 : vector<2x1x9x57xf32> to vector<2x9x57xf32>
    %c51 = arith.constant 51 : index
    %875 = memref.load %arg3[%c51] : memref<144xf32, #tpu.memory_space<smem>>
    %876 = vector.broadcast %875 : f32 to vector<2x9x57xf32>
    %877 = arith.mulf %874, %876 : vector<2x9x57xf32>
    %878 = arith.addf %864, %877 : vector<2x9x57xf32>
    %c59 = arith.constant 59 : index
    %879 = memref.load %arg3[%c59] : memref<144xf32, #tpu.memory_space<smem>>
    %880 = vector.broadcast %879 : f32 to vector<2x9x57xf32>
    %881 = arith.mulf %874, %880 : vector<2x9x57xf32>
    %882 = arith.addf %868, %881 : vector<2x9x57xf32>
    %c67 = arith.constant 67 : index
    %883 = memref.load %arg3[%c67] : memref<144xf32, #tpu.memory_space<smem>>
    %884 = vector.broadcast %883 : f32 to vector<2x9x57xf32>
    %885 = arith.mulf %874, %884 : vector<2x9x57xf32>
    %886 = arith.addf %872, %885 : vector<2x9x57xf32>
    %c0_773 = arith.constant 0 : index
    %c2_774 = arith.constant 2 : index
    %c1_775 = arith.constant 1 : index
    %c1_776 = arith.constant 1 : index
    %887 = vector.load %arg10[%c0_773, %c2_774, %c1_775, %c1_776] : memref<2x6x10x60xf32, #tpu.memory_space<vmem>>, vector<2x1x9x57xf32>
    %888 = vector.shape_cast %887 : vector<2x1x9x57xf32> to vector<2x9x57xf32>
    %c50 = arith.constant 50 : index
    %889 = memref.load %arg3[%c50] : memref<144xf32, #tpu.memory_space<smem>>
    %890 = vector.broadcast %889 : f32 to vector<2x9x57xf32>
    %891 = arith.mulf %888, %890 : vector<2x9x57xf32>
    %892 = arith.addf %878, %891 : vector<2x9x57xf32>
    %c58 = arith.constant 58 : index
    %893 = memref.load %arg3[%c58] : memref<144xf32, #tpu.memory_space<smem>>
    %894 = vector.broadcast %893 : f32 to vector<2x9x57xf32>
    %895 = arith.mulf %888, %894 : vector<2x9x57xf32>
    %896 = arith.addf %882, %895 : vector<2x9x57xf32>
    %c66 = arith.constant 66 : index
    %897 = memref.load %arg3[%c66] : memref<144xf32, #tpu.memory_space<smem>>
    %898 = vector.broadcast %897 : f32 to vector<2x9x57xf32>
    %899 = arith.mulf %888, %898 : vector<2x9x57xf32>
    %900 = arith.addf %886, %899 : vector<2x9x57xf32>
    %c0_777 = arith.constant 0 : index
    %c2_778 = arith.constant 2 : index
    %c1_779 = arith.constant 1 : index
    %c2_780 = arith.constant 2 : index
    %901 = vector.load %arg10[%c0_777, %c2_778, %c1_779, %c2_780] : memref<2x6x10x60xf32, #tpu.memory_space<vmem>>, vector<2x1x9x57xf32>
    %902 = vector.shape_cast %901 : vector<2x1x9x57xf32> to vector<2x9x57xf32>
    %c49 = arith.constant 49 : index
    %903 = memref.load %arg3[%c49] : memref<144xf32, #tpu.memory_space<smem>>
    %904 = vector.broadcast %903 : f32 to vector<2x9x57xf32>
    %905 = arith.mulf %902, %904 : vector<2x9x57xf32>
    %906 = arith.addf %892, %905 : vector<2x9x57xf32>
    %c57 = arith.constant 57 : index
    %907 = memref.load %arg3[%c57] : memref<144xf32, #tpu.memory_space<smem>>
    %908 = vector.broadcast %907 : f32 to vector<2x9x57xf32>
    %909 = arith.mulf %902, %908 : vector<2x9x57xf32>
    %910 = arith.addf %896, %909 : vector<2x9x57xf32>
    %c65 = arith.constant 65 : index
    %911 = memref.load %arg3[%c65] : memref<144xf32, #tpu.memory_space<smem>>
    %912 = vector.broadcast %911 : f32 to vector<2x9x57xf32>
    %913 = arith.mulf %902, %912 : vector<2x9x57xf32>
    %914 = arith.addf %900, %913 : vector<2x9x57xf32>
    %c0_781 = arith.constant 0 : index
    %c2_782 = arith.constant 2 : index
    %c1_783 = arith.constant 1 : index
    %c3_784 = arith.constant 3 : index
    %915 = vector.load %arg10[%c0_781, %c2_782, %c1_783, %c3_784] : memref<2x6x10x60xf32, #tpu.memory_space<vmem>>, vector<2x1x9x57xf32>
    %916 = vector.shape_cast %915 : vector<2x1x9x57xf32> to vector<2x9x57xf32>
    %c48 = arith.constant 48 : index
    %917 = memref.load %arg3[%c48] : memref<144xf32, #tpu.memory_space<smem>>
    %918 = vector.broadcast %917 : f32 to vector<2x9x57xf32>
    %919 = arith.mulf %916, %918 : vector<2x9x57xf32>
    %920 = arith.addf %906, %919 : vector<2x9x57xf32>
    %c56 = arith.constant 56 : index
    %921 = memref.load %arg3[%c56] : memref<144xf32, #tpu.memory_space<smem>>
    %922 = vector.broadcast %921 : f32 to vector<2x9x57xf32>
    %923 = arith.mulf %916, %922 : vector<2x9x57xf32>
    %924 = arith.addf %910, %923 : vector<2x9x57xf32>
    %c64 = arith.constant 64 : index
    %925 = memref.load %arg3[%c64] : memref<144xf32, #tpu.memory_space<smem>>
    %926 = vector.broadcast %925 : f32 to vector<2x9x57xf32>
    %927 = arith.mulf %916, %926 : vector<2x9x57xf32>
    %928 = arith.addf %914, %927 : vector<2x9x57xf32>
    %c0_785 = arith.constant 0 : index
    %c3_786 = arith.constant 3 : index
    %c0_787 = arith.constant 0 : index
    %c0_788 = arith.constant 0 : index
    %929 = vector.load %arg10[%c0_785, %c3_786, %c0_787, %c0_788] : memref<2x6x10x60xf32, #tpu.memory_space<vmem>>, vector<2x1x9x57xf32>
    %930 = vector.shape_cast %929 : vector<2x1x9x57xf32> to vector<2x9x57xf32>
    %c79 = arith.constant 79 : index
    %931 = memref.load %arg3[%c79] : memref<144xf32, #tpu.memory_space<smem>>
    %932 = vector.broadcast %931 : f32 to vector<2x9x57xf32>
    %933 = arith.mulf %930, %932 : vector<2x9x57xf32>
    %934 = arith.addf %920, %933 : vector<2x9x57xf32>
    %c87 = arith.constant 87 : index
    %935 = memref.load %arg3[%c87] : memref<144xf32, #tpu.memory_space<smem>>
    %936 = vector.broadcast %935 : f32 to vector<2x9x57xf32>
    %937 = arith.mulf %930, %936 : vector<2x9x57xf32>
    %938 = arith.addf %924, %937 : vector<2x9x57xf32>
    %c95 = arith.constant 95 : index
    %939 = memref.load %arg3[%c95] : memref<144xf32, #tpu.memory_space<smem>>
    %940 = vector.broadcast %939 : f32 to vector<2x9x57xf32>
    %941 = arith.mulf %930, %940 : vector<2x9x57xf32>
    %942 = arith.addf %928, %941 : vector<2x9x57xf32>
    %c0_789 = arith.constant 0 : index
    %c3_790 = arith.constant 3 : index
    %c0_791 = arith.constant 0 : index
    %c1_792 = arith.constant 1 : index
    %943 = vector.load %arg10[%c0_789, %c3_790, %c0_791, %c1_792] : memref<2x6x10x60xf32, #tpu.memory_space<vmem>>, vector<2x1x9x57xf32>
    %944 = vector.shape_cast %943 : vector<2x1x9x57xf32> to vector<2x9x57xf32>
    %c78 = arith.constant 78 : index
    %945 = memref.load %arg3[%c78] : memref<144xf32, #tpu.memory_space<smem>>
    %946 = vector.broadcast %945 : f32 to vector<2x9x57xf32>
    %947 = arith.mulf %944, %946 : vector<2x9x57xf32>
    %948 = arith.addf %934, %947 : vector<2x9x57xf32>
    %c86 = arith.constant 86 : index
    %949 = memref.load %arg3[%c86] : memref<144xf32, #tpu.memory_space<smem>>
    %950 = vector.broadcast %949 : f32 to vector<2x9x57xf32>
    %951 = arith.mulf %944, %950 : vector<2x9x57xf32>
    %952 = arith.addf %938, %951 : vector<2x9x57xf32>
    %c94 = arith.constant 94 : index
    %953 = memref.load %arg3[%c94] : memref<144xf32, #tpu.memory_space<smem>>
    %954 = vector.broadcast %953 : f32 to vector<2x9x57xf32>
    %955 = arith.mulf %944, %954 : vector<2x9x57xf32>
    %956 = arith.addf %942, %955 : vector<2x9x57xf32>
    %c0_793 = arith.constant 0 : index
    %c3_794 = arith.constant 3 : index
    %c0_795 = arith.constant 0 : index
    %c2_796 = arith.constant 2 : index
    %957 = vector.load %arg10[%c0_793, %c3_794, %c0_795, %c2_796] : memref<2x6x10x60xf32, #tpu.memory_space<vmem>>, vector<2x1x9x57xf32>
    %958 = vector.shape_cast %957 : vector<2x1x9x57xf32> to vector<2x9x57xf32>
    %c77 = arith.constant 77 : index
    %959 = memref.load %arg3[%c77] : memref<144xf32, #tpu.memory_space<smem>>
    %960 = vector.broadcast %959 : f32 to vector<2x9x57xf32>
    %961 = arith.mulf %958, %960 : vector<2x9x57xf32>
    %962 = arith.addf %948, %961 : vector<2x9x57xf32>
    %c85 = arith.constant 85 : index
    %963 = memref.load %arg3[%c85] : memref<144xf32, #tpu.memory_space<smem>>
    %964 = vector.broadcast %963 : f32 to vector<2x9x57xf32>
    %965 = arith.mulf %958, %964 : vector<2x9x57xf32>
    %966 = arith.addf %952, %965 : vector<2x9x57xf32>
    %c93 = arith.constant 93 : index
    %967 = memref.load %arg3[%c93] : memref<144xf32, #tpu.memory_space<smem>>
    %968 = vector.broadcast %967 : f32 to vector<2x9x57xf32>
    %969 = arith.mulf %958, %968 : vector<2x9x57xf32>
    %970 = arith.addf %956, %969 : vector<2x9x57xf32>
    %c0_797 = arith.constant 0 : index
    %c3_798 = arith.constant 3 : index
    %c0_799 = arith.constant 0 : index
    %c3_800 = arith.constant 3 : index
    %971 = vector.load %arg10[%c0_797, %c3_798, %c0_799, %c3_800] : memref<2x6x10x60xf32, #tpu.memory_space<vmem>>, vector<2x1x9x57xf32>
    %972 = vector.shape_cast %971 : vector<2x1x9x57xf32> to vector<2x9x57xf32>
    %c76 = arith.constant 76 : index
    %973 = memref.load %arg3[%c76] : memref<144xf32, #tpu.memory_space<smem>>
    %974 = vector.broadcast %973 : f32 to vector<2x9x57xf32>
    %975 = arith.mulf %972, %974 : vector<2x9x57xf32>
    %976 = arith.addf %962, %975 : vector<2x9x57xf32>
    %c84 = arith.constant 84 : index
    %977 = memref.load %arg3[%c84] : memref<144xf32, #tpu.memory_space<smem>>
    %978 = vector.broadcast %977 : f32 to vector<2x9x57xf32>
    %979 = arith.mulf %972, %978 : vector<2x9x57xf32>
    %980 = arith.addf %966, %979 : vector<2x9x57xf32>
    %c92 = arith.constant 92 : index
    %981 = memref.load %arg3[%c92] : memref<144xf32, #tpu.memory_space<smem>>
    %982 = vector.broadcast %981 : f32 to vector<2x9x57xf32>
    %983 = arith.mulf %972, %982 : vector<2x9x57xf32>
    %984 = arith.addf %970, %983 : vector<2x9x57xf32>
    %c0_801 = arith.constant 0 : index
    %c3_802 = arith.constant 3 : index
    %c1_803 = arith.constant 1 : index
    %c0_804 = arith.constant 0 : index
    %985 = vector.load %arg10[%c0_801, %c3_802, %c1_803, %c0_804] : memref<2x6x10x60xf32, #tpu.memory_space<vmem>>, vector<2x1x9x57xf32>
    %986 = vector.shape_cast %985 : vector<2x1x9x57xf32> to vector<2x9x57xf32>
    %c75 = arith.constant 75 : index
    %987 = memref.load %arg3[%c75] : memref<144xf32, #tpu.memory_space<smem>>
    %988 = vector.broadcast %987 : f32 to vector<2x9x57xf32>
    %989 = arith.mulf %986, %988 : vector<2x9x57xf32>
    %990 = arith.addf %976, %989 : vector<2x9x57xf32>
    %c83 = arith.constant 83 : index
    %991 = memref.load %arg3[%c83] : memref<144xf32, #tpu.memory_space<smem>>
    %992 = vector.broadcast %991 : f32 to vector<2x9x57xf32>
    %993 = arith.mulf %986, %992 : vector<2x9x57xf32>
    %994 = arith.addf %980, %993 : vector<2x9x57xf32>
    %c91 = arith.constant 91 : index
    %995 = memref.load %arg3[%c91] : memref<144xf32, #tpu.memory_space<smem>>
    %996 = vector.broadcast %995 : f32 to vector<2x9x57xf32>
    %997 = arith.mulf %986, %996 : vector<2x9x57xf32>
    %998 = arith.addf %984, %997 : vector<2x9x57xf32>
    %c0_805 = arith.constant 0 : index
    %c3_806 = arith.constant 3 : index
    %c1_807 = arith.constant 1 : index
    %c1_808 = arith.constant 1 : index
    %999 = vector.load %arg10[%c0_805, %c3_806, %c1_807, %c1_808] : memref<2x6x10x60xf32, #tpu.memory_space<vmem>>, vector<2x1x9x57xf32>
    %1000 = vector.shape_cast %999 : vector<2x1x9x57xf32> to vector<2x9x57xf32>
    %c74 = arith.constant 74 : index
    %1001 = memref.load %arg3[%c74] : memref<144xf32, #tpu.memory_space<smem>>
    %1002 = vector.broadcast %1001 : f32 to vector<2x9x57xf32>
    %1003 = arith.mulf %1000, %1002 : vector<2x9x57xf32>
    %1004 = arith.addf %990, %1003 : vector<2x9x57xf32>
    %c82 = arith.constant 82 : index
    %1005 = memref.load %arg3[%c82] : memref<144xf32, #tpu.memory_space<smem>>
    %1006 = vector.broadcast %1005 : f32 to vector<2x9x57xf32>
    %1007 = arith.mulf %1000, %1006 : vector<2x9x57xf32>
    %1008 = arith.addf %994, %1007 : vector<2x9x57xf32>
    %c90 = arith.constant 90 : index
    %1009 = memref.load %arg3[%c90] : memref<144xf32, #tpu.memory_space<smem>>
    %1010 = vector.broadcast %1009 : f32 to vector<2x9x57xf32>
    %1011 = arith.mulf %1000, %1010 : vector<2x9x57xf32>
    %1012 = arith.addf %998, %1011 : vector<2x9x57xf32>
    %c0_809 = arith.constant 0 : index
    %c3_810 = arith.constant 3 : index
    %c1_811 = arith.constant 1 : index
    %c2_812 = arith.constant 2 : index
    %1013 = vector.load %arg10[%c0_809, %c3_810, %c1_811, %c2_812] : memref<2x6x10x60xf32, #tpu.memory_space<vmem>>, vector<2x1x9x57xf32>
    %1014 = vector.shape_cast %1013 : vector<2x1x9x57xf32> to vector<2x9x57xf32>
    %c73 = arith.constant 73 : index
    %1015 = memref.load %arg3[%c73] : memref<144xf32, #tpu.memory_space<smem>>
    %1016 = vector.broadcast %1015 : f32 to vector<2x9x57xf32>
    %1017 = arith.mulf %1014, %1016 : vector<2x9x57xf32>
    %1018 = arith.addf %1004, %1017 : vector<2x9x57xf32>
    %c81 = arith.constant 81 : index
    %1019 = memref.load %arg3[%c81] : memref<144xf32, #tpu.memory_space<smem>>
    %1020 = vector.broadcast %1019 : f32 to vector<2x9x57xf32>
    %1021 = arith.mulf %1014, %1020 : vector<2x9x57xf32>
    %1022 = arith.addf %1008, %1021 : vector<2x9x57xf32>
    %c89 = arith.constant 89 : index
    %1023 = memref.load %arg3[%c89] : memref<144xf32, #tpu.memory_space<smem>>
    %1024 = vector.broadcast %1023 : f32 to vector<2x9x57xf32>
    %1025 = arith.mulf %1014, %1024 : vector<2x9x57xf32>
    %1026 = arith.addf %1012, %1025 : vector<2x9x57xf32>
    %c0_813 = arith.constant 0 : index
    %c3_814 = arith.constant 3 : index
    %c1_815 = arith.constant 1 : index
    %c3_816 = arith.constant 3 : index
    %1027 = vector.load %arg10[%c0_813, %c3_814, %c1_815, %c3_816] : memref<2x6x10x60xf32, #tpu.memory_space<vmem>>, vector<2x1x9x57xf32>
    %1028 = vector.shape_cast %1027 : vector<2x1x9x57xf32> to vector<2x9x57xf32>
    %c72 = arith.constant 72 : index
    %1029 = memref.load %arg3[%c72] : memref<144xf32, #tpu.memory_space<smem>>
    %1030 = vector.broadcast %1029 : f32 to vector<2x9x57xf32>
    %1031 = arith.mulf %1028, %1030 : vector<2x9x57xf32>
    %1032 = arith.addf %1018, %1031 : vector<2x9x57xf32>
    %c80 = arith.constant 80 : index
    %1033 = memref.load %arg3[%c80] : memref<144xf32, #tpu.memory_space<smem>>
    %1034 = vector.broadcast %1033 : f32 to vector<2x9x57xf32>
    %1035 = arith.mulf %1028, %1034 : vector<2x9x57xf32>
    %1036 = arith.addf %1022, %1035 : vector<2x9x57xf32>
    %c88 = arith.constant 88 : index
    %1037 = memref.load %arg3[%c88] : memref<144xf32, #tpu.memory_space<smem>>
    %1038 = vector.broadcast %1037 : f32 to vector<2x9x57xf32>
    %1039 = arith.mulf %1028, %1038 : vector<2x9x57xf32>
    %1040 = arith.addf %1026, %1039 : vector<2x9x57xf32>
    %c0_817 = arith.constant 0 : index
    %c4_818 = arith.constant 4 : index
    %c0_819 = arith.constant 0 : index
    %c0_820 = arith.constant 0 : index
    %1041 = vector.load %arg10[%c0_817, %c4_818, %c0_819, %c0_820] : memref<2x6x10x60xf32, #tpu.memory_space<vmem>>, vector<2x1x9x57xf32>
    %1042 = vector.shape_cast %1041 : vector<2x1x9x57xf32> to vector<2x9x57xf32>
    %c103 = arith.constant 103 : index
    %1043 = memref.load %arg3[%c103] : memref<144xf32, #tpu.memory_space<smem>>
    %1044 = vector.broadcast %1043 : f32 to vector<2x9x57xf32>
    %1045 = arith.mulf %1042, %1044 : vector<2x9x57xf32>
    %1046 = arith.addf %1032, %1045 : vector<2x9x57xf32>
    %c111 = arith.constant 111 : index
    %1047 = memref.load %arg3[%c111] : memref<144xf32, #tpu.memory_space<smem>>
    %1048 = vector.broadcast %1047 : f32 to vector<2x9x57xf32>
    %1049 = arith.mulf %1042, %1048 : vector<2x9x57xf32>
    %1050 = arith.addf %1036, %1049 : vector<2x9x57xf32>
    %c119 = arith.constant 119 : index
    %1051 = memref.load %arg3[%c119] : memref<144xf32, #tpu.memory_space<smem>>
    %1052 = vector.broadcast %1051 : f32 to vector<2x9x57xf32>
    %1053 = arith.mulf %1042, %1052 : vector<2x9x57xf32>
    %1054 = arith.addf %1040, %1053 : vector<2x9x57xf32>
    %c0_821 = arith.constant 0 : index
    %c4_822 = arith.constant 4 : index
    %c0_823 = arith.constant 0 : index
    %c1_824 = arith.constant 1 : index
    %1055 = vector.load %arg10[%c0_821, %c4_822, %c0_823, %c1_824] : memref<2x6x10x60xf32, #tpu.memory_space<vmem>>, vector<2x1x9x57xf32>
    %1056 = vector.shape_cast %1055 : vector<2x1x9x57xf32> to vector<2x9x57xf32>
    %c102 = arith.constant 102 : index
    %1057 = memref.load %arg3[%c102] : memref<144xf32, #tpu.memory_space<smem>>
    %1058 = vector.broadcast %1057 : f32 to vector<2x9x57xf32>
    %1059 = arith.mulf %1056, %1058 : vector<2x9x57xf32>
    %1060 = arith.addf %1046, %1059 : vector<2x9x57xf32>
    %c110 = arith.constant 110 : index
    %1061 = memref.load %arg3[%c110] : memref<144xf32, #tpu.memory_space<smem>>
    %1062 = vector.broadcast %1061 : f32 to vector<2x9x57xf32>
    %1063 = arith.mulf %1056, %1062 : vector<2x9x57xf32>
    %1064 = arith.addf %1050, %1063 : vector<2x9x57xf32>
    %c118 = arith.constant 118 : index
    %1065 = memref.load %arg3[%c118] : memref<144xf32, #tpu.memory_space<smem>>
    %1066 = vector.broadcast %1065 : f32 to vector<2x9x57xf32>
    %1067 = arith.mulf %1056, %1066 : vector<2x9x57xf32>
    %1068 = arith.addf %1054, %1067 : vector<2x9x57xf32>
    %c0_825 = arith.constant 0 : index
    %c4_826 = arith.constant 4 : index
    %c0_827 = arith.constant 0 : index
    %c2_828 = arith.constant 2 : index
    %1069 = vector.load %arg10[%c0_825, %c4_826, %c0_827, %c2_828] : memref<2x6x10x60xf32, #tpu.memory_space<vmem>>, vector<2x1x9x57xf32>
    %1070 = vector.shape_cast %1069 : vector<2x1x9x57xf32> to vector<2x9x57xf32>
    %c101 = arith.constant 101 : index
    %1071 = memref.load %arg3[%c101] : memref<144xf32, #tpu.memory_space<smem>>
    %1072 = vector.broadcast %1071 : f32 to vector<2x9x57xf32>
    %1073 = arith.mulf %1070, %1072 : vector<2x9x57xf32>
    %1074 = arith.addf %1060, %1073 : vector<2x9x57xf32>
    %c109 = arith.constant 109 : index
    %1075 = memref.load %arg3[%c109] : memref<144xf32, #tpu.memory_space<smem>>
    %1076 = vector.broadcast %1075 : f32 to vector<2x9x57xf32>
    %1077 = arith.mulf %1070, %1076 : vector<2x9x57xf32>
    %1078 = arith.addf %1064, %1077 : vector<2x9x57xf32>
    %c117 = arith.constant 117 : index
    %1079 = memref.load %arg3[%c117] : memref<144xf32, #tpu.memory_space<smem>>
    %1080 = vector.broadcast %1079 : f32 to vector<2x9x57xf32>
    %1081 = arith.mulf %1070, %1080 : vector<2x9x57xf32>
    %1082 = arith.addf %1068, %1081 : vector<2x9x57xf32>
    %c0_829 = arith.constant 0 : index
    %c4_830 = arith.constant 4 : index
    %c0_831 = arith.constant 0 : index
    %c3_832 = arith.constant 3 : index
    %1083 = vector.load %arg10[%c0_829, %c4_830, %c0_831, %c3_832] : memref<2x6x10x60xf32, #tpu.memory_space<vmem>>, vector<2x1x9x57xf32>
    %1084 = vector.shape_cast %1083 : vector<2x1x9x57xf32> to vector<2x9x57xf32>
    %c100 = arith.constant 100 : index
    %1085 = memref.load %arg3[%c100] : memref<144xf32, #tpu.memory_space<smem>>
    %1086 = vector.broadcast %1085 : f32 to vector<2x9x57xf32>
    %1087 = arith.mulf %1084, %1086 : vector<2x9x57xf32>
    %1088 = arith.addf %1074, %1087 : vector<2x9x57xf32>
    %c108 = arith.constant 108 : index
    %1089 = memref.load %arg3[%c108] : memref<144xf32, #tpu.memory_space<smem>>
    %1090 = vector.broadcast %1089 : f32 to vector<2x9x57xf32>
    %1091 = arith.mulf %1084, %1090 : vector<2x9x57xf32>
    %1092 = arith.addf %1078, %1091 : vector<2x9x57xf32>
    %c116 = arith.constant 116 : index
    %1093 = memref.load %arg3[%c116] : memref<144xf32, #tpu.memory_space<smem>>
    %1094 = vector.broadcast %1093 : f32 to vector<2x9x57xf32>
    %1095 = arith.mulf %1084, %1094 : vector<2x9x57xf32>
    %1096 = arith.addf %1082, %1095 : vector<2x9x57xf32>
    %c0_833 = arith.constant 0 : index
    %c4_834 = arith.constant 4 : index
    %c1_835 = arith.constant 1 : index
    %c0_836 = arith.constant 0 : index
    %1097 = vector.load %arg10[%c0_833, %c4_834, %c1_835, %c0_836] : memref<2x6x10x60xf32, #tpu.memory_space<vmem>>, vector<2x1x9x57xf32>
    %1098 = vector.shape_cast %1097 : vector<2x1x9x57xf32> to vector<2x9x57xf32>
    %c99 = arith.constant 99 : index
    %1099 = memref.load %arg3[%c99] : memref<144xf32, #tpu.memory_space<smem>>
    %1100 = vector.broadcast %1099 : f32 to vector<2x9x57xf32>
    %1101 = arith.mulf %1098, %1100 : vector<2x9x57xf32>
    %1102 = arith.addf %1088, %1101 : vector<2x9x57xf32>
    %c107 = arith.constant 107 : index
    %1103 = memref.load %arg3[%c107] : memref<144xf32, #tpu.memory_space<smem>>
    %1104 = vector.broadcast %1103 : f32 to vector<2x9x57xf32>
    %1105 = arith.mulf %1098, %1104 : vector<2x9x57xf32>
    %1106 = arith.addf %1092, %1105 : vector<2x9x57xf32>
    %c115 = arith.constant 115 : index
    %1107 = memref.load %arg3[%c115] : memref<144xf32, #tpu.memory_space<smem>>
    %1108 = vector.broadcast %1107 : f32 to vector<2x9x57xf32>
    %1109 = arith.mulf %1098, %1108 : vector<2x9x57xf32>
    %1110 = arith.addf %1096, %1109 : vector<2x9x57xf32>
    %c0_837 = arith.constant 0 : index
    %c4_838 = arith.constant 4 : index
    %c1_839 = arith.constant 1 : index
    %c1_840 = arith.constant 1 : index
    %1111 = vector.load %arg10[%c0_837, %c4_838, %c1_839, %c1_840] : memref<2x6x10x60xf32, #tpu.memory_space<vmem>>, vector<2x1x9x57xf32>
    %1112 = vector.shape_cast %1111 : vector<2x1x9x57xf32> to vector<2x9x57xf32>
    %c98 = arith.constant 98 : index
    %1113 = memref.load %arg3[%c98] : memref<144xf32, #tpu.memory_space<smem>>
    %1114 = vector.broadcast %1113 : f32 to vector<2x9x57xf32>
    %1115 = arith.mulf %1112, %1114 : vector<2x9x57xf32>
    %1116 = arith.addf %1102, %1115 : vector<2x9x57xf32>
    %c106 = arith.constant 106 : index
    %1117 = memref.load %arg3[%c106] : memref<144xf32, #tpu.memory_space<smem>>
    %1118 = vector.broadcast %1117 : f32 to vector<2x9x57xf32>
    %1119 = arith.mulf %1112, %1118 : vector<2x9x57xf32>
    %1120 = arith.addf %1106, %1119 : vector<2x9x57xf32>
    %c114 = arith.constant 114 : index
    %1121 = memref.load %arg3[%c114] : memref<144xf32, #tpu.memory_space<smem>>
    %1122 = vector.broadcast %1121 : f32 to vector<2x9x57xf32>
    %1123 = arith.mulf %1112, %1122 : vector<2x9x57xf32>
    %1124 = arith.addf %1110, %1123 : vector<2x9x57xf32>
    %c0_841 = arith.constant 0 : index
    %c4_842 = arith.constant 4 : index
    %c1_843 = arith.constant 1 : index
    %c2_844 = arith.constant 2 : index
    %1125 = vector.load %arg10[%c0_841, %c4_842, %c1_843, %c2_844] : memref<2x6x10x60xf32, #tpu.memory_space<vmem>>, vector<2x1x9x57xf32>
    %1126 = vector.shape_cast %1125 : vector<2x1x9x57xf32> to vector<2x9x57xf32>
    %c97 = arith.constant 97 : index
    %1127 = memref.load %arg3[%c97] : memref<144xf32, #tpu.memory_space<smem>>
    %1128 = vector.broadcast %1127 : f32 to vector<2x9x57xf32>
    %1129 = arith.mulf %1126, %1128 : vector<2x9x57xf32>
    %1130 = arith.addf %1116, %1129 : vector<2x9x57xf32>
    %c105 = arith.constant 105 : index
    %1131 = memref.load %arg3[%c105] : memref<144xf32, #tpu.memory_space<smem>>
    %1132 = vector.broadcast %1131 : f32 to vector<2x9x57xf32>
    %1133 = arith.mulf %1126, %1132 : vector<2x9x57xf32>
    %1134 = arith.addf %1120, %1133 : vector<2x9x57xf32>
    %c113 = arith.constant 113 : index
    %1135 = memref.load %arg3[%c113] : memref<144xf32, #tpu.memory_space<smem>>
    %1136 = vector.broadcast %1135 : f32 to vector<2x9x57xf32>
    %1137 = arith.mulf %1126, %1136 : vector<2x9x57xf32>
    %1138 = arith.addf %1124, %1137 : vector<2x9x57xf32>
    %c0_845 = arith.constant 0 : index
    %c4_846 = arith.constant 4 : index
    %c1_847 = arith.constant 1 : index
    %c3_848 = arith.constant 3 : index
    %1139 = vector.load %arg10[%c0_845, %c4_846, %c1_847, %c3_848] : memref<2x6x10x60xf32, #tpu.memory_space<vmem>>, vector<2x1x9x57xf32>
    %1140 = vector.shape_cast %1139 : vector<2x1x9x57xf32> to vector<2x9x57xf32>
    %c96 = arith.constant 96 : index
    %1141 = memref.load %arg3[%c96] : memref<144xf32, #tpu.memory_space<smem>>
    %1142 = vector.broadcast %1141 : f32 to vector<2x9x57xf32>
    %1143 = arith.mulf %1140, %1142 : vector<2x9x57xf32>
    %1144 = arith.addf %1130, %1143 : vector<2x9x57xf32>
    %c104 = arith.constant 104 : index
    %1145 = memref.load %arg3[%c104] : memref<144xf32, #tpu.memory_space<smem>>
    %1146 = vector.broadcast %1145 : f32 to vector<2x9x57xf32>
    %1147 = arith.mulf %1140, %1146 : vector<2x9x57xf32>
    %1148 = arith.addf %1134, %1147 : vector<2x9x57xf32>
    %c112 = arith.constant 112 : index
    %1149 = memref.load %arg3[%c112] : memref<144xf32, #tpu.memory_space<smem>>
    %1150 = vector.broadcast %1149 : f32 to vector<2x9x57xf32>
    %1151 = arith.mulf %1140, %1150 : vector<2x9x57xf32>
    %1152 = arith.addf %1138, %1151 : vector<2x9x57xf32>
    %c0_849 = arith.constant 0 : index
    %c5_850 = arith.constant 5 : index
    %c0_851 = arith.constant 0 : index
    %c0_852 = arith.constant 0 : index
    %1153 = vector.load %arg10[%c0_849, %c5_850, %c0_851, %c0_852] : memref<2x6x10x60xf32, #tpu.memory_space<vmem>>, vector<2x1x9x57xf32>
    %1154 = vector.shape_cast %1153 : vector<2x1x9x57xf32> to vector<2x9x57xf32>
    %c127 = arith.constant 127 : index
    %1155 = memref.load %arg3[%c127] : memref<144xf32, #tpu.memory_space<smem>>
    %1156 = vector.broadcast %1155 : f32 to vector<2x9x57xf32>
    %1157 = arith.mulf %1154, %1156 : vector<2x9x57xf32>
    %1158 = arith.addf %1144, %1157 : vector<2x9x57xf32>
    %c135 = arith.constant 135 : index
    %1159 = memref.load %arg3[%c135] : memref<144xf32, #tpu.memory_space<smem>>
    %1160 = vector.broadcast %1159 : f32 to vector<2x9x57xf32>
    %1161 = arith.mulf %1154, %1160 : vector<2x9x57xf32>
    %1162 = arith.addf %1148, %1161 : vector<2x9x57xf32>
    %c143 = arith.constant 143 : index
    %1163 = memref.load %arg3[%c143] : memref<144xf32, #tpu.memory_space<smem>>
    %1164 = vector.broadcast %1163 : f32 to vector<2x9x57xf32>
    %1165 = arith.mulf %1154, %1164 : vector<2x9x57xf32>
    %1166 = arith.addf %1152, %1165 : vector<2x9x57xf32>
    %c0_853 = arith.constant 0 : index
    %c5_854 = arith.constant 5 : index
    %c0_855 = arith.constant 0 : index
    %c1_856 = arith.constant 1 : index
    %1167 = vector.load %arg10[%c0_853, %c5_854, %c0_855, %c1_856] : memref<2x6x10x60xf32, #tpu.memory_space<vmem>>, vector<2x1x9x57xf32>
    %1168 = vector.shape_cast %1167 : vector<2x1x9x57xf32> to vector<2x9x57xf32>
    %c126 = arith.constant 126 : index
    %1169 = memref.load %arg3[%c126] : memref<144xf32, #tpu.memory_space<smem>>
    %1170 = vector.broadcast %1169 : f32 to vector<2x9x57xf32>
    %1171 = arith.mulf %1168, %1170 : vector<2x9x57xf32>
    %1172 = arith.addf %1158, %1171 : vector<2x9x57xf32>
    %c134 = arith.constant 134 : index
    %1173 = memref.load %arg3[%c134] : memref<144xf32, #tpu.memory_space<smem>>
    %1174 = vector.broadcast %1173 : f32 to vector<2x9x57xf32>
    %1175 = arith.mulf %1168, %1174 : vector<2x9x57xf32>
    %1176 = arith.addf %1162, %1175 : vector<2x9x57xf32>
    %c142 = arith.constant 142 : index
    %1177 = memref.load %arg3[%c142] : memref<144xf32, #tpu.memory_space<smem>>
    %1178 = vector.broadcast %1177 : f32 to vector<2x9x57xf32>
    %1179 = arith.mulf %1168, %1178 : vector<2x9x57xf32>
    %1180 = arith.addf %1166, %1179 : vector<2x9x57xf32>
    %c0_857 = arith.constant 0 : index
    %c5_858 = arith.constant 5 : index
    %c0_859 = arith.constant 0 : index
    %c2_860 = arith.constant 2 : index
    %1181 = vector.load %arg10[%c0_857, %c5_858, %c0_859, %c2_860] : memref<2x6x10x60xf32, #tpu.memory_space<vmem>>, vector<2x1x9x57xf32>
    %1182 = vector.shape_cast %1181 : vector<2x1x9x57xf32> to vector<2x9x57xf32>
    %c125 = arith.constant 125 : index
    %1183 = memref.load %arg3[%c125] : memref<144xf32, #tpu.memory_space<smem>>
    %1184 = vector.broadcast %1183 : f32 to vector<2x9x57xf32>
    %1185 = arith.mulf %1182, %1184 : vector<2x9x57xf32>
    %1186 = arith.addf %1172, %1185 : vector<2x9x57xf32>
    %c133 = arith.constant 133 : index
    %1187 = memref.load %arg3[%c133] : memref<144xf32, #tpu.memory_space<smem>>
    %1188 = vector.broadcast %1187 : f32 to vector<2x9x57xf32>
    %1189 = arith.mulf %1182, %1188 : vector<2x9x57xf32>
    %1190 = arith.addf %1176, %1189 : vector<2x9x57xf32>
    %c141 = arith.constant 141 : index
    %1191 = memref.load %arg3[%c141] : memref<144xf32, #tpu.memory_space<smem>>
    %1192 = vector.broadcast %1191 : f32 to vector<2x9x57xf32>
    %1193 = arith.mulf %1182, %1192 : vector<2x9x57xf32>
    %1194 = arith.addf %1180, %1193 : vector<2x9x57xf32>
    %c0_861 = arith.constant 0 : index
    %c5_862 = arith.constant 5 : index
    %c0_863 = arith.constant 0 : index
    %c3_864 = arith.constant 3 : index
    %1195 = vector.load %arg10[%c0_861, %c5_862, %c0_863, %c3_864] : memref<2x6x10x60xf32, #tpu.memory_space<vmem>>, vector<2x1x9x57xf32>
    %1196 = vector.shape_cast %1195 : vector<2x1x9x57xf32> to vector<2x9x57xf32>
    %c124 = arith.constant 124 : index
    %1197 = memref.load %arg3[%c124] : memref<144xf32, #tpu.memory_space<smem>>
    %1198 = vector.broadcast %1197 : f32 to vector<2x9x57xf32>
    %1199 = arith.mulf %1196, %1198 : vector<2x9x57xf32>
    %1200 = arith.addf %1186, %1199 : vector<2x9x57xf32>
    %c132 = arith.constant 132 : index
    %1201 = memref.load %arg3[%c132] : memref<144xf32, #tpu.memory_space<smem>>
    %1202 = vector.broadcast %1201 : f32 to vector<2x9x57xf32>
    %1203 = arith.mulf %1196, %1202 : vector<2x9x57xf32>
    %1204 = arith.addf %1190, %1203 : vector<2x9x57xf32>
    %c140 = arith.constant 140 : index
    %1205 = memref.load %arg3[%c140] : memref<144xf32, #tpu.memory_space<smem>>
    %1206 = vector.broadcast %1205 : f32 to vector<2x9x57xf32>
    %1207 = arith.mulf %1196, %1206 : vector<2x9x57xf32>
    %1208 = arith.addf %1194, %1207 : vector<2x9x57xf32>
    %c0_865 = arith.constant 0 : index
    %c5_866 = arith.constant 5 : index
    %c1_867 = arith.constant 1 : index
    %c0_868 = arith.constant 0 : index
    %1209 = vector.load %arg10[%c0_865, %c5_866, %c1_867, %c0_868] : memref<2x6x10x60xf32, #tpu.memory_space<vmem>>, vector<2x1x9x57xf32>
    %1210 = vector.shape_cast %1209 : vector<2x1x9x57xf32> to vector<2x9x57xf32>
    %c123 = arith.constant 123 : index
    %1211 = memref.load %arg3[%c123] : memref<144xf32, #tpu.memory_space<smem>>
    %1212 = vector.broadcast %1211 : f32 to vector<2x9x57xf32>
    %1213 = arith.mulf %1210, %1212 : vector<2x9x57xf32>
    %1214 = arith.addf %1200, %1213 : vector<2x9x57xf32>
    %c131 = arith.constant 131 : index
    %1215 = memref.load %arg3[%c131] : memref<144xf32, #tpu.memory_space<smem>>
    %1216 = vector.broadcast %1215 : f32 to vector<2x9x57xf32>
    %1217 = arith.mulf %1210, %1216 : vector<2x9x57xf32>
    %1218 = arith.addf %1204, %1217 : vector<2x9x57xf32>
    %c139 = arith.constant 139 : index
    %1219 = memref.load %arg3[%c139] : memref<144xf32, #tpu.memory_space<smem>>
    %1220 = vector.broadcast %1219 : f32 to vector<2x9x57xf32>
    %1221 = arith.mulf %1210, %1220 : vector<2x9x57xf32>
    %1222 = arith.addf %1208, %1221 : vector<2x9x57xf32>
    %c0_869 = arith.constant 0 : index
    %c5_870 = arith.constant 5 : index
    %c1_871 = arith.constant 1 : index
    %c1_872 = arith.constant 1 : index
    %1223 = vector.load %arg10[%c0_869, %c5_870, %c1_871, %c1_872] : memref<2x6x10x60xf32, #tpu.memory_space<vmem>>, vector<2x1x9x57xf32>
    %1224 = vector.shape_cast %1223 : vector<2x1x9x57xf32> to vector<2x9x57xf32>
    %c122 = arith.constant 122 : index
    %1225 = memref.load %arg3[%c122] : memref<144xf32, #tpu.memory_space<smem>>
    %1226 = vector.broadcast %1225 : f32 to vector<2x9x57xf32>
    %1227 = arith.mulf %1224, %1226 : vector<2x9x57xf32>
    %1228 = arith.addf %1214, %1227 : vector<2x9x57xf32>
    %c130 = arith.constant 130 : index
    %1229 = memref.load %arg3[%c130] : memref<144xf32, #tpu.memory_space<smem>>
    %1230 = vector.broadcast %1229 : f32 to vector<2x9x57xf32>
    %1231 = arith.mulf %1224, %1230 : vector<2x9x57xf32>
    %1232 = arith.addf %1218, %1231 : vector<2x9x57xf32>
    %c138 = arith.constant 138 : index
    %1233 = memref.load %arg3[%c138] : memref<144xf32, #tpu.memory_space<smem>>
    %1234 = vector.broadcast %1233 : f32 to vector<2x9x57xf32>
    %1235 = arith.mulf %1224, %1234 : vector<2x9x57xf32>
    %1236 = arith.addf %1222, %1235 : vector<2x9x57xf32>
    %c0_873 = arith.constant 0 : index
    %c5_874 = arith.constant 5 : index
    %c1_875 = arith.constant 1 : index
    %c2_876 = arith.constant 2 : index
    %1237 = vector.load %arg10[%c0_873, %c5_874, %c1_875, %c2_876] : memref<2x6x10x60xf32, #tpu.memory_space<vmem>>, vector<2x1x9x57xf32>
    %1238 = vector.shape_cast %1237 : vector<2x1x9x57xf32> to vector<2x9x57xf32>
    %c121 = arith.constant 121 : index
    %1239 = memref.load %arg3[%c121] : memref<144xf32, #tpu.memory_space<smem>>
    %1240 = vector.broadcast %1239 : f32 to vector<2x9x57xf32>
    %1241 = arith.mulf %1238, %1240 : vector<2x9x57xf32>
    %1242 = arith.addf %1228, %1241 : vector<2x9x57xf32>
    %c129 = arith.constant 129 : index
    %1243 = memref.load %arg3[%c129] : memref<144xf32, #tpu.memory_space<smem>>
    %1244 = vector.broadcast %1243 : f32 to vector<2x9x57xf32>
    %1245 = arith.mulf %1238, %1244 : vector<2x9x57xf32>
    %1246 = arith.addf %1232, %1245 : vector<2x9x57xf32>
    %c137 = arith.constant 137 : index
    %1247 = memref.load %arg3[%c137] : memref<144xf32, #tpu.memory_space<smem>>
    %1248 = vector.broadcast %1247 : f32 to vector<2x9x57xf32>
    %1249 = arith.mulf %1238, %1248 : vector<2x9x57xf32>
    %1250 = arith.addf %1236, %1249 : vector<2x9x57xf32>
    %c0_877 = arith.constant 0 : index
    %c5_878 = arith.constant 5 : index
    %c1_879 = arith.constant 1 : index
    %c3_880 = arith.constant 3 : index
    %1251 = vector.load %arg10[%c0_877, %c5_878, %c1_879, %c3_880] : memref<2x6x10x60xf32, #tpu.memory_space<vmem>>, vector<2x1x9x57xf32>
    %1252 = vector.shape_cast %1251 : vector<2x1x9x57xf32> to vector<2x9x57xf32>
    %c120 = arith.constant 120 : index
    %1253 = memref.load %arg3[%c120] : memref<144xf32, #tpu.memory_space<smem>>
    %1254 = vector.broadcast %1253 : f32 to vector<2x9x57xf32>
    %1255 = arith.mulf %1252, %1254 : vector<2x9x57xf32>
    %1256 = arith.addf %1242, %1255 : vector<2x9x57xf32>
    %c128 = arith.constant 128 : index
    %1257 = memref.load %arg3[%c128] : memref<144xf32, #tpu.memory_space<smem>>
    %1258 = vector.broadcast %1257 : f32 to vector<2x9x57xf32>
    %1259 = arith.mulf %1252, %1258 : vector<2x9x57xf32>
    %1260 = arith.addf %1246, %1259 : vector<2x9x57xf32>
    %c136 = arith.constant 136 : index
    %1261 = memref.load %arg3[%c136] : memref<144xf32, #tpu.memory_space<smem>>
    %1262 = vector.broadcast %1261 : f32 to vector<2x9x57xf32>
    %1263 = arith.mulf %1252, %1262 : vector<2x9x57xf32>
    %1264 = arith.addf %1250, %1263 : vector<2x9x57xf32>
    %cst_881 = arith.constant 0.000000e+00 : f32
    %1265 = vector.broadcast %cst_881 : f32 to vector<2x9x57xf32>
    %1266 = arith.maximumf %1256, %1265 : vector<2x9x57xf32>
    %c0_882 = arith.constant 0 : index
    %c0_883 = arith.constant 0 : index
    %c1_884 = arith.constant 1 : index
    %c3_885 = arith.constant 3 : index
    %1267 = vector.load %arg11[%c0_882, %c0_883, %c1_884, %c3_885] : memref<2x3x11x63xf32, #tpu.memory_space<vmem>>, vector<2x1x9x57xf32>
    %1268 = vector.shape_cast %1267 : vector<2x1x9x57xf32> to vector<2x9x57xf32>
    %1269 = vector.shape_cast %1266 : vector<2x9x57xf32> to vector<2x1x9x57xf32>
    tpu.vector_store %arg11[%c0_882, %c0_883, %c1_884, %c3_885], %1269 {strides = array<i32>} : memref<2x3x11x63xf32, #tpu.memory_space<vmem>>, vector<2x1x9x57xf32>,
    %cst_886 = arith.constant 0.000000e+00 : f32
    %1270 = vector.broadcast %cst_886 : f32 to vector<2x9x57xf32>
    %1271 = arith.maximumf %1260, %1270 : vector<2x9x57xf32>
    %c0_887 = arith.constant 0 : index
    %c1_888 = arith.constant 1 : index
    %c1_889 = arith.constant 1 : index
    %c3_890 = arith.constant 3 : index
    %1272 = vector.load %arg11[%c0_887, %c1_888, %c1_889, %c3_890] : memref<2x3x11x63xf32, #tpu.memory_space<vmem>>, vector<2x1x9x57xf32>
    %1273 = vector.shape_cast %1272 : vector<2x1x9x57xf32> to vector<2x9x57xf32>
    %1274 = vector.shape_cast %1271 : vector<2x9x57xf32> to vector<2x1x9x57xf32>
    tpu.vector_store %arg11[%c0_887, %c1_888, %c1_889, %c3_890], %1274 {strides = array<i32>} : memref<2x3x11x63xf32, #tpu.memory_space<vmem>>, vector<2x1x9x57xf32>,
    %cst_891 = arith.constant 0.000000e+00 : f32
    %1275 = vector.broadcast %cst_891 : f32 to vector<2x9x57xf32>
    %1276 = arith.maximumf %1264, %1275 : vector<2x9x57xf32>
    %c0_892 = arith.constant 0 : index
    %c2_893 = arith.constant 2 : index
    %c1_894 = arith.constant 1 : index
    %c3_895 = arith.constant 3 : index
    %1277 = vector.load %arg11[%c0_892, %c2_893, %c1_894, %c3_895] : memref<2x3x11x63xf32, #tpu.memory_space<vmem>>, vector<2x1x9x57xf32>
    %1278 = vector.shape_cast %1277 : vector<2x1x9x57xf32> to vector<2x9x57xf32>
    %1279 = vector.shape_cast %1276 : vector<2x9x57xf32> to vector<2x1x9x57xf32>
    tpu.vector_store %arg11[%c0_892, %c2_893, %c1_894, %c3_895], %1279 {strides = array<i32>} : memref<2x3x11x63xf32, #tpu.memory_space<vmem>>, vector<2x1x9x57xf32>,
    %cst_896 = arith.constant 0.000000e+00 : f32
    %1280 = vector.broadcast %cst_896 : f32 to vector<2x10x60xf32>
    %c0_897 = arith.constant 0 : index
    %1281 = memref.load %arg6[%c0_897] : memref<1xf32, #tpu.memory_space<smem>>
    %1282 = vector.broadcast %1281 : f32 to vector<2x10x60xf32>
    %1283 = arith.addf %1280, %1282 : vector<2x10x60xf32>
    %c0_898 = arith.constant 0 : index
    %c0_899 = arith.constant 0 : index
    %c0_900 = arith.constant 0 : index
    %c0_901 = arith.constant 0 : index
    %1284 = vector.load %arg11[%c0_898, %c0_899, %c0_900, %c0_901] : memref<2x3x11x63xf32, #tpu.memory_space<vmem>>, vector<2x1x10x60xf32>
    %1285 = vector.shape_cast %1284 : vector<2x1x10x60xf32> to vector<2x10x60xf32>
    %c7_902 = arith.constant 7 : index
    %1286 = memref.load %arg5[%c7_902] : memref<24xf32, #tpu.memory_space<smem>>
    %1287 = vector.broadcast %1286 : f32 to vector<2x10x60xf32>
    %1288 = arith.mulf %1285, %1287 : vector<2x10x60xf32>
    %1289 = arith.addf %1283, %1288 : vector<2x10x60xf32>
    %c0_903 = arith.constant 0 : index
    %c0_904 = arith.constant 0 : index
    %c0_905 = arith.constant 0 : index
    %c1_906 = arith.constant 1 : index
    %1290 = vector.load %arg11[%c0_903, %c0_904, %c0_905, %c1_906] : memref<2x3x11x63xf32, #tpu.memory_space<vmem>>, vector<2x1x10x60xf32>
    %1291 = vector.shape_cast %1290 : vector<2x1x10x60xf32> to vector<2x10x60xf32>
    %c6_907 = arith.constant 6 : index
    %1292 = memref.load %arg5[%c6_907] : memref<24xf32, #tpu.memory_space<smem>>
    %1293 = vector.broadcast %1292 : f32 to vector<2x10x60xf32>
    %1294 = arith.mulf %1291, %1293 : vector<2x10x60xf32>
    %1295 = arith.addf %1289, %1294 : vector<2x10x60xf32>
    %c0_908 = arith.constant 0 : index
    %c0_909 = arith.constant 0 : index
    %c0_910 = arith.constant 0 : index
    %c2_911 = arith.constant 2 : index
    %1296 = vector.load %arg11[%c0_908, %c0_909, %c0_910, %c2_911] : memref<2x3x11x63xf32, #tpu.memory_space<vmem>>, vector<2x1x10x60xf32>
    %1297 = vector.shape_cast %1296 : vector<2x1x10x60xf32> to vector<2x10x60xf32>
    %c5_912 = arith.constant 5 : index
    %1298 = memref.load %arg5[%c5_912] : memref<24xf32, #tpu.memory_space<smem>>
    %1299 = vector.broadcast %1298 : f32 to vector<2x10x60xf32>
    %1300 = arith.mulf %1297, %1299 : vector<2x10x60xf32>
    %1301 = arith.addf %1295, %1300 : vector<2x10x60xf32>
    %c0_913 = arith.constant 0 : index
    %c0_914 = arith.constant 0 : index
    %c0_915 = arith.constant 0 : index
    %c3_916 = arith.constant 3 : index
    %1302 = vector.load %arg11[%c0_913, %c0_914, %c0_915, %c3_916] : memref<2x3x11x63xf32, #tpu.memory_space<vmem>>, vector<2x1x10x60xf32>
    %1303 = vector.shape_cast %1302 : vector<2x1x10x60xf32> to vector<2x10x60xf32>
    %c4_917 = arith.constant 4 : index
    %1304 = memref.load %arg5[%c4_917] : memref<24xf32, #tpu.memory_space<smem>>
    %1305 = vector.broadcast %1304 : f32 to vector<2x10x60xf32>
    %1306 = arith.mulf %1303, %1305 : vector<2x10x60xf32>
    %1307 = arith.addf %1301, %1306 : vector<2x10x60xf32>
    %c0_918 = arith.constant 0 : index
    %c0_919 = arith.constant 0 : index
    %c1_920 = arith.constant 1 : index
    %c0_921 = arith.constant 0 : index
    %1308 = vector.load %arg11[%c0_918, %c0_919, %c1_920, %c0_921] : memref<2x3x11x63xf32, #tpu.memory_space<vmem>>, vector<2x1x10x60xf32>
    %1309 = vector.shape_cast %1308 : vector<2x1x10x60xf32> to vector<2x10x60xf32>
    %c3_922 = arith.constant 3 : index
    %1310 = memref.load %arg5[%c3_922] : memref<24xf32, #tpu.memory_space<smem>>
    %1311 = vector.broadcast %1310 : f32 to vector<2x10x60xf32>
    %1312 = arith.mulf %1309, %1311 : vector<2x10x60xf32>
    %1313 = arith.addf %1307, %1312 : vector<2x10x60xf32>
    %c0_923 = arith.constant 0 : index
    %c0_924 = arith.constant 0 : index
    %c1_925 = arith.constant 1 : index
    %c1_926 = arith.constant 1 : index
    %1314 = vector.load %arg11[%c0_923, %c0_924, %c1_925, %c1_926] : memref<2x3x11x63xf32, #tpu.memory_space<vmem>>, vector<2x1x10x60xf32>
    %1315 = vector.shape_cast %1314 : vector<2x1x10x60xf32> to vector<2x10x60xf32>
    %c2_927 = arith.constant 2 : index
    %1316 = memref.load %arg5[%c2_927] : memref<24xf32, #tpu.memory_space<smem>>
    %1317 = vector.broadcast %1316 : f32 to vector<2x10x60xf32>
    %1318 = arith.mulf %1315, %1317 : vector<2x10x60xf32>
    %1319 = arith.addf %1313, %1318 : vector<2x10x60xf32>
    %c0_928 = arith.constant 0 : index
    %c0_929 = arith.constant 0 : index
    %c1_930 = arith.constant 1 : index
    %c2_931 = arith.constant 2 : index
    %1320 = vector.load %arg11[%c0_928, %c0_929, %c1_930, %c2_931] : memref<2x3x11x63xf32, #tpu.memory_space<vmem>>, vector<2x1x10x60xf32>
    %1321 = vector.shape_cast %1320 : vector<2x1x10x60xf32> to vector<2x10x60xf32>
    %c1_932 = arith.constant 1 : index
    %1322 = memref.load %arg5[%c1_932] : memref<24xf32, #tpu.memory_space<smem>>
    %1323 = vector.broadcast %1322 : f32 to vector<2x10x60xf32>
    %1324 = arith.mulf %1321, %1323 : vector<2x10x60xf32>
    %1325 = arith.addf %1319, %1324 : vector<2x10x60xf32>
    %c0_933 = arith.constant 0 : index
    %c0_934 = arith.constant 0 : index
    %c1_935 = arith.constant 1 : index
    %c3_936 = arith.constant 3 : index
    %1326 = vector.load %arg11[%c0_933, %c0_934, %c1_935, %c3_936] : memref<2x3x11x63xf32, #tpu.memory_space<vmem>>, vector<2x1x10x60xf32>
    %1327 = vector.shape_cast %1326 : vector<2x1x10x60xf32> to vector<2x10x60xf32>
    %c0_937 = arith.constant 0 : index
    %1328 = memref.load %arg5[%c0_937] : memref<24xf32, #tpu.memory_space<smem>>
    %1329 = vector.broadcast %1328 : f32 to vector<2x10x60xf32>
    %1330 = arith.mulf %1327, %1329 : vector<2x10x60xf32>
    %1331 = arith.addf %1325, %1330 : vector<2x10x60xf32>
    %c0_938 = arith.constant 0 : index
    %c1_939 = arith.constant 1 : index
    %c0_940 = arith.constant 0 : index
    %c0_941 = arith.constant 0 : index
    %1332 = vector.load %arg11[%c0_938, %c1_939, %c0_940, %c0_941] : memref<2x3x11x63xf32, #tpu.memory_space<vmem>>, vector<2x1x10x60xf32>
    %1333 = vector.shape_cast %1332 : vector<2x1x10x60xf32> to vector<2x10x60xf32>
    %c15_942 = arith.constant 15 : index
    %1334 = memref.load %arg5[%c15_942] : memref<24xf32, #tpu.memory_space<smem>>
    %1335 = vector.broadcast %1334 : f32 to vector<2x10x60xf32>
    %1336 = arith.mulf %1333, %1335 : vector<2x10x60xf32>
    %1337 = arith.addf %1331, %1336 : vector<2x10x60xf32>
    %c0_943 = arith.constant 0 : index
    %c1_944 = arith.constant 1 : index
    %c0_945 = arith.constant 0 : index
    %c1_946 = arith.constant 1 : index
    %1338 = vector.load %arg11[%c0_943, %c1_944, %c0_945, %c1_946] : memref<2x3x11x63xf32, #tpu.memory_space<vmem>>, vector<2x1x10x60xf32>
    %1339 = vector.shape_cast %1338 : vector<2x1x10x60xf32> to vector<2x10x60xf32>
    %c14_947 = arith.constant 14 : index
    %1340 = memref.load %arg5[%c14_947] : memref<24xf32, #tpu.memory_space<smem>>
    %1341 = vector.broadcast %1340 : f32 to vector<2x10x60xf32>
    %1342 = arith.mulf %1339, %1341 : vector<2x10x60xf32>
    %1343 = arith.addf %1337, %1342 : vector<2x10x60xf32>
    %c0_948 = arith.constant 0 : index
    %c1_949 = arith.constant 1 : index
    %c0_950 = arith.constant 0 : index
    %c2_951 = arith.constant 2 : index
    %1344 = vector.load %arg11[%c0_948, %c1_949, %c0_950, %c2_951] : memref<2x3x11x63xf32, #tpu.memory_space<vmem>>, vector<2x1x10x60xf32>
    %1345 = vector.shape_cast %1344 : vector<2x1x10x60xf32> to vector<2x10x60xf32>
    %c13_952 = arith.constant 13 : index
    %1346 = memref.load %arg5[%c13_952] : memref<24xf32, #tpu.memory_space<smem>>
    %1347 = vector.broadcast %1346 : f32 to vector<2x10x60xf32>
    %1348 = arith.mulf %1345, %1347 : vector<2x10x60xf32>
    %1349 = arith.addf %1343, %1348 : vector<2x10x60xf32>
    %c0_953 = arith.constant 0 : index
    %c1_954 = arith.constant 1 : index
    %c0_955 = arith.constant 0 : index
    %c3_956 = arith.constant 3 : index
    %1350 = vector.load %arg11[%c0_953, %c1_954, %c0_955, %c3_956] : memref<2x3x11x63xf32, #tpu.memory_space<vmem>>, vector<2x1x10x60xf32>
    %1351 = vector.shape_cast %1350 : vector<2x1x10x60xf32> to vector<2x10x60xf32>
    %c12_957 = arith.constant 12 : index
    %1352 = memref.load %arg5[%c12_957] : memref<24xf32, #tpu.memory_space<smem>>
    %1353 = vector.broadcast %1352 : f32 to vector<2x10x60xf32>
    %1354 = arith.mulf %1351, %1353 : vector<2x10x60xf32>
    %1355 = arith.addf %1349, %1354 : vector<2x10x60xf32>
    %c0_958 = arith.constant 0 : index
    %c1_959 = arith.constant 1 : index
    %c1_960 = arith.constant 1 : index
    %c0_961 = arith.constant 0 : index
    %1356 = vector.load %arg11[%c0_958, %c1_959, %c1_960, %c0_961] : memref<2x3x11x63xf32, #tpu.memory_space<vmem>>, vector<2x1x10x60xf32>
    %1357 = vector.shape_cast %1356 : vector<2x1x10x60xf32> to vector<2x10x60xf32>
    %c11_962 = arith.constant 11 : index
    %1358 = memref.load %arg5[%c11_962] : memref<24xf32, #tpu.memory_space<smem>>
    %1359 = vector.broadcast %1358 : f32 to vector<2x10x60xf32>
    %1360 = arith.mulf %1357, %1359 : vector<2x10x60xf32>
    %1361 = arith.addf %1355, %1360 : vector<2x10x60xf32>
    %c0_963 = arith.constant 0 : index
    %c1_964 = arith.constant 1 : index
    %c1_965 = arith.constant 1 : index
    %c1_966 = arith.constant 1 : index
    %1362 = vector.load %arg11[%c0_963, %c1_964, %c1_965, %c1_966] : memref<2x3x11x63xf32, #tpu.memory_space<vmem>>, vector<2x1x10x60xf32>
    %1363 = vector.shape_cast %1362 : vector<2x1x10x60xf32> to vector<2x10x60xf32>
    %c10_967 = arith.constant 10 : index
    %1364 = memref.load %arg5[%c10_967] : memref<24xf32, #tpu.memory_space<smem>>
    %1365 = vector.broadcast %1364 : f32 to vector<2x10x60xf32>
    %1366 = arith.mulf %1363, %1365 : vector<2x10x60xf32>
    %1367 = arith.addf %1361, %1366 : vector<2x10x60xf32>
    %c0_968 = arith.constant 0 : index
    %c1_969 = arith.constant 1 : index
    %c1_970 = arith.constant 1 : index
    %c2_971 = arith.constant 2 : index
    %1368 = vector.load %arg11[%c0_968, %c1_969, %c1_970, %c2_971] : memref<2x3x11x63xf32, #tpu.memory_space<vmem>>, vector<2x1x10x60xf32>
    %1369 = vector.shape_cast %1368 : vector<2x1x10x60xf32> to vector<2x10x60xf32>
    %c9_972 = arith.constant 9 : index
    %1370 = memref.load %arg5[%c9_972] : memref<24xf32, #tpu.memory_space<smem>>
    %1371 = vector.broadcast %1370 : f32 to vector<2x10x60xf32>
    %1372 = arith.mulf %1369, %1371 : vector<2x10x60xf32>
    %1373 = arith.addf %1367, %1372 : vector<2x10x60xf32>
    %c0_973 = arith.constant 0 : index
    %c1_974 = arith.constant 1 : index
    %c1_975 = arith.constant 1 : index
    %c3_976 = arith.constant 3 : index
    %1374 = vector.load %arg11[%c0_973, %c1_974, %c1_975, %c3_976] : memref<2x3x11x63xf32, #tpu.memory_space<vmem>>, vector<2x1x10x60xf32>
    %1375 = vector.shape_cast %1374 : vector<2x1x10x60xf32> to vector<2x10x60xf32>
    %c8_977 = arith.constant 8 : index
    %1376 = memref.load %arg5[%c8_977] : memref<24xf32, #tpu.memory_space<smem>>
    %1377 = vector.broadcast %1376 : f32 to vector<2x10x60xf32>
    %1378 = arith.mulf %1375, %1377 : vector<2x10x60xf32>
    %1379 = arith.addf %1373, %1378 : vector<2x10x60xf32>
    %c0_978 = arith.constant 0 : index
    %c2_979 = arith.constant 2 : index
    %c0_980 = arith.constant 0 : index
    %c0_981 = arith.constant 0 : index
    %1380 = vector.load %arg11[%c0_978, %c2_979, %c0_980, %c0_981] : memref<2x3x11x63xf32, #tpu.memory_space<vmem>>, vector<2x1x10x60xf32>
    %1381 = vector.shape_cast %1380 : vector<2x1x10x60xf32> to vector<2x10x60xf32>
    %c23_982 = arith.constant 23 : index
    %1382 = memref.load %arg5[%c23_982] : memref<24xf32, #tpu.memory_space<smem>>
    %1383 = vector.broadcast %1382 : f32 to vector<2x10x60xf32>
    %1384 = arith.mulf %1381, %1383 : vector<2x10x60xf32>
    %1385 = arith.addf %1379, %1384 : vector<2x10x60xf32>
    %c0_983 = arith.constant 0 : index
    %c2_984 = arith.constant 2 : index
    %c0_985 = arith.constant 0 : index
    %c1_986 = arith.constant 1 : index
    %1386 = vector.load %arg11[%c0_983, %c2_984, %c0_985, %c1_986] : memref<2x3x11x63xf32, #tpu.memory_space<vmem>>, vector<2x1x10x60xf32>
    %1387 = vector.shape_cast %1386 : vector<2x1x10x60xf32> to vector<2x10x60xf32>
    %c22_987 = arith.constant 22 : index
    %1388 = memref.load %arg5[%c22_987] : memref<24xf32, #tpu.memory_space<smem>>
    %1389 = vector.broadcast %1388 : f32 to vector<2x10x60xf32>
    %1390 = arith.mulf %1387, %1389 : vector<2x10x60xf32>
    %1391 = arith.addf %1385, %1390 : vector<2x10x60xf32>
    %c0_988 = arith.constant 0 : index
    %c2_989 = arith.constant 2 : index
    %c0_990 = arith.constant 0 : index
    %c2_991 = arith.constant 2 : index
    %1392 = vector.load %arg11[%c0_988, %c2_989, %c0_990, %c2_991] : memref<2x3x11x63xf32, #tpu.memory_space<vmem>>, vector<2x1x10x60xf32>
    %1393 = vector.shape_cast %1392 : vector<2x1x10x60xf32> to vector<2x10x60xf32>
    %c21_992 = arith.constant 21 : index
    %1394 = memref.load %arg5[%c21_992] : memref<24xf32, #tpu.memory_space<smem>>
    %1395 = vector.broadcast %1394 : f32 to vector<2x10x60xf32>
    %1396 = arith.mulf %1393, %1395 : vector<2x10x60xf32>
    %1397 = arith.addf %1391, %1396 : vector<2x10x60xf32>
    %c0_993 = arith.constant 0 : index
    %c2_994 = arith.constant 2 : index
    %c0_995 = arith.constant 0 : index
    %c3_996 = arith.constant 3 : index
    %1398 = vector.load %arg11[%c0_993, %c2_994, %c0_995, %c3_996] : memref<2x3x11x63xf32, #tpu.memory_space<vmem>>, vector<2x1x10x60xf32>
    %1399 = vector.shape_cast %1398 : vector<2x1x10x60xf32> to vector<2x10x60xf32>
    %c20_997 = arith.constant 20 : index
    %1400 = memref.load %arg5[%c20_997] : memref<24xf32, #tpu.memory_space<smem>>
    %1401 = vector.broadcast %1400 : f32 to vector<2x10x60xf32>
    %1402 = arith.mulf %1399, %1401 : vector<2x10x60xf32>
    %1403 = arith.addf %1397, %1402 : vector<2x10x60xf32>
    %c0_998 = arith.constant 0 : index
    %c2_999 = arith.constant 2 : index
    %c1_1000 = arith.constant 1 : index
    %c0_1001 = arith.constant 0 : index
    %1404 = vector.load %arg11[%c0_998, %c2_999, %c1_1000, %c0_1001] : memref<2x3x11x63xf32, #tpu.memory_space<vmem>>, vector<2x1x10x60xf32>
    %1405 = vector.shape_cast %1404 : vector<2x1x10x60xf32> to vector<2x10x60xf32>
    %c19_1002 = arith.constant 19 : index
    %1406 = memref.load %arg5[%c19_1002] : memref<24xf32, #tpu.memory_space<smem>>
    %1407 = vector.broadcast %1406 : f32 to vector<2x10x60xf32>
    %1408 = arith.mulf %1405, %1407 : vector<2x10x60xf32>
    %1409 = arith.addf %1403, %1408 : vector<2x10x60xf32>
    %c0_1003 = arith.constant 0 : index
    %c2_1004 = arith.constant 2 : index
    %c1_1005 = arith.constant 1 : index
    %c1_1006 = arith.constant 1 : index
    %1410 = vector.load %arg11[%c0_1003, %c2_1004, %c1_1005, %c1_1006] : memref<2x3x11x63xf32, #tpu.memory_space<vmem>>, vector<2x1x10x60xf32>
    %1411 = vector.shape_cast %1410 : vector<2x1x10x60xf32> to vector<2x10x60xf32>
    %c18_1007 = arith.constant 18 : index
    %1412 = memref.load %arg5[%c18_1007] : memref<24xf32, #tpu.memory_space<smem>>
    %1413 = vector.broadcast %1412 : f32 to vector<2x10x60xf32>
    %1414 = arith.mulf %1411, %1413 : vector<2x10x60xf32>
    %1415 = arith.addf %1409, %1414 : vector<2x10x60xf32>
    %c0_1008 = arith.constant 0 : index
    %c2_1009 = arith.constant 2 : index
    %c1_1010 = arith.constant 1 : index
    %c2_1011 = arith.constant 2 : index
    %1416 = vector.load %arg11[%c0_1008, %c2_1009, %c1_1010, %c2_1011] : memref<2x3x11x63xf32, #tpu.memory_space<vmem>>, vector<2x1x10x60xf32>
    %1417 = vector.shape_cast %1416 : vector<2x1x10x60xf32> to vector<2x10x60xf32>
    %c17_1012 = arith.constant 17 : index
    %1418 = memref.load %arg5[%c17_1012] : memref<24xf32, #tpu.memory_space<smem>>
    %1419 = vector.broadcast %1418 : f32 to vector<2x10x60xf32>
    %1420 = arith.mulf %1417, %1419 : vector<2x10x60xf32>
    %1421 = arith.addf %1415, %1420 : vector<2x10x60xf32>
    %c0_1013 = arith.constant 0 : index
    %c2_1014 = arith.constant 2 : index
    %c1_1015 = arith.constant 1 : index
    %c3_1016 = arith.constant 3 : index
    %1422 = vector.load %arg11[%c0_1013, %c2_1014, %c1_1015, %c3_1016] : memref<2x3x11x63xf32, #tpu.memory_space<vmem>>, vector<2x1x10x60xf32>
    %1423 = vector.shape_cast %1422 : vector<2x1x10x60xf32> to vector<2x10x60xf32>
    %c16_1017 = arith.constant 16 : index
    %1424 = memref.load %arg5[%c16_1017] : memref<24xf32, #tpu.memory_space<smem>>
    %1425 = vector.broadcast %1424 : f32 to vector<2x10x60xf32>
    %1426 = arith.mulf %1423, %1425 : vector<2x10x60xf32>
    %1427 = arith.addf %1421, %1426 : vector<2x10x60xf32>
    %c0_1018 = arith.constant 0 : index
    %c0_1019 = arith.constant 0 : index
    %c0_1020 = arith.constant 0 : index
    %c0_1021 = arith.constant 0 : index
    %1428 = vector.load %arg8[%c0_1018, %c0_1019, %c0_1020, %c0_1021] : memref<2x1x10x60xf32, #tpu.memory_space<vmem>>, vector<2x1x10x60xf32>
    %1429 = vector.shape_cast %1428 : vector<2x1x10x60xf32> to vector<2x10x60xf32>
    %1430 = vector.shape_cast %1427 : vector<2x10x60xf32> to vector<2x1x10x60xf32>
    tpu.vector_store %arg8[%c0_1018, %c0_1019, %c0_1020, %c0_1021], %1430 {strides = array<i32>} : memref<2x1x10x60xf32, #tpu.memory_space<vmem>>, vector<2x1x10x60xf32>,
    %c0_1022 = arith.constant 0 : index
    %c0_1023 = arith.constant 0 : index
    %c0_1024 = arith.constant 0 : index
    %c0_1025 = arith.constant 0 : index
    %1431 = vector.load %arg7[%c0_1022, %c0_1023, %c0_1024, %c0_1025] : memref<2x1x10x60xf32, #tpu.memory_space<vmem>>, vector<2x1x10x60xf32>
    %1432 = math.exp %1431 : vector<2x1x10x60xf32>
    %c0_1026 = arith.constant 0 : index
    %c0_1027 = arith.constant 0 : index
    %c0_1028 = arith.constant 0 : index
    %c0_1029 = arith.constant 0 : index
    %1433 = vector.load %arg9[%c0_1026, %c0_1027, %c0_1028, %c0_1029] : memref<2x1x10x60xf32, #tpu.memory_space<vmem>>, vector<2x1x10x60xf32>
    tpu.vector_store %arg9[%c0_1026, %c0_1027, %c0_1028, %c0_1029], %1432 {strides = array<i32>} : memref<2x1x10x60xf32, #tpu.memory_space<vmem>>, vector<2x1x10x60xf32>,
    return
  }
}

</mosaic_0001>

<bundles_post_ra>
// kernel: conv_decoder_forward.1
= control target key start
LH: loop header
LB: loop body
LE: loop exit
PB: predicated region body
PF: predicated region fallthrough
CT: control target
= control target key end

     0   :  { %16 = vsyncpa [#allocation6], 0  ;;  %s15902_s0 = inlined_call_operand.vmem [shape: f32[2,32], index: 0, kind: input, shape index: {}]   ;;  %s15903_s1 = inlined_call_operand.hbm [shape: f32[6,8,32,54], index: 1, kind: input, shape index: {}]   ;;  %s15904_s2 = inlined_call_operand.vmem [shape: f32[6,8,1,54], index: 2, kind: input, shape index: {}]   ;;  %s15905_s3 = inlined_call_operand.vmem [shape: f32[144], index: 3, kind: input, shape index: {}]   ;;  %s15906_s4 = inlined_call_operand.vmem [shape: f32[3], index: 4, kind: input, shape index: {}]   ;;  %s15907_s5 = inlined_call_operand.vmem [shape: f32[24], index: 5, kind: input, shape index: {}]   ;;  %s15908_s6 = inlined_call_operand.<no memory space> [shape: f32[1], index: 6, kind: input, shape index: {}]   ;;  %s15909_s7 = inlined_call_operand.vmem [shape: f32[2,1,10,60], index: 7, kind: input, shape index: {}]   ;;  %s15910_s8 = inlined_call_operand.vmem [shape: f32[2,1,10,60], index: 8, kind: output, shape index: {0}]   ;;  %s15911_s9 = inlined_call_operand.vmem [shape: f32[2,1,10,60], index: 9, kind: output, shape index: {1}]  }
   0x1   :  { %17 = vsyncpa [#allocation7], 0 }
   0x2   :  { %18 = vsyncpa [#allocation10], 0  ;;  %s51_s11 = sshll.u32 %s15906_s4, 4  ;;  %s52_s11 = int_to_ptr.vmem [resolvable:$true] %s51_s11 }
   0x3   :  { %s11324_s12 = scalar_lea.vmem %s52_s11, 16  ;;  %p11329_p1 = scmp.lt.s32.totalorder %s52_s11, %s52_s11 }
   0x4   :  { %p11325_p0 = scmp.ne.s32.totalorder %s52_s11, %s11324_s12  ;;  %p11330_p2 = scmp.lt.s32.totalorder %s11324_s12, %s11324_s12 }
   0x6   :  { %p11331_p3 = por %p11330_p2, %p11329_p1 }
   0x8   :  { %p11332_p4 = pnand %p11331_p3, %p11325_p0 }
   0xa   :  { %11335 = shalt.err (!%p11332_p4)
}
   0xb   :  { %s11388_s13 = smov [#allocation9]   ;;  %s11389_s14 = smov [#allocation5]  }
   0xc   :  { %54 = dma.vmem_to_smem %s52_s11, 16, %s11388_s13, [#allocation10]  }
   0xd   :  { %s26_s15 = sshll.u32 %s11389_s14, 4  ;;  %s11336_s18 = scalar_lea.hbm %s15903_s1, 24576  ;;  %s27_s15 = int_to_ptr.vmem [resolvable:$true] %s26_s15 }
   0xe   :  { %p11337_p5 = scmp.ne.s32.totalorder %s15903_s1, %s11336_s18  ;;  %p11340_p6 = scmp.lt.u32.totalorder %s11336_s18, %s15903_s1 }
  0x10   :  { %p11342_p7 = pnand %p11340_p6, %p11337_p5 }
  0x12   :  { %11345 = shalt.err (!%p11342_p7)
}
  0x13   :  { %s11346_s22 = scalar_lea.vmem %s27_s15, 24576  ;;  %p11351_p9 = scmp.lt.s32.totalorder %s27_s15, %s27_s15 }
  0x14   :  { %p11347_p8 = scmp.ne.s32.totalorder %s27_s15, %s11346_s22  ;;  %p11352_p10 = scmp.lt.s32.totalorder %s11346_s22, %s11346_s22 }
  0x16   :  { %p11353_p11 = por %p11352_p10, %p11351_p9 }
  0x18   :  { %p11354_p12 = pnand %p11353_p11, %p11347_p8 }
  0x1a   :  { %11357 = shalt.err (!%p11354_p12)
}
  0x1b   :  { %s11390_s23 = smov 128   ;;  %s11391_s24 = smov 8  }
  0x1c   :  { %32 = dma.hbm_to_vmem [thread:$0]  %s15903_s1, 24576, %s27_s15, [#allocation6], %s11390_s23, %s11390_s23, %s11391_s24  }
  0x1d   :  { %s41_s29 = sshll.u32 %s15905_s3, 4  ;;  %s61_s11 = sshll.u32 %s15907_s5, 4  ;;  %s42_s29 = int_to_ptr.vmem [resolvable:$true] %s41_s29  ;;  %s62_s11 = int_to_ptr.vmem [resolvable:$true] %s61_s11 }
  0x1e   :  { %s11358_s12 = scalar_lea.vmem %s42_s29, 32  ;;  %p11363_p0 = scmp.lt.s32.totalorder %s42_s29, %s42_s29 }
  0x1f   :  { %p11359_p13 = scmp.ne.s32.totalorder %s42_s29, %s11358_s12  ;;  %p11364_p1 = scmp.lt.s32.totalorder %s11358_s12, %s11358_s12 }
  0x21   :  { %p11365_p2 = por %p11364_p1, %p11363_p0 }
  0x23   :  { %p11366_p3 = pnand %p11365_p2, %p11359_p13 }
  0x25   :  { %11369 = shalt.err (!%p11366_p3)
}
  0x26   :  { %s11392_s13 = smov [#allocation8]   ;;  %s11370_s1 = scalar_lea.vmem %s62_s11, 16 }
  0x27   :  { %44 = dma.vmem_to_smem %s42_s29, 32, %s11392_s13, [#allocation7]  }
  0x28   :  { %p11371_p4 = scmp.ne.s32.totalorder %s62_s11, %s11370_s1  ;;  %p11375_p5 = scmp.lt.s32.totalorder %s62_s11, %s62_s11 }
  0x29   :  { %p11376_p6 = scmp.lt.s32.totalorder %s11370_s1, %s11370_s1 }
  0x2b   :  { %p11377_p7 = por %p11376_p6, %p11375_p5 }
  0x2d   :  { %p11378_p8 = pnand %p11377_p7, %p11371_p4 }
  0x2f   :  { %11381 = shalt.err (!%p11378_p8)
}
  0x30   :  { %s11393_s3 = smov [#allocation11]  }
  0x31   :  { %64 = dma.vmem_to_smem %s62_s11, 16, %s11393_s3, [#allocation10]  }
  0x32   :  { %11382 = dma.done.wait [#allocation6], 24576  }
  0x33   :  { %11383 = vsyncadd [#allocation6], 4294942720 }
  0x34   :  { %11384 = dma.done.wait [#allocation7], 32  }
  0x35   :  { %11385 = vsyncadd [#allocation7], 4294967264 }
  0x36   :  { %11386 = dma.done.wait [#allocation10], 32  }
  0x37   :  { %11387 = vsyncadd [#allocation10], 4294967264 }
  0x38   :  { %81 = sfence }
  0x39   :  { %v123_v0 = vld [vmem:[#allocation5] sm:$0xff]  ;;  %v124_v1 = vld [vmem:[#allocation5 + $0x8] sm:$0xff]  ;;  %v11394_v3 = vmov 0.0|0.0   ;;  %v125_v6 = vld [vmem:[#allocation5 + $0x10] sm:$0xff]  ;;  %vm11395_vm0 = vmmov 0   ;;  %v15912_v9 = vmov 0.0  }
  0x3a   :  { %v250_v2 = vld [vmem:[#allocation5 + $0x20] sm:$0xff]  ;;  %11001 = vmatprep.subr.bf16.mxu0 %v11394_v3  ;;  %v11002_v4 = vpack.c.bf16 %v124_v1, %v123_v0  ;;  %11007 = vmatprep.subr.bf16.mxu1 %v11394_v3  ;;  %v251_v5 = vld [vmem:[#allocation5 + $0x28] sm:$0xff]  ;;  %v126_v7 = vld [vmem:[#allocation5 + $0x18] sm:$0xff]  ;;  %vm134_vm1 = vcmask 261120   ;;  %vm84_vm2 = vcmask 484352   ;;  %s10082_s15 = sld [smem:[#allocation8 + $0x2]] }
  0x3b   :  { %v11008_v8 = vpack.c.bf16 %v251_v5, %v250_v2  ;;  %10481 = vmatprep.mubr.msk.f32.mxu0 %vm11395_vm0, %v15912_v9  ;;  %v252_v10 = vld [vmem:[#allocation5 + $0x30] sm:$0xff]  ;;  %v253_v11 = vld [vmem:[#allocation5 + $0x38] sm:$0xff]  ;;  %10492 = vmatprep.mubr.msk.f32.mxu1 %vm11395_vm0, %v15912_v9  ;;  %v11005_v12 = vpack.c.bf16 %v126_v7, %v125_v6  ;;  %v373_v14 = vld [vmem:[#allocation5 + $0x40] sm:$0xff]  ;;  %85 = vst.msk [vmem:[#allocation2 + $0x8] sm:$0x3] %vm84_vm2, %v15912_v9  ;;  %s11572_s16 = sld [smem:[#allocation8 + $0xa]] }
  0x3c   :  { %11003 = vmatpush3.bf16.msra.mxu0 %v11002_v4  ;;  %v11011_v13 = vpack.c.bf16 %v253_v11, %v252_v10  ;;  %v374_v15 = vld [vmem:[#allocation5 + $0x48] sm:$0xff]  ;;  %v496_v16 = vld [vmem:[#allocation5 + $0x60] sm:$0xff]  ;;  %v375_v21 = vld [vmem:[#allocation5 + $0x50] sm:$0xff]  ;;  %87 = vst.msk [vmem:[#allocation2 + $0x18] sm:$0x3] %vm84_vm2, %v15912_v9  ;;  %s11397_s4 = smov 127  }
  0x3d   :  { %11009 = vmatpush3.bf16.msra.mxu1 %v11008_v8  ;;  %11004 = vmatprep.subr.bf16.mxu0 %v11394_v3  ;;  %v497_v17 = vld [vmem:[#allocation5 + $0x68] sm:$0xff]  ;;  %v11484_v18 = vld [vmem:[%s15902_s0] sm:$0x3]  ;;  %v11014_v19 = vpack.c.bf16 %v374_v15, %v373_v14  ;;  %v376_v22 = vld [vmem:[#allocation5 + $0x58] sm:$0xff]  ;;  %89 = vst.msk [vmem:[#allocation2 + $0x28] sm:$0x3] %vm84_vm2, %v15912_v9 }
  0x3e   :  { %11010 = vmatprep.subr.bf16.mxu1 %v11394_v3  ;;  %v11020_v20 = vpack.c.bf16 %v497_v17, %v496_v16  ;;  %v498_v23 = vld [vmem:[#allocation5 + $0x70] sm:$0xff]  ;;  %v499_v24 = vld [vmem:[#allocation5 + $0x78] sm:$0xff]  ;;  %v11017_v25 = vpack.c.bf16 %v376_v22, %v375_v21  ;;  %v619_v27 = vld [vmem:[#allocation5 + $0x80] sm:$0xff]  ;;  %91 = vst.msk [vmem:[#allocation2 + $0x38] sm:$0x3] %vm84_vm2, %v15912_v9  ;;  %s10084_s21 = sld [smem:[#allocation8 + $0x12]] }
  0x3f   :  { %v11023_v26 = vpack.c.bf16 %v499_v24, %v498_v23  ;;  %v620_v28 = vld [vmem:[#allocation5 + $0x88] sm:$0xff]  ;;  %93 = vst.msk [vmem:[#allocation2 + $0x48] sm:$0x3] %vm84_vm2, %v15912_v9  ;;  %95 = vst.msk [vmem:[#allocation2 + $0x58] sm:$0x3] %vm84_vm2, %v15912_v9  ;;  %v742_v29 = vld [vmem:[#allocation5 + $0xa0] sm:$0xff] }
  0x40   :  { %11006 = vmatpush3.bf16.msra.mxu0 %v11005_v12  ;;  %97 = vst.msk [vmem:[#allocation2 + $0x68] sm:$0x3] %vm84_vm2, %v15912_v9  ;;  %99 = vst.msk [vmem:[#allocation2 + $0x78] sm:$0x3] %vm84_vm2, %v15912_v9  ;;  %v743_v30 = vld [vmem:[#allocation5 + $0xa8] sm:$0xff]  ;;  %v11026_v31 = vpack.c.bf16 %v620_v28, %v619_v27  ;;  %v621_v33 = vld [vmem:[#allocation5 + $0x90] sm:$0xff] }
  0x41   :  { %11012 = vmatpush3.bf16.msra.mxu1 %v11011_v13  ;;  %11013 = vmatprep.subr.bf16.mxu0 %v11394_v3  ;;  %101 = vst.msk [vmem:[#allocation2 + $0x88] sm:$0x3] %vm84_vm2, %v15912_v9  ;;  %103 = vst.msk [vmem:[#allocation2 + $0x98] sm:$0x3] %vm84_vm2, %v15912_v9  ;;  %v11032_v32 = vpack.c.bf16 %v743_v30, %v742_v29  ;;  %v622_v34 = vld [vmem:[#allocation5 + $0x98] sm:$0xff]  ;;  %v744_v35 = vld [vmem:[#allocation5 + $0xb0] sm:$0xff] }
  0x42   :  { %11019 = vmatprep.subr.bf16.mxu1 %v11394_v3  ;;  %105 = vst.msk [vmem:[#allocation2 + $0xa8] sm:$0x3] %vm84_vm2, %v15912_v9  ;;  %107 = vst.msk [vmem:[#allocation2 + $0xb8] sm:$0x3] %vm84_vm2, %v15912_v9  ;;  %v745_v36 = vld [vmem:[#allocation5 + $0xb8] sm:$0xff]  ;;  %v11029_v37 = vpack.c.bf16 %v622_v34, %v621_v33  ;;  %v865_v39 = vld [vmem:[#allocation5 + $0xc0] sm:$0xff] }
  0x43   :  { %10482 = vmatmul.mubr.msk.f32.vlgmr.msra.gmra.mrb[0].mxu0 %vm134_vm1, %v11484_v18  ;;  %v11035_v38 = vpack.c.bf16 %v745_v36, %v744_v35  ;;  %v866_v40 = vld [vmem:[#allocation5 + $0xc8] sm:$0xff]  ;;  %v988_v41 = vld [vmem:[#allocation5 + $0xe0] sm:$0xff]  ;;  %v867_v45 = vld [vmem:[#allocation5 + $0xd0] sm:$0xff]  ;;  %s11624_s22 = sld [smem:[#allocation8 + $0x1]]  ;;  %s11398_s28 = smov 126   ;;  %vm82_vm3 = vcmask 490496  }
  0x44   :  { %11015 = vmatpush3.bf16.msra.mxu0 %v11014_v19  ;;  %10493 = vmatmul.mubr.msk.f32.vlgmr.msra.gmra.mrb[0].mxu1 %vm134_vm1, %v11484_v18  ;;  %v989_v42 = vld [vmem:[#allocation5 + $0xe8] sm:$0xff]  ;;  %v11038_v43 = vpack.c.bf16 %v866_v40, %v865_v39  ;;  %v868_v46 = vld [vmem:[#allocation5 + $0xd8] sm:$0xff]  ;;  %v990_v47 = vld [vmem:[#allocation5 + $0xf0] sm:$0xff]  ;;  %v11570_v19 = vstv %s10082_s15  ;;  %v11602_v40 = vstv %s11572_s16  ;;  %s10086_s27 = sld [smem:[#allocation8 + $0x9]]  ;;  %s6502_s30 = sld [smem:[#allocation8]]  ;;  %83 = vst.msk [vmem:[#allocation2] sm:$0xff] %vm82_vm3, %v15912_v9 }
  0x45   :  { %11016 = vmatprep.subr.bf16.mxu0 %v11394_v3  ;;  %11021 = vmatpush3.bf16.msra.mxu1 %v11020_v20  ;;  %v11044_v44 = vpack.c.bf16 %v989_v42, %v988_v41  ;;  %v991_v48 = vld [vmem:[#allocation5 + $0xf8] sm:$0xff]  ;;  %v11041_v49 = vpack.c.bf16 %v868_v46, %v867_v45  ;;  %v1111_v51 = vld [vmem:[#allocation5 + $0x100] sm:$0xff]  ;;  %v1112_v52 = vld [vmem:[#allocation5 + $0x108] sm:$0xff]  ;;  %s10087_s29 = sld [smem:[#allocation8 + $0x11]]  ;;  %s10088_s10 = sld [smem:[#allocation8 + $0x8]]  ;;  %86 = vst.msk [vmem:[#allocation2 + $0x10] sm:$0xff] %vm82_vm3, %v15912_v9 }
  0x46   :  { %10503 = vmatprep.mubr.msk.f32.mxu0 %vm11395_vm0, %v15912_v9  ;;  %11022 = vmatprep.subr.bf16.mxu1 %v11394_v3  ;;  %v11047_v50 = vpack.c.bf16 %v991_v48, %v990_v47  ;;  %v1235_v53 = vld [vmem:[#allocation5 + $0x120] sm:$0xff]  ;;  %v1236_v54 = vld [vmem:[#allocation5 + $0x128] sm:$0xff]  ;;  %v11050_v55 = vpack.c.bf16 %v1112_v52, %v1111_v51  ;;  %v1113_v57 = vld [vmem:[#allocation5 + $0x110] sm:$0xff]  ;;  %s11399_s11 = smov 125   ;;  %s10089_s12 = sld [smem:[#allocation8 + $0x10]]  ;;  %88 = vst.msk [vmem:[#allocation2 + $0x20] sm:$0xff] %vm82_vm3, %v15912_v9 }
  0x47   :  { %10514 = vmatprep.mubr.msk.f32.mxu1 %vm11395_vm0, %v15912_v9  ;;  %v11056_v56 = vpack.c.bf16 %v1236_v54, %v1235_v53  ;;  %v1114_v58 = vld [vmem:[#allocation5 + $0x118] sm:$0xff]  ;;  %v1237_v59 = vld [vmem:[#allocation5 + $0x130] sm:$0xff]  ;;  %v1358_v63 = vld [vmem:[#allocation5 + $0x140] sm:$0xff]  ;;  %s10105_s13 = sld [smem:[#allocation8 + $0x1a]]  ;;  %90 = vst.msk [vmem:[#allocation2 + $0x30] sm:$0xff] %vm82_vm3, %v15912_v9  ;;  %vm246_vm4 = vcmask 458776  }
  0x48   :  { %11018 = vmatpush3.bf16.msra.mxu0 %v11017_v25  ;;  %v1238_v60 = vld [vmem:[#allocation5 + $0x138] sm:$0xff]  ;;  %v11053_v61 = vpack.c.bf16 %v1114_v58, %v1113_v57  ;;  %v1359_v0 = vld [vmem:[#allocation5 + $0x148] sm:$0xff]  ;;  %v1481_v1 = vld [vmem:[#allocation5 + $0x160] sm:$0xff]  ;;  %s10106_s1 = sld [smem:[#allocation8 + $0x22]]  ;;  %92 = vst.msk [vmem:[#allocation2 + $0x40] sm:$0xff] %vm82_vm3, %v15912_v9  ;;  %s10070_s24 = sld [smem:[#allocation8 + $0x6]] }
  0x49   :  { %11024 = vmatpush3.bf16.msra.mxu1 %v11023_v26  ;;  %11025 = vmatprep.subr.bf16.mxu0 %v11394_v3  ;;  %v11059_v62 = vpack.c.bf16 %v1238_v60, %v1237_v59  ;;  %v1482_v2 = vld [vmem:[#allocation5 + $0x168] sm:$0xff]  ;;  %v11062_v4 = vpack.c.bf16 %v1359_v0, %v1358_v63  ;;  %v1360_v6 = vld [vmem:[#allocation5 + $0x150] sm:$0xff]  ;;  %v1361_v7 = vld [vmem:[#allocation5 + $0x158] sm:$0xff]  ;;  %94 = vst.msk [vmem:[#allocation2 + $0x50] sm:$0xff] %vm82_vm3, %v15912_v9  ;;  %s10071_s25 = sld [smem:[#allocation8 + $0xe]]  ;;  %s12428_s3 = sld [smem:[#allocation9 + $0x1]] }
  0x4a   :  { %11031 = vmatprep.subr.bf16.mxu1 %v11394_v3  ;;  %v11068_v5 = vpack.c.bf16 %v1482_v2, %v1481_v1  ;;  %v1483_v8 = vld [vmem:[#allocation5 + $0x170] sm:$0xff]  ;;  %v1484_v10 = vld [vmem:[#allocation5 + $0x178] sm:$0xff]  ;;  %v11065_v11 = vpack.c.bf16 %v1361_v7, %v1360_v6  ;;  %v1604_v13 = vld [vmem:[#allocation5 + $0x180] sm:$0xff]  ;;  %96 = vst.msk [vmem:[#allocation2 + $0x60] sm:$0xff] %vm82_vm3, %v15912_v9  ;;  %s10072_s26 = sld [smem:[#allocation8 + $0x16]]  ;;  %s12434_s5 = sld [smem:[#allocation8 + $0x4]] }
  0x4b   :  { %10504 = vmatmul.mubr.msk.f32.vlgmr.msra.gmra.mrb[2].mxu0 %vm134_vm1, %v11484_v18  ;;  %v11071_v12 = vpack.c.bf16 %v1484_v10, %v1483_v8  ;;  %v1605_v14 = vld [vmem:[#allocation5 + $0x188] sm:$0xff]  ;;  %v1727_v15 = vld [vmem:[#allocation5 + $0x1a0] sm:$0xff]  ;;  %v1606_v21 = vld [vmem:[#allocation5 + $0x190] sm:$0xff]  ;;  %v11653_v10 = vstv %s11624_s22  ;;  %98 = vst.msk [vmem:[#allocation2 + $0x70] sm:$0xff] %vm82_vm3, %v15912_v9  ;;  %s12452_s14 = sld [smem:[#allocation8 + $0x3]]  ;;  %s12461_s16 = sld [smem:[#allocation8 + $0xc]] }
  0x4c   :  { %11027 = vmatpush3.bf16.msra.mxu0 %v11026_v31  ;;  %10515 = vmatmul.mubr.msk.f32.vlgmr.msra.gmra.mrb[2].mxu1 %vm134_vm1, %v11484_v18  ;;  %v1728_v16 = vld [vmem:[#allocation5 + $0x1a8] sm:$0xff]  ;;  %v11074_v17 = vpack.c.bf16 %v1605_v14, %v1604_v13  ;;  %v1607_v22 = vld [vmem:[#allocation5 + $0x198] sm:$0xff]  ;;  %v1729_v23 = vld [vmem:[#allocation5 + $0x1b0] sm:$0xff]  ;;  %100 = vst.msk [vmem:[#allocation2 + $0x80] sm:$0xff] %vm82_vm3, %v15912_v9  ;;  %s12454_s15 = sld [smem:[#allocation8 + $0xb]]  ;;  %s12470_s18 = sld [smem:[#allocation8 + $0x1f]] }
  0x4d   :  { %11028 = vmatprep.subr.bf16.mxu0 %v11394_v3  ;;  %11033 = vmatpush3.bf16.msra.mxu1 %v11032_v32  ;;  %v11080_v20 = vpack.c.bf16 %v1728_v16, %v1727_v15  ;;  %v1730_v24 = vld [vmem:[#allocation5 + $0x1b8] sm:$0xff]  ;;  %v11576_v25 = vld [vmem:[#allocation2 + $0x9] sm:$0x1]  ;;  %v11077_v29 = vpack.c.bf16 %v1607_v22, %v1606_v21  ;;  %v1850_v33 = vld [vmem:[#allocation5 + $0x1c0] sm:$0xff]  ;;  %102 = vst.msk [vmem:[#allocation2 + $0x90] sm:$0xff] %vm82_vm3, %v15912_v9  ;;  %s12463_s17 = sld [smem:[#allocation8 + $0x13]] }
  0x4e   :  { %10525 = vmatprep.mubr.msk.f32.mxu0 %vm11395_vm0, %v15912_v9  ;;  %11034 = vmatprep.subr.bf16.mxu1 %v11394_v3  ;;  %v6349_v26 = vmul.f32 %v11570_v19, %v11576_v25  ;;  %v9896_v27 = vld [vmem:[%s15909_s7 + $0x8] sm:$0x3]  ;;  %v9898_v28 = vld [vmem:[%s15909_s7 + $0x18] sm:$0x3]  ;;  %v11083_v32 = vpack.c.bf16 %v1730_v24, %v1729_v23  ;;  %v1973_v36 = vld [vmem:[#allocation5 + $0x1e0] sm:$0xff]  ;;  %v6375_v46 = vmul.f32 %v11602_v40, %v11576_v25  ;;  %s12479_s19 = sld [smem:[#allocation8 + $0x27]] }
  0x4f   :  { %10536 = vmatprep.mubr.msk.f32.mxu1 %vm11395_vm0, %v15912_v9  ;;  %v9901_v30 = vmul.f32 1.442695, %v9896_v27  ;;  %v9905_v31 = vmul.f32 1.442695, %v9898_v28  ;;  %v1851_v34 = vld [vmem:[#allocation5 + $0x1c8] sm:$0xff]  ;;  %v1852_v42 = vld [vmem:[#allocation5 + $0x1d0] sm:$0xff]  ;;  %v6427_v16 = vmul.f32 %v11653_v10, %v11576_v25  ;;  %v11673_v28 = vstv %s10086_s27 }
  0x50   :  { %11030 = vmatpush3.bf16.msra.mxu0 %v11029_v37  ;;  %v11591_v35 = vld [vmem:[#allocation2 + $0x69] sm:$0x1]  ;;  %6358 = vrot.lane.b32.xlu1 %v6349_v26, %s11397_s4  ;;  %v11086_v39 = vpack.c.bf16 %v1851_v34, %v1850_v33  ;;  %v1976_v45 = vld [vmem:[#allocation5 + $0x1f8] sm:$0xff]  ;;  %v2220_v51 = vld [vmem:[#allocation5 + $0x220] sm:$0xff]  ;;  %v6453_v34 = vmul.f32 %v11673_v28, %v11576_v25  ;;  %104 = vst.msk [vmem:[#allocation2 + $0xa0] sm:$0xff] %vm82_vm3, %v15912_v9  ;;  %s10073_s27 = sld [smem:[#allocation8 + $0x5]] }
  0x51   :  { %11036 = vmatpush3.bf16.msra.mxu1 %v11035_v38  ;;  %11037 = vmatprep.subr.bf16.mxu0 %v11394_v3  ;;  %v1974_v37 = vld [vmem:[#allocation5 + $0x1e8] sm:$0xff]  ;;  %11303 = vpow2.f32 %v9901_v30  ;;  %v6351_v38 = vmul.f32 %v11570_v19, %v11591_v35  ;;  %v6377_v53 = vmul.f32 %v11602_v40, %v11591_v35  ;;  %v2098_v59 = vld [vmem:[#allocation5 + $0x210] sm:$0xff]  ;;  %v2099_v60 = vld [vmem:[#allocation5 + $0x218] sm:$0xff]  ;;  %v6429_v26 = vmul.f32 %v11653_v10, %v11591_v35  ;;  %s12481_s20 = sld [smem:[#allocation8 + $0x2f]]  ;;  %s12494_s22 = sld [smem:[#allocation8 + $0x14]] }
  0x52   :  { %11043 = vmatprep.subr.bf16.mxu1 %v11394_v3  ;;  %11305 = vpow2.f32 %v9905_v31  ;;  %v11092_v41 = vpack.c.bf16 %v1974_v37, %v1973_v36  ;;  %v2221_v52 = vld [vmem:[#allocation5 + $0x228] sm:$0xff]  ;;  %v11101_v0 = vpack.c.bf16 %v2099_v60, %v2098_v59  ;;  %v2343_v2 = vld [vmem:[#allocation5 + $0x240] sm:$0xff]  ;;  %v2346_v13 = vld [vmem:[#allocation5 + $0x258] sm:$0xff]  ;;  %106 = vst.msk [vmem:[#allocation2 + $0xb0] sm:$0xff] %vm82_vm3, %v15912_v9  ;;  %s12605_s23 = sld [smem:[#allocation8 + $0x19]]  ;;  %vm110_vm5 = vcmask 509952  }
  0x53   :  { %10526 = vmatmul.mubr.msk.f32.vlgmr.msra.gmra.mrb[4].mxu0 %vm134_vm1, %v11484_v18  ;;  %v11104_v58 = vpack.c.bf16 %v2221_v52, %v2220_v51  ;;  %v2467_v6 = vld [vmem:[#allocation5 + $0x268] sm:$0xff]  ;;  %v2468_v14 = vld [vmem:[#allocation5 + $0x270] sm:$0xff]  ;;  %v2469_v15 = vld [vmem:[#allocation5 + $0x278] sm:$0xff]  ;;  %vm108_vm6 = vcmask 515072   ;;  %vm9282_vm7 = vcmask 483352   ;;  %vm9280_vm8 = vcmask 490520  }
  0x54   :  { %11039 = vmatpush3.bf16.msra.mxu0 %v11038_v43  ;;  %10537 = vmatmul.mubr.msk.f32.vlgmr.msra.gmra.mrb[4].mxu1 %vm134_vm1, %v11484_v18  ;;  %v1853_v43 = vld [vmem:[#allocation5 + $0x1d8] sm:$0xff]  ;;  %v2589_v21 = vld [vmem:[#allocation5 + $0x280] sm:$0xff]  ;;  %v2590_v22 = vld [vmem:[#allocation5 + $0x288] sm:$0xff] }
  0x55   :  { %11040 = vmatprep.subr.bf16.mxu0 %v11394_v3  ;;  %11045 = vmatpush3.bf16.msra.mxu1 %v11044_v44  ;;  %v1975_v44 = vld [vmem:[#allocation5 + $0x1f0] sm:$0xff]  ;;  %v11089_v47 = vpack.c.bf16 %v1853_v43, %v1852_v42  ;;  %v2712_v23 = vld [vmem:[#allocation5 + $0x2a0] sm:$0xff]  ;;  %v2713_v24 = vld [vmem:[#allocation5 + $0x2a8] sm:$0xff]  ;;  %v11122_v27 = vpack.c.bf16 %v2590_v22, %v2589_v21  ;;  %v6455_v43 = vmul.f32 %v11673_v28, %v11591_v35 }
  0x56   :  { %10547 = vmatprep.mubr.msk.f32.mxu0 %vm11395_vm0, %v15912_v9  ;;  %11046 = vmatprep.subr.bf16.mxu1 %v11394_v3  ;;  %v11095_v48 = vpack.c.bf16 %v1976_v45, %v1975_v44  ;;  %v2591_v30 = vld [vmem:[#allocation5 + $0x290] sm:$0xff]  ;;  %v2592_v31 = vld [vmem:[#allocation5 + $0x298] sm:$0xff]  ;;  %v2959_v42 = vld [vmem:[#allocation5 + $0x2e8] sm:$0xff]  ;;  %v11693_v45 = vstv %s10087_s29  ;;  %s10067_s29 = sld [smem:[#allocation8 + $0x7]] }
  0x57   :  { %10558 = vmatprep.mubr.msk.f32.mxu1 %vm11395_vm0, %v15912_v9  ;;  %6362 = vrot.lane.b32.xlu1 %v6351_v38, %s11397_s4  ;;  %v2715_v33 = vld [vmem:[#allocation5 + $0x2b8] sm:$0xff]  ;;  %v11125_v36 = vpack.c.bf16 %v2592_v31, %v2591_v30  ;;  %v2835_v38 = vld [vmem:[#allocation5 + $0x2c0] sm:$0xff]  ;;  %v6479_v51 = vmul.f32 %v11693_v45, %v11576_v25  ;;  %v6481_v59 = vmul.f32 %v11693_v45, %v11591_v35  ;;  %v3453_v21 = vld [vmem:[#allocation5 + $0x370] sm:$0xff] }
  0x58   :  { %11042 = vmatpush3.bf16.msra.mxu0 %v11041_v49  ;;  %v2096_v49 = vld [vmem:[#allocation5 + $0x200] sm:$0xff]  ;;  %v3454_v22 = vld [vmem:[#allocation5 + $0x378] sm:$0xff]  ;;  %v3698_v31 = vld [vmem:[#allocation5 + $0x3a8] sm:$0xff] }
  0x59   :  { %11048 = vmatpush3.bf16.msra.mxu1 %v11047_v50  ;;  %11049 = vmatprep.subr.bf16.mxu0 %v11394_v3  ;;  %v2097_v50 = vld [vmem:[#allocation5 + $0x208] sm:$0xff]  ;;  %v3697_v30 = vld [vmem:[#allocation5 + $0x3a0] sm:$0xff] }
  0x5a   :  { %11055 = vmatprep.subr.bf16.mxu1 %v11394_v3 }
  0x5b   :  { %10548 = vmatmul.mubr.msk.f32.vlgmr.msra.gmra.mrb[6].mxu0 %vm134_vm1, %v11484_v18  ;;  %6384 = vrot.lane.b32.xlu1 %v6375_v46, %s11397_s4  ;;  %v11304_v54 = vpop.eup %11303 }
  0x5c   :  { %11051 = vmatpush3.bf16.msra.mxu0 %v11050_v55  ;;  %10559 = vmatmul.mubr.msk.f32.vlgmr.msra.gmra.mrb[6].mxu1 %vm134_vm1, %v11484_v18  ;;  %v11098_v55 = vpack.c.bf16 %v2097_v50, %v2096_v49  ;;  %v11306_v57 = vpop.eup %11305  ;;  %9908 = vst.msk [vmem:[%s15911_s9 + $0x8] sm:$0x3] %vm84_vm2, %v11304_v54  ;;  %v2960_v49 = vld [vmem:[#allocation5 + $0x2f0] sm:$0xff]  ;;  %v2961_v50 = vld [vmem:[#allocation5 + $0x2f8] sm:$0xff]  ;;  %v3081_v54 = vld [vmem:[#allocation5 + $0x300] sm:$0xff] }
  0x5d   :  { %11052 = vmatprep.subr.bf16.mxu0 %v11394_v3  ;;  %11057 = vmatpush3.bf16.msra.mxu1 %v11056_v56  ;;  %v11622_v56 = vstv %s10084_s21  ;;  %9910 = vst.msk [vmem:[%s15911_s9 + $0x18] sm:$0x3] %vm84_vm2, %v11306_v57  ;;  %v3205_v57 = vld [vmem:[#allocation5 + $0x320] sm:$0xff]  ;;  %s11401_s21 = smov 3  }
  0x5e   :  { %10569 = vmatprep.mubr.msk.f32.mxu0 %vm11395_vm0, %v15912_v9  ;;  %11058 = vmatprep.subr.bf16.mxu1 %v11394_v3  ;;  %v6401_v63 = vmul.f32 %v11622_v56, %v11576_v25  ;;  %v6403_v7 = vmul.f32 %v11622_v56, %v11591_v35 }
  0x5f   :  { %10580 = vmatprep.mubr.msk.f32.mxu1 %vm11395_vm0, %v15912_v9  ;;  %6388 = vrot.lane.b32.xlu1 %v6377_v53, %s11397_s4  ;;  %v11143_v53 = vpack.c.bf16 %v2961_v50, %v2960_v49  ;;  %v3944_v49 = vld [vmem:[#allocation5 + $0x3e8] sm:$0xff] }
  0x60   :  { %11054 = vmatpush3.bf16.msra.mxu0 %v11053_v61  ;;  %v2222_v61 = vld [vmem:[#allocation5 + $0x230] sm:$0xff] }
  0x61   :  { %11060 = vmatpush3.bf16.msra.mxu1 %v11059_v62  ;;  %11061 = vmatprep.subr.bf16.mxu0 %v11394_v3  ;;  %v2223_v62 = vld [vmem:[#allocation5 + $0x238] sm:$0xff] }
  0x62   :  { %11067 = vmatprep.subr.bf16.mxu1 %v11394_v3  ;;  %v11107_v1 = vpack.c.bf16 %v2223_v62, %v2222_v61  ;;  %v11713_v61 = vstv %s6502_s30  ;;  %s10074_s30 = sld [smem:[#allocation8 + $0xd]] }
  0x63   :  { %10570 = vmatmul.mubr.msk.f32.vlgmr.msra.gmra.mrb[8].mxu0 %vm134_vm1, %v11484_v18  ;;  %6410 = vrot.lane.b32.xlu1 %v6401_v63, %s11397_s4  ;;  %v3083_v63 = vld [vmem:[#allocation5 + $0x310] sm:$0xff] }
  0x64   :  { %11063 = vmatpush3.bf16.msra.mxu0 %v11062_v4  ;;  %10581 = vmatmul.mubr.msk.f32.vlgmr.msra.gmra.mrb[8].mxu1 %vm134_vm1, %v11484_v18  ;;  %v2344_v4 = vld [vmem:[#allocation5 + $0x248] sm:$0xff] }
  0x65   :  { %11064 = vmatprep.subr.bf16.mxu0 %v11394_v3  ;;  %11069 = vmatpush3.bf16.msra.mxu1 %v11068_v5  ;;  %v2466_v5 = vld [vmem:[#allocation5 + $0x260] sm:$0xff]  ;;  %v11110_v8 = vpack.c.bf16 %v2344_v4, %v2343_v2  ;;  %v3208_v2 = vld [vmem:[#allocation5 + $0x338] sm:$0xff]  ;;  %v6505_v4 = vmul.f32 %v11713_v61, %v11576_v25 }
  0x66   :  { %10591 = vmatprep.mubr.msk.f32.mxu0 %vm11395_vm0, %v15912_v9  ;;  %11070 = vmatprep.subr.bf16.mxu1 %v11394_v3 }
  0x67   :  { %10602 = vmatprep.mubr.msk.f32.mxu1 %vm11395_vm0, %v15912_v9  ;;  %6414 = vrot.lane.b32.xlu1 %v6403_v7, %s11397_s4  ;;  %v3328_v7 = vld [vmem:[#allocation5 + $0x340] sm:$0xff] }
  0x68   :  { %11066 = vmatpush3.bf16.msra.mxu0 %v11065_v11  ;;  %v11116_v11 = vpack.c.bf16 %v2467_v6, %v2466_v5 }
  0x69   :  { %11072 = vmatpush3.bf16.msra.mxu1 %v11071_v12  ;;  %11073 = vmatprep.subr.bf16.mxu0 %v11394_v3  ;;  %v2345_v12 = vld [vmem:[#allocation5 + $0x250] sm:$0xff] }
  0x6a   :  { %11079 = vmatprep.subr.bf16.mxu1 %v11394_v3 }
  0x6b   :  { %10592 = vmatmul.mubr.msk.f32.vlgmr.msra.gmra.mrb[10].mxu0 %vm134_vm1, %v11484_v18  ;;  %6436 = vrot.lane.b32.xlu1 %v6427_v16, %s11398_s28 }
  0x6c   :  { %11075 = vmatpush3.bf16.msra.mxu0 %v11074_v17  ;;  %10603 = vmatmul.mubr.msk.f32.vlgmr.msra.gmra.mrb[10].mxu1 %vm134_vm1, %v11484_v18  ;;  %v11113_v17 = vpack.c.bf16 %v2346_v13, %v2345_v12  ;;  %v3452_v12 = vld [vmem:[#allocation5 + $0x368] sm:$0xff]  ;;  %v6507_v13 = vmul.f32 %v11713_v61, %v11591_v35 }
  0x6d   :  { %11076 = vmatprep.subr.bf16.mxu0 %v11394_v3  ;;  %11081 = vmatpush3.bf16.msra.mxu1 %v11080_v20  ;;  %v11119_v20 = vpack.c.bf16 %v2469_v15, %v2468_v14  ;;  %v11733_v15 = vstv %s10088_s10  ;;  %s6035_s10 = sld [smem:[#allocation9]] }
  0x6e   :  { %10613 = vmatprep.mubr.msk.f32.mxu0 %vm11395_vm0, %v15912_v9  ;;  %11082 = vmatprep.subr.bf16.mxu1 %v11394_v3 }
  0x6f   :  { %10624 = vmatprep.mubr.msk.f32.mxu1 %vm11395_vm0, %v15912_v9  ;;  %6440 = vrot.lane.b32.xlu1 %v6429_v26, %s11398_s28  ;;  %v11167_v26 = vpack.c.bf16 %v3454_v22, %v3453_v21  ;;  %v4314_v21 = vld [vmem:[#allocation5 + $0x448] sm:$0xff]  ;;  %v4436_v22 = vld [vmem:[#allocation5 + $0x460] sm:$0xff] }
  0x70   :  { %11078 = vmatpush3.bf16.msra.mxu0 %v11077_v29  ;;  %v11128_v29 = vpack.c.bf16 %v2713_v24, %v2712_v23  ;;  %v6531_v23 = vmul.f32 %v11733_v15, %v11576_v25 }
  0x71   :  { %11084 = vmatpush3.bf16.msra.mxu1 %v11083_v32  ;;  %11085 = vmatprep.subr.bf16.mxu0 %v11394_v3  ;;  %v2714_v32 = vld [vmem:[#allocation5 + $0x2b0] sm:$0xff] }
  0x72   :  { %11091 = vmatprep.subr.bf16.mxu1 %v11394_v3  ;;  %v11131_v37 = vpack.c.bf16 %v2715_v33, %v2714_v32  ;;  %v6533_v32 = vmul.f32 %v11733_v15, %v11591_v35 }
  0x73   :  { %10614 = vmatmul.mubr.msk.f32.vlgmr.msra.gmra.mrb[12].mxu0 %vm134_vm1, %v11484_v18  ;;  %6462 = vrot.lane.b32.xlu1 %v6453_v34, %s11398_s28  ;;  %v11753_v34 = vstv %s10089_s12  ;;  %s12414_s12 = sld [smem:[#allocation8 + $0x15]] }
  0x74   :  { %11087 = vmatpush3.bf16.msra.mxu0 %v11086_v39  ;;  %10625 = vmatmul.mubr.msk.f32.vlgmr.msra.gmra.mrb[12].mxu1 %vm134_vm1, %v11484_v18  ;;  %v2836_v39 = vld [vmem:[#allocation5 + $0x2c8] sm:$0xff] }
  0x75   :  { %11088 = vmatprep.subr.bf16.mxu0 %v11394_v3  ;;  %11093 = vmatpush3.bf16.msra.mxu1 %v11092_v41  ;;  %v2958_v41 = vld [vmem:[#allocation5 + $0x2e0] sm:$0xff]  ;;  %v11134_v44 = vpack.c.bf16 %v2836_v39, %v2835_v38  ;;  %v3577_v38 = vld [vmem:[#allocation5 + $0x398] sm:$0xff]  ;;  %v3699_v39 = vld [vmem:[#allocation5 + $0x3b0] sm:$0xff] }
  0x76   :  { %10635 = vmatprep.mubr.msk.f32.mxu0 %vm11395_vm0, %v15912_v9  ;;  %11094 = vmatprep.subr.bf16.mxu1 %v11394_v3  ;;  %v11140_v46 = vpack.c.bf16 %v2959_v42, %v2958_v41  ;;  %v3700_v41 = vld [vmem:[#allocation5 + $0x3b8] sm:$0xff]  ;;  %v6557_v42 = vmul.f32 %v11753_v34, %v11576_v25  ;;  %v6559_v25 = vmul.f32 %v11753_v34, %v11591_v35 }
  0x77   :  { %10646 = vmatprep.mubr.msk.f32.mxu1 %vm11395_vm0, %v15912_v9  ;;  %6466 = vrot.lane.b32.xlu1 %v6455_v43, %s11398_s28 }
  0x78   :  { %11090 = vmatpush3.bf16.msra.mxu0 %v11089_v47  ;;  %v2837_v47 = vld [vmem:[#allocation5 + $0x2d0] sm:$0xff] }
  0x79   :  { %11096 = vmatpush3.bf16.msra.mxu1 %v11095_v48  ;;  %11097 = vmatprep.subr.bf16.mxu0 %v11394_v3  ;;  %v2838_v48 = vld [vmem:[#allocation5 + $0x2d8] sm:$0xff] }
  0x7a   :  { %11103 = vmatprep.subr.bf16.mxu1 %v11394_v3  ;;  %v11137_v52 = vpack.c.bf16 %v2838_v48, %v2837_v47  ;;  %v3821_v47 = vld [vmem:[#allocation5 + $0x3c8] sm:$0xff]  ;;  %v3943_v48 = vld [vmem:[#allocation5 + $0x3e0] sm:$0xff] }
  0x7b   :  { %10636 = vmatmul.mubr.msk.f32.vlgmr.msra.gmra.mrb[14].mxu0 %vm134_vm1, %v11484_v18  ;;  %6488 = vrot.lane.b32.xlu1 %v6479_v51, %s11398_s28  ;;  %v6849_v51 = vld [vmem:[#allocation2 + $0x19] sm:$0x1] }
  0x7c   :  { %11099 = vmatpush3.bf16.msra.mxu0 %v11098_v55  ;;  %10647 = vmatmul.mubr.msk.f32.vlgmr.msra.gmra.mrb[14].mxu1 %vm134_vm1, %v11484_v18  ;;  %v3082_v55 = vld [vmem:[#allocation5 + $0x308] sm:$0xff] }
  0x7d   :  { %11100 = vmatprep.subr.bf16.mxu0 %v11394_v3  ;;  %11105 = vmatpush3.bf16.msra.mxu1 %v11104_v58  ;;  %v3206_v58 = vld [vmem:[#allocation5 + $0x328] sm:$0xff]  ;;  %v11146_v60 = vpack.c.bf16 %v3082_v55, %v3081_v54  ;;  %v3822_v54 = vld [vmem:[#allocation5 + $0x3d0] sm:$0xff]  ;;  %v3823_v55 = vld [vmem:[#allocation5 + $0x3d8] sm:$0xff] }
  0x7e   :  { %10657 = vmatprep.mubr.msk.f32.mxu0 %vm11395_vm0, %v15912_v9  ;;  %11106 = vmatprep.subr.bf16.mxu1 %v11394_v3  ;;  %v11152_v62 = vpack.c.bf16 %v3206_v58, %v3205_v57  ;;  %v3945_v57 = vld [vmem:[#allocation5 + $0x3f0] sm:$0xff]  ;;  %v3946_v58 = vld [vmem:[#allocation5 + $0x3f8] sm:$0xff] }
  0x7f   :  { %10668 = vmatprep.mubr.msk.f32.mxu1 %vm11395_vm0, %v15912_v9  ;;  %6492 = vrot.lane.b32.xlu1 %v6481_v59, %s11398_s28  ;;  %v11185_v59 = vpack.c.bf16 %v3823_v55, %v3822_v54  ;;  %v4807_v55 = vld [vmem:[#allocation5 + $0x4d0] sm:$0xff] }
  0x80   :  { %11102 = vmatpush3.bf16.msra.mxu0 %v11101_v0  ;;  %v3084_v0 = vld [vmem:[#allocation5 + $0x318] sm:$0xff] }
  0x81   :  { %11108 = vmatpush3.bf16.msra.mxu1 %v11107_v1  ;;  %11109 = vmatprep.subr.bf16.mxu0 %v11394_v3  ;;  %v3207_v1 = vld [vmem:[#allocation5 + $0x330] sm:$0xff]  ;;  %v11149_v5 = vpack.c.bf16 %v3084_v0, %v3083_v63  ;;  %v4066_v63 = vld [vmem:[#allocation5 + $0x400] sm:$0xff]  ;;  %v4067_v0 = vld [vmem:[#allocation5 + $0x408] sm:$0xff] }
  0x82   :  { %11115 = vmatprep.subr.bf16.mxu1 %v11394_v3  ;;  %v11155_v6 = vpack.c.bf16 %v3208_v2, %v3207_v1  ;;  %v4190_v1 = vld [vmem:[#allocation5 + $0x420] sm:$0xff]  ;;  %v4191_v2 = vld [vmem:[#allocation5 + $0x428] sm:$0xff] }
  0x83   :  { %10658 = vmatmul.mubr.msk.f32.vlgmr.msra.gmra.mrb[16].mxu0 %vm134_vm1, %v11484_v18  ;;  %6514 = vrot.lane.b32.xlu1 %v6505_v4, %s11399_s11 }
  0x84   :  { %11111 = vmatpush3.bf16.msra.mxu0 %v11110_v8  ;;  %10669 = vmatmul.mubr.msk.f32.vlgmr.msra.gmra.mrb[16].mxu1 %vm134_vm1, %v11484_v18  ;;  %v3329_v8 = vld [vmem:[#allocation5 + $0x348] sm:$0xff] }
  0x85   :  { %11112 = vmatprep.subr.bf16.mxu0 %v11394_v3  ;;  %11117 = vmatpush3.bf16.msra.mxu1 %v11116_v11  ;;  %v3451_v11 = vld [vmem:[#allocation5 + $0x360] sm:$0xff]  ;;  %v11158_v14 = vpack.c.bf16 %v3329_v8, %v3328_v7  ;;  %v11200_v7 = vpack.c.bf16 %v4191_v2, %v4190_v1  ;;  %v4068_v8 = vld [vmem:[#allocation5 + $0x410] sm:$0xff]  ;;  %v5176_v2 = vld [vmem:[#allocation5 + $0x528] sm:$0xff] }
  0x86   :  { %10679 = vmatprep.mubr.msk.f32.mxu0 %vm11395_vm0, %v15912_v9  ;;  %11118 = vmatprep.subr.bf16.mxu1 %v11394_v3  ;;  %v11164_v16 = vpack.c.bf16 %v3452_v12, %v3451_v11  ;;  %v4069_v11 = vld [vmem:[#allocation5 + $0x418] sm:$0xff]  ;;  %v4192_v12 = vld [vmem:[#allocation5 + $0x430] sm:$0xff]  ;;  %v5175_v1 = vld [vmem:[#allocation5 + $0x520] sm:$0xff] }
  0x87   :  { %10690 = vmatprep.mubr.msk.f32.mxu1 %vm11395_vm0, %v15912_v9  ;;  %6518 = vrot.lane.b32.xlu1 %v6507_v13, %s11399_s11  ;;  %v4193_v13 = vld [vmem:[#allocation5 + $0x438] sm:$0xff] }
  0x88   :  { %11114 = vmatpush3.bf16.msra.mxu0 %v11113_v17  ;;  %v3330_v17 = vld [vmem:[#allocation5 + $0x350] sm:$0xff] }
  0x89   :  { %11120 = vmatpush3.bf16.msra.mxu1 %v11119_v20  ;;  %11121 = vmatprep.subr.bf16.mxu0 %v11394_v3  ;;  %v3331_v20 = vld [vmem:[#allocation5 + $0x358] sm:$0xff] }
  0x8a   :  { %11127 = vmatprep.subr.bf16.mxu1 %v11394_v3  ;;  %v11161_v24 = vpack.c.bf16 %v3331_v20, %v3330_v17  ;;  %v11203_v17 = vpack.c.bf16 %v4193_v13, %v4192_v12  ;;  %v4313_v20 = vld [vmem:[#allocation5 + $0x440] sm:$0xff]  ;;  %v5178_v12 = vld [vmem:[#allocation5 + $0x538] sm:$0xff] }
  0x8b   :  { %10680 = vmatmul.mubr.msk.f32.vlgmr.msra.gmra.mrb[18].mxu0 %vm134_vm1, %v11484_v18  ;;  %6540 = vrot.lane.b32.xlu1 %v6531_v23, %s11399_s11  ;;  %v4437_v23 = vld [vmem:[#allocation5 + $0x468] sm:$0xff] }
  0x8c   :  { %11123 = vmatpush3.bf16.msra.mxu0 %v11122_v27  ;;  %10691 = vmatmul.mubr.msk.f32.vlgmr.msra.gmra.mrb[18].mxu1 %vm134_vm1, %v11484_v18  ;;  %v3574_v27 = vld [vmem:[#allocation5 + $0x380] sm:$0xff] }
  0x8d   :  { %11124 = vmatprep.subr.bf16.mxu0 %v11394_v3  ;;  %11129 = vmatpush3.bf16.msra.mxu1 %v11128_v29  ;;  %v3575_v29 = vld [vmem:[#allocation5 + $0x388] sm:$0xff] }
  0x8e   :  { %10701 = vmatprep.mubr.msk.f32.mxu0 %vm11395_vm0, %v15912_v9  ;;  %11130 = vmatprep.subr.bf16.mxu1 %v11394_v3  ;;  %v11170_v33 = vpack.c.bf16 %v3575_v29, %v3574_v27  ;;  %v4315_v27 = vld [vmem:[#allocation5 + $0x450] sm:$0xff]  ;;  %v4316_v29 = vld [vmem:[#allocation5 + $0x458] sm:$0xff] }
  0x8f   :  { %10712 = vmatprep.mubr.msk.f32.mxu1 %vm11395_vm0, %v15912_v9  ;;  %6544 = vrot.lane.b32.xlu1 %v6533_v32, %s11399_s11  ;;  %v11209_v32 = vpack.c.bf16 %v4316_v29, %v4315_v27  ;;  %v5423_v27 = vld [vmem:[#allocation5 + $0x570] sm:$0xff]  ;;  %v5424_v29 = vld [vmem:[#allocation5 + $0x578] sm:$0xff] }
  0x90   :  { %11126 = vmatpush3.bf16.msra.mxu0 %v11125_v36  ;;  %v11176_v36 = vpack.c.bf16 %v3698_v31, %v3697_v30  ;;  %v4438_v30 = vld [vmem:[#allocation5 + $0x470] sm:$0xff]  ;;  %v4439_v31 = vld [vmem:[#allocation5 + $0x478] sm:$0xff] }
  0x91   :  { %11132 = vmatpush3.bf16.msra.mxu1 %v11131_v37  ;;  %11133 = vmatprep.subr.bf16.mxu0 %v11394_v3  ;;  %v3576_v37 = vld [vmem:[#allocation5 + $0x390] sm:$0xff] }
  0x92   :  { %11139 = vmatprep.subr.bf16.mxu1 %v11394_v3  ;;  %v11173_v43 = vpack.c.bf16 %v3577_v38, %v3576_v37  ;;  %v4560_v37 = vld [vmem:[#allocation5 + $0x488] sm:$0xff]  ;;  %v4682_v38 = vld [vmem:[#allocation5 + $0x4a0] sm:$0xff] }
  0x93   :  { %10702 = vmatmul.mubr.msk.f32.vlgmr.msra.gmra.mrb[20].mxu0 %vm134_vm1, %v11484_v18  ;;  %6566 = vrot.lane.b32.xlu1 %v6557_v42, %s11399_s11  ;;  %v4561_v42 = vld [vmem:[#allocation5 + $0x490] sm:$0xff] }
  0x94   :  { %11135 = vmatpush3.bf16.msra.mxu0 %v11134_v44  ;;  %10713 = vmatmul.mubr.msk.f32.vlgmr.msra.gmra.mrb[20].mxu1 %vm134_vm1, %v11484_v18  ;;  %v11179_v44 = vpack.c.bf16 %v3700_v41, %v3699_v39  ;;  %v4683_v39 = vld [vmem:[#allocation5 + $0x4a8] sm:$0xff] }
  0x95   :  { %11136 = vmatprep.subr.bf16.mxu0 %v11394_v3  ;;  %11141 = vmatpush3.bf16.msra.mxu1 %v11140_v46  ;;  %v3820_v46 = vld [vmem:[#allocation5 + $0x3c0] sm:$0xff] }
  0x96   :  { %10723 = vmatprep.mubr.msk.f32.mxu0 %vm11395_vm0, %v15912_v9  ;;  %11142 = vmatprep.subr.bf16.mxu1 %v11394_v3  ;;  %v11182_v50 = vpack.c.bf16 %v3821_v47, %v3820_v46  ;;  %v4685_v46 = vld [vmem:[#allocation5 + $0x4b8] sm:$0xff]  ;;  %v11825_v47 = vld [vmem:[%s15902_s0] sm:$0x3]  ;;  %s12442_s0 = sld [smem:[#allocation9 + $0x2]] }
  0x97   :  { %10734 = vmatprep.mubr.msk.f32.mxu1 %vm11395_vm0, %v15912_v9  ;;  %6570 = vrot.lane.b32.xlu1 %v6559_v25, %s11399_s11  ;;  %v4805_v25 = vld [vmem:[#allocation5 + $0x4c0] sm:$0xff] }
  0x98   :  { %11138 = vmatpush3.bf16.msra.mxu0 %v11137_v52  ;;  %v11773_v52 = vstv %s10105_s13  ;;  %s12418_s13 = sld [smem:[#allocation8 + $0xf]] }
  0x99   :  { %11144 = vmatpush3.bf16.msra.mxu1 %v11143_v53  ;;  %11145 = vmatprep.subr.bf16.mxu0 %v11394_v3  ;;  %16009 = vst [vmem:[#allocation15_spill] sm:$0xff] %v11773_v52  ;;  %v11188_v53 = vpack.c.bf16 %v3944_v49, %v3943_v48  ;;  %v6885_v35 = vmul.f32 %v11773_v52, %v6849_v51 }
  0x9a   :  { %11151 = vmatprep.subr.bf16.mxu1 %v11394_v3 }
  0x9b   :  { %10724 = vmatmul.mubr.msk.f32.vlgmr.msra.gmra.mrb[22].mxu0 %vm134_vm1, %v11484_v18  ;;  %6894 = vrot.lane.b32.xlu1 %v6885_v35, %s11397_s4  ;;  %v4930_v35 = vld [vmem:[#allocation5 + $0x4f0] sm:$0xff] }
  0x9c   :  { %11147 = vmatpush3.bf16.msra.mxu0 %v11146_v60  ;;  %10735 = vmatmul.mubr.msk.f32.vlgmr.msra.gmra.mrb[22].mxu1 %vm134_vm1, %v11484_v18  ;;  %v6851_v60 = vld [vmem:[#allocation2 + $0x79] sm:$0x1] }
  0x9d   :  { %11148 = vmatprep.subr.bf16.mxu0 %v11394_v3  ;;  %11153 = vmatpush3.bf16.msra.mxu1 %v11152_v62  ;;  %v11191_v62 = vpack.c.bf16 %v3946_v58, %v3945_v57  ;;  %v6887_v4 = vmul.f32 %v11773_v52, %v6851_v60  ;;  %v4808_v57 = vld [vmem:[#allocation5 + $0x4d8] sm:$0xff] }
  0x9e   :  { %10745 = vmatprep.mubr.msk.f32.mxu0 %vm11395_vm0, %v15912_v9  ;;  %11154 = vmatprep.subr.bf16.mxu1 %v11394_v3  ;;  %v11233_v60 = vpack.c.bf16 %v4808_v57, %v4807_v55  ;;  %v5914_v55 = vld [vmem:[#allocation5 + $0x5e8] sm:$0xff] }
  0x9f   :  { %10756 = vmatprep.mubr.msk.f32.mxu1 %vm11395_vm0, %v15912_v9  ;;  %6898 = vrot.lane.b32.xlu1 %v6887_v4, %s11397_s4 }
  0xa0   :  { %11150 = vmatpush3.bf16.msra.mxu0 %v11149_v5  ;;  %v11194_v5 = vpack.c.bf16 %v4067_v0, %v4066_v63  ;;  %v5051_v63 = vld [vmem:[#allocation5 + $0x500] sm:$0xff]  ;;  %v5052_v0 = vld [vmem:[#allocation5 + $0x508] sm:$0xff] }
  0xa1   :  { %11156 = vmatpush3.bf16.msra.mxu1 %v11155_v6  ;;  %11157 = vmatprep.subr.bf16.mxu0 %v11394_v3  ;;  %v11791_v6 = vstv %s10106_s1  ;;  %v11242_v4 = vpack.c.bf16 %v5052_v0, %v5051_v63  ;;  %v213_v63 = vlaneseq  ;;  %s12423_s1 = sld [smem:[#allocation8 + $0x17]] }
  0xa2   :  { %11163 = vmatprep.subr.bf16.mxu1 %v11394_v3  ;;  %16010 = vst [vmem:[#allocation16_spill] sm:$0xff] %v11791_v6 }
  0xa3   :  { %10746 = vmatmul.mubr.msk.f32.vlgmr.msra.gmra.mrb[24].mxu0 %vm134_vm1, %v11484_v18 }
  0xa4   :  { %11159 = vmatpush3.bf16.msra.mxu0 %v11158_v14  ;;  %10757 = vmatmul.mubr.msk.f32.vlgmr.msra.gmra.mrb[24].mxu1 %vm134_vm1, %v11484_v18  ;;  %v6911_v14 = vmul.f32 %v11791_v6, %v6849_v51  ;;  %v4928_v51 = vld [vmem:[#allocation5 + $0x4e0] sm:$0xff]  ;;  %v12563_v6 = vstv %s12494_s22  ;;  %s10117_s22 = sld [smem:[#allocation8 + $0x36]] }
  0xa5   :  { %11160 = vmatprep.subr.bf16.mxu0 %v11394_v3  ;;  %11165 = vmatpush3.bf16.msra.mxu1 %v11164_v16  ;;  %v11197_v16 = vpack.c.bf16 %v4069_v11, %v4068_v8  ;;  %v11248_v8 = vpack.c.bf16 %v5176_v2, %v5175_v1  ;;  %v5177_v11 = vld [vmem:[#allocation5 + $0x530] sm:$0xff]  ;;  %v214_v1 = vshrl.u32 %v213_v63, 7 }
  0xa6   :  { %10767 = vmatprep.mubr.msk.f32.mxu0 %vm11395_vm0, %v15912_v9  ;;  %11166 = vmatprep.subr.bf16.mxu1 %v11394_v3 }
  0xa7   :  { %10778 = vmatprep.mubr.msk.f32.mxu1 %vm11395_vm0, %v15912_v9  ;;  %6920 = vrot.lane.b32.xlu1 %v6911_v14, %s11397_s4  ;;  %v11251_v14 = vpack.c.bf16 %v5178_v12, %v5177_v11 }
  0xa8   :  { %11162 = vmatpush3.bf16.msra.mxu0 %v11161_v24  ;;  %v11206_v24 = vpack.c.bf16 %v4314_v21, %v4313_v20  ;;  %v5421_v20 = vld [vmem:[#allocation5 + $0x560] sm:$0xff]  ;;  %v5422_v21 = vld [vmem:[#allocation5 + $0x568] sm:$0xff] }
  0xa9   :  { %11168 = vmatpush3.bf16.msra.mxu1 %v11167_v26  ;;  %11169 = vmatprep.subr.bf16.mxu0 %v11394_v3  ;;  %v11212_v26 = vpack.c.bf16 %v4437_v23, %v4436_v22  ;;  %v5300_v23 = vld [vmem:[#allocation5 + $0x550] sm:$0xff] }
  0xaa   :  { %11175 = vmatprep.subr.bf16.mxu1 %v11394_v3 }
  0xab   :  { %10768 = vmatmul.mubr.msk.f32.vlgmr.msra.gmra.mrb[26].mxu0 %vm134_vm1, %v11484_v18 }
  0xac   :  { %11171 = vmatpush3.bf16.msra.mxu0 %v11170_v33  ;;  %10779 = vmatmul.mubr.msk.f32.vlgmr.msra.gmra.mrb[26].mxu1 %vm134_vm1, %v11484_v18  ;;  %v11215_v33 = vpack.c.bf16 %v4439_v31, %v4438_v30  ;;  %v11263_v31 = vpack.c.bf16 %v5424_v29, %v5423_v27 }
  0xad   :  { %11172 = vmatprep.subr.bf16.mxu0 %v11394_v3  ;;  %11177 = vmatpush3.bf16.msra.mxu1 %v11176_v36  ;;  %v4559_v36 = vld [vmem:[#allocation5 + $0x480] sm:$0xff] }
  0xae   :  { %10789 = vmatprep.mubr.msk.f32.mxu0 %vm11395_vm0, %v15912_v9  ;;  %11178 = vmatprep.subr.bf16.mxu1 %v11394_v3  ;;  %v11218_v41 = vpack.c.bf16 %v4560_v37, %v4559_v36  ;;  %v5667_v36 = vld [vmem:[#allocation5 + $0x5a0] sm:$0xff]  ;;  %v5668_v37 = vld [vmem:[#allocation5 + $0x5a8] sm:$0xff] }
  0xaf   :  { %10800 = vmatprep.mubr.msk.f32.mxu1 %vm11395_vm0, %v15912_v9 }
  0xb0   :  { %11174 = vmatpush3.bf16.msra.mxu0 %v11173_v43  ;;  %v4562_v43 = vld [vmem:[#allocation5 + $0x498] sm:$0xff] }
  0xb1   :  { %11180 = vmatpush3.bf16.msra.mxu1 %v11179_v44  ;;  %11181 = vmatprep.subr.bf16.mxu0 %v11394_v3  ;;  %v4684_v44 = vld [vmem:[#allocation5 + $0x4b0] sm:$0xff]  ;;  %v11221_v48 = vpack.c.bf16 %v4562_v43, %v4561_v42  ;;  %v5670_v43 = vld [vmem:[#allocation5 + $0x5b8] sm:$0xff] }
  0xb2   :  { %11187 = vmatprep.subr.bf16.mxu1 %v11394_v3  ;;  %v11227_v49 = vpack.c.bf16 %v4685_v46, %v4684_v44  ;;  %v5669_v42 = vld [vmem:[#allocation5 + $0x5b0] sm:$0xff] }
  0xb3   :  { %10790 = vmatmul.mubr.msk.f32.vlgmr.msra.gmra.mrb[28].mxu0 %vm134_vm1, %v11484_v18  ;;  %v11275_v46 = vpack.c.bf16 %v5670_v43, %v5669_v42 }
  0xb4   :  { %11183 = vmatpush3.bf16.msra.mxu0 %v11182_v50  ;;  %10801 = vmatmul.mubr.msk.f32.vlgmr.msra.gmra.mrb[28].mxu1 %vm134_vm1, %v11484_v18  ;;  %v4806_v50 = vld [vmem:[#allocation5 + $0x4c8] sm:$0xff] }
  0xb5   :  { %11184 = vmatprep.subr.bf16.mxu0 %v11394_v3  ;;  %11189 = vmatpush3.bf16.msra.mxu1 %v11188_v53  ;;  %v4929_v53 = vld [vmem:[#allocation5 + $0x4e8] sm:$0xff]  ;;  %v11230_v54 = vpack.c.bf16 %v4806_v50, %v4805_v25  ;;  %v5792_v50 = vld [vmem:[#allocation5 + $0x5d0] sm:$0xff] }
  0xb6   :  { %10811 = vmatprep.mubr.msk.f32.mxu0 %vm11395_vm0, %v15912_v9  ;;  %11190 = vmatprep.subr.bf16.mxu1 %v11394_v3  ;;  %v11236_v58 = vpack.c.bf16 %v4929_v53, %v4928_v51  ;;  %v5793_v51 = vld [vmem:[#allocation5 + $0x5d8] sm:$0xff]  ;;  %v5913_v53 = vld [vmem:[#allocation5 + $0x5e0] sm:$0xff] }
  0xb7   :  { %10822 = vmatprep.mubr.msk.f32.mxu1 %vm11395_vm0, %v15912_v9  ;;  %v11284_v57 = vpack.c.bf16 %v5914_v55, %v5913_v53  ;;  %v9937_v55 = vld [vmem:[%s15904_s2 + $0x5] ss:$0 sm:$0xff] }
  0xb8   :  { %11186 = vmatpush3.bf16.msra.mxu0 %v11185_v59  ;;  %v4931_v59 = vld [vmem:[#allocation5 + $0x4f8] sm:$0xff] }
  0xb9   :  { %11192 = vmatpush3.bf16.msra.mxu1 %v11191_v62  ;;  %11193 = vmatprep.subr.bf16.mxu0 %v11394_v3  ;;  %v11239_v62 = vpack.c.bf16 %v4931_v59, %v4930_v35  ;;  %v5916_v35 = vld [vmem:[#allocation5 + $0x5f8] sm:$0xff] }
  0xba   :  { %11199 = vmatprep.subr.bf16.mxu1 %v11394_v3 }
  0xbb   :  { %10812 = vmatmul.mubr.msk.f32.vlgmr.msra.gmra.mrb[30].mxu0 %vm134_vm1, %v11484_v18 }
  0xbc   :  { %11195 = vmatpush3.bf16.msra.mxu0 %v11194_v5  ;;  %10823 = vmatmul.mubr.msk.f32.vlgmr.msra.gmra.mrb[30].mxu1 %vm134_vm1, %v11484_v18  ;;  %v5053_v5 = vld [vmem:[#allocation5 + $0x510] sm:$0xff] }
  0xbd   :  { %11196 = vmatprep.subr.bf16.mxu0 %v11394_v3  ;;  %11201 = vmatpush3.bf16.msra.mxu1 %v11200_v7  ;;  %v5054_v7 = vld [vmem:[#allocation5 + $0x518] sm:$0xff] }
  0xbe   :  { %10833 = vmatprep.mubr.msk.f32.mxu0 %vm11395_vm0, %v15912_v9  ;;  %11202 = vmatprep.subr.bf16.mxu1 %v11394_v3  ;;  %v11245_v13 = vpack.c.bf16 %v5054_v7, %v5053_v5 }
  0xbf   :  { %10844 = vmatprep.mubr.msk.f32.mxu1 %vm11395_vm0, %v15912_v9 }
  0xc0   :  { %11198 = vmatpush3.bf16.msra.mxu0 %v11197_v16  ;;  %v5298_v16 = vld [vmem:[#allocation5 + $0x540] sm:$0xff] }
  0xc1   :  { %11204 = vmatpush3.bf16.msra.mxu1 %v11203_v17  ;;  %11205 = vmatprep.subr.bf16.mxu0 %v11394_v3  ;;  %v5299_v17 = vld [vmem:[#allocation5 + $0x548] sm:$0xff] }
  0xc2   :  { %11211 = vmatprep.subr.bf16.mxu1 %v11394_v3  ;;  %v11254_v22 = vpack.c.bf16 %v5299_v17, %v5298_v16 }
  0xc3   :  { %10834 = vmatmul.mubr.msk.f32.vlgmr.msra.gmra.mrb[32].mxu0 %vm134_vm1, %v11484_v18 }
  0xc4   :  { %11207 = vmatpush3.bf16.msra.mxu0 %v11206_v24  ;;  %10845 = vmatmul.mubr.msk.f32.vlgmr.msra.gmra.mrb[32].mxu1 %vm134_vm1, %v11484_v18  ;;  %v11224_v18 = vpack.c.bf16 %v4683_v39, %v4682_v38  ;;  %v5301_v24 = vld [vmem:[#allocation5 + $0x558] sm:$0xff]  ;;  %v5546_v39 = vld [vmem:[#allocation5 + $0x590] sm:$0xff] }
  0xc5   :  { %11208 = vmatprep.subr.bf16.mxu0 %v11394_v3  ;;  %11213 = vmatpush3.bf16.msra.mxu1 %v11212_v26  ;;  %v11260_v26 = vpack.c.bf16 %v5422_v21, %v5421_v20  ;;  %v11257_v30 = vpack.c.bf16 %v5301_v24, %v5300_v23  ;;  %v11936_v20 = vsub.s32 0, %v214_v1 }
  0xc6   :  { %10855 = vmatprep.mubr.msk.f32.mxu0 %vm11395_vm0, %v15912_v9  ;;  %11214 = vmatprep.subr.bf16.mxu1 %v11394_v3 }
  0xc7   :  { %10866 = vmatprep.mubr.msk.f32.mxu1 %vm11395_vm0, %v15912_v9 }
  0xc8   :  { %11210 = vmatpush3.bf16.msra.mxu0 %v11209_v32  ;;  %v5544_v32 = vld [vmem:[#allocation5 + $0x580] sm:$0xff] }
  0xc9   :  { %11216 = vmatpush3.bf16.msra.mxu1 %v11215_v33  ;;  %11217 = vmatprep.subr.bf16.mxu0 %v11394_v3  ;;  %v5545_v33 = vld [vmem:[#allocation5 + $0x588] sm:$0xff] }
  0xca   :  { %11223 = vmatprep.subr.bf16.mxu1 %v11394_v3  ;;  %v11266_v38 = vpack.c.bf16 %v5545_v33, %v5544_v32 }
  0xcb   :  { %10856 = vmatmul.mubr.msk.f32.vlgmr.msra.gmra.mrb[34].mxu0 %vm134_vm1, %v11825_v47 }
  0xcc   :  { %11219 = vmatpush3.bf16.msra.mxu0 %v11218_v41  ;;  %10867 = vmatmul.mubr.msk.f32.vlgmr.msra.gmra.mrb[34].mxu1 %vm134_vm1, %v11825_v47  ;;  %v5547_v41 = vld [vmem:[#allocation5 + $0x598] sm:$0xff] }
  0xcd   :  { %11220 = vmatprep.subr.bf16.mxu0 %v11394_v3  ;;  %11225 = vmatpush3.bf16.msra.mxu1 %v11224_v18  ;;  %v11272_v18 = vpack.c.bf16 %v5668_v37, %v5667_v36  ;;  %v11269_v44 = vpack.c.bf16 %v5547_v41, %v5546_v39 }
  0xce   :  { %10877 = vmatprep.mubr.msk.f32.mxu0 %vm11395_vm0, %v15912_v9  ;;  %11226 = vmatprep.subr.bf16.mxu1 %v11394_v3 }
  0xcf   :  { %10888 = vmatprep.mubr.msk.f32.mxu1 %vm11395_vm0, %v15912_v9 }
  0xd0   :  { %11222 = vmatpush3.bf16.msra.mxu0 %v11221_v48  ;;  %v5790_v48 = vld [vmem:[#allocation5 + $0x5c0] sm:$0xff] }
  0xd1   :  { %11228 = vmatpush3.bf16.msra.mxu1 %v11227_v49  ;;  %11229 = vmatprep.subr.bf16.mxu0 %v11394_v3  ;;  %v5791_v49 = vld [vmem:[#allocation5 + $0x5c8] sm:$0xff] }
  0xd2   :  { %11235 = vmatprep.subr.bf16.mxu1 %v11394_v3  ;;  %v11278_v25 = vpack.c.bf16 %v5791_v49, %v5790_v48 }
  0xd3   :  { %10878 = vmatmul.mubr.msk.f32.vlgmr.msra.gmra.mrb[36].mxu0 %vm134_vm1, %v11825_v47 }
  0xd4   :  { %10889 = vmatmul.mubr.msk.f32.vlgmr.msra.gmra.mrb[36].mxu1 %vm134_vm1, %v11825_v47  ;;  %11231 = vmatpush3.bf16.msra.mxu0 %v11230_v54  ;;  %v11281_v54 = vpack.c.bf16 %v5793_v51, %v5792_v50  ;;  %v9934_v51 = vld [vmem:[%s15904_s2 + $0x4] ss:$0 sm:$0xff] }
  0xd5   :  { %11232 = vmatprep.subr.bf16.mxu0 %v11394_v3  ;;  %11237 = vmatpush3.bf16.msra.mxu1 %v11236_v58  ;;  %v5915_v58 = vld [vmem:[#allocation5 + $0x5f0] sm:$0xff] }
  0xd6   :  { %10899 = vmatprep.mubr.msk.f32.mxu0 %vm11395_vm0, %v15912_v9  ;;  %11238 = vmatprep.subr.bf16.mxu1 %v11394_v3  ;;  %v11287_v59 = vpack.c.bf16 %v5916_v35, %v5915_v58 }
  0xd7   :  { %10910 = vmatprep.mubr.msk.f32.mxu1 %vm11395_vm0, %v15912_v9 }
  0xd8   :  { %11234 = vmatpush3.bf16.msra.mxu0 %v11233_v60  ;;  %v11400_v60 = vmov 1966171168  }
  0xd9   :  { %11241 = vmatprep.subr.bf16.mxu0 %v11394_v3  ;;  %11240 = vmatpush3.bf16.msra.mxu1 %v11239_v62  ;;  %v211_v62 = vunpack.c.l.s4 %v11400_v60 }
  0xda   :  { %11247 = vmatprep.subr.bf16.mxu1 %v11394_v3 }
  0xdb   :  { %10900 = vmatmul.mubr.msk.f32.vlgmr.msra.gmra.mrb[38].mxu0 %vm134_vm1, %v11825_v47  ;;  %v212_v0 = vunpack.c.0.s8 %v211_v62 }
  0xdc   :  { %11243 = vmatpush3.bf16.msra.mxu0 %v11242_v4  ;;  %10911 = vmatmul.mubr.msk.f32.vlgmr.msra.gmra.mrb[38].mxu1 %vm134_vm1, %v11825_v47  ;;  %v11931_v4 = vpop.permute.xlu1 %6358 }
  0xdd   :  { %11244 = vmatprep.subr.bf16.mxu0 %v11394_v3  ;;  %11249 = vmatpush3.bf16.msra.mxu1 %v11248_v8  ;;  %v11933_v7 = vsub.s32 %v212_v0, %v214_v1 }
  0xde   :  { %10921 = vmatprep.mubr.msk.f32.mxu0 %vm11395_vm0, %v15912_v9  ;;  %11250 = vmatprep.subr.bf16.mxu1 %v11394_v3 }
  0xdf   :  { %10932 = vmatprep.mubr.msk.f32.mxu1 %vm11395_vm0, %v15912_v9 }
  0xe0   :  { %11246 = vmatpush3.bf16.msra.mxu0 %v11245_v13  ;;  %v11942_v23 = vpop.permute.xlu1 %6362 }
  0xe1   :  { %11253 = vmatprep.subr.bf16.mxu0 %v11394_v3  ;;  %11252 = vmatpush3.bf16.msra.mxu1 %v11251_v14  ;;  %16011 = vst [vmem:[#allocation17_spill] sm:$0xff] %v11942_v23 }
  0xe2   :  { %11259 = vmatprep.subr.bf16.mxu1 %v11394_v3 }
  0xe3   :  { %10922 = vmatmul.mubr.msk.f32.vlgmr.msra.gmra.mrb[40].mxu0 %vm134_vm1, %v11825_v47 }
  0xe4   :  { %11255 = vmatpush3.bf16.msra.mxu0 %v11254_v22  ;;  %10933 = vmatmul.mubr.msk.f32.vlgmr.msra.gmra.mrb[40].mxu1 %vm134_vm1, %v11825_v47  ;;  %v9928_v22 = vld [vmem:[%s15904_s2 + $0x2] ss:$0 sm:$0xff]  ;;  %v11956_v48 = vpop.permute.xlu1 %6384 }
  0xe5   :  { %11256 = vmatprep.subr.bf16.mxu0 %v11394_v3  ;;  %11261 = vmatpush3.bf16.msra.mxu1 %v11260_v26  ;;  %v9931_v26 = vld [vmem:[%s15904_s2 + $0x3] ss:$0 sm:$0xff]  ;;  %16012 = vst [vmem:[#allocation18_spill] sm:$0xff] %v11956_v48 }
  0xe6   :  { %10943 = vmatprep.mubr.msk.f32.mxu0 %vm11395_vm0, %v15912_v9  ;;  %11262 = vmatprep.subr.bf16.mxu1 %v11394_v3 }
  0xe7   :  { %10954 = vmatprep.mubr.msk.f32.mxu1 %vm11395_vm0, %v15912_v9 }
  0xe8   :  { %11258 = vmatpush3.bf16.msra.mxu0 %v11257_v30 }
  0xe9   :  { %11265 = vmatprep.subr.bf16.mxu0 %v11394_v3  ;;  %11264 = vmatpush3.bf16.msra.mxu1 %v11263_v31 }
  0xea   :  { %11271 = vmatprep.subr.bf16.mxu1 %v11394_v3 }
  0xeb   :  { %10944 = vmatmul.mubr.msk.f32.vlgmr.msra.gmra.mrb[42].mxu0 %vm134_vm1, %v11825_v47 }
  0xec   :  { %11267 = vmatpush3.bf16.msra.mxu0 %v11266_v38  ;;  %10955 = vmatmul.mubr.msk.f32.vlgmr.msra.gmra.mrb[42].mxu1 %vm134_vm1, %v11825_v47 }
  0xed   :  { %11268 = vmatprep.subr.bf16.mxu0 %v11394_v3  ;;  %11273 = vmatpush3.bf16.msra.mxu1 %v11272_v18 }
  0xee   :  { %10965 = vmatprep.mubr.msk.f32.mxu0 %vm11395_vm0, %v15912_v9  ;;  %11274 = vmatprep.subr.bf16.mxu1 %v11394_v3 }
  0xef   :  { %10976 = vmatprep.mubr.msk.f32.mxu1 %vm11395_vm0, %v15912_v9 }
  0xf0   :  { %11270 = vmatpush3.bf16.msra.mxu0 %v11269_v44 }
  0xf1   :  { %11276 = vmatpush3.bf16.msra.mxu1 %v11275_v46  ;;  %11277 = vmatprep.subr.bf16.mxu0 %v11394_v3 }
  0xf2   :  { %11283 = vmatprep.subr.bf16.mxu1 %v11394_v3 }
  0xf3   :  { %10966 = vmatmul.mubr.msk.f32.vlgmr.msra.gmra.mrb[44].mxu0 %vm134_vm1, %v11825_v47 }
  0xf4   :  { %10977 = vmatmul.mubr.msk.f32.vlgmr.msra.gmra.mrb[44].mxu1 %vm134_vm1, %v11825_v47  ;;  %10987 = vmatprep.mubr.msk.f32.mxu0 %vm11395_vm0, %v15912_v9 }
  0xf5   :  { %10998 = vmatprep.mubr.msk.f32.mxu1 %vm11395_vm0, %v15912_v9  ;;  %11279 = vmatpush3.bf16.msra.mxu0 %v11278_v25 }
  0xf6   :  { %11280 = vmatprep.subr.bf16.mxu0 %v11394_v3  ;;  %11285 = vmatpush3.bf16.msra.mxu1 %v11284_v57 }
  0xf7   :  { %11286 = vmatprep.subr.bf16.mxu1 %v11394_v3  ;;  %v9922_v3 = vld [vmem:[%s15904_s2] ss:$0 sm:$0xff] }
  0xf9   :  { %11282 = vmatpush3.bf16.msra.mxu0 %v11281_v54 }
  0xfa   :  { %11288 = vmatpush3.bf16.msra.mxu1 %v11287_v59 }
  0xfc   :  { %10988 = vmatmul.mubr.msk.f32.vlgmr.msra.gmra.mrb[46].mxu0 %vm134_vm1, %v11825_v47 }
  0xfd   :  { %10999 = vmatmul.mubr.msk.f32.vlgmr.msra.gmra.mrb[46].mxu1 %vm134_vm1, %v11825_v47  ;;  %v9925_v47 = vld [vmem:[%s15904_s2 + $0x1] ss:$0 sm:$0xff] }
 0x116   :  { %v204_v2 = vpop.f32.mrb[0].mxu0 }
 0x117   :  { %v205_v5 = vadd.f32 %v9922_v3, %v204_v2  ;;  %v10483_v8 = vpop.f32.mrb[1].mxu0  ;;  %v328_v11 = vpop.f32.mrb[0].mxu1 }
 0x118   :  { %v329_v12 = vadd.f32 %v9925_v47, %v328_v11  ;;  %v10494_v13 = vpop.f32.mrb[1].mxu1  ;;  %v11974_v2 = vpop.permute.xlu1 %6388 }
 0x119   :  { %v208_v14 = vmax.f32 %v205_v5, 0.0  ;;  %16013 = vst [vmem:[#allocation19_spill] sm:$0xff] %v11974_v2 }
 0x11a   :  { %v332_v16 = vmax.f32 %v329_v12, 0.0 }
 0x11b   :  { %v216_v17 = vrot.slane %v208_v14, %v11933_v7 }
 0x11c   :  { %v340_v21 = vrot.slane %v332_v16, %v11933_v7 }
 0x11d   :  { %v217_v24 = vcombine.high %v216_v17, %v216_v17  ;;  %v224_v27 = vrot.slane %v216_v17, %v11933_v7  ;;  %v9940_v17 = vld [vmem:[%s15904_s2 + $0x6] ss:$0 sm:$0xff] }
 0x11e   :  { %v341_v29 = vcombine.high %v340_v21, %v340_v21  ;;  %v348_v30 = vrot.slane %v340_v21, %v11933_v7  ;;  %v451_v31 = vpop.f32.mrb[2].mxu0 }
 0x11f   :  { %v452_v32 = vadd.f32 %v9928_v22, %v451_v31  ;;  %v10505_v33 = vpop.f32.mrb[3].mxu0  ;;  %v574_v36 = vpop.f32.mrb[2].mxu1  ;;  %v235_v37 = vrot.slane %v224_v27, %v11936_v20  ;;  %v231_v38 = vrot.slane %v217_v24, %v11933_v7  ;;  %v9943_v24 = vld [vmem:[%s15904_s2 + $0x7] ss:$0 sm:$0xff] }
 0x120   :  { %v575_v39 = vadd.f32 %v9931_v26, %v574_v36  ;;  %v10516_v41 = vpop.f32.mrb[3].mxu1  ;;  %v359_v18 = vrot.slane %v348_v30, %v11936_v20  ;;  %v355_v42 = vrot.slane %v341_v29, %v11933_v7  ;;  %v11992_v30 = vpop.permute.xlu1 %6410 }
 0x121   :  { %v455_v43 = vmax.f32 %v452_v32, 0.0  ;;  %240 = vrot.lane.b32.xlu0 %v235_v37, %s11401_s21  ;;  %v239_v25 = vrot.slane %v231_v38, %v11936_v20  ;;  %16014 = vst [vmem:[#allocation20_spill] sm:$0xff] %v11992_v30 }
 0x122   :  { %v578_v44 = vmax.f32 %v575_v39, 0.0  ;;  %364 = vrot.lane.b32.xlu1 %v359_v18, %s11401_s21  ;;  %v363_v46 = vrot.slane %v355_v42, %v11936_v20 }
 0x123   :  { %v463_v49 = vrot.slane %v455_v43, %v11933_v7 }
 0x124   :  { %v586_v50 = vrot.slane %v578_v44, %v11933_v7 }
 0x125   :  { %v464_v53 = vcombine.high %v463_v49, %v463_v49  ;;  %v471_v54 = vrot.slane %v463_v49, %v11933_v7  ;;  %242 = vrot.lane.b32.xlu0 %v239_v25, %s11401_s21 }
 0x126   :  { %v587_v57 = vcombine.high %v586_v50, %v586_v50  ;;  %v594_v58 = vrot.slane %v586_v50, %v11933_v7  ;;  %v697_v35 = vpop.f32.mrb[4].mxu0  ;;  %366 = vrot.lane.b32.xlu1 %v363_v46, %s11401_s21  ;;  %v9946_v50 = vld [vmem:[%s15904_s2 + $0x8] ss:$0 sm:$0xff] }
 0x127   :  { %v698_v59 = vadd.f32 %v9934_v51, %v697_v35  ;;  %v10527_v60 = vpop.f32.mrb[5].mxu0  ;;  %v820_v62 = vpop.f32.mrb[4].mxu1  ;;  %v482_v63 = vrot.slane %v471_v54, %v11936_v20  ;;  %v478_v0 = vrot.slane %v464_v53, %v11933_v7 }
 0x128   :  { %v821_v1 = vadd.f32 %v9937_v55, %v820_v62  ;;  %v10538_v3 = vpop.f32.mrb[5].mxu1  ;;  %v601_v47 = vrot.slane %v587_v57, %v11933_v7  ;;  %v605_v11 = vrot.slane %v594_v58, %v11936_v20  ;;  %v12008_v51 = vpop.permute.xlu1 %6414  ;;  %v9949_v55 = vld [vmem:[%s15904_s2 + $0x9] ss:$0 sm:$0xff] }
 0x129   :  { %v701_v5 = vmax.f32 %v698_v59, 0.0  ;;  %487 = vrot.lane.b32.xlu0 %v482_v63, %s11401_s21  ;;  %v486_v8 = vrot.slane %v478_v0, %v11936_v20  ;;  %16015 = vst [vmem:[#allocation21_spill] sm:$0xff] %v12008_v51 }
 0x12a   :  { %v824_v12 = vmax.f32 %v821_v1, 0.0  ;;  %v609_v14 = vrot.slane %v601_v47, %v11936_v20 }
 0x12b   :  { %v709_v13 = vrot.slane %v701_v5, %v11933_v7  ;;  %489 = vrot.lane.b32.xlu1 %v486_v8, %s11401_s21 }
 0x12c   :  { %v832_v16 = vrot.slane %v824_v12, %v11933_v7 }
 0x12d   :  { %v710_v21 = vcombine.high %v709_v13, %v709_v13  ;;  %v717_v22 = vrot.slane %v709_v13, %v11933_v7  ;;  %610 = vrot.lane.b32.xlu0 %v605_v11, %s11401_s21  ;;  %v12023_v13 = vpop.permute.xlu1 %6436 }
 0x12e   :  { %v833_v26 = vcombine.high %v832_v16, %v832_v16  ;;  %v840_v27 = vrot.slane %v832_v16, %v11933_v7  ;;  %v943_v29 = vpop.f32.mrb[6].mxu0  ;;  %16016 = vst [vmem:[#allocation22_spill] sm:$0xff] %v12023_v13 }
 0x12f   :  { %v944_v31 = vadd.f32 %v9940_v17, %v943_v29  ;;  %v10549_v32 = vpop.f32.mrb[7].mxu0  ;;  %612 = vrot.lane.b32.xlu1 %v609_v14, %s11401_s21  ;;  %v1066_v33 = vpop.f32.mrb[6].mxu1  ;;  %v728_v36 = vrot.slane %v717_v22, %v11936_v20  ;;  %v724_v37 = vrot.slane %v710_v21, %v11933_v7  ;;  %v9952_v21 = vld [vmem:[%s15904_s2 + $0xa] ss:$0 sm:$0xff] }
 0x130   :  { %v1067_v38 = vadd.f32 %v9943_v24, %v1066_v33  ;;  %v10560_v39 = vpop.f32.mrb[7].mxu1  ;;  %v847_v41 = vrot.slane %v833_v26, %v11933_v7  ;;  %v851_v43 = vrot.slane %v840_v27, %v11936_v20  ;;  %v9955_v26 = vld [vmem:[%s15904_s2 + $0xb] ss:$0 sm:$0xff] }
 0x131   :  { %v947_v18 = vmax.f32 %v944_v31, 0.0  ;;  %733 = vrot.lane.b32.xlu0 %v728_v36, %s11401_s21  ;;  %v732_v42 = vrot.slane %v724_v37, %v11936_v20 }
 0x132   :  { %v1070_v44 = vmax.f32 %v1067_v38, 0.0  ;;  %v855_v49 = vrot.slane %v847_v41, %v11936_v20 }
 0x133   :  { %v955_v46 = vrot.slane %v947_v18, %v11933_v7  ;;  %735 = vrot.lane.b32.xlu1 %v732_v42, %s11401_s21  ;;  %v12042_v42 = vpop.permute.xlu1 %6440 }
 0x134   :  { %v1078_v25 = vrot.slane %v1070_v44, %v11933_v7  ;;  %16017 = vst [vmem:[#allocation23_spill] sm:$0xff] %v12042_v42 }
 0x135   :  { %v956_v53 = vcombine.high %v955_v46, %v955_v46  ;;  %v963_v54 = vrot.slane %v955_v46, %v11933_v7  ;;  %856 = vrot.lane.b32.xlu0 %v851_v43, %s11401_s21 }
 0x136   :  { %v1079_v57 = vcombine.high %v1078_v25, %v1078_v25  ;;  %v1086_v58 = vrot.slane %v1078_v25, %v11933_v7  ;;  %v1189_v35 = vpop.f32.mrb[8].mxu0 }
 0x137   :  { %v1190_v59 = vadd.f32 %v9946_v50, %v1189_v35  ;;  %v10571_v60 = vpop.f32.mrb[9].mxu0  ;;  %858 = vrot.lane.b32.xlu1 %v855_v49, %s11401_s21  ;;  %v1313_v62 = vpop.f32.mrb[8].mxu1  ;;  %v974_v63 = vrot.slane %v963_v54, %v11936_v20  ;;  %v970_v0 = vrot.slane %v956_v53, %v11933_v7  ;;  %v9958_v54 = vld [vmem:[%s15904_s2 + $0xc] ss:$0 sm:$0xff] }
 0x138   :  { %v1314_v1 = vadd.f32 %v9949_v55, %v1313_v62  ;;  %v10582_v3 = vpop.f32.mrb[9].mxu1  ;;  %v1093_v47 = vrot.slane %v1079_v57, %v11933_v7  ;;  %v1097_v11 = vrot.slane %v1086_v58, %v11936_v20  ;;  %v9961_v58 = vld [vmem:[%s15904_s2 + $0xd] ss:$0 sm:$0xff]  ;;  %v12060_v62 = vpop.permute.xlu1 %6462 }
 0x139   :  { %v1193_v5 = vmax.f32 %v1190_v59, 0.0  ;;  %979 = vrot.lane.b32.xlu0 %v974_v63, %s11401_s21  ;;  %v978_v8 = vrot.slane %v970_v0, %v11936_v20  ;;  %16018 = vst [vmem:[#allocation24_spill] sm:$0xff] %v12060_v62 }
 0x13a   :  { %v1317_v12 = vmax.f32 %v1314_v1, 0.0  ;;  %v1101_v16 = vrot.slane %v1093_v47, %v11936_v20 }
 0x13b   :  { %v1201_v14 = vrot.slane %v1193_v5, %v11933_v7  ;;  %981 = vrot.lane.b32.xlu1 %v978_v8, %s11401_s21 }
 0x13c   :  { %v1325_v17 = vrot.slane %v1317_v12, %v11933_v7 }
 0x13d   :  { %v1202_v22 = vcombine.high %v1201_v14, %v1201_v14  ;;  %v1209_v24 = vrot.slane %v1201_v14, %v11933_v7  ;;  %1102 = vrot.lane.b32.xlu0 %v1097_v11, %s11401_s21 }
 0x13e   :  { %v1326_v27 = vcombine.high %v1325_v17, %v1325_v17  ;;  %v1333_v29 = vrot.slane %v1325_v17, %v11933_v7  ;;  %v1436_v31 = vpop.f32.mrb[10].mxu0 }
 0x13f   :  { %v1437_v32 = vadd.f32 %v9952_v21, %v1436_v31  ;;  %v10593_v33 = vpop.f32.mrb[11].mxu0  ;;  %1104 = vrot.lane.b32.xlu1 %v1101_v16, %s11401_s21  ;;  %v1559_v36 = vpop.f32.mrb[10].mxu1  ;;  %v1220_v37 = vrot.slane %v1209_v24, %v11936_v20  ;;  %v1216_v38 = vrot.slane %v1202_v22, %v11933_v7 }
 0x140   :  { %v1560_v39 = vadd.f32 %v9955_v26, %v1559_v36  ;;  %v10604_v41 = vpop.f32.mrb[11].mxu1  ;;  %v1340_v18 = vrot.slane %v1326_v27, %v11933_v7  ;;  %v1344_v46 = vrot.slane %v1333_v29, %v11936_v20  ;;  %v9964_v26 = vld [vmem:[%s15904_s2 + $0xe] ss:$0 sm:$0xff]  ;;  %v12076_v27 = vpop.permute.xlu1 %6466 }
 0x141   :  { %v1440_v43 = vmax.f32 %v1437_v32, 0.0  ;;  %1225 = vrot.lane.b32.xlu0 %v1220_v37, %s11401_s21  ;;  %v1224_v44 = vrot.slane %v1216_v38, %v11936_v20  ;;  %16019 = vst [vmem:[#allocation25_spill] sm:$0xff] %v12076_v27  ;;  %v9967_v32 = vld [vmem:[%s15904_s2 + $0xf] ss:$0 sm:$0xff] }
 0x142   :  { %v1563_v49 = vmax.f32 %v1560_v39, 0.0  ;;  %v1348_v50 = vrot.slane %v1340_v18, %v11936_v20 }
 0x143   :  { %v1448_v25 = vrot.slane %v1440_v43, %v11933_v7  ;;  %1227 = vrot.lane.b32.xlu1 %v1224_v44, %s11401_s21 }
 0x144   :  { %v1571_v53 = vrot.slane %v1563_v49, %v11933_v7 }
 0x145   :  { %v1449_v55 = vcombine.high %v1448_v25, %v1448_v25  ;;  %v1456_v57 = vrot.slane %v1448_v25, %v11933_v7  ;;  %1349 = vrot.lane.b32.xlu0 %v1344_v46, %s11401_s21 }
 0x146   :  { %v1572_v35 = vcombine.high %v1571_v53, %v1571_v53  ;;  %v1579_v59 = vrot.slane %v1571_v53, %v11933_v7  ;;  %v1682_v60 = vpop.f32.mrb[12].mxu0 }
 0x147   :  { %v1683_v63 = vadd.f32 %v9958_v54, %v1682_v60  ;;  %v10615_v0 = vpop.f32.mrb[13].mxu0  ;;  %1351 = vrot.lane.b32.xlu1 %v1348_v50, %s11401_s21  ;;  %v1805_v1 = vpop.f32.mrb[12].mxu1  ;;  %v1467_v3 = vrot.slane %v1456_v57, %v11936_v20  ;;  %v1463_v47 = vrot.slane %v1449_v55, %v11933_v7 }
 0x148   :  { %v1806_v5 = vadd.f32 %v9961_v58, %v1805_v1  ;;  %v10626_v8 = vpop.f32.mrb[13].mxu1  ;;  %v1586_v11 = vrot.slane %v1572_v35, %v11933_v7  ;;  %v1590_v16 = vrot.slane %v1579_v59, %v11936_v20  ;;  %v12091_v55 = vpop.permute.xlu1 %6488  ;;  %v9970_v59 = vld [vmem:[%s15904_s2 + $0x10] ss:$0 sm:$0xff]  ;;  %v9973_v0 = vld [vmem:[%s15904_s2 + $0x11] ss:$0 sm:$0xff] }
 0x149   :  { %v1686_v12 = vmax.f32 %v1683_v63, 0.0  ;;  %1472 = vrot.lane.b32.xlu0 %v1467_v3, %s11401_s21  ;;  %v1471_v14 = vrot.slane %v1463_v47, %v11936_v20  ;;  %16020 = vst [vmem:[#allocation26_spill] sm:$0xff] %v12091_v55 }
 0x14a   :  { %v1809_v17 = vmax.f32 %v1806_v5, 0.0  ;;  %v1594_v22 = vrot.slane %v1586_v11, %v11936_v20 }
 0x14b   :  { %v1694_v21 = vrot.slane %v1686_v12, %v11933_v7  ;;  %1474 = vrot.lane.b32.xlu1 %v1471_v14, %s11401_s21 }
 0x14c   :  { %v1817_v24 = vrot.slane %v1809_v17, %v11933_v7 }
 0x14d   :  { %v1695_v29 = vcombine.high %v1694_v21, %v1694_v21  ;;  %v1702_v31 = vrot.slane %v1694_v21, %v11933_v7  ;;  %1595 = vrot.lane.b32.xlu0 %v1590_v16, %s11401_s21 }
 0x14e   :  { %v1818_v33 = vcombine.high %v1817_v24, %v1817_v24  ;;  %v1825_v36 = vrot.slane %v1817_v24, %v11933_v7  ;;  %v1928_v37 = vpop.f32.mrb[14].mxu0 }
 0x14f   :  { %v1929_v38 = vadd.f32 %v9964_v26, %v1928_v37  ;;  %v10637_v39 = vpop.f32.mrb[15].mxu0  ;;  %1597 = vrot.lane.b32.xlu1 %v1594_v22, %s11401_s21  ;;  %v2051_v41 = vpop.f32.mrb[14].mxu1  ;;  %v1713_v18 = vrot.slane %v1702_v31, %v11936_v20  ;;  %v1709_v43 = vrot.slane %v1695_v29, %v11933_v7  ;;  %v9976_v37 = vld [vmem:[%s15904_s2 + $0x12] ss:$0 sm:$0xff] }
 0x150   :  { %v2052_v44 = vadd.f32 %v9967_v32, %v2051_v41  ;;  %v10648_v46 = vpop.f32.mrb[15].mxu1  ;;  %v1832_v49 = vrot.slane %v1818_v33, %v11933_v7  ;;  %v1836_v53 = vrot.slane %v1825_v36, %v11936_v20  ;;  %v12110_v22 = vpop.permute.xlu1 %6492  ;;  %v9979_v41 = vld [vmem:[%s15904_s2 + $0x13] ss:$0 sm:$0xff] }
 0x151   :  { %v1932_v25 = vmax.f32 %v1929_v38, 0.0  ;;  %1718 = vrot.lane.b32.xlu0 %v1713_v18, %s11401_s21  ;;  %v1717_v50 = vrot.slane %v1709_v43, %v11936_v20  ;;  %16021 = vst [vmem:[#allocation27_spill] sm:$0xff] %v12110_v22  ;;  %v12529_v22 = vstv %s12463_s17  ;;  %s12773_s17 = sld [smem:[#allocation8 + $0x37]] }
 0x152   :  { %v2055_v54 = vmax.f32 %v2052_v44, 0.0  ;;  %v1840_v58 = vrot.slane %v1832_v49, %v11936_v20 }
 0x153   :  { %v1940_v57 = vrot.slane %v1932_v25, %v11933_v7  ;;  %1720 = vrot.lane.b32.xlu1 %v1717_v50, %s11401_s21 }
 0x154   :  { %v2063_v35 = vrot.slane %v2055_v54, %v11933_v7  ;;  %v12128_v46 = vpop.permute.xlu1 %6514 }
 0x155   :  { %v1941_v60 = vcombine.high %v1940_v57, %v1940_v57  ;;  %v1948_v63 = vrot.slane %v1940_v57, %v11933_v7  ;;  %1841 = vrot.lane.b32.xlu0 %v1836_v53, %s11401_s21  ;;  %16022 = vst [vmem:[#allocation28_spill] sm:$0xff] %v12128_v46 }
 0x156   :  { %v2064_v1 = vcombine.high %v2063_v35, %v2063_v35  ;;  %v2071_v3 = vrot.slane %v2063_v35, %v11933_v7  ;;  %v2174_v47 = vpop.f32.mrb[16].mxu0 }
 0x157   :  { %v2175_v5 = vadd.f32 %v9970_v59, %v2174_v47  ;;  %v10659_v8 = vpop.f32.mrb[17].mxu0  ;;  %1843 = vrot.lane.b32.xlu1 %v1840_v58, %s11401_s21  ;;  %v2298_v11 = vpop.f32.mrb[16].mxu1  ;;  %v1959_v12 = vrot.slane %v1948_v63, %v11936_v20  ;;  %v1955_v14 = vrot.slane %v1941_v60, %v11933_v7 }
 0x158   :  { %v2299_v16 = vadd.f32 %v9973_v0, %v2298_v11  ;;  %v10670_v17 = vpop.f32.mrb[17].mxu1  ;;  %v2078_v21 = vrot.slane %v2064_v1, %v11933_v7  ;;  %v2082_v29 = vrot.slane %v2071_v3, %v11936_v20  ;;  %v12144_v8 = vpop.permute.xlu1 %6518 }
 0x159   :  { %v2178_v24 = vmax.f32 %v2175_v5, 0.0  ;;  %1964 = vrot.lane.b32.xlu0 %v1959_v12, %s11401_s21  ;;  %v1963_v26 = vrot.slane %v1955_v14, %v11936_v20  ;;  %v9982_v5 = vld [vmem:[%s15904_s2 + $0x14] ss:$0 sm:$0xff]  ;;  %16023 = vst [vmem:[#allocation29_spill] sm:$0xff] %v12144_v8  ;;  %v9985_v14 = vld [vmem:[%s15904_s2 + $0x15] ss:$0 sm:$0xff]  ;;  %v12548_v8 = vstv %s12479_s19 }
 0x15a   :  { %v2302_v31 = vmax.f32 %v2299_v16, 0.0  ;;  %v2086_v33 = vrot.slane %v2078_v21, %v11936_v20  ;;  %16033 = vst [vmem:[#allocation39_spill] sm:$0xff] %v12548_v8  ;;  %s12779_s19 = sld [smem:[#allocation8 + $0x47]] }
 0x15b   :  { %v2186_v32 = vrot.slane %v2178_v24, %v11933_v7  ;;  %1966 = vrot.lane.b32.xlu1 %v1963_v26, %s11401_s21 }
 0x15c   :  { %v2310_v36 = vrot.slane %v2302_v31, %v11933_v7 }
 0x15d   :  { %v2187_v38 = vcombine.high %v2186_v32, %v2186_v32  ;;  %v2194_v39 = vrot.slane %v2186_v32, %v11933_v7  ;;  %2087 = vrot.lane.b32.xlu0 %v2082_v29, %s11401_s21 }
 0x15e   :  { %v2311_v18 = vcombine.high %v2310_v36, %v2310_v36  ;;  %v2318_v43 = vrot.slane %v2310_v36, %v11933_v7  ;;  %v2421_v44 = vpop.f32.mrb[18].mxu0 }
 0x15f   :  { %v2422_v49 = vadd.f32 %v9976_v37, %v2421_v44  ;;  %v10681_v25 = vpop.f32.mrb[19].mxu0  ;;  %2089 = vrot.lane.b32.xlu1 %v2086_v33, %s11401_s21  ;;  %v2544_v50 = vpop.f32.mrb[18].mxu1  ;;  %v2205_v53 = vrot.slane %v2194_v39, %v11936_v20  ;;  %v2201_v54 = vrot.slane %v2187_v38, %v11933_v7 }
 0x160   :  { %v2545_v57 = vadd.f32 %v9979_v41, %v2544_v50  ;;  %v10692_v58 = vpop.f32.mrb[19].mxu1  ;;  %v2325_v35 = vrot.slane %v2311_v18, %v11933_v7  ;;  %v2329_v63 = vrot.slane %v2318_v43, %v11936_v20  ;;  %v12159_v43 = vpop.permute.xlu1 %6540  ;;  %v9988_v50 = vld [vmem:[%s15904_s2 + $0x16] ss:$0 sm:$0xff] }
 0x161   :  { %v2425_v59 = vmax.f32 %v2422_v49, 0.0  ;;  %2210 = vrot.lane.b32.xlu0 %v2205_v53, %s11401_s21  ;;  %v2209_v60 = vrot.slane %v2201_v54, %v11936_v20  ;;  %16024 = vst [vmem:[#allocation30_spill] sm:$0xff] %v12159_v43 }
 0x162   :  { %v2548_v0 = vmax.f32 %v2545_v57, 0.0  ;;  %v2333_v3 = vrot.slane %v2325_v35, %v11936_v20  ;;  %v9991_v57 = vld [vmem:[%s15904_s2 + $0x17] ss:$0 sm:$0xff] }
 0x163   :  { %v2433_v1 = vrot.slane %v2425_v59, %v11933_v7  ;;  %2212 = vrot.lane.b32.xlu1 %v2209_v60, %s11401_s21 }
 0x164   :  { %v2556_v47 = vrot.slane %v2548_v0, %v11933_v7 }
 0x165   :  { %v2434_v11 = vcombine.high %v2433_v1, %v2433_v1  ;;  %v2441_v12 = vrot.slane %v2433_v1, %v11933_v7  ;;  %2334 = vrot.lane.b32.xlu0 %v2329_v63, %s11401_s21 }
 0x166   :  { %v2557_v16 = vcombine.high %v2556_v47, %v2556_v47  ;;  %v2564_v17 = vrot.slane %v2556_v47, %v11933_v7  ;;  %v2667_v21 = vpop.f32.mrb[20].mxu0 }
 0x167   :  { %v2668_v24 = vadd.f32 %v9982_v5, %v2667_v21  ;;  %v10703_v26 = vpop.f32.mrb[21].mxu0  ;;  %2336 = vrot.lane.b32.xlu1 %v2333_v3, %s11401_s21  ;;  %v2790_v29 = vpop.f32.mrb[20].mxu1  ;;  %v2452_v31 = vrot.slane %v2441_v12, %v11936_v20  ;;  %v2448_v32 = vrot.slane %v2434_v11, %v11933_v7 }
 0x168   :  { %v2791_v33 = vadd.f32 %v9985_v14, %v2790_v29  ;;  %v10714_v36 = vpop.f32.mrb[21].mxu1  ;;  %v2571_v37 = vrot.slane %v2557_v16, %v11933_v7  ;;  %v2575_v41 = vrot.slane %v2564_v17, %v11936_v20  ;;  %v12178_v12 = vpop.permute.xlu1 %6544 }
 0x169   :  { %v2671_v38 = vmax.f32 %v2668_v24, 0.0  ;;  %2457 = vrot.lane.b32.xlu0 %v2452_v31, %s11401_s21  ;;  %v2456_v39 = vrot.slane %v2448_v32, %v11936_v20  ;;  %16025 = vst [vmem:[#allocation31_spill] sm:$0xff] %v12178_v12  ;;  %v9994_v31 = vld [vmem:[%s15904_s2 + $0x18] ss:$0 sm:$0xff]  ;;  %v9997_v36 = vld [vmem:[%s15904_s2 + $0x19] ss:$0 sm:$0xff] }
 0x16a   :  { %v2794_v18 = vmax.f32 %v2791_v33, 0.0  ;;  %v2579_v49 = vrot.slane %v2571_v37, %v11936_v20 }
 0x16b   :  { %v2679_v44 = vrot.slane %v2671_v38, %v11933_v7  ;;  %2459 = vrot.lane.b32.xlu1 %v2456_v39, %s11401_s21 }
 0x16c   :  { %v2802_v25 = vrot.slane %v2794_v18, %v11933_v7 }
 0x16d   :  { %v2680_v53 = vcombine.high %v2679_v44, %v2679_v44  ;;  %v2687_v54 = vrot.slane %v2679_v44, %v11933_v7  ;;  %2580 = vrot.lane.b32.xlu0 %v2575_v41, %s11401_s21  ;;  %v12196_v41 = vpop.permute.xlu1 %6566 }
 0x16e   :  { %v2803_v58 = vcombine.high %v2802_v25, %v2802_v25  ;;  %v2810_v35 = vrot.slane %v2802_v25, %v11933_v7  ;;  %v2913_v59 = vpop.f32.mrb[22].mxu0  ;;  %16026 = vst [vmem:[#allocation32_spill] sm:$0xff] %v12196_v41 }
 0x16f   :  { %v2914_v60 = vadd.f32 %v9988_v50, %v2913_v59  ;;  %v10725_v63 = vpop.f32.mrb[23].mxu0  ;;  %2582 = vrot.lane.b32.xlu1 %v2579_v49, %s11401_s21  ;;  %v3036_v0 = vpop.f32.mrb[22].mxu1  ;;  %v2698_v1 = vrot.slane %v2687_v54, %v11936_v20  ;;  %v2694_v3 = vrot.slane %v2680_v53, %v11933_v7 }
 0x170   :  { %v3037_v47 = vadd.f32 %v9991_v57, %v3036_v0  ;;  %v10736_v5 = vpop.f32.mrb[23].mxu1  ;;  %v2817_v11 = vrot.slane %v2803_v58, %v11933_v7  ;;  %v2821_v17 = vrot.slane %v2810_v35, %v11936_v20 }
 0x171   :  { %v2917_v14 = vmax.f32 %v2914_v60, 0.0  ;;  %2703 = vrot.lane.b32.xlu0 %v2698_v1, %s11401_s21  ;;  %v2702_v16 = vrot.slane %v2694_v3, %v11936_v20  ;;  %v10000_v3 = vld [vmem:[%s15904_s2 + $0x1a] ss:$0 sm:$0xff] }
 0x172   :  { %v3040_v21 = vmax.f32 %v3037_v47, 0.0  ;;  %v2825_v26 = vrot.slane %v2817_v11, %v11936_v20  ;;  %v12212_v47 = vpop.permute.xlu1 %6570 }
 0x173   :  { %v2925_v24 = vrot.slane %v2917_v14, %v11933_v7  ;;  %2705 = vrot.lane.b32.xlu1 %v2702_v16, %s11401_s21  ;;  %16027 = vst [vmem:[#allocation33_spill] sm:$0xff] %v12212_v47  ;;  %v10003_v14 = vld [vmem:[%s15904_s2 + $0x1b] ss:$0 sm:$0xff]  ;;  %v12523_v47 = vstv %s12461_s16  ;;  %s10101_s16 = sld [smem:[#allocation8 + $0x2c]] }
 0x174   :  { %v3048_v29 = vrot.slane %v3040_v21, %v11933_v7 }
 0x175   :  { %v2926_v32 = vcombine.high %v2925_v24, %v2925_v24  ;;  %v2933_v33 = vrot.slane %v2925_v24, %v11933_v7  ;;  %2826 = vrot.lane.b32.xlu0 %v2821_v17, %s11401_s21 }
 0x176   :  { %v3049_v37 = vcombine.high %v3048_v29, %v3048_v29  ;;  %v3056_v38 = vrot.slane %v3048_v29, %v11933_v7  ;;  %v3159_v39 = vpop.f32.mrb[24].mxu0 }
 0x177   :  { %v3160_v18 = vadd.f32 %v9994_v31, %v3159_v39  ;;  %v10747_v44 = vpop.f32.mrb[25].mxu0  ;;  %2828 = vrot.lane.b32.xlu1 %v2825_v26, %s11401_s21  ;;  %v3283_v49 = vpop.f32.mrb[24].mxu1  ;;  %v2944_v25 = vrot.slane %v2933_v33, %v11936_v20  ;;  %v2940_v50 = vrot.slane %v2926_v32, %v11933_v7 }
 0x178   :  { %v3284_v53 = vadd.f32 %v9997_v36, %v3283_v49  ;;  %v10758_v54 = vpop.f32.mrb[25].mxu1  ;;  %v3063_v57 = vrot.slane %v3049_v37, %v11933_v7  ;;  %v3067_v59 = vrot.slane %v3056_v38, %v11936_v20  ;;  %v12227_v49 = vpop.permute.xlu1 %6894 }
 0x179   :  { %v3163_v58 = vmax.f32 %v3160_v18, 0.0  ;;  %2949 = vrot.lane.b32.xlu0 %v2944_v25, %s11401_s21  ;;  %v2948_v35 = vrot.slane %v2940_v50, %v11936_v20  ;;  %16028 = vst [vmem:[#allocation34_spill] sm:$0xff] %v12227_v49  ;;  %v10006_v54 = vld [vmem:[%s15904_s2 + $0x1c] ss:$0 sm:$0xff]  ;;  %v12518_v49 = vstv %s12454_s15  ;;  %s10100_s15 = sld [smem:[#allocation8 + $0x24]] }
 0x17a   :  { %v3287_v60 = vmax.f32 %v3284_v53, 0.0  ;;  %v3071_v0 = vrot.slane %v3063_v57, %v11936_v20 }
 0x17b   :  { %v3171_v63 = vrot.slane %v3163_v58, %v11933_v7  ;;  %2951 = vrot.lane.b32.xlu1 %v2948_v35, %s11401_s21  ;;  %v10009_v35 = vld [vmem:[%s15904_s2 + $0x1d] ss:$0 sm:$0xff] }
 0x17c   :  { %v3295_v1 = vrot.slane %v3287_v60, %v11933_v7 }
 0x17d   :  { %v3172_v5 = vcombine.high %v3171_v63, %v3171_v63  ;;  %v3179_v11 = vrot.slane %v3171_v63, %v11933_v7  ;;  %3072 = vrot.lane.b32.xlu0 %v3067_v59, %s11401_s21 }
 0x17e   :  { %v3296_v16 = vcombine.high %v3295_v1, %v3295_v1  ;;  %v3303_v17 = vrot.slane %v3295_v1, %v11933_v7  ;;  %v3406_v21 = vpop.f32.mrb[26].mxu0 }
 0x17f   :  { %v3407_v24 = vadd.f32 %v10000_v3, %v3406_v21  ;;  %v10769_v26 = vpop.f32.mrb[27].mxu0  ;;  %3074 = vrot.lane.b32.xlu1 %v3071_v0, %s11401_s21  ;;  %v3529_v29 = vpop.f32.mrb[26].mxu1  ;;  %v3190_v31 = vrot.slane %v3179_v11, %v11936_v20  ;;  %v3186_v32 = vrot.slane %v3172_v5, %v11933_v7 }
 0x180   :  { %v3530_v33 = vadd.f32 %v10003_v14, %v3529_v29  ;;  %v10780_v36 = vpop.f32.mrb[27].mxu1  ;;  %v3310_v37 = vrot.slane %v3296_v16, %v11933_v7  ;;  %v3314_v18 = vrot.slane %v3303_v17, %v11936_v20  ;;  %v12245_v17 = vpop.permute.xlu1 %6898 }
 0x181   :  { %v3410_v38 = vmax.f32 %v3407_v24, 0.0  ;;  %3195 = vrot.lane.b32.xlu0 %v3190_v31, %s11401_s21  ;;  %v3194_v39 = vrot.slane %v3186_v32, %v11936_v20  ;;  %16029 = vst [vmem:[#allocation35_spill] sm:$0xff] %v12245_v17 }
 0x182   :  { %v3533_v44 = vmax.f32 %v3530_v33, 0.0  ;;  %v3318_v50 = vrot.slane %v3310_v37, %v11936_v20  ;;  %v10012_v37 = vld [vmem:[%s15904_s2 + $0x1e] ss:$0 sm:$0xff] }
 0x183   :  { %v3418_v25 = vrot.slane %v3410_v38, %v11933_v7  ;;  %3197 = vrot.lane.b32.xlu1 %v3194_v39, %s11401_s21 }
 0x184   :  { %v3541_v53 = vrot.slane %v3533_v44, %v11933_v7 }
 0x185   :  { %v3419_v57 = vcombine.high %v3418_v25, %v3418_v25  ;;  %v3426_v58 = vrot.slane %v3418_v25, %v11933_v7  ;;  %3319 = vrot.lane.b32.xlu0 %v3314_v18, %s11401_s21  ;;  %v10015_v18 = vld [vmem:[%s15904_s2 + $0x1f] ss:$0 sm:$0xff] }
 0x186   :  { %v3542_v59 = vcombine.high %v3541_v53, %v3541_v53  ;;  %v3549_v60 = vrot.slane %v3541_v53, %v11933_v7  ;;  %v3652_v63 = vpop.f32.mrb[28].mxu0  ;;  %v12264_v53 = vpop.permute.xlu1 %6920 }
 0x187   :  { %v3653_v0 = vadd.f32 %v10006_v54, %v3652_v63  ;;  %v10791_v1 = vpop.f32.mrb[29].mxu0  ;;  %3321 = vrot.lane.b32.xlu1 %v3318_v50, %s11401_s21  ;;  %v3775_v3 = vpop.f32.mrb[28].mxu1  ;;  %v3437_v5 = vrot.slane %v3426_v58, %v11936_v20  ;;  %v3433_v11 = vrot.slane %v3419_v57, %v11933_v7  ;;  %16030 = vst [vmem:[#allocation36_spill] sm:$0xff] %v12264_v53 }
 0x188   :  { %v3776_v14 = vadd.f32 %v10009_v35, %v3775_v3  ;;  %v10802_v16 = vpop.f32.mrb[29].mxu1  ;;  %v3556_v21 = vrot.slane %v3542_v59, %v11933_v7  ;;  %v3560_v29 = vrot.slane %v3549_v60, %v11936_v20 }
 0x189   :  { %v3656_v24 = vmax.f32 %v3653_v0, 0.0  ;;  %3442 = vrot.lane.b32.xlu0 %v3437_v5, %s11401_s21  ;;  %v3441_v26 = vrot.slane %v3433_v11, %v11936_v20 }
 0x18a   :  { %v3779_v31 = vmax.f32 %v3776_v14, 0.0  ;;  %v3564_v33 = vrot.slane %v3556_v21, %v11936_v20 }
 0x18b   :  { %v3664_v32 = vrot.slane %v3656_v24, %v11933_v7  ;;  %3444 = vrot.lane.b32.xlu1 %v3441_v26, %s11401_s21 }
 0x18c   :  { %v3787_v36 = vrot.slane %v3779_v31, %v11933_v7 }
 0x18d   :  { %v3665_v38 = vcombine.high %v3664_v32, %v3664_v32  ;;  %v3672_v39 = vrot.slane %v3664_v32, %v11933_v7  ;;  %3565 = vrot.lane.b32.xlu0 %v3560_v29, %s11401_s21  ;;  %v10018_v29 = vld [vmem:[%s15904_s2 + $0x20] ss:$0 sm:$0xff] }
 0x18e   :  { %v3788_v44 = vcombine.high %v3787_v36, %v3787_v36  ;;  %v3795_v25 = vrot.slane %v3787_v36, %v11933_v7  ;;  %v3898_v50 = vpop.f32.mrb[30].mxu0 }
 0x18f   :  { %v3679_v54 = vrot.slane %v3665_v38, %v11933_v7  ;;  %v3899_v57 = vadd.f32 %v10012_v37, %v3898_v50  ;;  %v10813_v58 = vpop.f32.mrb[31].mxu0  ;;  %3567 = vrot.lane.b32.xlu1 %v3564_v33, %s11401_s21  ;;  %v4021_v35 = vpop.f32.mrb[30].mxu1  ;;  %v3683_v59 = vrot.slane %v3672_v39, %v11936_v20  ;;  %v10021_v38 = vld [vmem:[%s15904_s2 + $0x21] ss:$0 sm:$0xff] }
 0x190   :  { %v3802_v60 = vrot.slane %v3788_v44, %v11933_v7  ;;  %v4022_v63 = vadd.f32 %v10015_v18, %v4021_v35  ;;  %v10824_v0 = vpop.f32.mrb[31].mxu1  ;;  %v3806_v5 = vrot.slane %v3795_v25, %v11936_v20 }
 0x191   :  { %v3902_v1 = vmax.f32 %v3899_v57, 0.0  ;;  %3688 = vrot.lane.b32.xlu0 %v3683_v59, %s11401_s21  ;;  %v3687_v3 = vrot.slane %v3679_v54, %v11936_v20 }
 0x192   :  { %v4025_v11 = vmax.f32 %v4022_v63, 0.0  ;;  %v3810_v21 = vrot.slane %v3802_v60, %v11936_v20 }
 0x193   :  { %v3910_v14 = vrot.slane %v3902_v1, %v11933_v7  ;;  %v241_v16 = vpop.permute.xlu0 %240  ;;  %3690 = vrot.lane.b32.xlu1 %v3687_v3, %s11401_s21 }
 0x194   :  { %v4033_v24 = vrot.slane %v4025_v11, %v11933_v7  ;;  %247 = vst.msk [vmem:[#allocation2 + $0x1] sm:$0x1] %vm246_vm4, %v241_v16  ;;  %v365_v26 = vpop.permute.xlu1 %364 }
 0x195   :  { %v3911_v31 = vcombine.high %v3910_v14, %v3910_v14  ;;  %v3918_v32 = vrot.slane %v3910_v14, %v11933_v7  ;;  %3811 = vrot.lane.b32.xlu0 %v3806_v5, %s11401_s21  ;;  %370 = vst.msk [vmem:[#allocation2 + $0x2] sm:$0x1] %vm246_vm4, %v365_v26  ;;  %v10024_v14 = vld [vmem:[%s15904_s2 + $0x22] ss:$0 sm:$0xff] }
 0x196   :  { %v4034_v33 = vcombine.high %v4033_v24, %v4033_v24  ;;  %v4041_v36 = vrot.slane %v4033_v24, %v11933_v7  ;;  %v4144_v37 = vpop.f32.mrb[32].mxu0 }
 0x197   :  { %v3925_v39 = vrot.slane %v3911_v31, %v11933_v7  ;;  %v4145_v18 = vadd.f32 %v10018_v29, %v4144_v37  ;;  %v243_v44 = vpop.permute.xlu0 %242  ;;  %v10835_v25 = vpop.f32.mrb[33].mxu0  ;;  %3813 = vrot.lane.b32.xlu1 %v3810_v21, %s11401_s21  ;;  %v3929_v50 = vrot.slane %v3918_v32, %v11936_v20  ;;  %v10027_v31 = vld [vmem:[%s15904_s2 + $0x23] ss:$0 sm:$0xff] }
 0x198   :  { %v4048_v54 = vrot.slane %v4034_v33, %v11933_v7  ;;  %248 = vst.msk [vmem:[#allocation2 + $0x61] sm:$0x1] %vm246_vm4, %v243_v44  ;;  %v4268_v57 = vpop.f32.mrb[32].mxu1  ;;  %v367_v58 = vpop.permute.xlu1 %366  ;;  %v4052_v0 = vrot.slane %v4041_v36, %v11936_v20 }
 0x199   :  { %v4148_v35 = vmax.f32 %v4145_v18, 0.0  ;;  %v4269_v59 = vadd.f32 %v10021_v38, %v4268_v57  ;;  %3934 = vrot.lane.b32.xlu0 %v3929_v50, %s11401_s21  ;;  %371 = vst.msk [vmem:[#allocation2 + $0x62] sm:$0x1] %vm246_vm4, %v367_v58  ;;  %v10846_v60 = vpop.f32.mrb[33].mxu1  ;;  %v3933_v63 = vrot.slane %v3925_v39, %v11936_v20 }
 0x19a   :  { %v4056_v11 = vrot.slane %v4048_v54, %v11936_v20 }
 0x19b   :  { %v4156_v1 = vrot.slane %v4148_v35, %v11933_v7  ;;  %v4272_v3 = vmax.f32 %v4269_v59, 0.0  ;;  %v488_v5 = vpop.permute.xlu0 %487  ;;  %3936 = vrot.lane.b32.xlu1 %v3933_v63, %s11401_s21 }
 0x19c   :  { %493 = vst.msk [vmem:[#allocation2 + $0x3] sm:$0x1] %vm246_vm4, %v488_v5 }
 0x19d   :  { %v4157_v16 = vcombine.high %v4156_v1, %v4156_v1  ;;  %v4164_v21 = vrot.slane %v4156_v1, %v11933_v7  ;;  %v4280_v24 = vrot.slane %v4272_v3, %v11933_v7  ;;  %4057 = vrot.lane.b32.xlu0 %v4052_v0, %s11401_s21  ;;  %v490_v26 = vpop.permute.xlu1 %489  ;;  %v10030_v3 = vld [vmem:[%s15904_s2 + $0x24] ss:$0 sm:$0xff] }
 0x19e   :  { %494 = vst.msk [vmem:[#allocation2 + $0x63] sm:$0x1] %vm246_vm4, %v490_v26  ;;  %v4391_v29 = vpop.f32.mrb[34].mxu0 }
 0x19f   :  { %v4171_v32 = vrot.slane %v4157_v16, %v11933_v7  ;;  %v4281_v33 = vcombine.high %v4280_v24, %v4280_v24  ;;  %v4288_v36 = vrot.slane %v4280_v24, %v11933_v7  ;;  %v4392_v37 = vadd.f32 %v10024_v14, %v4391_v29  ;;  %v611_v38 = vpop.permute.xlu0 %610  ;;  %v10857_v39 = vpop.f32.mrb[35].mxu0  ;;  %4059 = vrot.lane.b32.xlu1 %v4056_v11, %s11401_s21  ;;  %v10033_v24 = vld [vmem:[%s15904_s2 + $0x25] ss:$0 sm:$0xff] }
 0x1a0   :  { %616 = vst.msk [vmem:[#allocation2 + $0x4] sm:$0x1] %vm246_vm4, %v611_v38  ;;  %v4514_v18 = vpop.f32.mrb[34].mxu1  ;;  %v4175_v44 = vrot.slane %v4164_v21, %v11936_v20 }
 0x1a1   :  { %v4295_v25 = vrot.slane %v4281_v33, %v11933_v7  ;;  %v4395_v50 = vmax.f32 %v4392_v37, 0.0  ;;  %v4515_v54 = vadd.f32 %v10027_v31, %v4514_v18  ;;  %v613_v57 = vpop.permute.xlu1 %612  ;;  %v10868_v58 = vpop.f32.mrb[35].mxu1  ;;  %v4179_v35 = vrot.slane %v4171_v32, %v11936_v20 }
 0x1a2   :  { %4180 = vrot.lane.b32.xlu0 %v4175_v44, %s11401_s21  ;;  %617 = vst.msk [vmem:[#allocation2 + $0x64] sm:$0x1] %vm246_vm4, %v613_v57  ;;  %v4299_v59 = vrot.slane %v4288_v36, %v11936_v20 }
 0x1a3   :  { %v4403_v60 = vrot.slane %v4395_v50, %v11933_v7  ;;  %v4518_v63 = vmax.f32 %v4515_v54, 0.0  ;;  %v734_v0 = vpop.permute.xlu0 %733  ;;  %4182 = vrot.lane.b32.xlu1 %v4179_v35, %s11401_s21  ;;  %v4303_v1 = vrot.slane %v4295_v25, %v11936_v20 }
 0x1a4   :  { %739 = vst.msk [vmem:[#allocation2 + $0x5] sm:$0x1] %vm246_vm4, %v734_v0 }
 0x1a5   :  { %v4404_v5 = vcombine.high %v4403_v60, %v4403_v60  ;;  %v4411_v11 = vrot.slane %v4403_v60, %v11933_v7  ;;  %v4526_v14 = vrot.slane %v4518_v63, %v11933_v7  ;;  %v736_v16 = vpop.permute.xlu1 %735 }
 0x1a6   :  { %4304 = vrot.lane.b32.xlu0 %v4299_v59, %s11401_s21  ;;  %740 = vst.msk [vmem:[#allocation2 + $0x65] sm:$0x1] %vm246_vm4, %v736_v16  ;;  %v4637_v21 = vpop.f32.mrb[36].mxu0 }
 0x1a7   :  { %v4418_v26 = vrot.slane %v4404_v5, %v11933_v7  ;;  %v4527_v29 = vcombine.high %v4526_v14, %v4526_v14  ;;  %v4534_v31 = vrot.slane %v4526_v14, %v11933_v7  ;;  %v4638_v32 = vadd.f32 %v10030_v3, %v4637_v21  ;;  %v857_v33 = vpop.permute.xlu0 %856  ;;  %v10879_v36 = vpop.f32.mrb[37].mxu0  ;;  %4306 = vrot.lane.b32.xlu1 %v4303_v1, %s11401_s21 }
 0x1a8   :  { %862 = vst.msk [vmem:[#allocation2 + $0x6] sm:$0x1] %vm246_vm4, %v857_v33  ;;  %v4760_v37 = vpop.f32.mrb[36].mxu1  ;;  %v4422_v38 = vrot.slane %v4411_v11, %v11936_v20 }
 0x1a9   :  { %v4541_v39 = vrot.slane %v4527_v29, %v11933_v7  ;;  %v4641_v18 = vmax.f32 %v4638_v32, 0.0  ;;  %v4761_v44 = vadd.f32 %v10033_v24, %v4760_v37  ;;  %v859_v25 = vpop.permute.xlu1 %858  ;;  %v10890_v50 = vpop.f32.mrb[37].mxu1  ;;  %v4426_v54 = vrot.slane %v4418_v26, %v11936_v20 }
 0x1aa   :  { %4427 = vrot.lane.b32.xlu0 %v4422_v38, %s11401_s21  ;;  %863 = vst.msk [vmem:[#allocation2 + $0x66] sm:$0x1] %vm246_vm4, %v859_v25  ;;  %v4545_v57 = vrot.slane %v4534_v31, %v11936_v20  ;;  %v12372_v25 = vstv %s10070_s24  ;;  %s12614_s24 = sld [smem:[#allocation8 + $0x21]] }
 0x1ab   :  { %v4649_v58 = vrot.slane %v4641_v18, %v11933_v7  ;;  %v4764_v35 = vmax.f32 %v4761_v44, 0.0  ;;  %v980_v59 = vpop.permute.xlu0 %979  ;;  %4429 = vrot.lane.b32.xlu1 %v4426_v54, %s11401_s21  ;;  %v4549_v60 = vrot.slane %v4541_v39, %v11936_v20 }
 0x1ac   :  { %985 = vst.msk [vmem:[#allocation2 + $0x7] sm:$0x1] %vm246_vm4, %v980_v59 }
 0x1ad   :  { %v4650_v63 = vcombine.high %v4649_v58, %v4649_v58  ;;  %v4657_v0 = vrot.slane %v4649_v58, %v11933_v7  ;;  %v4772_v1 = vrot.slane %v4764_v35, %v11933_v7  ;;  %v982_v3 = vpop.permute.xlu1 %981 }
 0x1ae   :  { %4550 = vrot.lane.b32.xlu0 %v4545_v57, %s11401_s21  ;;  %986 = vst.msk [vmem:[#allocation2 + $0x67] sm:$0x1] %vm246_vm4, %v982_v3  ;;  %v12353_v5 = vpop.f32.mrb[38].mxu0 }
 0x1af   :  { %v4664_v11 = vrot.slane %v4650_v63, %v11933_v7  ;;  %v4773_v14 = vcombine.high %v4772_v1, %v4772_v1  ;;  %v4780_v16 = vrot.slane %v4772_v1, %v11933_v7  ;;  %v1103_v21 = vpop.permute.xlu0 %1102  ;;  %4552 = vrot.lane.b32.xlu1 %v4549_v60, %s11401_s21  ;;  %v4668_v24 = vrot.slane %v4657_v0, %v11936_v20  ;;  %v12359_v26 = vpop.f32.mrb[38].mxu1 }
 0x1b0   :  { %1108 = vst.msk [vmem:[#allocation2 + $0x8] sm:$0x1] %vm246_vm4, %v1103_v21  ;;  %v10901_v29 = vpop.f32.mrb[39].mxu0  ;;  %v10912_v31 = vpop.f32.mrb[39].mxu1  ;;  %v12388_v1 = vstv %s10071_s25  ;;  %v12398_v21 = vstv %s10072_s26  ;;  %s12616_s25 = sld [smem:[#allocation8 + $0x29]]  ;;  %s12629_s26 = sld [smem:[#allocation8 + $0x18]] }
 0x1b1   :  { %v4787_v32 = vrot.slane %v4773_v14, %v11933_v7  ;;  %v1105_v33 = vpop.permute.xlu1 %1104  ;;  %v4672_v36 = vrot.slane %v4664_v11, %v11936_v20  ;;  %v4791_v37 = vrot.slane %v4780_v16, %v11936_v20 }
 0x1b2   :  { %4673 = vrot.lane.b32.xlu0 %v4668_v24, %s11401_s21  ;;  %1109 = vst.msk [vmem:[#allocation2 + $0x68] sm:$0x1] %vm246_vm4, %v1105_v33 }
 0x1b3   :  { %v1226_v38 = vpop.permute.xlu0 %1225  ;;  %4675 = vrot.lane.b32.xlu1 %v4672_v36, %s11401_s21  ;;  %v4795_v39 = vrot.slane %v4787_v32, %v11936_v20  ;;  %v12370_v18 = vld [vmem:[#allocation2] sm:$0xff] }
 0x1b4   :  { %1232 = vst.msk [vmem:[#allocation2 + $0x11] sm:$0x1] %vm246_vm4, %v1226_v38  ;;  %v6080_v35 = vmul.f32 %v12372_v25, %v12370_v18  ;;  %v6106_v11 = vmul.f32 %v12388_v1, %v12370_v18  ;;  %v6132_v32 = vmul.f32 %v12398_v21, %v12370_v18 }
 0x1b5   :  { %v1228_v44 = vpop.permute.xlu1 %1227  ;;  %v12583_v43 = vld [vmem:[#allocation2 + $0x60] sm:$0xff] }
 0x1b6   :  { %4796 = vrot.lane.b32.xlu0 %v4791_v37, %s11401_s21  ;;  %1233 = vst.msk [vmem:[#allocation2 + $0x71] sm:$0x1] %vm246_vm4, %v1228_v44  ;;  %v12376_v50 = vpop.f32.mrb[40].mxu0 }
 0x1b7   :  { %v12378_v54 = vld [vmem:[#allocation2 + $0x8] sm:$0x1]  ;;  %v1350_v57 = vpop.permute.xlu0 %1349  ;;  %4798 = vrot.lane.b32.xlu1 %v4795_v39, %s11401_s21  ;;  %v12381_v58 = vpop.f32.mrb[40].mxu1  ;;  %v12412_v39 = vstv %s10073_s27  ;;  %s12642_s27 = sld [smem:[#allocation8 + $0x20]] }
 0x1b8   :  { %1355 = vst.msk [vmem:[#allocation2 + $0x12] sm:$0x1] %vm246_vm4, %v1350_v57  ;;  %v6081_v59 = vmul.f32 %v12372_v25, %v12378_v54  ;;  %v10923_v60 = vpop.f32.mrb[41].mxu0  ;;  %v10934_v63 = vpop.f32.mrb[41].mxu1  ;;  %v6107_v16 = vmul.f32 %v12388_v1, %v12378_v54  ;;  %v6133_v38 = vmul.f32 %v12398_v21, %v12378_v54  ;;  %v12421_v57 = vstv %s10067_s29  ;;  %v12509_v17 = vld [vmem:[#allocation2 + $0x1] sm:$0xff]  ;;  %s12646_s29 = sld [smem:[#allocation8 + $0x28]] }
 0x1b9   :  { %v1352_v0 = vpop.permute.xlu1 %1351  ;;  %v6159_v60 = vmul.f32 %v12412_v39, %v12378_v54  ;;  %v12432_v63 = vstv %s10074_s30  ;;  %v6263_v42 = vmul.f32 %v12523_v47, %v12378_v54  ;;  %v12587_v30 = vld [vmem:[#allocation2 + $0x68] sm:$0x1]  ;;  %s10093_s30 = sld [smem:[#allocation8 + $0x1e]] }
 0x1ba   :  { %1356 = vst.msk [vmem:[#allocation2 + $0x72] sm:$0x1] %vm246_vm4, %v1352_v0  ;;  %6088 = vrot.lane.b32.xlu0 %v6080_v35, %s11397_s4  ;;  %v6158_v35 = vmul.f32 %v12412_v39, %v12370_v18 }
 0x1bb   :  { %v1473_v3 = vpop.permute.xlu0 %1472  ;;  %6090 = vrot.lane.b32.xlu1 %v6081_v59, %s11397_s4 }
 0x1bc   :  { %1478 = vst.msk [vmem:[#allocation2 + $0x13] sm:$0x1] %vm246_vm4, %v1473_v3  ;;  %v6050_v3 = vmul.f32 %v12421_v57, %v12370_v18 }
 0x1bd   :  { %v1475_v14 = vpop.permute.xlu1 %1474 }
 0x1be   :  { %1479 = vst.msk [vmem:[#allocation2 + $0x73] sm:$0x1] %vm246_vm4, %v1475_v14  ;;  %6114 = vrot.lane.b32.xlu0 %v6106_v11, %s11397_s4  ;;  %v12402_v24 = vpop.f32.mrb[42].mxu0 }
 0x1bf   :  { %v1596_v29 = vpop.permute.xlu0 %1595  ;;  %6116 = vrot.lane.b32.xlu1 %v6107_v16, %s11397_s4  ;;  %v12405_v31 = vpop.f32.mrb[42].mxu1  ;;  %v6184_v16 = vmul.f32 %v12432_v63, %v12370_v18 }
 0x1c0   :  { %1601 = vst.msk [vmem:[#allocation2 + $0x14] sm:$0x1] %vm246_vm4, %v1596_v29  ;;  %v10945_v33 = vpop.f32.mrb[43].mxu0  ;;  %v10956_v36 = vpop.f32.mrb[43].mxu1  ;;  %v12450_v29 = vstv %s6035_s10  ;;  %s10139_s10 = sld [smem:[#allocation8 + $0x57]] }
 0x1c1   :  { %v1598_v37 = vpop.permute.xlu1 %1597 }
 0x1c2   :  { %1602 = vst.msk [vmem:[#allocation2 + $0x74] sm:$0x1] %vm246_vm4, %v1598_v37  ;;  %6140 = vrot.lane.b32.xlu0 %v6132_v32, %s11397_s4  ;;  %v6185_v37 = vmul.f32 %v12432_v63, %v12378_v54 }
 0x1c3   :  { %v1719_v44 = vpop.permute.xlu0 %1718  ;;  %6142 = vrot.lane.b32.xlu1 %v6133_v38, %s11397_s4  ;;  %v12459_v38 = vstv %s12414_s12  ;;  %s10140_s12 = sld [smem:[#allocation8 + $0x5f]] }
 0x1c4   :  { %1724 = vst.msk [vmem:[#allocation2 + $0x15] sm:$0x1] %vm246_vm4, %v1719_v44  ;;  %v12468_v44 = vstv %s12418_s13  ;;  %s10094_s13 = sld [smem:[#allocation8 + $0x26]] }
 0x1c5   :  { %v1721_v59 = vpop.permute.xlu1 %1720 }
 0x1c6   :  { %1725 = vst.msk [vmem:[#allocation2 + $0x75] sm:$0x1] %vm246_vm4, %v1721_v59  ;;  %6166 = vrot.lane.b32.xlu0 %v6158_v35, %s11398_s28  ;;  %v12438_v0 = vpop.f32.mrb[44].mxu0  ;;  %v12474_v59 = vadd.f32 %v6050_v3, %v12450_v29  ;;  %v6211_v3 = vmul.f32 %v12459_v38, %v12378_v54 }
 0x1c7   :  { %v1842_v11 = vpop.permute.xlu0 %1841  ;;  %6168 = vrot.lane.b32.xlu1 %v6159_v60, %s11398_s28  ;;  %v12445_v14 = vpop.f32.mrb[44].mxu1  ;;  %v12477_v60 = vstv %s12423_s1  ;;  %s10095_s1 = sld [smem:[#allocation8 + $0x2e]] }
 0x1c8   :  { %1847 = vst.msk [vmem:[#allocation2 + $0x16] sm:$0x1] %vm246_vm4, %v1842_v11  ;;  %v10967_v32 = vpop.f32.mrb[45].mxu0  ;;  %v10978_v33 = vpop.f32.mrb[45].mxu1  ;;  %v6210_v11 = vmul.f32 %v12459_v38, %v12370_v18 }
 0x1c9   :  { %v1844_v36 = vpop.permute.xlu1 %1843  ;;  %v12492_v33 = vstv %s12434_s5  ;;  %s10097_s5 = sld [smem:[#allocation8 + $0x25]] }
 0x1ca   :  { %1848 = vst.msk [vmem:[#allocation2 + $0x76] sm:$0x1] %vm246_vm4, %v1844_v36  ;;  %6192 = vrot.lane.b32.xlu0 %v6184_v16, %s11398_s28  ;;  %v12487_v16 = vstv %s12428_s3  ;;  %v6060_v36 = vmul.f32 %v12468_v44, %v12370_v18  ;;  %s10096_s3 = sld [smem:[#allocation8 + $0x1d]] }
 0x1cb   :  { %v1965_v35 = vpop.permute.xlu0 %1964  ;;  %6194 = vrot.lane.b32.xlu1 %v6185_v37, %s11398_s28  ;;  %v12501_v37 = vstv %s12442_s0  ;;  %s10098_s0 = sld [smem:[#allocation8 + $0x2d]] }
 0x1cc   :  { %1970 = vst.msk [vmem:[#allocation2 + $0x17] sm:$0x1] %vm246_vm4, %v1965_v35  ;;  %v6070_v35 = vmul.f32 %v12477_v60, %v12370_v18  ;;  %v12507_v53 = vadd.f32 %v6060_v36, %v12487_v16 }
 0x1cd   :  { %v1967_v32 = vpop.permute.xlu1 %1966 }
 0x1ce   :  { %1971 = vst.msk [vmem:[#allocation2 + $0x77] sm:$0x1] %vm246_vm4, %v1967_v32  ;;  %6218 = vrot.lane.b32.xlu0 %v6210_v11, %s11398_s28  ;;  %v6236_v32 = vmul.f32 %v12492_v33, %v12370_v18  ;;  %v12515_v11 = vstv %s12452_s14  ;;  %v12526_v36 = vadd.f32 %v6070_v35, %v12501_v37  ;;  %v12545_v35 = vmul.f32 %v12518_v49, %v12509_v17  ;;  %s12754_s14 = sld [smem:[#allocation8 + $0x44]] }
 0x1cf   :  { %v2088_v9 = vpop.permute.xlu0 %2087  ;;  %6220 = vrot.lane.b32.xlu1 %v6211_v3, %s11398_s28  ;;  %v6237_v3 = vmul.f32 %v12492_v33, %v12378_v54  ;;  %v12541_v27 = vmul.f32 %v12515_v11, %v12509_v17 }
 0x1d0   :  { %2093 = vst.msk [vmem:[#allocation2 + $0x18] sm:$0x1] %vm246_vm4, %v2088_v9  ;;  %v12534_v9 = vstv %s12470_s18  ;;  %s12777_s18 = sld [smem:[#allocation8 + $0x3f]] }
 0x1d1   :  { %v2090_v52 = vpop.permute.xlu1 %2089  ;;  %16031 = vst [vmem:[#allocation37_spill] sm:$0xff] %v12534_v9 }
 0x1d2   :  { %2094 = vst.msk [vmem:[#allocation2 + $0x78] sm:$0x1] %vm246_vm4, %v2090_v52  ;;  %6244 = vrot.lane.b32.xlu0 %v6236_v32, %s11399_s11  ;;  %v12551_v52 = vstv %s12481_s20  ;;  %v6262_v32 = vmul.f32 %v12523_v47, %v12370_v18  ;;  %s10142_s20 = sld [smem:[#allocation8 + $0x56]] }
 0x1d3   :  { %v12536_v12 = vld [vmem:[#allocation2 + $0x10] sm:$0xff]  ;;  %v2211_v51 = vpop.permute.xlu0 %2210  ;;  %6246 = vrot.lane.b32.xlu1 %v6237_v3, %s11399_s11  ;;  %16034 = vst [vmem:[#allocation40_spill] sm:$0xff] %v12551_v52  ;;  %v12558_v3 = vmul.f32 %v12529_v22, %v12509_v17 }
 0x1d4   :  { %16032 = vst [vmem:[#allocation38_spill] sm:$0xff] %v12536_v12  ;;  %2217 = vst.msk [vmem:[#allocation2 + $0x21] sm:$0x1] %vm246_vm4, %v2211_v51  ;;  %v12567_v23 = vmul.f32 %v12534_v9, %v12536_v12  ;;  %v12573_v51 = vmul.f32 %v12548_v8, %v12536_v12  ;;  %v12577_v41 = vmul.f32 %v12551_v52, %v12536_v12 }
 0x1d5   :  { %16035 = vst [vmem:[#allocation41_spill] sm:$0xff] %v12558_v3  ;;  %v2213_v2 = vpop.permute.xlu1 %2212  ;;  %v6083_v12 = vmul.f32 %v12372_v25, %v12587_v30 }
 0x1d6   :  { %16036 = vst [vmem:[#allocation42_spill] sm:$0xff] %v12567_v23  ;;  %2218 = vst.msk [vmem:[#allocation2 + $0x81] sm:$0x1] %vm246_vm4, %v2213_v2  ;;  %6270 = vrot.lane.b32.xlu0 %v6262_v32, %s11399_s11  ;;  %v6288_v23 = vmul.f32 %v12563_v6, %v12370_v18  ;;  %v6289_v32 = vmul.f32 %v12563_v6, %v12378_v54  ;;  %v6052_v18 = vmul.f32 %v12421_v57, %v12583_v43 }
 0x1d7   :  { %16037 = vst [vmem:[#allocation43_spill] sm:$0xff] %v12573_v51  ;;  %16038 = vst [vmem:[#allocation44_spill] sm:$0xff] %v12577_v41  ;;  %v2335_v55 = vpop.permute.xlu0 %2334  ;;  %6272 = vrot.lane.b32.xlu1 %v6263_v42, %s11399_s11  ;;  %v12592_v42 = vld [vmem:[#allocation2 + $0x61] sm:$0xff] }
 0x1d8   :  { %2340 = vst.msk [vmem:[#allocation2 + $0x22] sm:$0x1] %vm246_vm4, %v2335_v55  ;;  %v6348_v55 = vmul.f32 %v11570_v19, %v12509_v17 }
 0x1d9   :  { %v2337_v2 = vpop.permute.xlu1 %2336 }
 0x1da   :  { %2341 = vst.msk [vmem:[#allocation2 + $0x82] sm:$0x1] %vm246_vm4, %v2337_v2  ;;  %6296 = vrot.lane.b32.xlu0 %v6288_v23, %s11399_s11  ;;  %v6062_v23 = vmul.f32 %v12468_v44, %v12583_v43  ;;  %v6072_v2 = vmul.f32 %v12477_v60, %v12583_v43 }
 0x1db   :  { %v2458_v41 = vpop.permute.xlu0 %2457  ;;  %6298 = vrot.lane.b32.xlu1 %v6289_v32, %s11399_s11  ;;  %v12612_v32 = vadd.f32 %v6052_v18, %v12450_v29  ;;  %v6374_v18 = vmul.f32 %v11602_v40, %v12509_v17 }
 0x1dc   :  { %2463 = vst.msk [vmem:[#allocation2 + $0x23] sm:$0x1] %vm246_vm4, %v2458_v41  ;;  %v12609_v41 = vpop.f32.mrb[46].mxu0  ;;  %v12620_v3 = vadd.f32 %v6062_v23, %v12487_v16  ;;  %v12623_v46 = vadd.f32 %v6072_v2, %v12501_v37  ;;  %v12640_v23 = vmul.f32 %v12529_v22, %v12592_v42  ;;  %v6582_v2 = vld [vmem:[#allocation2 + $0x70] sm:$0xff] }
 0x1dd   :  { %v2460_v51 = vpop.permute.xlu1 %2459  ;;  %16039 = vst [vmem:[#allocation45_spill] sm:$0xff] %v12609_v41  ;;  %16040 = vst [vmem:[#allocation46_spill] sm:$0xff] %v12612_v32  ;;  %v12680_v41 = vstv %s12629_s26  ;;  %s10121_s26 = sld [smem:[#allocation8 + $0x3d]] }
 0x1de   :  { %2464 = vst.msk [vmem:[#allocation2 + $0x83] sm:$0x1] %vm246_vm4, %v2460_v51  ;;  %6356 = vrot.lane.b32.xlu0 %v6348_v55, %s11397_s4  ;;  %16041 = vst [vmem:[#allocation47_spill] sm:$0xff] %v12620_v3  ;;  %v12627_v51 = vmul.f32 %v12515_v11, %v12592_v42  ;;  %v10989_v55 = vpop.f32.mrb[47].mxu0  ;;  %v6848_v3 = vld [vmem:[#allocation2 + $0x11] sm:$0xff] }
 0x1df   :  { %v2581_v62 = vpop.permute.xlu0 %2580  ;;  %6094 = vrot.lane.b32.xlu1 %v6083_v12, %s11397_s4  ;;  %16042 = vst [vmem:[#allocation48_spill] sm:$0xff] %v12623_v46  ;;  %v12636_v12 = vmul.f32 %v12518_v49, %v12592_v42  ;;  %16045 = vst [vmem:[#allocation51_spill] sm:$0xff] %v12640_v23  ;;  %v6109_v55 = vmul.f32 %v12388_v1, %v12587_v30  ;;  %v12651_v23 = vpop.f32.mrb[46].mxu1 }
 0x1e0   :  { %16043 = vst [vmem:[#allocation49_spill] sm:$0xff] %v12627_v51  ;;  %2586 = vst.msk [vmem:[#allocation2 + $0x24] sm:$0x1] %vm246_vm4, %v2581_v62  ;;  %v12657_v51 = vmul.f32 %v12534_v9, %v6582_v2  ;;  %v12697_v9 = vstv %s12646_s29  ;;  %s10138_s29 = sld [smem:[#allocation8 + $0x4f]] }
 0x1e1   :  { %16044 = vst [vmem:[#allocation50_spill] sm:$0xff] %v12636_v12  ;;  %v2583_v46 = vpop.permute.xlu1 %2582  ;;  %16046 = vst [vmem:[#allocation52_spill] sm:$0xff] %v12651_v23  ;;  %v6400_v12 = vmul.f32 %v11622_v56, %v12509_v17  ;;  %v12665_v23 = vstv %s12605_s23  ;;  %s10118_s23 = sld [smem:[#allocation8 + $0x3e]] }
 0x1e2   :  { %2587 = vst.msk [vmem:[#allocation2 + $0x84] sm:$0x1] %vm246_vm4, %v2583_v46  ;;  %6382 = vrot.lane.b32.xlu0 %v6374_v18, %s11397_s4  ;;  %16047 = vst [vmem:[#allocation53_spill] sm:$0xff] %v12657_v51  ;;  %v12660_v46 = vmul.f32 %v12548_v8, %v6582_v2  ;;  %v11000_v18 = vpop.f32.mrb[47].mxu1  ;;  %v12673_v51 = vstv %s12614_s24  ;;  %s10119_s24 = sld [smem:[#allocation8 + $0x46]] }
 0x1e3   :  { %v2704_v62 = vpop.permute.xlu0 %2703  ;;  %6120 = vrot.lane.b32.xlu1 %v6109_v55, %s11397_s4  ;;  %v6135_v55 = vmul.f32 %v12398_v21, %v12587_v30  ;;  %16049 = vst [vmem:[#allocation55_spill] sm:$0xff] %v12665_v23  ;;  %16051 = vst [vmem:[#allocation57_spill] sm:$0xff] %v12673_v51 }
 0x1e4   :  { %2709 = vst.msk [vmem:[#allocation2 + $0x25] sm:$0x1] %vm246_vm4, %v2704_v62  ;;  %16048 = vst [vmem:[#allocation54_spill] sm:$0xff] %v12660_v46  ;;  %v12668_v62 = vmul.f32 %v12551_v52, %v6582_v2  ;;  %v12676_v46 = vstv %s12616_s25  ;;  %v6426_v2 = vmul.f32 %v11653_v10, %v12509_v17  ;;  %v6850_v52 = vld [vmem:[#allocation2 + $0x71] sm:$0xff]  ;;  %s10120_s25 = sld [smem:[#allocation8 + $0x35]] }
 0x1e5   :  { %v2706_v32 = vpop.permute.xlu1 %2705  ;;  %16052 = vst [vmem:[#allocation58_spill] sm:$0xff] %v12676_v46  ;;  %16053 = vst [vmem:[#allocation59_spill] sm:$0xff] %v12680_v41  ;;  %v12703_v48 = vmul.f32 %v12676_v46, %v6848_v3 }
 0x1e6   :  { %16050 = vst [vmem:[#allocation56_spill] sm:$0xff] %v12668_v62  ;;  %2710 = vst.msk [vmem:[#allocation2 + $0x85] sm:$0x1] %vm246_vm4, %v2706_v32  ;;  %6408 = vrot.lane.b32.xlu0 %v6400_v12, %s11397_s4  ;;  %v10036_v32 = vld [vmem:[%s15904_s2 + $0x26] ss:$0 sm:$0xff]  ;;  %v12689_v62 = vstv %s12642_s27  ;;  %v12692_v12 = vmul.f32 %v12665_v23, %v6848_v3  ;;  %v12708_v23 = vmul.f32 %v12680_v41, %v6848_v3  ;;  %s10149_s27 = sld [smem:[#allocation8 + $0x5c]] }
 0x1e7   :  { %v2827_v18 = vpop.permute.xlu0 %2826  ;;  %6146 = vrot.lane.b32.xlu1 %v6135_v55, %s11397_s4  ;;  %16054 = vst [vmem:[#allocation60_spill] sm:$0xff] %v12689_v62  ;;  %v6161_v55 = vmul.f32 %v12412_v39, %v12587_v30  ;;  %16056 = vst [vmem:[#allocation62_spill] sm:$0xff] %v12697_v9  ;;  %v4884_v13 = vadd.f32 %v10036_v32, %v12353_v5  ;;  %v6187_v5 = vmul.f32 %v12432_v63, %v12587_v30 }
 0x1e8   :  { %2832 = vst.msk [vmem:[#allocation2 + $0x26] sm:$0x1] %vm246_vm4, %v2827_v18  ;;  %16055 = vst [vmem:[#allocation61_spill] sm:$0xff] %v12692_v12  ;;  %v12700_v18 = vmul.f32 %v12673_v51, %v6848_v3  ;;  %v10039_v51 = vld [vmem:[%s15904_s2 + $0x27] ss:$0 sm:$0xff] }
 0x1e9   :  { %v2829_v8 = vpop.permute.xlu1 %2828  ;;  %16058 = vst [vmem:[#allocation64_spill] sm:$0xff] %v12703_v48  ;;  %16059 = vst [vmem:[#allocation65_spill] sm:$0xff] %v12708_v23  ;;  %v12725_v23 = vmul.f32 %v12697_v9, %v6850_v52  ;;  %v5007_v32 = vadd.f32 %v10039_v51, %v12359_v26  ;;  %v6478_v52 = vmul.f32 %v11693_v45, %v12509_v17 }
 0x1ea   :  { %16057 = vst [vmem:[#allocation63_spill] sm:$0xff] %v12700_v18  ;;  %2833 = vst.msk [vmem:[#allocation2 + $0x86] sm:$0x1] %vm246_vm4, %v2829_v8  ;;  %6434 = vrot.lane.b32.xlu0 %v6426_v2, %s11398_s28  ;;  %v12716_v18 = vmul.f32 %v12689_v62, %v6848_v3  ;;  %v6452_v8 = vmul.f32 %v11673_v28, %v12509_v17  ;;  %v12722_v2 = vmul.f32 %v12697_v9, %v6848_v3  ;;  %v10042_v3 = vld [vmem:[%s15904_s2 + $0x28] ss:$0 sm:$0xff] }
 0x1eb   :  { %v2950_v12 = vpop.permute.xlu0 %2949  ;;  %6172 = vrot.lane.b32.xlu1 %v6161_v55, %s11398_s28  ;;  %16062 = vst [vmem:[#allocation68_spill] sm:$0xff] %v12725_v23  ;;  %v5010_v26 = vmax.f32 %v5007_v32, 0.0  ;;  %v12798_v9 = vstv %s12754_s14  ;;  %s10099_s14 = sld [smem:[#allocation8 + $0x1c]] }
 0x1ec   :  { %16060 = vst [vmem:[#allocation66_spill] sm:$0xff] %v12716_v18  ;;  %2955 = vst.msk [vmem:[#allocation2 + $0x27] sm:$0x1] %vm246_vm4, %v2950_v12  ;;  %v4887_v18 = vmax.f32 %v4884_v13, 0.0  ;;  %v5130_v13 = vadd.f32 %v10042_v3, %v12376_v50  ;;  %v6239_v50 = vmul.f32 %v12492_v33, %v12587_v30 }
 0x1ed   :  { %16061 = vst [vmem:[#allocation67_spill] sm:$0xff] %v12722_v2  ;;  %v2952_v55 = vpop.permute.xlu1 %2951  ;;  %16063 = vst [vmem:[#allocation69_spill] sm:$0xff] %v12798_v9 }
 0x1ee   :  { %2956 = vst.msk [vmem:[#allocation2 + $0x87] sm:$0x1] %vm246_vm4, %v2952_v55  ;;  %6460 = vrot.lane.b32.xlu0 %v6452_v8, %s11398_s28  ;;  %v6213_v55 = vmul.f32 %v12459_v38, %v12587_v30  ;;  %v12746_v8 = vrot.slane %v4887_v18, %v11933_v7  ;;  %v12761_v18 = vrot.slane %v5010_v26, %v11933_v7 }
 0x1ef   :  { %v3073_v12 = vpop.permute.xlu0 %3072  ;;  %6198 = vrot.lane.b32.xlu1 %v6187_v5, %s11398_s28  ;;  %v6504_v5 = vmul.f32 %v11713_v61, %v12509_v17 }
 0x1f0   :  { %3078 = vst.msk [vmem:[#allocation2 + $0x28] sm:$0x1] %vm246_vm4, %v3073_v12  ;;  %v5133_v12 = vmax.f32 %v5130_v13, 0.0  ;;  %v4896_v3 = vcombine.high %v12746_v8, %v12746_v8  ;;  %v6265_v13 = vmul.f32 %v12523_v47, %v12587_v30 }
 0x1f1   :  { %v3075_v23 = vpop.permute.xlu1 %3074 }
 0x1f2   :  { %3079 = vst.msk [vmem:[#allocation2 + $0x88] sm:$0x1] %vm246_vm4, %v3075_v23  ;;  %6486 = vrot.lane.b32.xlu0 %v6478_v52, %s11398_s28  ;;  %v10045_v23 = vld [vmem:[%s15904_s2 + $0x29] ss:$0 sm:$0xff] }
 0x1f3   :  { %v3196_v51 = vpop.permute.xlu0 %3195  ;;  %6224 = vrot.lane.b32.xlu1 %v6213_v55, %s11398_s28  ;;  %v5254_v55 = vadd.f32 %v10045_v23, %v12381_v58  ;;  %v5019_v58 = vcombine.high %v12761_v18, %v12761_v18  ;;  %v12786_v23 = vrot.slane %v5133_v12, %v11933_v7  ;;  %v7116_v48 = vld [vmem:[#allocation2 + $0x20] sm:$0xff]  ;;  %v6556_v12 = vmul.f32 %v11753_v34, %v12509_v17 }
 0x1f4   :  { %3202 = vst.msk [vmem:[#allocation2 + $0x31] sm:$0x1] %vm246_vm4, %v3196_v51  ;;  %v10048_v51 = vld [vmem:[%s15904_s2 + $0x2a] ss:$0 sm:$0xff] }
 0x1f5   :  { %v3198_v32 = vpop.permute.xlu1 %3197  ;;  %v5257_v2 = vmax.f32 %v5254_v55, 0.0  ;;  %v5033_v55 = vrot.slane %v5019_v58, %v11933_v7 }
 0x1f6   :  { %3203 = vst.msk [vmem:[#allocation2 + $0x91] sm:$0x1] %vm246_vm4, %v3198_v32  ;;  %6512 = vrot.lane.b32.xlu0 %v6504_v5, %s11399_s11  ;;  %v6530_v5 = vmul.f32 %v11733_v15, %v12509_v17  ;;  %v5377_v32 = vadd.f32 %v10048_v51, %v12402_v24  ;;  %v5142_v51 = vcombine.high %v12786_v23, %v12786_v23 }
 0x1f7   :  { %v3320_v52 = vpop.permute.xlu0 %3319  ;;  %6250 = vrot.lane.b32.xlu1 %v6239_v50, %s11399_s11  ;;  %v4910_v50 = vrot.slane %v4896_v3, %v11933_v7  ;;  %v6291_v3 = vmul.f32 %v12563_v6, %v12587_v30  ;;  %v12810_v62 = vrot.slane %v5257_v2, %v11933_v7 }
 0x1f8   :  { %3325 = vst.msk [vmem:[#allocation2 + $0x32] sm:$0x1] %vm246_vm4, %v3320_v52 }
 0x1f9   :  { %v3322_v26 = vpop.permute.xlu1 %3321  ;;  %v4918_v58 = vrot.slane %v4910_v50, %v11936_v20  ;;  %v12832_v50 = vstv %s12779_s19  ;;  %s10141_s19 = sld [smem:[#allocation8 + $0x4e]] }
 0x1fa   :  { %3326 = vst.msk [vmem:[#allocation2 + $0x92] sm:$0x1] %vm246_vm4, %v3322_v26  ;;  %6538 = vrot.lane.b32.xlu0 %v6530_v5, %s11399_s11  ;;  %v10051_v26 = vld [vmem:[%s15904_s2 + $0x2b] ss:$0 sm:$0xff]  ;;  %v7118_v5 = vld [vmem:[#allocation2 + $0x80] sm:$0xff]  ;;  %16068 = vst [vmem:[#allocation74_spill] sm:$0xff] %v12832_v50 }
 0x1fb   :  { %v3443_v52 = vpop.permute.xlu0 %3442  ;;  %6276 = vrot.lane.b32.xlu1 %v6265_v13, %s11399_s11  ;;  %v5380_v13 = vmax.f32 %v5377_v32, 0.0  ;;  %v5500_v17 = vadd.f32 %v10051_v26, %v12405_v31  ;;  %v6082_v32 = vmul.f32 %v12372_v25, %v12583_v43  ;;  %v10054_v31 = vld [vmem:[%s15904_s2 + $0x2c] ss:$0 sm:$0xff]  ;;  %v12826_v26 = vstv %s12773_s17  ;;  %s10136_s17 = sld [smem:[#allocation8 + $0x38]] }
 0x1fc   :  { %3448 = vst.msk [vmem:[#allocation2 + $0x33] sm:$0x1] %vm246_vm4, %v3443_v52  ;;  %16066 = vst [vmem:[#allocation72_spill] sm:$0xff] %v12826_v26  ;;  %v5041_v25 = vrot.slane %v5033_v55, %v11936_v20  ;;  %v5623_v46 = vadd.f32 %v10054_v31, %v12438_v0  ;;  %v6108_v55 = vmul.f32 %v12388_v1, %v12583_v43 }
 0x1fd   :  { %v3445_v24 = vpop.permute.xlu1 %3444  ;;  %v12867_v31 = vmul.f32 %v12832_v50, %v7118_v5 }
 0x1fe   :  { %3449 = vst.msk [vmem:[#allocation2 + $0x93] sm:$0x1] %vm246_vm4, %v3445_v24  ;;  %6564 = vrot.lane.b32.xlu0 %v6556_v12, %s11399_s11  ;;  %v12814_v24 = vmul.f32 %v12798_v9, %v7116_v48  ;;  %v12817_v12 = vmul.f32 %v12798_v9, %v7118_v5  ;;  %v5266_v9 = vcombine.high %v12810_v62, %v12810_v62 }
 0x1ff   :  { %v3566_v52 = vpop.permute.xlu0 %3565  ;;  %6302 = vrot.lane.b32.xlu1 %v6291_v3, %s11399_s11  ;;  %v12829_v3 = vstv %s12777_s18  ;;  %16074 = vst [vmem:[#allocation80_spill] sm:$0xff] %v12867_v31  ;;  %s10137_s18 = sld [smem:[#allocation8 + $0x40]] }
 0x200   :  { %16064 = vst [vmem:[#allocation70_spill] sm:$0xff] %v12814_v24  ;;  %16065 = vst [vmem:[#allocation71_spill] sm:$0xff] %v12817_v12  ;;  %v5156_v24 = vrot.slane %v5142_v51, %v11933_v7  ;;  %v5503_v12 = vmax.f32 %v5500_v17, 0.0  ;;  %v12846_v51 = vmul.f32 %v12826_v26, %v7116_v48  ;;  %v12858_v17 = vmul.f32 %v12829_v3, %v7116_v48 }
 0x201   :  { %3571 = vst.msk [vmem:[#allocation2 + $0x34] sm:$0x1] %vm246_vm4, %v3566_v52  ;;  %v3568_v2 = vpop.permute.xlu1 %3567  ;;  %16067 = vst [vmem:[#allocation73_spill] sm:$0xff] %v12829_v3  ;;  %v12838_v52 = vrot.slane %v5380_v13, %v11933_v7  ;;  %v10057_v13 = vld [vmem:[%s15904_s2 + $0x2d] ss:$0 sm:$0xff]  ;;  %v12861_v0 = vmul.f32 %v12829_v3, %v7118_v5 }
 0x202   :  { %3572 = vst.msk [vmem:[#allocation2 + $0x94] sm:$0x1] %vm246_vm4, %v3568_v2  ;;  %6092 = vrot.lane.b32.xlu0 %v6082_v32, %s11397_s4  ;;  %16069 = vst [vmem:[#allocation75_spill] sm:$0xff] %v12846_v51  ;;  %v12849_v2 = vmul.f32 %v12826_v26, %v7118_v5  ;;  %v12864_v32 = vmul.f32 %v12832_v50, %v7116_v48  ;;  %v5164_v48 = vrot.slane %v5156_v24, %v11936_v20  ;;  %v11312_v3 = vld [vmem:[#allocation2 + $0x9] sm:$0x1] }
 0x203   :  { %v3689_v41 = vpop.permute.xlu0 %3688  ;;  %4921 = vrot.lane.b32.xlu1 %v4918_v58, %s11401_s21  ;;  %16071 = vst [vmem:[#allocation77_spill] sm:$0xff] %v12858_v17  ;;  %16072 = vst [vmem:[#allocation78_spill] sm:$0xff] %v12861_v0  ;;  %v5389_v1 = vcombine.high %v12838_v52, %v12838_v52  ;;  %v5280_v17 = vrot.slane %v5266_v9, %v11933_v7  ;;  %v5746_v5 = vadd.f32 %v10057_v13, %v12445_v14 }
 0x204   :  { %16070 = vst [vmem:[#allocation76_spill] sm:$0xff] %v12849_v2  ;;  %3694 = vst.msk [vmem:[#allocation2 + $0x35] sm:$0x1] %vm246_vm4, %v3689_v41  ;;  %v12874_v41 = vrot.slane %v5503_v12, %v11933_v7  ;;  %v4903_v51 = vrot.slane %v12746_v8, %v11933_v7  ;;  %v6319_v26 = vmul.f32 %v11312_v3, %v12515_v11 }
 0x205   :  { %v3691_v58 = vpop.permute.xlu1 %3690  ;;  %16073 = vst [vmem:[#allocation79_spill] sm:$0xff] %v12864_v32  ;;  %v5626_v32 = vmax.f32 %v5623_v46, 0.0  ;;  %v5403_v12 = vrot.slane %v5389_v1, %v11933_v7  ;;  %v5288_v46 = vrot.slane %v5280_v17, %v11936_v20  ;;  %v5749_v24 = vmax.f32 %v5746_v5, 0.0 }
 0x206   :  { %3695 = vst.msk [vmem:[#allocation2 + $0x95] sm:$0x1] %vm246_vm4, %v3691_v58  ;;  %6118 = vrot.lane.b32.xlu0 %v6108_v55, %s11397_s4  ;;  %v6134_v55 = vmul.f32 %v12398_v21, %v12583_v43  ;;  %v5512_v9 = vcombine.high %v12874_v41, %v12874_v41  ;;  %v6160_v21 = vmul.f32 %v12412_v39, %v12583_v43 }
 0x207   :  { %v3812_v0 = vpop.permute.xlu0 %3811  ;;  %5044 = vrot.lane.b32.xlu1 %v5041_v25, %s11401_s21  ;;  %v12890_v14 = vrot.slane %v5626_v32, %v11933_v7  ;;  %v12903_v17 = vrot.slane %v5749_v24, %v11933_v7  ;;  %v6186_v39 = vmul.f32 %v12432_v63, %v12583_v43 }
 0x208   :  { %3817 = vst.msk [vmem:[#allocation2 + $0x36] sm:$0x1] %vm246_vm4, %v3812_v0  ;;  %v5526_v0 = vrot.slane %v5512_v9, %v11933_v7 }
 0x209   :  { %v3814_v58 = vpop.permute.xlu1 %3813  ;;  %v5635_v1 = vcombine.high %v12890_v14, %v12890_v14 }
 0x20a   :  { %3818 = vst.msk [vmem:[#allocation2 + $0x96] sm:$0x1] %vm246_vm4, %v3814_v58  ;;  %6144 = vrot.lane.b32.xlu0 %v6134_v55, %s11397_s4  ;;  %v5758_v58 = vcombine.high %v12903_v17, %v12903_v17  ;;  %v5534_v9 = vrot.slane %v5526_v0, %v11936_v20 }
 0x20b   :  { %v3935_v25 = vpop.permute.xlu0 %3934  ;;  %5167 = vrot.lane.b32.xlu1 %v5164_v48, %s11401_s21  ;;  %v5411_v48 = vrot.slane %v5403_v12, %v11936_v20  ;;  %v5649_v55 = vrot.slane %v5635_v1, %v11933_v7 }
 0x20c   :  { %3940 = vst.msk [vmem:[#allocation2 + $0x37] sm:$0x1] %vm246_vm4, %v3935_v25  ;;  %v6212_v25 = vmul.f32 %v12459_v38, %v12583_v43 }
 0x20d   :  { %v3937_v13 = vpop.permute.xlu1 %3936  ;;  %v5657_v24 = vrot.slane %v5649_v55, %v11936_v20  ;;  %v12936_v55 = vld [vmem:[#allocation2 + $0x18] sm:$0x1] }
 0x20e   :  { %3941 = vst.msk [vmem:[#allocation2 + $0x97] sm:$0x1] %vm246_vm4, %v3937_v13  ;;  %6170 = vrot.lane.b32.xlu0 %v6160_v21, %s11398_s28  ;;  %v6238_v13 = vmul.f32 %v12492_v33, %v12583_v43  ;;  %v6264_v33 = vmul.f32 %v12523_v47, %v12583_v43 }
 0x20f   :  { %v4058_v32 = vpop.permute.xlu0 %4057  ;;  %5291 = vrot.lane.b32.xlu1 %v5288_v46, %s11401_s21  ;;  %v5772_v46 = vrot.slane %v5758_v58, %v11933_v7 }
 0x210   :  { %4063 = vst.msk [vmem:[#allocation2 + $0x38] sm:$0x1] %vm246_vm4, %v4058_v32  ;;  %v12931_v32 = vstv %s10149_s27  ;;  %s10122_s27 = sld [smem:[#allocation8 + $0x45]] }
 0x211   :  { %v4060_v5 = vpop.permute.xlu1 %4059  ;;  %v5780_v1 = vrot.slane %v5772_v46, %v11936_v20  ;;  %16075 = vst [vmem:[#allocation81_spill] sm:$0xff] %v12931_v32  ;;  %v12953_v46 = vstv %s10139_s10  ;;  %s10102_s10 = sld [smem:[#allocation8 + $0x1b]] }
 0x212   :  { %4064 = vst.msk [vmem:[#allocation2 + $0x98] sm:$0x1] %vm246_vm4, %v4060_v5  ;;  %6196 = vrot.lane.b32.xlu0 %v6186_v39, %s11398_s28  ;;  %16079 = vst [vmem:[#allocation85_spill] sm:$0xff] %v12953_v46 }
 0x213   :  { %5414 = vrot.lane.b32.xlu1 %v5411_v48, %s11401_s21  ;;  %v7652_v0 = vld [vmem:[#allocation2 + $0x30] sm:$0xff] }
 0x214   :  { %v4181_v12 = vpop.permute.xlu0 %4180  ;;  %v12941_v58 = vmul.f32 %v12931_v32, %v7652_v0 }
 0x215   :  { %4187 = vst.msk [vmem:[#allocation2 + $0x41] sm:$0x1] %vm246_vm4, %v4181_v12  ;;  %v4183_v63 = vpop.permute.xlu1 %4182  ;;  %v7654_v48 = vld [vmem:[#allocation2 + $0x90] sm:$0xff] }
 0x216   :  { %4188 = vst.msk [vmem:[#allocation2 + $0xa1] sm:$0x1] %vm246_vm4, %v4183_v63  ;;  %6222 = vrot.lane.b32.xlu0 %v6212_v25, %s11398_s28  ;;  %16076 = vst [vmem:[#allocation82_spill] sm:$0xff] %v12941_v58  ;;  %v12947_v12 = vmul.f32 %v12931_v32, %v7654_v48  ;;  %v6290_v25 = vmul.f32 %v12563_v6, %v12583_v43  ;;  %v12951_v63 = vstv %s10093_s30  ;;  %v13041_v58 = vstv %s10100_s15  ;;  %s10124_s30 = sld [smem:[#allocation8 + $0x3c]]  ;;  %s10134_s15 = sld [smem:[#allocation8 + $0x41]] }
 0x217   :  { %5537 = vrot.lane.b32.xlu1 %v5534_v9, %s11401_s21  ;;  %v12944_v9 = vstv %s10138_s29  ;;  %v12970_v43 = vmul.f32 %v12953_v46, %v7652_v0  ;;  %s10123_s29 = sld [smem:[#allocation8 + $0x34]] }
 0x218   :  { %v4305_v21 = vpop.permute.xlu0 %4304  ;;  %16077 = vst [vmem:[#allocation83_spill] sm:$0xff] %v12944_v9  ;;  %16078 = vst [vmem:[#allocation84_spill] sm:$0xff] %v12947_v12  ;;  %v12966_v6 = vmul.f32 %v12944_v9, %v7654_v48 }
 0x219   :  { %4310 = vst.msk [vmem:[#allocation2 + $0x42] sm:$0x1] %vm246_vm4, %v4305_v21  ;;  %v4307_v38 = vpop.permute.xlu1 %4306  ;;  %v6617_v21 = vmul.f32 %v12951_v63, %v12936_v55  ;;  %16083 = vst [vmem:[#allocation89_spill] sm:$0xff] %v12970_v43 }
 0x21a   :  { %4311 = vst.msk [vmem:[#allocation2 + $0xa2] sm:$0x1] %vm246_vm4, %v4307_v38  ;;  %6248 = vrot.lane.b32.xlu0 %v6238_v13, %s11399_s11  ;;  %v12958_v13 = vstv %s10140_s12  ;;  %v12963_v38 = vmul.f32 %v12944_v9, %v7652_v0  ;;  %16082 = vst [vmem:[#allocation88_spill] sm:$0xff] %v12966_v6  ;;  %v13031_v6 = vstv %s10099_s14  ;;  %v6532_v9 = vmul.f32 %v11733_v15, %v12592_v42  ;;  %s10129_s12 = sld [smem:[#allocation8 + $0x32]]  ;;  %s13650_s14 = sld [smem:[#allocation8 + $0x39]] }
 0x21b   :  { %5660 = vrot.lane.b32.xlu1 %v5657_v24, %s11401_s21  ;;  %16080 = vst [vmem:[#allocation86_spill] sm:$0xff] %v12958_v13  ;;  %v6071_v15 = vmul.f32 %v12477_v60, %v12378_v54 }
 0x21c   :  { %v4428_v39 = vpop.permute.xlu0 %4427  ;;  %16081 = vst [vmem:[#allocation87_spill] sm:$0xff] %v12963_v38  ;;  %v6773_v38 = vmul.f32 %v13031_v6, %v12936_v55 }
 0x21d   :  { %4433 = vst.msk [vmem:[#allocation2 + $0x43] sm:$0x1] %vm246_vm4, %v4428_v39  ;;  %v4430_v5 = vpop.permute.xlu1 %4429 }
 0x21e   :  { %4434 = vst.msk [vmem:[#allocation2 + $0xa3] sm:$0x1] %vm246_vm4, %v4430_v5  ;;  %6274 = vrot.lane.b32.xlu0 %v6264_v33, %s11399_s11  ;;  %v6350_v33 = vmul.f32 %v11570_v19, %v12592_v42  ;;  %v12977_v5 = vstv %s10094_s13  ;;  %s10103_s13 = sld [smem:[#allocation8 + $0x23]] }
 0x21f   :  { %5783 = vrot.lane.b32.xlu1 %v5780_v1, %s11401_s21  ;;  %v12973_v1 = vmul.f32 %v12953_v46, %v7654_v48 }
 0x220   :  { %v4551_v47 = vpop.permute.xlu0 %4550 }
 0x221   :  { %4556 = vst.msk [vmem:[#allocation2 + $0x44] sm:$0x1] %vm246_vm4, %v4551_v47  ;;  %v4553_v24 = vpop.permute.xlu1 %4552  ;;  %16084 = vst [vmem:[#allocation90_spill] sm:$0xff] %v12973_v1  ;;  %v12980_v47 = vmul.f32 %v12958_v13, %v7652_v0  ;;  %v6376_v0 = vmul.f32 %v11602_v40, %v12592_v42  ;;  %v13003_v40 = vstv %s10096_s3  ;;  %s10130_s3 = sld [smem:[#allocation8 + $0x3a]] }
 0x222   :  { %4557 = vst.msk [vmem:[#allocation2 + $0xa4] sm:$0x1] %vm246_vm4, %v4553_v24  ;;  %6300 = vrot.lane.b32.xlu0 %v6290_v25, %s11399_s11  ;;  %v6643_v24 = vmul.f32 %v12977_v5, %v12936_v55 }
 0x223   :  { %6626 = vrot.lane.b32.xlu1 %v6617_v21, %s11397_s4  ;;  %16085 = vst [vmem:[#allocation91_spill] sm:$0xff] %v12980_v47  ;;  %v12986_v21 = vmul.f32 %v12958_v13, %v7654_v48  ;;  %v12993_v47 = vstv %s10095_s1  ;;  %v6799_v13 = vmul.f32 %v13041_v58, %v12936_v55  ;;  %s10104_s1 = sld [smem:[#allocation8 + $0x2b]] }
 0x224   :  { %v4674_v39 = vpop.permute.xlu0 %4673  ;;  %v6669_v48 = vmul.f32 %v12993_v47, %v12936_v55 }
 0x225   :  { %4679 = vst.msk [vmem:[#allocation2 + $0x45] sm:$0x1] %vm246_vm4, %v4674_v39  ;;  %v4676_v25 = vpop.permute.xlu1 %4675  ;;  %16086 = vst [vmem:[#allocation92_spill] sm:$0xff] %v12986_v21 }
 0x226   :  { %4680 = vst.msk [vmem:[#allocation2 + $0xa5] sm:$0x1] %vm246_vm4, %v4676_v25  ;;  %6360 = vrot.lane.b32.xlu0 %v6350_v33, %s11397_s4  ;;  %v6402_v25 = vmul.f32 %v11622_v56, %v12592_v42 }
 0x227   :  { %6652 = vrot.lane.b32.xlu1 %v6643_v24, %s11397_s4 }
 0x228   :  { %v4797_v19 = vpop.permute.xlu0 %4796 }
 0x229   :  { %4802 = vst.msk [vmem:[#allocation2 + $0x46] sm:$0x1] %vm246_vm4, %v4797_v19  ;;  %v4799_v39 = vpop.permute.xlu1 %4798  ;;  %v6695_v19 = vmul.f32 %v13003_v40, %v12936_v55 }
 0x22a   :  { %4803 = vst.msk [vmem:[#allocation2 + $0xa6] sm:$0x1] %vm246_vm4, %v4799_v39  ;;  %6386 = vrot.lane.b32.xlu0 %v6376_v0, %s11397_s4  ;;  %v6428_v0 = vmul.f32 %v11653_v10, %v12592_v42 }
 0x22b   :  { %6678 = vrot.lane.b32.xlu1 %v6669_v48, %s11397_s4  ;;  %v13011_v48 = vstv %s10097_s5  ;;  %s10131_s5 = sld [smem:[#allocation8 + $0x42]] }
 0x22c   :  { %v6089_v33 = vpop.permute.xlu0 %6088  ;;  %v6721_v56 = vmul.f32 %v13011_v48, %v12936_v55 }
 0x22d   :  { %v6091_v24 = vpop.permute.xlu1 %6090  ;;  %v6100_v32 = vadd.f32 %v6089_v33, %v12474_v59 }
 0x22e   :  { %6412 = vrot.lane.b32.xlu0 %v6402_v25, %s11397_s4  ;;  %v6454_v25 = vmul.f32 %v11673_v28, %v12592_v42 }
 0x22f   :  { %6704 = vrot.lane.b32.xlu1 %v6695_v19, %s11398_s28  ;;  %v13021_v19 = vstv %s10098_s0  ;;  %s10132_s0 = sld [smem:[#allocation8 + $0x31]] }
 0x230   :  { %v6115_v39 = vpop.permute.xlu0 %6114  ;;  %v6747_v43 = vmul.f32 %v13021_v19, %v12936_v55 }
 0x231   :  { %v6117_v21 = vpop.permute.xlu1 %6116  ;;  %v6126_v8 = vadd.f32 %v6115_v39, %v12507_v53 }
 0x232   :  { %6438 = vrot.lane.b32.xlu0 %v6428_v0, %s11398_s28 }
 0x233   :  { %6730 = vrot.lane.b32.xlu1 %v6721_v56, %s11398_s28  ;;  %v6480_v56 = vmul.f32 %v11693_v45, %v12592_v42 }
 0x234   :  { %v13017_v1 = vpop.permute.xlu0 %6140 }
 0x235   :  { %v13023_v10 = vpop.permute.xlu1 %6142 }
 0x236   :  { %6464 = vrot.lane.b32.xlu0 %v6454_v25, %s11398_s28  ;;  %v6051_v25 = vmul.f32 %v12421_v57, %v12378_v54 }
 0x237   :  { %6756 = vrot.lane.b32.xlu1 %v6747_v43, %s11398_s28  ;;  %v6506_v43 = vmul.f32 %v11713_v61, %v12592_v42  ;;  %v13052_v61 = vstv %s10101_s16  ;;  %s10135_s16 = sld [smem:[#allocation8 + $0x30]] }
 0x238   :  { %v6167_v0 = vpop.permute.xlu0 %6166  ;;  %16087 = vst [vmem:[#allocation93_spill] sm:$0xff] %v13052_v61  ;;  %v6825_v2 = vmul.f32 %v13052_v61, %v12936_v55  ;;  %v6558_v61 = vmul.f32 %v11753_v34, %v12592_v42  ;;  %v6075_v34 = vadd.f32 %v6071_v15, %v12501_v37 }
 0x239   :  { %v6169_v28 = vpop.permute.xlu1 %6168  ;;  %v6178_v50 = vadd.f32 %v6167_v0, %v6100_v32 }
 0x23a   :  { %6490 = vrot.lane.b32.xlu0 %v6480_v56, %s11398_s28  ;;  %v6061_v56 = vmul.f32 %v12468_v44, %v12378_v54  ;;  %v5026_v54 = vrot.slane %v12761_v18, %v11933_v7  ;;  %v5149_v18 = vrot.slane %v12786_v23, %v11933_v7 }
 0x23b   :  { %6782 = vrot.lane.b32.xlu1 %v6773_v38, %s11399_s11  ;;  %v6055_v38 = vadd.f32 %v6051_v25, %v12450_v29 }
 0x23c   :  { %v6193_v12 = vpop.permute.xlu0 %6192  ;;  %v6065_v25 = vadd.f32 %v6061_v56, %v12487_v16 }
 0x23d   :  { %v6195_v45 = vpop.permute.xlu1 %6194  ;;  %v6204_v56 = vadd.f32 %v6193_v12, %v6126_v8 }
 0x23e   :  { %6516 = vrot.lane.b32.xlu0 %v6506_v43, %s11399_s11  ;;  %v13057_v43 = vld [vmem:[#allocation2 + $0x78] sm:$0x1]  ;;  %v6127_v0 = vadd.f32 %v6117_v21, %v6065_v25  ;;  %v6152_v21 = vadd.f32 %v13017_v1, %v12526_v36 }
 0x23f   :  { %6808 = vrot.lane.b32.xlu1 %v6799_v13, %s11399_s11  ;;  %v6101_v13 = vadd.f32 %v6091_v24, %v6055_v38  ;;  %v6619_v32 = vmul.f32 %v12951_v63, %v13057_v43 }
 0x240   :  { %v6219_v46 = vpop.permute.xlu0 %6218  ;;  %v6205_v53 = vadd.f32 %v6195_v45, %v6127_v0 }
 0x241   :  { %v6221_v31 = vpop.permute.xlu1 %6220  ;;  %v6179_v59 = vadd.f32 %v6169_v28, %v6101_v13  ;;  %v6153_v13 = vadd.f32 %v13023_v10, %v6075_v34  ;;  %v6230_v25 = vadd.f32 %v6219_v46, %v6152_v21  ;;  %v5160_v10 = vrot.slane %v5149_v18, %v11936_v20  ;;  %v16089_v46 = vld [vmem:[#allocation18_spill] sm:$0xff] }
 0x242   :  { %6542 = vrot.lane.b32.xlu0 %v6532_v9, %s11399_s11  ;;  %v5396_v18 = vrot.slane %v12838_v52, %v11933_v7  ;;  %v16098_v52 = vld [vmem:[#allocation26_spill] sm:$0xff] }
 0x243   :  { %6834 = vrot.lane.b32.xlu1 %v6825_v2, %s11399_s11  ;;  %v4914_v2 = vrot.slane %v4903_v51, %v11936_v20  ;;  %v6329_v51 = vmul.f32 %v11312_v3, %v12518_v49  ;;  %v6231_v36 = vadd.f32 %v6221_v31, %v6153_v13  ;;  %v16090_v31 = vld [vmem:[#allocation37_spill] sm:$0xff]  ;;  %v16095_v13 = vld [vmem:[#allocation39_spill] sm:$0xff] }
 0x244   :  { %v6245_v33 = vpop.permute.xlu0 %6244 }
 0x245   :  { %v6256_v24 = vadd.f32 %v6245_v33, %v6178_v50  ;;  %v6247_v9 = vpop.permute.xlu1 %6246  ;;  %v16088_v33 = vld [vmem:[#allocation22_spill] sm:$0xff] }
 0x246   :  { %v6257_v28 = vadd.f32 %v6247_v9, %v6179_v59  ;;  %6568 = vrot.lane.b32.xlu0 %v6558_v61, %s11399_s11  ;;  %v5037_v61 = vrot.slane %v5026_v54, %v11936_v20  ;;  %v6339_v59 = vmul.f32 %v11312_v3, %v12529_v22  ;;  %v6587_v3 = vmul.f32 %v16090_v31, %v12936_v55  ;;  %v16091_v54 = vld [vmem:[#allocation28_spill] sm:$0xff] }
 0x247   :  { %v13077_v38 = vadd.f32 %v12541_v27, %v6256_v24  ;;  %6630 = vrot.lane.b32.xlu1 %v6619_v32, %s11397_s4  ;;  %v6645_v27 = vmul.f32 %v12977_v5, %v13057_v43 }
 0x248   :  { %v6323_v42 = vadd.f32 %v6319_v26, %v6257_v28  ;;  %v6271_v50 = vpop.permute.xlu0 %6270  ;;  %v16092_v28 = vld [vmem:[#allocation41_spill] sm:$0xff] }
 0x249   :  { %v6282_v39 = vadd.f32 %v6271_v50, %v6204_v56  ;;  %v6273_v12 = vpop.permute.xlu1 %6272  ;;  %v16093_v50 = vld [vmem:[#allocation24_spill] sm:$0xff] }
 0x24a   :  { %v6369_v26 = vadd.f32 %v11931_v4, %v6323_v42  ;;  %v6283_v45 = vadd.f32 %v6273_v12, %v6205_v53  ;;  %4919 = vrot.lane.b32.xlu0 %v4914_v2, %s11401_s21  ;;  %v5273_v4 = vrot.slane %v12810_v62, %v11933_v7  ;;  %v10060_v53 = vld [vmem:[%s15904_s2 + $0x2e] ss:$0 sm:$0xff] }
 0x24b   :  { %v13093_v23 = vadd.f32 %v12545_v35, %v6282_v39  ;;  %6656 = vrot.lane.b32.xlu1 %v6645_v27, %s11397_s4  ;;  %v6671_v35 = vmul.f32 %v12993_v47, %v13057_v43  ;;  %v6697_v39 = vmul.f32 %v13003_v40, %v13057_v43  ;;  %v16094_v27 = vld [vmem:[#allocation20_spill] sm:$0xff] }
 0x24c   :  { %v6333_v1 = vadd.f32 %v6329_v51, %v6283_v45  ;;  %v6297_v15 = vpop.permute.xlu0 %6296  ;;  %v6447_v8 = vadd.f32 %v16088_v33, %v6369_v26  ;;  %v5284_v12 = vrot.slane %v5273_v4, %v11936_v20  ;;  %v6597_v26 = vmul.f32 %v16095_v13, %v12936_v55  ;;  %v16096_v45 = vld [vmem:[#allocation30_spill] sm:$0xff]  ;;  %v10063_v33 = vld [vmem:[%s15904_s2 + $0x2f] ss:$0 sm:$0xff]  ;;  %s13202_s2 = sld [smem:[#allocation8 + $0x2a]] }
 0x24d   :  { %v6308_v24 = vadd.f32 %v6297_v15, %v6230_v25  ;;  %v6299_v9 = vpop.permute.xlu1 %6298 }
 0x24e   :  { %v6395_v32 = vadd.f32 %v16089_v46, %v6333_v1  ;;  %v6309_v2 = vadd.f32 %v6299_v9, %v6231_v36  ;;  %5042 = vrot.lane.b32.xlu0 %v5037_v61, %s11401_s21  ;;  %v6525_v0 = vadd.f32 %v16091_v54, %v6447_v8  ;;  %v16097_v36 = vld [vmem:[#allocation45_spill] sm:$0xff]  ;;  %v5519_v9 = vrot.slane %v12874_v41, %v11933_v7  ;;  %v16101_v54 = vld [vmem:[#allocation52_spill] sm:$0xff] }
 0x24f   :  { %v13109_v56 = vadd.f32 %v16092_v28, %v6308_v24  ;;  %6682 = vrot.lane.b32.xlu1 %v6671_v35, %s11397_s4  ;;  %v5869_v1 = vadd.f32 %v10060_v53, %v16097_v36  ;;  %v5407_v24 = vrot.slane %v5396_v18, %v11936_v20  ;;  %v16099_v35 = vld [vmem:[#allocation40_spill] sm:$0xff]  ;;  %v6749_v41 = vmul.f32 %v13021_v19, %v13057_v43 }
 0x250   :  { %v6343_v62 = vadd.f32 %v6339_v59, %v6309_v2  ;;  %v6357_v34 = vpop.permute.xlu0 %6356  ;;  %v13115_v42 = vadd.f32 %v6587_v3, %v6525_v0  ;;  %v6473_v51 = vadd.f32 %v16093_v50, %v6395_v32  ;;  %v6607_v46 = vmul.f32 %v16099_v35, %v12936_v55  ;;  %v16100_v32 = vld [vmem:[#allocation32_spill] sm:$0xff] }
 0x251   :  { %v6095_v21 = vpop.permute.xlu1 %6094  ;;  %v5872_v3 = vmax.f32 %v5869_v1, 0.0  ;;  %v5992_v0 = vadd.f32 %v10063_v33, %v16101_v54  ;;  %v5530_v50 = vrot.slane %v5519_v9, %v11936_v20  ;;  %v5642_v55 = vrot.slane %v12890_v14, %v11933_v7 }
 0x252   :  { %v6421_v61 = vadd.f32 %v16094_v27, %v6343_v62  ;;  %5165 = vrot.lane.b32.xlu0 %v5160_v10, %s11401_s21  ;;  %v6551_v25 = vadd.f32 %v16096_v45, %v6473_v51  ;;  %v6723_v10 = vmul.f32 %v13011_v48, %v13057_v43  ;;  %v6775_v27 = vmul.f32 %v13031_v6, %v13057_v43 }
 0x253   :  { %6708 = vrot.lane.b32.xlu1 %v6697_v39, %s11398_s28  ;;  %v13161_v51 = vrot.slane %v5872_v3, %v11933_v7  ;;  %v5995_v18 = vmax.f32 %v5992_v0, 0.0  ;;  %v6368_v9 = vadd.f32 %v6357_v34, %v13077_v38  ;;  %v6073_v54 = vmul.f32 %v12477_v60, %v12587_v30 }
 0x254   :  { %v6499_v15 = vadd.f32 %v16098_v52, %v6421_v61  ;;  %v6383_v59 = vpop.permute.xlu0 %6382  ;;  %v13134_v8 = vadd.f32 %v6597_v26, %v6551_v25  ;;  %v5653_v61 = vrot.slane %v5642_v55, %v11936_v20  ;;  %v5765_v26 = vrot.slane %v12903_v17, %v11933_v7 }
 0x255   :  { %v6121_v4 = vpop.permute.xlu1 %6120  ;;  %v5881_v14 = vcombine.high %v13161_v51, %v13161_v51  ;;  %v13173_v45 = vrot.slane %v5995_v18, %v11933_v7  ;;  %v6053_v25 = vmul.f32 %v12421_v57, %v12587_v30  ;;  %v6801_v52 = vmul.f32 %v13041_v58, %v13057_v43 }
 0x256   :  { %5289 = vrot.lane.b32.xlu0 %v5284_v12, %s11401_s21  ;;  %v6577_v2 = vadd.f32 %v16100_v32, %v6499_v15  ;;  %v5776_v17 = vrot.slane %v5765_v26, %v11936_v20  ;;  %v6063_v57 = vmul.f32 %v12468_v44, %v12587_v30  ;;  %v16102_v32 = vld [vmem:[#allocation93_spill] sm:$0xff] }
 0x257   :  { %6734 = vrot.lane.b32.xlu1 %v6723_v10, %s11398_s28  ;;  %v5895_v15 = vrot.slane %v5881_v14, %v11933_v7  ;;  %v6004_v33 = vcombine.high %v13173_v45, %v13173_v45  ;;  %v6057_v10 = vadd.f32 %v6053_v25, %v12450_v29 }
 0x258   :  { %v13147_v28 = vpop.permute.xlu0 %6408  ;;  %v13149_v62 = vadd.f32 %v6607_v46, %v6577_v2  ;;  %v6827_v2 = vmul.f32 %v16102_v32, %v13057_v43  ;;  %v6067_v44 = vadd.f32 %v6063_v57, %v12487_v16  ;;  %v16104_v16 = vld [vmem:[#allocation42_spill] sm:$0xff]  ;;  %v16105_v57 = vld [vmem:[#allocation17_spill] sm:$0xff] }
 0x259   :  { %v13151_v53 = vpop.permute.xlu1 %6146  ;;  %v6103_v3 = vadd.f32 %v6095_v21, %v6057_v10  ;;  %v5903_v29 = vrot.slane %v5895_v15, %v11936_v20  ;;  %v16103_v21 = vld [vmem:[#allocation38_spill] sm:$0xff] }
 0x25a   :  { %5412 = vrot.lane.b32.xlu0 %v5407_v24, %s11401_s21  ;;  %v6616_v18 = vmul.f32 %v12951_v63, %v16103_v21  ;;  %v16109_v21 = vld [vmem:[#allocation19_spill] sm:$0xff] }
 0x25b   :  { %6760 = vrot.lane.b32.xlu1 %v6749_v41, %s11398_s28  ;;  %v6018_v41 = vrot.slane %v6004_v33, %v11933_v7 }
 0x25c   :  { %v6435_v39 = vpop.permute.xlu0 %6434 }
 0x25d   :  { %v6173_v12 = vpop.permute.xlu1 %6172  ;;  %v6446_v0 = vadd.f32 %v6435_v39, %v6368_v9  ;;  %v6129_v39 = vadd.f32 %v6121_v4, %v6067_v44  ;;  %v16108_v44 = vld [vmem:[#allocation23_spill] sm:$0xff] }
 0x25e   :  { %5535 = vrot.lane.b32.xlu0 %v5530_v50, %s11401_s21  ;;  %v6181_v38 = vadd.f32 %v6173_v12, %v6103_v3  ;;  %v11313_v50 = vld [vmem:[#allocation2 + $0x69] sm:$0x1] }
 0x25f   :  { %6786 = vrot.lane.b32.xlu1 %v6775_v27, %s11399_s11  ;;  %v6321_v55 = vmul.f32 %v11313_v50, %v12515_v11  ;;  %v6394_v27 = vadd.f32 %v6383_v59, %v13093_v23  ;;  %v13209_v11 = vld [vmem:[#allocation2 + $0x10] sm:$0xff]  ;;  %v6026_v23 = vrot.slane %v6018_v41, %v11936_v20  ;;  %v6077_v59 = vadd.f32 %v6073_v54, %v12501_v37  ;;  %v16106_v37 = vld [vmem:[#allocation43_spill] sm:$0xff] }
 0x260   :  { %v6461_v36 = vpop.permute.xlu0 %6460  ;;  %v6642_v14 = vmul.f32 %v13209_v11, %v12977_v5 }
 0x261   :  { %v6199_v1 = vpop.permute.xlu1 %6198  ;;  %v6472_v26 = vadd.f32 %v6461_v36, %v6394_v27  ;;  %v6420_v36 = vadd.f32 %v13147_v28, %v13109_v56  ;;  %v6155_v10 = vadd.f32 %v13151_v53, %v6077_v59  ;;  %v13227_v56 = vld [vmem:[#allocation2 + $0x79] sm:$0x1]  ;;  %v16107_v28 = vld [vmem:[#allocation16_spill] sm:$0xff]  ;;  %v6694_v59 = vmul.f32 %v13209_v11, %v13003_v40 }
 0x262   :  { %5658 = vrot.lane.b32.xlu0 %v5653_v61, %s11401_s21  ;;  %v6207_v25 = vadd.f32 %v6199_v1, %v6129_v39  ;;  %v6913_v53 = vmul.f32 %v13227_v56, %v16107_v28  ;;  %v16111_v39 = vld [vmem:[#allocation44_spill] sm:$0xff] }
 0x263   :  { %6812 = vrot.lane.b32.xlu1 %v6801_v52, %s11399_s11 }
 0x264   :  { %v6487_v24 = vpop.permute.xlu0 %6486 }
 0x265   :  { %v6225_v46 = vpop.permute.xlu1 %6224  ;;  %v6498_v3 = vadd.f32 %v6487_v24, %v6420_v36 }
 0x266   :  { %5781 = vrot.lane.b32.xlu0 %v5776_v17, %s11401_s21  ;;  %v6331_v17 = vmul.f32 %v11313_v50, %v12518_v49  ;;  %v6668_v49 = vmul.f32 %v13209_v11, %v12993_v47  ;;  %v6233_v54 = vadd.f32 %v6225_v46, %v6155_v10  ;;  %v6589_v46 = vmul.f32 %v16090_v31, %v13057_v43  ;;  %v16115_v10 = vld [vmem:[#allocation27_spill] sm:$0xff] }
 0x267   :  { %6838 = vrot.lane.b32.xlu1 %v6827_v2, %s11399_s11 }
 0x268   :  { %v6513_v34 = vpop.permute.xlu0 %6512 }
 0x269   :  { %v6524_v30 = vadd.f32 %v6513_v34, %v6446_v0  ;;  %v6251_v60 = vpop.permute.xlu1 %6250 }
 0x26a   :  { %v6259_v61 = vadd.f32 %v6251_v60, %v6181_v38  ;;  %6624 = vrot.lane.b32.xlu0 %v6616_v18, %s11397_s4 }
 0x26b   :  { %v13206_v12 = vadd.f32 %v16104_v16, %v6524_v30  ;;  %5906 = vrot.lane.b32.xlu1 %v5903_v29, %s11401_s21  ;;  %v6341_v29 = vmul.f32 %v11313_v50, %v12529_v22  ;;  %v16110_v30 = vld [vmem:[#allocation29_spill] sm:$0xff]  ;;  %v13245_v22 = vld [vmem:[#allocation2 + $0x19] sm:$0x1] }
 0x26c   :  { %v6325_v4 = vadd.f32 %v6321_v55, %v6259_v61  ;;  %v6539_v52 = vpop.permute.xlu0 %6538  ;;  %v13234_v55 = vstv %s13202_s2  ;;  %s10143_s2 = sld [smem:[#allocation8 + $0x5e]] }
 0x26d   :  { %v6550_v15 = vadd.f32 %v6539_v52, %v6472_v26  ;;  %v6277_v33 = vpop.permute.xlu1 %6276  ;;  %v6937_v50 = vmul.f32 %v13245_v22, %v13234_v55  ;;  %v16112_v26 = vld [vmem:[#allocation25_spill] sm:$0xff] }
 0x26e   :  { %v6371_v9 = vadd.f32 %v16105_v57, %v6325_v4  ;;  %v6285_v2 = vadd.f32 %v6277_v33, %v6207_v25  ;;  %6650 = vrot.lane.b32.xlu0 %v6642_v14, %s11397_s4  ;;  %v16113_v4 = vld [vmem:[#allocation21_spill] sm:$0xff]  ;;  %v6939_v33 = vmul.f32 %v13227_v56, %v13234_v55 }
 0x26f   :  { %v13222_v1 = vadd.f32 %v16106_v37, %v6550_v15  ;;  %6029 = vrot.lane.b32.xlu1 %v6026_v23, %s11401_s21  ;;  %v6599_v15 = vmul.f32 %v16095_v13, %v13057_v43 }
 0x270   :  { %v6335_v0 = vadd.f32 %v6331_v17, %v6285_v2  ;;  %v6565_v41 = vpop.permute.xlu0 %6564  ;;  %v6449_v24 = vadd.f32 %v16108_v44, %v6371_v9  ;;  %v16114_v17 = vld [vmem:[#allocation31_spill] sm:$0xff]  ;;  %v6720_v2 = vmul.f32 %v13209_v11, %v13011_v48 }
 0x271   :  { %v6576_v38 = vadd.f32 %v6565_v41, %v6498_v3  ;;  %v6303_v34 = vpop.permute.xlu1 %6302 }
 0x272   :  { %v6397_v18 = vadd.f32 %v16109_v21, %v6335_v0  ;;  %v6311_v27 = vadd.f32 %v6303_v34, %v6233_v54  ;;  %6676 = vrot.lane.b32.xlu0 %v6668_v49, %s11397_s4  ;;  %v6527_v60 = vadd.f32 %v16110_v30, %v6449_v24  ;;  %v16116_v49 = vld [vmem:[#allocation33_spill] sm:$0xff]  ;;  %v16117_v54 = vld [vmem:[#allocation55_spill] sm:$0xff]  ;;  %v6798_v30 = vmul.f32 %v13209_v11, %v13041_v58 }
 0x273   :  { %v13242_v61 = vadd.f32 %v16111_v39, %v6576_v38  ;;  %6924 = vrot.lane.b32.xlu1 %v6913_v53, %s11397_s4  ;;  %v6609_v53 = vmul.f32 %v16099_v35, %v13057_v43  ;;  %v6963_v0 = vmul.f32 %v13245_v22, %v16117_v54  ;;  %v6965_v43 = vmul.f32 %v13227_v56, %v16117_v54  ;;  %v16118_v21 = vld [vmem:[#allocation57_spill] sm:$0xff] }
 0x274   :  { %v6475_v16 = vadd.f32 %v16112_v26, %v6397_v18  ;;  %v6345_v14 = vadd.f32 %v6341_v29, %v6311_v27  ;;  %v6093_v23 = vpop.permute.xlu0 %6092  ;;  %v13252_v25 = vadd.f32 %v6589_v46, %v6527_v60  ;;  %v6746_v29 = vmul.f32 %v13209_v11, %v13021_v19  ;;  %v16119_v26 = vld [vmem:[#allocation46_spill] sm:$0xff] }
 0x275   :  { %v4922_v31 = vpop.permute.xlu1 %4921  ;;  %v6772_v38 = vmul.f32 %v13209_v11, %v13031_v6  ;;  %v6989_v18 = vmul.f32 %v13245_v22, %v16118_v21  ;;  %v6991_v46 = vmul.f32 %v13227_v56, %v16118_v21 }
 0x276   :  { %v6423_v52 = vadd.f32 %v16113_v4, %v6345_v14  ;;  %4926 = vst.msk [vmem:[#allocation2 + $0xa7] sm:$0x1] %vm246_vm4, %v4922_v31  ;;  %6702 = vrot.lane.b32.xlu0 %v6694_v59, %s11398_s28  ;;  %v6553_v36 = vadd.f32 %v16114_v17, %v6475_v16  ;;  %v6102_v16 = vadd.f32 %v6093_v23, %v16119_v26  ;;  %v16120_v31 = vld [vmem:[#allocation58_spill] sm:$0xff] }
 0x277   :  { %6946 = vrot.lane.b32.xlu1 %v6937_v50, %s11397_s4  ;;  %v6824_v50 = vmul.f32 %v13209_v11, %v16102_v32  ;;  %v7015_v4 = vmul.f32 %v13245_v22, %v16120_v31  ;;  %v13307_v17 = vld [vmem:[#allocation2 + $0x11] sm:$0xff]  ;;  %v16122_v11 = vld [vmem:[#allocation47_spill] sm:$0xff] }
 0x278   :  { %v6501_v57 = vadd.f32 %v16115_v10, %v6423_v52  ;;  %v6119_v9 = vpop.permute.xlu0 %6118  ;;  %v13266_v3 = vadd.f32 %v6599_v15, %v6553_v36  ;;  %v16121_v36 = vld [vmem:[#allocation15_spill] sm:$0xff] }
 0x279   :  { %v5045_v37 = vpop.permute.xlu1 %5044  ;;  %v6884_v15 = vmul.f32 %v13307_v17, %v16121_v36 }
 0x27a   :  { %5049 = vst.msk [vmem:[#allocation2 + $0xa8] sm:$0x1] %vm246_vm4, %v5045_v37  ;;  %6728 = vrot.lane.b32.xlu0 %v6720_v2, %s11398_s28  ;;  %v6579_v13 = vadd.f32 %v16116_v49, %v6501_v57  ;;  %v16123_v2 = vld [vmem:[#allocation49_spill] sm:$0xff]  ;;  %v7017_v49 = vmul.f32 %v13227_v56, %v16120_v31 }
 0x27b   :  { %6950 = vrot.lane.b32.xlu1 %v6939_v33, %s11397_s4  ;;  %v6128_v33 = vadd.f32 %v6119_v9, %v16122_v11 }
 0x27c   :  { %v6145_v41 = vpop.permute.xlu0 %6144  ;;  %v13278_v44 = vadd.f32 %v6609_v53, %v6579_v13  ;;  %v6910_v53 = vmul.f32 %v13307_v17, %v16107_v28 }
 0x27d   :  { %v5168_v24 = vpop.permute.xlu1 %5167 }
 0x27e   :  { %5173 = vst.msk [vmem:[#allocation2 + $0xb1] sm:$0x1] %vm246_vm4, %v5168_v24  ;;  %6754 = vrot.lane.b32.xlu0 %v6746_v29, %s11398_s28 }
 0x27f   :  { %6972 = vrot.lane.b32.xlu1 %v6963_v0, %s11398_s28  ;;  %v16124_v0 = vld [vmem:[#allocation48_spill] sm:$0xff] }
 0x280   :  { %v6171_v35 = vpop.permute.xlu0 %6170  ;;  %v6154_v9 = vadd.f32 %v6145_v41, %v16124_v0 }
 0x281   :  { %v5292_v34 = vpop.permute.xlu1 %5291  ;;  %v6180_v59 = vadd.f32 %v6171_v35, %v6102_v16  ;;  %v16125_v35 = vld [vmem:[#allocation50_spill] sm:$0xff] }
 0x282   :  { %5296 = vst.msk [vmem:[#allocation2 + $0xb2] sm:$0x1] %vm246_vm4, %v5292_v34  ;;  %6780 = vrot.lane.b32.xlu0 %v6772_v38, %s11399_s11  ;;  %v16126_v34 = vld [vmem:[#allocation59_spill] sm:$0xff] }
 0x283   :  { %6976 = vrot.lane.b32.xlu1 %v6965_v43, %s11398_s28 }
 0x284   :  { %v6197_v27 = vpop.permute.xlu0 %6196 }
 0x285   :  { %v5415_v60 = vpop.permute.xlu1 %5414  ;;  %v6206_v57 = vadd.f32 %v6197_v27, %v6128_v33 }
 0x286   :  { %5419 = vst.msk [vmem:[#allocation2 + $0xb3] sm:$0x1] %vm246_vm4, %v5415_v60  ;;  %6806 = vrot.lane.b32.xlu0 %v6798_v30, %s11399_s11  ;;  %v11318_v30 = vld [vmem:[#allocation2 + $0x70] sm:$0xff] }
 0x287   :  { %6998 = vrot.lane.b32.xlu1 %v6989_v18, %s11398_s28  ;;  %v7041_v18 = vmul.f32 %v13245_v22, %v16126_v34  ;;  %v6618_v60 = vmul.f32 %v11318_v30, %v12951_v63  ;;  %v16128_v63 = vld [vmem:[#allocation60_spill] sm:$0xff]  ;;  %v6748_v0 = vmul.f32 %v11318_v30, %v13021_v19 }
 0x288   :  { %v6223_v39 = vpop.permute.xlu0 %6222 }
 0x289   :  { %v5538_v14 = vpop.permute.xlu1 %5537  ;;  %v6232_v43 = vadd.f32 %v6223_v39, %v6154_v9  ;;  %v7043_v39 = vmul.f32 %v13227_v56, %v16126_v34 }
 0x28a   :  { %5542 = vst.msk [vmem:[#allocation2 + $0xb4] sm:$0x1] %vm246_vm4, %v5538_v14  ;;  %6832 = vrot.lane.b32.xlu0 %v6824_v50, %s11399_s11  ;;  %v16127_v50 = vld [vmem:[#allocation51_spill] sm:$0xff]  ;;  %v6644_v14 = vmul.f32 %v11318_v30, %v12977_v5  ;;  %v7069_v5 = vmul.f32 %v13227_v56, %v16128_v63 }
 0x28b   :  { %7002 = vrot.lane.b32.xlu1 %v6991_v46, %s11398_s28 }
 0x28c   :  { %v6249_v52 = vpop.permute.xlu0 %6248 }
 0x28d   :  { %v6258_v23 = vadd.f32 %v6249_v52, %v6180_v59  ;;  %v5661_v10 = vpop.permute.xlu1 %5660 }
 0x28e   :  { %5665 = vst.msk [vmem:[#allocation2 + $0xb5] sm:$0x1] %vm246_vm4, %v5661_v10  ;;  %6892 = vrot.lane.b32.xlu0 %v6884_v15, %s11397_s4  ;;  %v6670_v15 = vmul.f32 %v11318_v30, %v12993_v47 }
 0x28f   :  { %v6324_v37 = vadd.f32 %v16123_v2, %v6258_v23  ;;  %7024 = vrot.lane.b32.xlu1 %v7015_v4, %s11398_s28  ;;  %v7067_v4 = vmul.f32 %v13245_v22, %v16128_v63  ;;  %v6696_v23 = vmul.f32 %v11318_v30, %v13003_v40 }
 0x290   :  { %v6275_v13 = vpop.permute.xlu0 %6274 }
 0x291   :  { %v6284_v29 = vadd.f32 %v6275_v13, %v6206_v57  ;;  %v5784_v24 = vpop.permute.xlu1 %5783  ;;  %v16129_v57 = vld [vmem:[#allocation62_spill] sm:$0xff] }
 0x292   :  { %5788 = vst.msk [vmem:[#allocation2 + $0xb6] sm:$0x1] %vm246_vm4, %v5784_v24  ;;  %6918 = vrot.lane.b32.xlu0 %v6910_v53, %s11397_s4  ;;  %v7093_v47 = vmul.f32 %v13245_v22, %v16129_v57  ;;  %v7095_v40 = vmul.f32 %v13227_v56, %v16129_v57  ;;  %v6774_v24 = vmul.f32 %v11318_v30, %v13031_v6  ;;  %v13392_v57 = vstv %s10118_s23  ;;  %s10145_s23 = sld [smem:[#allocation8 + $0x55]] }
 0x293   :  { %v6334_v38 = vadd.f32 %v16125_v35, %v6284_v29  ;;  %7028 = vrot.lane.b32.xlu1 %v7017_v49, %s11398_s28  ;;  %v6722_v49 = vmul.f32 %v11318_v30, %v13011_v48  ;;  %v13366_v29 = vld [vmem:[#allocation2 + $0x28] sm:$0x1] }
 0x294   :  { %v6301_v27 = vpop.permute.xlu0 %6300 }
 0x295   :  { %v6310_v46 = vadd.f32 %v6301_v27, %v6232_v43  ;;  %v13328_v41 = vpop.permute.xlu1 %6626  ;;  %v13371_v43 = vstv %s10117_s22  ;;  %v13377_v27 = vld [vmem:[#allocation2 + $0x88] sm:$0x1]  ;;  %s10144_s22 = sld [smem:[#allocation8 + $0x4d]] }
 0x296   :  { %6628 = vrot.lane.b32.xlu0 %v6618_v60, %s11397_s4  ;;  %v7153_v19 = vmul.f32 %v13371_v43, %v13366_v29 }
 0x297   :  { %v6344_v26 = vadd.f32 %v16127_v50, %v6310_v46  ;;  %7050 = vrot.lane.b32.xlu1 %v7041_v18, %s11399_s11  ;;  %v6800_v50 = vmul.f32 %v11318_v30, %v13041_v58 }
 0x298   :  { %v6361_v16 = vpop.permute.xlu0 %6360 }
 0x299   :  { %v13336_v59 = vpop.permute.xlu1 %6652  ;;  %v6370_v35 = vadd.f32 %v6361_v16, %v6324_v37  ;;  %v7155_v37 = vmul.f32 %v13371_v43, %v13377_v27 }
 0x29a   :  { %6654 = vrot.lane.b32.xlu0 %v6644_v14, %s11397_s4 }
 0x29b   :  { %7054 = vrot.lane.b32.xlu1 %v7043_v39, %s11399_s11 }
 0x29c   :  { %v6387_v52 = vpop.permute.xlu0 %6386 }
 0x29d   :  { %v13343_v11 = vpop.permute.xlu1 %6678  ;;  %v6396_v6 = vadd.f32 %v6387_v52, %v6334_v38 }
 0x29e   :  { %6680 = vrot.lane.b32.xlu0 %v6670_v15, %s11397_s4 }
 0x29f   :  { %7076 = vrot.lane.b32.xlu1 %v7067_v4, %s11399_s11  ;;  %v16130_v4 = vld [vmem:[#allocation53_spill] sm:$0xff] }
 0x2a0   :  { %v6413_v33 = vpop.permute.xlu0 %6412 }
 0x2a1   :  { %v13350_v10 = vpop.permute.xlu1 %6704  ;;  %v6422_v58 = vadd.f32 %v6413_v33, %v6344_v26 }
 0x2a2   :  { %6706 = vrot.lane.b32.xlu0 %v6696_v23, %s11398_s28  ;;  %v6826_v23 = vmul.f32 %v11318_v30, %v16102_v32  ;;  %v5888_v32 = vrot.slane %v13161_v51, %v11933_v7 }
 0x2a3   :  { %7080 = vrot.lane.b32.xlu1 %v7069_v5, %s11399_s11 }
 0x2a4   :  { %v6439_v2 = vpop.permute.xlu0 %6438  ;;  %v5899_v51 = vrot.slane %v5888_v32, %v11936_v20 }
 0x2a5   :  { %v13357_v13 = vpop.permute.xlu1 %6730  ;;  %v6448_v60 = vadd.f32 %v6439_v2, %v6370_v35 }
 0x2a6   :  { %6732 = vrot.lane.b32.xlu0 %v6722_v49, %s11398_s28  ;;  %v16131_v49 = vld [vmem:[#allocation54_spill] sm:$0xff] }
 0x2a7   :  { %7102 = vrot.lane.b32.xlu1 %v7093_v47, %s11399_s11  ;;  %v7179_v47 = vmul.f32 %v13392_v57, %v13366_v29 }
 0x2a8   :  { %v6465_v53 = vpop.permute.xlu0 %6464 }
 0x2a9   :  { %v13364_v9 = vpop.permute.xlu1 %6756  ;;  %v6474_v16 = vadd.f32 %v6465_v53, %v6396_v6  ;;  %v13405_v53 = vld [vmem:[#allocation2 + $0x71] sm:$0xff] }
 0x2aa   :  { %6758 = vrot.lane.b32.xlu0 %v6748_v0, %s11398_s28  ;;  %v6886_v26 = vmul.f32 %v13405_v53, %v16121_v36  ;;  %v13421_v36 = vstv %s10119_s24  ;;  %s10146_s24 = sld [smem:[#allocation8 + $0x5d]] }
 0x2ab   :  { %7106 = vrot.lane.b32.xlu1 %v7095_v40, %s11399_s11 }
 0x2ac   :  { %v6491_v48 = vpop.permute.xlu0 %6490 }
 0x2ad   :  { %v13373_v18 = vpop.permute.xlu1 %6782  ;;  %v6500_v2 = vadd.f32 %v6491_v48, %v6422_v58  ;;  %v7181_v48 = vmul.f32 %v13392_v57, %v13377_v27  ;;  %v6936_v58 = vmul.f32 %v13307_v17, %v13234_v55 }
 0x2ae   :  { %6784 = vrot.lane.b32.xlu0 %v6774_v24, %s11399_s11  ;;  %v16132_v24 = vld [vmem:[#allocation56_spill] sm:$0xff] }
 0x2af   :  { %7162 = vrot.lane.b32.xlu1 %v7153_v19, %s11397_s4  ;;  %v6011_v19 = vrot.slane %v13173_v45, %v11933_v7  ;;  %v7207_v45 = vmul.f32 %v13421_v36, %v13377_v27 }
 0x2b0   :  { %v6517_v46 = vpop.permute.xlu0 %6516 }
 0x2b1   :  { %v6526_v39 = vadd.f32 %v6517_v46, %v6448_v60  ;;  %v13382_v14 = vpop.permute.xlu1 %6808  ;;  %v6022_v6 = vrot.slane %v6011_v19, %v11936_v20  ;;  %v13479_v19 = vstv %s10122_s27  ;;  %s10153_s27 = sld [smem:[#allocation8 + $0x4a]] }
 0x2b2   :  { %6810 = vrot.lane.b32.xlu0 %v6800_v50, %s11399_s11  ;;  %v7205_v50 = vmul.f32 %v13421_v36, %v13366_v29  ;;  %16135 = vst [vmem:[#allocation18_spill] sm:$0xff] %v13479_v19 }
 0x2b3   :  { %v13388_v15 = vadd.f32 %v16130_v4, %v6526_v39  ;;  %7166 = vrot.lane.b32.xlu1 %v7155_v37, %s11397_s4  ;;  %v13440_v4 = vstv %s10120_s25  ;;  %s10147_s25 = sld [smem:[#allocation8 + $0x4c]] }
 0x2b4   :  { %v6543_v5 = vpop.permute.xlu0 %6542 }
 0x2b5   :  { %v6552_v38 = vadd.f32 %v6543_v5, %v6474_v16  ;;  %v13394_v52 = vpop.permute.xlu1 %6834  ;;  %v6912_v16 = vmul.f32 %v13405_v53, %v16107_v28  ;;  %v7231_v5 = vmul.f32 %v13440_v4, %v13366_v29 }
 0x2b6   :  { %6836 = vrot.lane.b32.xlu0 %v6826_v23, %s11399_s11 }
 0x2b7   :  { %v13400_v40 = vadd.f32 %v16131_v49, %v6552_v38  ;;  %7188 = vrot.lane.b32.xlu1 %v7179_v47, %s11397_s4  ;;  %v7233_v38 = vmul.f32 %v13440_v4, %v13377_v27  ;;  %v13460_v49 = vstv %s10121_s26  ;;  %s10148_s26 = sld [smem:[#allocation8 + $0x54]] }
 0x2b8   :  { %v6569_v30 = vpop.permute.xlu0 %6568 }
 0x2b9   :  { %v6578_v33 = vadd.f32 %v6569_v30, %v6500_v2  ;;  %v13409_v0 = vpop.permute.xlu1 %6630  ;;  %v6938_v2 = vmul.f32 %v13405_v53, %v13234_v55  ;;  %v7257_v30 = vmul.f32 %v13460_v49, %v13366_v29  ;;  %v7259_v55 = vmul.f32 %v13460_v49, %v13377_v27 }
 0x2ba   :  { %6896 = vrot.lane.b32.xlu0 %v6886_v26, %s11397_s4 }
 0x2bb   :  { %v13415_v35 = vadd.f32 %v16132_v24, %v6578_v33  ;;  %7192 = vrot.lane.b32.xlu1 %v7181_v48, %s11397_s4  ;;  %v16134_v48 = vld [vmem:[#allocation61_spill] sm:$0xff] }
 0x2bc   :  { %v4920_v60 = vpop.permute.xlu0 %4919 }
 0x2bd   :  { %16133 = vst [vmem:[#allocation22_spill] sm:$0xff] %v13415_v35  ;;  %4925 = vst.msk [vmem:[#allocation2 + $0x47] sm:$0x1] %vm246_vm4, %v4920_v60  ;;  %v13424_v46 = vpop.permute.xlu1 %6656 }
 0x2be   :  { %5904 = vrot.lane.b32.xlu0 %v5899_v51, %s11401_s21  ;;  %v6964_v51 = vmul.f32 %v13405_v53, %v16117_v54  ;;  %v7285_v54 = vmul.f32 %v13479_v19, %v13377_v27 }
 0x2bf   :  { %7214 = vrot.lane.b32.xlu1 %v7205_v50, %s11397_s4  ;;  %v7283_v50 = vmul.f32 %v13479_v19, %v13366_v29 }
 0x2c0   :  { %v5043_v39 = vpop.permute.xlu0 %5042 }
 0x2c1   :  { %5048 = vst.msk [vmem:[#allocation2 + $0x48] sm:$0x1] %vm246_vm4, %v5043_v39  ;;  %v13432_v7 = vpop.permute.xlu1 %6682 }
 0x2c2   :  { %6027 = vrot.lane.b32.xlu0 %v6022_v6, %s11401_s21 }
 0x2c3   :  { %7218 = vrot.lane.b32.xlu1 %v7207_v45, %s11397_s4  ;;  %v16136_v45 = vld [vmem:[#allocation63_spill] sm:$0xff] }
 0x2c4   :  { %v5166_v37 = vpop.permute.xlu0 %5165 }
 0x2c5   :  { %5172 = vst.msk [vmem:[#allocation2 + $0x51] sm:$0x1] %vm246_vm4, %v5166_v37  ;;  %v13443_v20 = vpop.permute.xlu1 %6708 }
 0x2c6   :  { %6922 = vrot.lane.b32.xlu0 %v6912_v16, %s11397_s4  ;;  %v6990_v16 = vmul.f32 %v13405_v53, %v16118_v21  ;;  %v16138_v21 = vld [vmem:[#allocation64_spill] sm:$0xff] }
 0x2c7   :  { %7240 = vrot.lane.b32.xlu1 %v7231_v5, %s11398_s28  ;;  %v13498_v5 = vstv %s10123_s29  ;;  %s10154_s29 = sld [smem:[#allocation8 + $0x52]] }
 0x2c8   :  { %v5290_v23 = vpop.permute.xlu0 %5289  ;;  %16137 = vst [vmem:[#allocation37_spill] sm:$0xff] %v13498_v5 }
 0x2c9   :  { %5295 = vst.msk [vmem:[#allocation2 + $0x52] sm:$0x1] %vm246_vm4, %v5290_v23  ;;  %v13452_v28 = vpop.permute.xlu1 %6734 }
 0x2ca   :  { %6944 = vrot.lane.b32.xlu0 %v6936_v58, %s11397_s4  ;;  %v7309_v58 = vmul.f32 %v13498_v5, %v13366_v29 }
 0x2cb   :  { %7244 = vrot.lane.b32.xlu1 %v7233_v38, %s11398_s28 }
 0x2cc   :  { %v5413_v47 = vpop.permute.xlu0 %5412 }
 0x2cd   :  { %5418 = vst.msk [vmem:[#allocation2 + $0x53] sm:$0x1] %vm246_vm4, %v5413_v47  ;;  %v13463_v32 = vpop.permute.xlu1 %6760 }
 0x2ce   :  { %6948 = vrot.lane.b32.xlu0 %v6938_v2, %s11397_s4  ;;  %v7311_v2 = vmul.f32 %v13498_v5, %v13377_v27 }
 0x2cf   :  { %7266 = vrot.lane.b32.xlu1 %v7257_v30, %s11398_s28 }
 0x2d0   :  { %v5536_v26 = vpop.permute.xlu0 %5535 }
 0x2d1   :  { %5541 = vst.msk [vmem:[#allocation2 + $0x54] sm:$0x1] %vm246_vm4, %v5536_v26  ;;  %v13470_v33 = vpop.permute.xlu1 %6786  ;;  %v7016_v26 = vmul.f32 %v13405_v53, %v16120_v31  ;;  %v16140_v31 = vld [vmem:[#allocation65_spill] sm:$0xff] }
 0x2d2   :  { %6970 = vrot.lane.b32.xlu0 %v16134_v48, %s11398_s28 }
 0x2d3   :  { %7270 = vrot.lane.b32.xlu1 %v7259_v55, %s11398_s28  ;;  %v13513_v55 = vstv %s10124_s30  ;;  %s10126_s30 = sld [smem:[#allocation8 + $0x33]] }
 0x2d4   :  { %v5659_v24 = vpop.permute.xlu0 %5658  ;;  %16139 = vst [vmem:[#allocation28_spill] sm:$0xff] %v13513_v55 }
 0x2d5   :  { %5664 = vst.msk [vmem:[#allocation2 + $0x55] sm:$0x1] %vm246_vm4, %v5659_v24  ;;  %v13482_v60 = vpop.permute.xlu1 %6812  ;;  %v7335_v24 = vmul.f32 %v13513_v55, %v13366_v29 }
 0x2d6   :  { %6974 = vrot.lane.b32.xlu0 %v6964_v51, %s11398_s28 }
 0x2d7   :  { %7292 = vrot.lane.b32.xlu1 %v7283_v50, %s11398_s28 }
 0x2d8   :  { %v5782_v6 = vpop.permute.xlu0 %5781 }
 0x2d9   :  { %5787 = vst.msk [vmem:[#allocation2 + $0x56] sm:$0x1] %vm246_vm4, %v5782_v6  ;;  %v13489_v39 = vpop.permute.xlu1 %6838  ;;  %v7337_v6 = vmul.f32 %v13513_v55, %v13377_v27 }
 0x2da   :  { %6996 = vrot.lane.b32.xlu0 %v16136_v45, %s11398_s28  ;;  %v7042_v45 = vmul.f32 %v13405_v53, %v16126_v34 }
 0x2db   :  { %7296 = vrot.lane.b32.xlu1 %v7285_v54, %s11398_s28 }
 0x2dc   :  { %v6625_v37 = vpop.permute.xlu0 %6624 }
 0x2dd   :  { %v5907_v23 = vpop.permute.xlu1 %5906 }
 0x2de   :  { %5911 = vst.msk [vmem:[#allocation2 + $0xb7] sm:$0x1] %vm246_vm4, %v5907_v23  ;;  %7000 = vrot.lane.b32.xlu0 %v6990_v16, %s11398_s28  ;;  %v16141_v23 = vld [vmem:[#allocation69_spill] sm:$0xff] }
 0x2df   :  { %7318 = vrot.lane.b32.xlu1 %v7309_v58, %s11399_s11  ;;  %v7361_v58 = vmul.f32 %v16141_v23, %v13366_v29  ;;  %v7363_v34 = vmul.f32 %v16141_v23, %v13377_v27  ;;  %v7068_v23 = vmul.f32 %v13405_v53, %v16128_v63 }
 0x2e0   :  { %v6651_v38 = vpop.permute.xlu0 %6650 }
 0x2e1   :  { %v6030_v47 = vpop.permute.xlu1 %6029  ;;  %v6662_v55 = vadd.f32 %v6651_v38, %v13222_v1 }
 0x2e2   :  { %6034 = vst.msk [vmem:[#allocation2 + $0xb8] sm:$0x1] %vm246_vm4, %v6030_v47  ;;  %7022 = vrot.lane.b32.xlu0 %v16138_v21, %s11398_s28  ;;  %v13536_v47 = vld [vmem:[#allocation2 + $0x29] sm:$0x1]  ;;  %v6636_v21 = vadd.f32 %v6625_v37, %v13206_v12 }
 0x2e3   :  { %7322 = vrot.lane.b32.xlu1 %v7311_v2, %s11399_s11  ;;  %v13552_v37 = vld [vmem:[#allocation2 + $0x89] sm:$0x1] }
 0x2e4   :  { %v6677_v30 = vpop.permute.xlu0 %6676 }
 0x2e5   :  { %v13515_v48 = vpop.permute.xlu1 %6924  ;;  %v6688_v1 = vadd.f32 %v6677_v30, %v13242_v61 }
 0x2e6   :  { %7026 = vrot.lane.b32.xlu0 %v7016_v26, %s11398_s28 }
 0x2e7   :  { %7344 = vrot.lane.b32.xlu1 %v7335_v24, %s11399_s11  ;;  %v13543_v24 = vstv %s10102_s10  ;;  %s10155_s10 = sld [smem:[#allocation8 + $0x5a]] }
 0x2e8   :  { %v6703_v51 = vpop.permute.xlu0 %6702 }
 0x2e9   :  { %v13521_v50 = vpop.permute.xlu1 %6946 }
 0x2ea   :  { %7048 = vrot.lane.b32.xlu0 %v16140_v31, %s11399_s11  ;;  %v13547_v31 = vstv %s10129_s12  ;;  %s10127_s12 = sld [smem:[#allocation8 + $0x3b]] }
 0x2eb   :  { %7348 = vrot.lane.b32.xlu1 %v7337_v6, %s11399_s11  ;;  %v16142_v6 = vld [vmem:[#allocation66_spill] sm:$0xff]  ;;  %v7421_v12 = vmul.f32 %v13547_v31, %v13536_v47 }
 0x2ec   :  { %v6729_v54 = vpop.permute.xlu0 %6728 }
 0x2ed   :  { %v13530_v16 = vpop.permute.xlu1 %6950 }
 0x2ee   :  { %7052 = vrot.lane.b32.xlu0 %v7042_v45, %s11399_s11  ;;  %v6714_v45 = vadd.f32 %v6703_v51, %v6636_v21  ;;  %v13561_v51 = vstv %s10103_s13  ;;  %v6740_v21 = vadd.f32 %v6729_v54, %v6662_v55  ;;  %v6637_v55 = vadd.f32 %v13328_v41, %v13115_v42  ;;  %s10156_s13 = sld [smem:[#allocation8 + $0x49]] }
 0x2ef   :  { %7370 = vrot.lane.b32.xlu1 %v7361_v58, %s11399_s11  ;;  %v13576_v54 = vstv %s10104_s1  ;;  %s14113_s1 = sld [smem:[#allocation8 + $0x43]] }
 0x2f0   :  { %v6755_v2 = vpop.permute.xlu0 %6754  ;;  %v6874_v41 = vmul.f32 %v13307_v17, %v13576_v54 }
 0x2f1   :  { %v13539_v26 = vpop.permute.xlu1 %6972 }
 0x2f2   :  { %7074 = vrot.lane.b32.xlu0 %v16142_v6, %s11399_s11  ;;  %v6854_v6 = vmul.f32 %v13307_v17, %v13543_v24 }
 0x2f3   :  { %7374 = vrot.lane.b32.xlu1 %v7363_v34, %s11399_s11  ;;  %v7423_v34 = vmul.f32 %v13547_v31, %v13552_v37 }
 0x2f4   :  { %v6781_v58 = vpop.permute.xlu0 %6780 }
 0x2f5   :  { %v6792_v5 = vadd.f32 %v6781_v58, %v6714_v45  ;;  %v13557_v19 = vpop.permute.xlu1 %6976  ;;  %v6864_v58 = vmul.f32 %v13307_v17, %v13561_v51 }
 0x2f6   :  { %7078 = vrot.lane.b32.xlu0 %v7068_v23, %s11399_s11  ;;  %v6766_v23 = vadd.f32 %v6755_v2, %v6688_v1  ;;  %v16144_v1 = vld [vmem:[#allocation68_spill] sm:$0xff] }
 0x2f7   :  { %7430 = vrot.lane.b32.xlu1 %v7421_v12, %s11397_s4  ;;  %v13567_v35 = vadd.f32 %v6854_v6, %v6792_v5  ;;  %v16143_v12 = vld [vmem:[#allocation67_spill] sm:$0xff]  ;;  %v13580_v5 = vstv %s10130_s3  ;;  %v6715_v6 = vadd.f32 %v13350_v10, %v6637_v55  ;;  %s14137_s3 = sld [smem:[#allocation8 + $0x51]] }
 0x2f8   :  { %v6807_v63 = vpop.permute.xlu0 %6806  ;;  %v7447_v61 = vmul.f32 %v13580_v5, %v13536_v47  ;;  %v7449_v10 = vmul.f32 %v13580_v5, %v13552_v37  ;;  %v13607_v55 = vld [vmem:[#allocation2 + $0x20] sm:$0xff] }
 0x2f9   :  { %v6818_v38 = vadd.f32 %v6807_v63, %v6740_v21  ;;  %v13570_v45 = vpop.permute.xlu1 %6998  ;;  %v6793_v2 = vadd.f32 %v13373_v18, %v6715_v6  ;;  %v7152_v18 = vmul.f32 %v13607_v55, %v13371_v43  ;;  %v6857_v6 = vmul.f32 %v13227_v56, %v13543_v24 }
 0x2fa   :  { %7100 = vrot.lane.b32.xlu0 %v16143_v12, %s11399_s11  ;;  %v6855_v12 = vmul.f32 %v13245_v22, %v13543_v24 }
 0x2fb   :  { %7434 = vrot.lane.b32.xlu1 %v7423_v34, %s11397_s4  ;;  %v13585_v30 = vadd.f32 %v6864_v58, %v6818_v38  ;;  %v6639_v34 = vadd.f32 %v13409_v0, %v13252_v25  ;;  %v13613_v0 = vstv %s10131_s5  ;;  %s14190_s5 = sld [smem:[#allocation8 + $0x59]] }
 0x2fc   :  { %v6833_v21 = vpop.permute.xlu0 %6832 }
 0x2fd   :  { %v6844_v63 = vadd.f32 %v6833_v21, %v6766_v23  ;;  %v13588_v42 = vpop.permute.xlu1 %7002  ;;  %v6717_v17 = vadd.f32 %v13443_v20, %v6639_v34  ;;  %v6663_v23 = vadd.f32 %v13336_v59, %v13134_v8  ;;  %v7473_v21 = vmul.f32 %v13613_v0, %v13536_v47  ;;  %v13627_v34 = vld [vmem:[#allocation2 + $0x80] sm:$0xff] }
 0x2fe   :  { %7104 = vrot.lane.b32.xlu0 %v16144_v1, %s11399_s11  ;;  %v7154_v8 = vmul.f32 %v13627_v34, %v13371_v43  ;;  %v16145_v1 = vld [vmem:[#allocation34_spill] sm:$0xff]  ;;  %v6665_v43 = vadd.f32 %v13424_v46, %v13266_v3 }
 0x2ff   :  { %7456 = vrot.lane.b32.xlu1 %v7447_v61, %s11397_s4  ;;  %v13602_v38 = vadd.f32 %v6874_v41, %v6844_v63  ;;  %v6859_v61 = vadd.f32 %v6855_v12, %v6793_v2  ;;  %v6795_v20 = vadd.f32 %v13470_v33, %v6717_v17  ;;  %v6741_v63 = vadd.f32 %v13357_v13, %v6663_v23 }
 0x300   :  { %v13605_v58 = vpop.permute.xlu0 %6892  ;;  %v6865_v33 = vmul.f32 %v13245_v22, %v13561_v51  ;;  %v7475_v13 = vmul.f32 %v13613_v0, %v13552_v37 }
 0x301   :  { %v13611_v25 = vpop.permute.xlu1 %7024  ;;  %v6819_v12 = vadd.f32 %v13382_v14, %v6741_v63  ;;  %v6861_v2 = vadd.f32 %v6857_v6, %v6795_v20  ;;  %v7178_v14 = vmul.f32 %v13607_v55, %v13392_v57  ;;  %v13648_v6 = vstv %s10132_s0  ;;  %s10159_s0 = sld [smem:[#allocation8 + $0x48]] }
 0x302   :  { %7160 = vrot.lane.b32.xlu0 %v7152_v18, %s11397_s4  ;;  %v6743_v63 = vadd.f32 %v13452_v28, %v6665_v43  ;;  %v6867_v28 = vmul.f32 %v13227_v56, %v13561_v51 }
 0x303   :  { %7460 = vrot.lane.b32.xlu1 %v7449_v10, %s11397_s4  ;;  %v6905_v10 = vadd.f32 %v16145_v1, %v6859_v61  ;;  %v16146_v61 = vld [vmem:[#allocation72_spill] sm:$0xff]  ;;  %v7180_v1 = vmul.f32 %v13627_v34, %v13392_v57 }
 0x304   :  { %v13625_v41 = vpop.permute.xlu0 %6918  ;;  %v7123_v20 = vmul.f32 %v16146_v61, %v13366_v29 }
 0x305   :  { %v13631_v59 = vpop.permute.xlu1 %7028  ;;  %v6983_v17 = vadd.f32 %v13539_v26, %v6905_v10  ;;  %v6689_v26 = vadd.f32 %v13343_v11, %v13149_v62  ;;  %v7499_v10 = vmul.f32 %v13648_v6, %v13536_v47 }
 0x306   :  { %7164 = vrot.lane.b32.xlu0 %v7154_v8, %s11397_s4  ;;  %v16147_v8 = vld [vmem:[#allocation35_spill] sm:$0xff] }
 0x307   :  { %7482 = vrot.lane.b32.xlu1 %v7473_v21, %s11397_s4  ;;  %v6869_v21 = vadd.f32 %v6865_v33, %v6819_v12  ;;  %v6907_v3 = vadd.f32 %v16147_v8, %v6861_v2  ;;  %v6821_v33 = vadd.f32 %v13482_v60, %v6743_v63  ;;  %v6767_v62 = vadd.f32 %v13364_v9, %v6689_v26 }
 0x308   :  { %v13644_v18 = vpop.permute.xlu0 %6628  ;;  %v7125_v60 = vmul.f32 %v16146_v61, %v13377_v27  ;;  %v7204_v9 = vmul.f32 %v13607_v55, %v13421_v36 }
 0x309   :  { %v7051_v23 = vpop.permute.xlu1 %7050  ;;  %v6985_v12 = vadd.f32 %v13557_v19, %v6907_v3  ;;  %v6875_v19 = vmul.f32 %v13245_v22, %v13576_v54  ;;  %v13693_v22 = vstv %s13650_s14  ;;  %s10160_s14 = sld [smem:[#allocation8 + $0x50]] }
 0x30a   :  { %v7061_v46 = vadd.f32 %v7051_v23, %v6983_v17  ;;  %7186 = vrot.lane.b32.xlu0 %v7178_v14, %s11397_s4  ;;  %v6845_v14 = vadd.f32 %v13394_v52, %v6767_v62  ;;  %v7501_v23 = vmul.f32 %v13648_v6, %v13552_v37 }
 0x30b   :  { %7486 = vrot.lane.b32.xlu1 %v7475_v13, %s11397_s4  ;;  %v16148_v13 = vld [vmem:[#allocation36_spill] sm:$0xff] }
 0x30c   :  { %v13668_v2 = vpop.permute.xlu0 %6654  ;;  %v13670_v43 = vadd.f32 %v7123_v20, %v7061_v46  ;;  %v6931_v57 = vadd.f32 %v16148_v13, %v6869_v21  ;;  %v6691_v20 = vadd.f32 %v13432_v7, %v13278_v44  ;;  %v6871_v21 = vadd.f32 %v6867_v28, %v6821_v33  ;;  %v16149_v44 = vld [vmem:[#allocation73_spill] sm:$0xff] }
 0x30d   :  { %v7055_v11 = vpop.permute.xlu1 %7054  ;;  %v7133_v7 = vmul.f32 %v16149_v44, %v13366_v29 }
 0x30e   :  { %v7063_v17 = vadd.f32 %v7055_v11, %v6985_v12  ;;  %7190 = vrot.lane.b32.xlu0 %v7180_v1, %s11397_s4  ;;  %v7009_v63 = vadd.f32 %v13570_v45, %v6931_v57  ;;  %v6769_v3 = vadd.f32 %v13463_v32, %v6691_v20  ;;  %v6933_v46 = vadd.f32 %v13515_v48, %v6871_v21 }
 0x30f   :  { %7508 = vrot.lane.b32.xlu1 %v7499_v10, %s11398_s28  ;;  %v6877_v45 = vmul.f32 %v13227_v56, %v13576_v54  ;;  %v7206_v1 = vmul.f32 %v13627_v34, %v13421_v36  ;;  %v7525_v32 = vmul.f32 %v13693_v22, %v13536_v47  ;;  %v6879_v10 = vadd.f32 %v6875_v19, %v6845_v14 }
 0x310   :  { %v13688_v61 = vpop.permute.xlu0 %6680  ;;  %v13690_v52 = vadd.f32 %v7125_v60, %v7063_v17  ;;  %v6847_v48 = vadd.f32 %v13489_v39, %v6769_v3  ;;  %v7011_v33 = vadd.f32 %v13588_v42, %v6933_v46  ;;  %v7135_v36 = vmul.f32 %v16149_v44, %v13377_v27 }
 0x311   :  { %v7077_v8 = vpop.permute.xlu1 %7076  ;;  %v6957_v11 = vadd.f32 %v13521_v50, %v6879_v10  ;;  %v7527_v39 = vmul.f32 %v13693_v22, %v13552_v37  ;;  %v7230_v17 = vmul.f32 %v13607_v55, %v13440_v4  ;;  %v6638_v3 = vadd.f32 %v13644_v18, %v13388_v15 }
 0x312   :  { %v7087_v26 = vadd.f32 %v7077_v8, %v7009_v63  ;;  %7212 = vrot.lane.b32.xlu0 %v7204_v9, %s11397_s4  ;;  %v6881_v13 = vadd.f32 %v6877_v45, %v6847_v48  ;;  %v13725_v9 = vstv %s10134_s15  ;;  %v6664_v15 = vadd.f32 %v13668_v2, %v13400_v40  ;;  %s10161_s15 = sld [smem:[#allocation8 + $0x58]] }
 0x313   :  { %7512 = vrot.lane.b32.xlu1 %v7501_v23, %s11398_s28  ;;  %v7035_v42 = vadd.f32 %v13611_v25, %v6957_v11  ;;  %v16150_v23 = vld [vmem:[#allocation74_spill] sm:$0xff]  ;;  %v7551_v25 = vmul.f32 %v13725_v9, %v13536_v47  ;;  %v7258_v2 = vmul.f32 %v13627_v34, %v13460_v49 }
 0x314   :  { %v6707_v28 = vpop.permute.xlu0 %6706  ;;  %v13709_v12 = vadd.f32 %v7133_v7, %v7087_v26  ;;  %v6959_v14 = vadd.f32 %v13530_v16, %v6881_v13  ;;  %v7143_v20 = vmul.f32 %v16150_v23, %v13366_v29  ;;  %v7232_v16 = vmul.f32 %v13627_v34, %v13440_v4 }
 0x315   :  { %v7081_v62 = vpop.permute.xlu1 %7080  ;;  %v7145_v29 = vmul.f32 %v16150_v23, %v13377_v27  ;;  %v6716_v44 = vadd.f32 %v6707_v28, %v6638_v3  ;;  %v7256_v4 = vmul.f32 %v13607_v55, %v13460_v49  ;;  %v6856_v27 = vmul.f32 %v13405_v53, %v13543_v24  ;;  %v16151_v28 = vld [vmem:[#allocation22_spill] sm:$0xff] }
 0x316   :  { %v7089_v56 = vadd.f32 %v7081_v62, %v7011_v33  ;;  %7216 = vrot.lane.b32.xlu0 %v7206_v1, %s11397_s4  ;;  %v7037_v21 = vadd.f32 %v13631_v59, %v6959_v14  ;;  %v7553_v59 = vmul.f32 %v13725_v9, %v13552_v37  ;;  %v6690_v24 = vadd.f32 %v13688_v61, %v16151_v28  ;;  %v13841_v28 = vld [vmem:[#allocation2 + $0x98] sm:$0x1] }
 0x317   :  { %7534 = vrot.lane.b32.xlu1 %v7525_v32, %s11398_s28  ;;  %v13756_v32 = vstv %s10135_s16  ;;  %v13807_v3 = vstv %s10137_s18  ;;  %s10165_s16 = sld [smem:[#allocation8 + $0x66]] }
 0x318   :  { %v6733_v57 = vpop.permute.xlu0 %6732  ;;  %v13721_v60 = vadd.f32 %v7135_v36, %v7089_v56  ;;  %v7577_v10 = vmul.f32 %v13756_v32, %v13536_v47  ;;  %v6866_v56 = vmul.f32 %v13405_v53, %v13561_v51  ;;  %v6876_v51 = vmul.f32 %v13405_v53, %v13576_v54  ;;  %s10167_s18 = sld [smem:[#allocation8 + $0x76]] }
 0x319   :  { %v7103_v50 = vpop.permute.xlu1 %7102  ;;  %v6742_v48 = vadd.f32 %v6733_v57, %v6664_v15 }
 0x31a   :  { %v7113_v19 = vadd.f32 %v7103_v50, %v7035_v42  ;;  %7238 = vrot.lane.b32.xlu0 %v7230_v17, %s11398_s28  ;;  %v16152_v42 = vld [vmem:[#allocation18_spill] sm:$0xff]  ;;  %v13784_v50 = vstv %s10136_s17  ;;  %s10166_s17 = sld [smem:[#allocation8 + $0x6e]] }
 0x31b   :  { %7538 = vrot.lane.b32.xlu1 %v7527_v39, %s11398_s28  ;;  %v7579_v39 = vmul.f32 %v13756_v32, %v13552_v37  ;;  %v7282_v61 = vmul.f32 %v13607_v55, %v16152_v42  ;;  %v7603_v14 = vmul.f32 %v13784_v50, %v13536_v47  ;;  %v7605_v53 = vmul.f32 %v13784_v50, %v13552_v37 }
 0x31c   :  { %v6759_v63 = vpop.permute.xlu0 %6758  ;;  %v13735_v8 = vadd.f32 %v7143_v20, %v7113_v19  ;;  %v7284_v20 = vmul.f32 %v13627_v34, %v16152_v42 }
 0x31d   :  { %v7107_v46 = vpop.permute.xlu1 %7106  ;;  %v6768_v36 = vadd.f32 %v6759_v63, %v6690_v24 }
 0x31e   :  { %v7115_v26 = vadd.f32 %v7107_v46, %v7037_v21  ;;  %7242 = vrot.lane.b32.xlu0 %v7232_v16, %s11398_s28  ;;  %v16153_v21 = vld [vmem:[#allocation37_spill] sm:$0xff]  ;;  %v7629_v46 = vmul.f32 %v13807_v3, %v13536_v47 }
 0x31f   :  { %7560 = vrot.lane.b32.xlu1 %v7551_v25, %s11398_s28  ;;  %v7308_v63 = vmul.f32 %v13607_v55, %v16153_v21 }
 0x320   :  { %v6785_v7 = vpop.permute.xlu0 %6784  ;;  %v13747_v45 = vadd.f32 %v7145_v29, %v7115_v26  ;;  %v7310_v29 = vmul.f32 %v13627_v34, %v16153_v21 }
 0x321   :  { %v6794_v18 = vadd.f32 %v6785_v7, %v6716_v44  ;;  %v13751_v1 = vpop.permute.xlu1 %7162 }
 0x322   :  { %7264 = vrot.lane.b32.xlu0 %v7256_v4, %s11398_s28  ;;  %v16154_v4 = vld [vmem:[#allocation28_spill] sm:$0xff] }
 0x323   :  { %7564 = vrot.lane.b32.xlu1 %v7553_v59, %s11398_s28  ;;  %v13761_v33 = vadd.f32 %v6856_v27, %v6794_v18  ;;  %v7631_v59 = vmul.f32 %v13807_v3, %v13552_v37  ;;  %v7334_v15 = vmul.f32 %v13607_v55, %v16154_v4  ;;  %v13827_v27 = vld [vmem:[#allocation2 + $0x38] sm:$0x1] }
 0x324   :  { %v6811_v40 = vpop.permute.xlu0 %6810 }
 0x325   :  { %v6820_v62 = vadd.f32 %v6811_v40, %v6742_v48  ;;  %v13767_v11 = vpop.permute.xlu1 %7166  ;;  %v13835_v40 = vstv %s10141_s19  ;;  %s10168_s19 = sld [smem:[#allocation8 + $0x65]] }
 0x326   :  { %7268 = vrot.lane.b32.xlu0 %v7258_v2, %s11398_s28  ;;  %v7689_v55 = vmul.f32 %v13835_v40, %v13827_v27 }
 0x327   :  { %7586 = vrot.lane.b32.xlu1 %v7577_v10, %s11399_s11  ;;  %v13775_v13 = vadd.f32 %v6866_v56, %v6820_v62  ;;  %v7336_v10 = vmul.f32 %v13627_v34, %v16154_v4  ;;  %v7691_v34 = vmul.f32 %v13835_v40, %v13841_v28  ;;  %v16155_v56 = vld [vmem:[#allocation70_spill] sm:$0xff] }
 0x328   :  { %v6837_v49 = vpop.permute.xlu0 %6836 }
 0x329   :  { %v6846_v57 = vadd.f32 %v6837_v49, %v6768_v36  ;;  %v13779_v17 = vpop.permute.xlu1 %7188  ;;  %v13856_v49 = vld [vmem:[#allocation2 + $0x21] sm:$0xff] }
 0x32a   :  { %7290 = vrot.lane.b32.xlu0 %v7282_v61, %s11398_s28  ;;  %v7446_v4 = vmul.f32 %v13580_v5, %v13856_v49 }
 0x32b   :  { %7590 = vrot.lane.b32.xlu1 %v7579_v39, %s11399_s11  ;;  %v13789_v19 = vadd.f32 %v6876_v51, %v6846_v57  ;;  %v13854_v39 = vstv %s10142_s20  ;;  %v16156_v57 = vld [vmem:[#allocation71_spill] sm:$0xff]  ;;  %s10169_s20 = sld [smem:[#allocation8 + $0x6d]] }
 0x32c   :  { %v13791_v23 = vpop.permute.xlu0 %6896  ;;  %v7715_v61 = vmul.f32 %v13854_v39, %v13827_v27 }
 0x32d   :  { %v13795_v25 = vpop.permute.xlu1 %7192 }
 0x32e   :  { %7294 = vrot.lane.b32.xlu0 %v7284_v20, %s11398_s28  ;;  %v13867_v20 = vld [vmem:[#allocation2 + $0x81] sm:$0xff] }
 0x32f   :  { %7612 = vrot.lane.b32.xlu1 %v7603_v14, %s11399_s11  ;;  %v7420_v14 = vmul.f32 %v13547_v31, %v13856_v49 }
 0x330   :  { %v5905_v54 = vpop.permute.xlu0 %5904 }
 0x331   :  { %5910 = vst.msk [vmem:[#allocation2 + $0x57] sm:$0x1] %vm246_vm4, %v5905_v54  ;;  %v13804_v16 = vpop.permute.xlu1 %7214  ;;  %v7717_v54 = vmul.f32 %v13854_v39, %v13841_v28 }
 0x332   :  { %7316 = vrot.lane.b32.xlu0 %v7308_v63, %s11399_s11  ;;  %v7422_v63 = vmul.f32 %v13547_v31, %v13867_v20 }
 0x333   :  { %7616 = vrot.lane.b32.xlu1 %v7605_v53, %s11399_s11 }
 0x334   :  { %v6028_v26 = vpop.permute.xlu0 %6027 }
 0x335   :  { %6033 = vst.msk [vmem:[#allocation2 + $0x58] sm:$0x1] %vm246_vm4, %v6028_v26  ;;  %v13815_v44 = vpop.permute.xlu1 %7218 }
 0x336   :  { %7320 = vrot.lane.b32.xlu0 %v7310_v29, %s11399_s11 }
 0x337   :  { %7638 = vrot.lane.b32.xlu1 %v7629_v46, %s11399_s11  ;;  %v13877_v46 = vstv %s10143_s2  ;;  %s10170_s2 = sld [smem:[#allocation8 + $0x75]] }
 0x338   :  { %v13821_v7 = vpop.permute.xlu0 %6922  ;;  %v7741_v29 = vmul.f32 %v13877_v46, %v13827_v27  ;;  %v7743_v31 = vmul.f32 %v13877_v46, %v13841_v28 }
 0x339   :  { %v13825_v18 = vpop.permute.xlu1 %7240 }
 0x33a   :  { %7342 = vrot.lane.b32.xlu0 %v7334_v15, %s11399_s11 }
 0x33b   :  { %7642 = vrot.lane.b32.xlu1 %v7631_v59, %s11399_s11 }
 0x33c   :  { %v13831_v48 = vpop.permute.xlu0 %6944 }
 0x33d   :  { %v13837_v2 = vpop.permute.xlu1 %7244 }
 0x33e   :  { %7346 = vrot.lane.b32.xlu0 %v7336_v10, %s11399_s11 }
 0x33f   :  { %7698 = vrot.lane.b32.xlu1 %v7689_v55, %s11397_s4  ;;  %v7448_v55 = vmul.f32 %v13580_v5, %v13867_v20 }
 0x340   :  { %v13845_v24 = vpop.permute.xlu0 %6948 }
 0x341   :  { %v13847_v62 = vpop.permute.xlu1 %7266 }
 0x342   :  { %7368 = vrot.lane.b32.xlu0 %v16155_v56, %s11399_s11 }
 0x343   :  { %7702 = vrot.lane.b32.xlu1 %v7691_v34, %s11397_s4  ;;  %v13895_v34 = vstv %s10144_s22  ;;  %s10171_s22 = sld [smem:[#allocation8 + $0x64]] }
 0x344   :  { %v6971_v36 = vpop.permute.xlu0 %6970  ;;  %16157 = vst [vmem:[#allocation41_spill] sm:$0xff] %v13895_v34 }
 0x345   :  { %v13858_v42 = vpop.permute.xlu1 %7270 }
 0x346   :  { %7372 = vrot.lane.b32.xlu0 %v16156_v57, %s11399_s11 }
 0x347   :  { %7724 = vrot.lane.b32.xlu1 %v7715_v61, %s11397_s4  ;;  %v7767_v61 = vmul.f32 %v13895_v34, %v13827_v27 }
 0x348   :  { %v6975_v51 = vpop.permute.xlu0 %6974 }
 0x349   :  { %v13869_v53 = vpop.permute.xlu1 %7292 }
 0x34a   :  { %7428 = vrot.lane.b32.xlu0 %v7420_v14, %s11397_s4  ;;  %v7472_v14 = vmul.f32 %v13613_v0, %v13856_v49 }
 0x34b   :  { %7728 = vrot.lane.b32.xlu1 %v7717_v54, %s11397_s4  ;;  %v6904_v54 = vadd.f32 %v13605_v58, %v13567_v35  ;;  %v6906_v35 = vadd.f32 %v13791_v23, %v13761_v33  ;;  %v6930_v33 = vadd.f32 %v13625_v41, %v13585_v30  ;;  %v6932_v30 = vadd.f32 %v13821_v7, %v13775_v13 }
 0x34c   :  { %v6997_v21 = vpop.permute.xlu0 %6996  ;;  %v6956_v13 = vadd.f32 %v13831_v48, %v13602_v38  ;;  %v6958_v38 = vadd.f32 %v13845_v24, %v13789_v19 }
 0x34d   :  { %v13879_v26 = vpop.permute.xlu1 %7296 }
 0x34e   :  { %7432 = vrot.lane.b32.xlu0 %v7422_v63, %s11397_s4  ;;  %v7769_v63 = vmul.f32 %v13895_v34, %v13841_v28 }
 0x34f   :  { %7750 = vrot.lane.b32.xlu1 %v7741_v29, %s11397_s4  ;;  %v6982_v29 = vadd.f32 %v6971_v36, %v6904_v54  ;;  %v6984_v36 = vadd.f32 %v6975_v51, %v6906_v35  ;;  %v7008_v51 = vadd.f32 %v6997_v21, %v6930_v33 }
 0x350   :  { %v7001_v59 = vpop.permute.xlu0 %7000 }
 0x351   :  { %v13887_v15 = vpop.permute.xlu1 %7318 }
 0x352   :  { %7454 = vrot.lane.b32.xlu0 %v7446_v4, %s11397_s4 }
 0x353   :  { %7754 = vrot.lane.b32.xlu1 %v7743_v31, %s11397_s4  ;;  %v7474_v31 = vmul.f32 %v13613_v0, %v13867_v20 }
 0x354   :  { %v7023_v10 = vpop.permute.xlu0 %7022 }
 0x355   :  { %v13897_v56 = vpop.permute.xlu1 %7322 }
 0x356   :  { %7458 = vrot.lane.b32.xlu0 %v7448_v55, %s11397_s4  ;;  %v13915_v55 = vstv %s10145_s23  ;;  %s10172_s23 = sld [smem:[#allocation8 + $0x6c]] }
 0x357   :  { %7776 = vrot.lane.b32.xlu1 %v7767_v61, %s11398_s28  ;;  %16158 = vst [vmem:[#allocation24_spill] sm:$0xff] %v13915_v55  ;;  %v7793_v34 = vmul.f32 %v13915_v55, %v13827_v27 }
 0x358   :  { %v7027_v57 = vpop.permute.xlu0 %7026 }
 0x359   :  { %v13907_v5 = vpop.permute.xlu1 %7344 }
 0x35a   :  { %7480 = vrot.lane.b32.xlu0 %v7472_v14, %s11397_s4  ;;  %v16159_v14 = vld [vmem:[#allocation75_spill] sm:$0xff] }
 0x35b   :  { %7780 = vrot.lane.b32.xlu1 %v7769_v63, %s11398_s28  ;;  %v7498_v63 = vmul.f32 %v13648_v6, %v13856_v49 }
 0x35c   :  { %v7049_v4 = vpop.permute.xlu0 %7048 }
 0x35d   :  { %v7060_v58 = vadd.f32 %v7049_v4, %v6982_v29  ;;  %v13919_v61 = vpop.permute.xlu1 %7348  ;;  %v7795_v4 = vmul.f32 %v13915_v55, %v13841_v28 }
 0x35e   :  { %7484 = vrot.lane.b32.xlu0 %v7474_v31, %s11397_s4 }
 0x35f   :  { %7802 = vrot.lane.b32.xlu1 %v7793_v34, %s11398_s28  ;;  %v13926_v54 = vadd.f32 %v16159_v14, %v7060_v58  ;;  %v16160_v34 = vld [vmem:[#allocation76_spill] sm:$0xff]  ;;  %v7500_v58 = vmul.f32 %v13648_v6, %v13867_v20  ;;  %v13943_v14 = vstv %s10146_s24  ;;  %s10173_s24 = sld [smem:[#allocation8 + $0x74]] }
 0x360   :  { %v7053_v0 = vpop.permute.xlu0 %7052  ;;  %16161 = vst [vmem:[#allocation20_spill] sm:$0xff] %v13943_v14  ;;  %v7819_v21 = vmul.f32 %v13943_v14, %v13827_v27 }
 0x361   :  { %v7062_v23 = vadd.f32 %v7053_v0, %v6984_v36  ;;  %v13932_v29 = vpop.permute.xlu1 %7370  ;;  %v7010_v0 = vadd.f32 %v7001_v59, %v6932_v30  ;;  %v7034_v59 = vadd.f32 %v7023_v10, %v6956_v13  ;;  %v7526_v30 = vmul.f32 %v13693_v22, %v13867_v20 }
 0x362   :  { %7506 = vrot.lane.b32.xlu0 %v7498_v63, %s11398_s28  ;;  %v16162_v63 = vld [vmem:[#allocation77_spill] sm:$0xff] }
 0x363   :  { %7806 = vrot.lane.b32.xlu1 %v7795_v4, %s11398_s28  ;;  %v13939_v31 = vadd.f32 %v16160_v34, %v7062_v23  ;;  %v7524_v23 = vmul.f32 %v13693_v22, %v13856_v49  ;;  %v16163_v34 = vld [vmem:[#allocation78_spill] sm:$0xff] }
 0x364   :  { %v7075_v35 = vpop.permute.xlu0 %7074 }
 0x365   :  { %v7086_v41 = vadd.f32 %v7075_v35, %v7008_v51  ;;  %v13947_v36 = vpop.permute.xlu1 %7374  ;;  %v7821_v51 = vmul.f32 %v13943_v14, %v13841_v28 }
 0x366   :  { %7510 = vrot.lane.b32.xlu0 %v7500_v58, %s11398_s28 }
 0x367   :  { %7828 = vrot.lane.b32.xlu1 %v7819_v21, %s11398_s28  ;;  %v13954_v33 = vadd.f32 %v16162_v63, %v7086_v41  ;;  %v13971_v41 = vstv %s10147_s25  ;;  %v16166_v63 = vld [vmem:[#allocation79_spill] sm:$0xff]  ;;  %s10177_s25 = sld [smem:[#allocation8 + $0x62]] }
 0x368   :  { %v7079_v6 = vpop.permute.xlu0 %7078  ;;  %16165 = vst [vmem:[#allocation30_spill] sm:$0xff] %v13971_v41  ;;  %v7845_v10 = vmul.f32 %v13971_v41, %v13827_v27  ;;  %v7847_v24 = vmul.f32 %v13971_v41, %v13841_v28 }
 0x369   :  { %v7088_v7 = vadd.f32 %v7079_v6, %v7010_v0  ;;  %v13960_v4 = vpop.permute.xlu1 %7430  ;;  %v7036_v0 = vadd.f32 %v7027_v57, %v6958_v38  ;;  %v16168_v57 = vld [vmem:[#allocation80_spill] sm:$0xff] }
 0x36a   :  { %7532 = vrot.lane.b32.xlu0 %v7524_v23, %s11398_s28  ;;  %v7550_v23 = vmul.f32 %v13725_v9, %v13856_v49 }
 0x36b   :  { %7832 = vrot.lane.b32.xlu1 %v7821_v51, %s11398_s28  ;;  %v13967_v35 = vadd.f32 %v16163_v34, %v7088_v7  ;;  %v13999_v34 = vstv %s10148_s26  ;;  %s10178_s26 = sld [smem:[#allocation8 + $0x6a]] }
 0x36c   :  { %v7101_v58 = vpop.permute.xlu0 %7100  ;;  %16170 = vst [vmem:[#allocation40_spill] sm:$0xff] %v13999_v34 }
 0x36d   :  { %16164 = vst [vmem:[#allocation39_spill] sm:$0xff] %v13967_v35  ;;  %v7112_v48 = vadd.f32 %v7101_v58, %v7034_v59  ;;  %v13975_v21 = vpop.permute.xlu1 %7434  ;;  %v7552_v59 = vmul.f32 %v13725_v9, %v13867_v20  ;;  %v7873_v9 = vmul.f32 %v13999_v34, %v13841_v28  ;;  %v14119_v35 = vstv %s10127_s12  ;;  %s10162_s12 = sld [smem:[#allocation8 + $0x67]] }
 0x36e   :  { %7536 = vrot.lane.b32.xlu0 %v7526_v30, %s11398_s28  ;;  %v7871_v30 = vmul.f32 %v13999_v34, %v13827_v27  ;;  %v7604_v34 = vmul.f32 %v13784_v50, %v13867_v20 }
 0x36f   :  { %7854 = vrot.lane.b32.xlu1 %v7845_v10, %s11399_s11  ;;  %v13982_v6 = vadd.f32 %v16166_v63, %v7112_v48  ;;  %v7576_v48 = vmul.f32 %v13756_v32, %v13856_v49  ;;  %v7578_v63 = vmul.f32 %v13756_v32, %v13867_v20 }
 0x370   :  { %v7105_v22 = vpop.permute.xlu0 %7104 }
 0x371   :  { %16167 = vst [vmem:[#allocation45_spill] sm:$0xff] %v13982_v6  ;;  %v7114_v13 = vadd.f32 %v7105_v22, %v7036_v0  ;;  %v13986_v19 = vpop.permute.xlu1 %7456 }
 0x372   :  { %7558 = vrot.lane.b32.xlu0 %v7550_v23, %s11398_s28  ;;  %v16171_v23 = vld [vmem:[#allocation81_spill] sm:$0xff] }
 0x373   :  { %7858 = vrot.lane.b32.xlu1 %v7847_v24, %s11399_s11  ;;  %v13993_v7 = vadd.f32 %v16168_v57, %v7114_v13  ;;  %v7897_v13 = vmul.f32 %v16171_v23, %v13827_v27  ;;  %v14027_v24 = vld [vmem:[#allocation2 + $0x39] sm:$0x1]  ;;  %v7899_v32 = vmul.f32 %v16171_v23, %v13841_v28 }
 0x374   :  { %v13995_v51 = vpop.permute.xlu0 %7160 }
 0x375   :  { %16169 = vst [vmem:[#allocation26_spill] sm:$0xff] %v13993_v7  ;;  %v14001_v58 = vpop.permute.xlu1 %7460 }
 0x376   :  { %7562 = vrot.lane.b32.xlu0 %v7552_v59, %s11398_s28  ;;  %v7602_v59 = vmul.f32 %v13784_v50, %v13856_v49  ;;  %v14062_v50 = vstv %s10154_s29  ;;  %s10179_s29 = sld [smem:[#allocation8 + $0x72]] }
 0x377   :  { %7880 = vrot.lane.b32.xlu1 %v7871_v30, %s11399_s11  ;;  %16176 = vst [vmem:[#allocation42_spill] sm:$0xff] %v14062_v50 }
 0x378   :  { %v14007_v38 = vpop.permute.xlu0 %7164 }
 0x379   :  { %v14011_v10 = vpop.permute.xlu1 %7482 }
 0x37a   :  { %7584 = vrot.lane.b32.xlu0 %v7576_v48, %s11399_s11  ;;  %v14038_v48 = vstv %s10153_s27  ;;  %s10150_s27 = sld [smem:[#allocation8 + $0x4b]] }
 0x37b   :  { %7884 = vrot.lane.b32.xlu1 %v7873_v9, %s11399_s11  ;;  %16173 = vst [vmem:[#allocation52_spill] sm:$0xff] %v14038_v48  ;;  %v7957_v9 = vmul.f32 %v14038_v48, %v14027_v24 }
 0x37c   :  { %v14017_v0 = vpop.permute.xlu0 %7186 }
 0x37d   :  { %v14021_v22 = vpop.permute.xlu1 %7486 }
 0x37e   :  { %7588 = vrot.lane.b32.xlu0 %v7578_v63, %s11399_s11  ;;  %v14043_v63 = vld [vmem:[#allocation2 + $0x99] sm:$0x1] }
 0x37f   :  { %7906 = vrot.lane.b32.xlu1 %v7897_v13, %s11399_s11  ;;  %v7959_v23 = vmul.f32 %v14038_v48, %v14043_v63 }
 0x380   :  { %v14029_v57 = vpop.permute.xlu0 %7190 }
 0x381   :  { %16172 = vst [vmem:[#allocation32_spill] sm:$0xff] %v14029_v57  ;;  %v14033_v30 = vpop.permute.xlu1 %7508 }
 0x382   :  { %7610 = vrot.lane.b32.xlu0 %v7602_v59, %s11399_s11 }
 0x383   :  { %7910 = vrot.lane.b32.xlu1 %v7899_v32, %s11399_s11  ;;  %v7628_v32 = vmul.f32 %v13807_v3, %v13856_v49 }
 0x384   :  { %v14045_v13 = vpop.permute.xlu0 %7212 }
 0x385   :  { %16174 = vst [vmem:[#allocation93_spill] sm:$0xff] %v14045_v13  ;;  %v14049_v41 = vpop.permute.xlu1 %7512  ;;  %v14077_v13 = vstv %s10126_s30  ;;  %s10151_s30 = sld [smem:[#allocation8 + $0x53]] }
 0x386   :  { %7614 = vrot.lane.b32.xlu0 %v7604_v34, %s11399_s11  ;;  %v7983_v34 = vmul.f32 %v14062_v50, %v14027_v24 }
 0x387   :  { %7966 = vrot.lane.b32.xlu1 %v7957_v9, %s11397_s4  ;;  %v7173_v9 = vadd.f32 %v13751_v1, %v13670_v43  ;;  %v7175_v43 = vadd.f32 %v13767_v11, %v13690_v52  ;;  %v14097_v52 = vstv %s10155_s10  ;;  %v14100_v11 = vld [vmem:[#allocation2 + $0x90] sm:$0xff]  ;;  %s10180_s10 = sld [smem:[#allocation8 + $0x61]] }
 0x388   :  { %v14055_v59 = vpop.permute.xlu0 %7216  ;;  %16177 = vst [vmem:[#allocation17_spill] sm:$0xff] %v14097_v52 }
 0x389   :  { %16175 = vst [vmem:[#allocation38_spill] sm:$0xff] %v14055_v59  ;;  %v14059_v14 = vpop.permute.xlu1 %7534  ;;  %v7630_v59 = vmul.f32 %v13807_v3, %v13867_v20  ;;  %v7391_v3 = vmul.f32 %v14077_v13, %v13536_v47 }
 0x38a   :  { %7636 = vrot.lane.b32.xlu0 %v7628_v32, %s11399_s11  ;;  %v7251_v32 = vadd.f32 %v13825_v18, %v7173_v9  ;;  %v14089_v18 = vld [vmem:[#allocation2 + $0x30] sm:$0xff] }
 0x38b   :  { %7970 = vrot.lane.b32.xlu1 %v7959_v23, %s11397_s4  ;;  %v7985_v23 = vmul.f32 %v14062_v50, %v14043_v63  ;;  %v7199_v50 = vadd.f32 %v13779_v17, %v13709_v12  ;;  %v7401_v12 = vmul.f32 %v14119_v35, %v13536_v47  ;;  %v7714_v17 = vmul.f32 %v14089_v18, %v13854_v39 }
 0x38c   :  { %v14069_v48 = vpop.permute.xlu0 %7238  ;;  %v7329_v1 = vadd.f32 %v13887_v15, %v7251_v32  ;;  %v7690_v15 = vmul.f32 %v14100_v11, %v13835_v40  ;;  %v8009_v32 = vmul.f32 %v14097_v52, %v14027_v24 }
 0x38d   :  { %v14073_v7 = vpop.permute.xlu1 %7538 }
 0x38e   :  { %7640 = vrot.lane.b32.xlu0 %v7630_v59, %s11399_s11  ;;  %v7688_v59 = vmul.f32 %v14089_v18, %v13835_v40  ;;  %v7277_v40 = vadd.f32 %v13847_v62, %v7199_v50  ;;  %v7201_v62 = vadd.f32 %v13795_v25, %v13721_v60  ;;  %v16178_v60 = vld [vmem:[#allocation83_spill] sm:$0xff] }
 0x38f   :  { %7992 = vrot.lane.b32.xlu1 %v7983_v34, %s11397_s4  ;;  %v7253_v34 = vadd.f32 %v13837_v2, %v7175_v43  ;;  %v7395_v2 = vadd.f32 %v7391_v3, %v7329_v1  ;;  %v7393_v43 = vmul.f32 %v14077_v13, %v13552_v37  ;;  %v7659_v25 = vmul.f32 %v16178_v60, %v13827_v27 }
 0x390   :  { %v14087_v6 = vpop.permute.xlu0 %7242 }
 0x391   :  { %v14093_v9 = vpop.permute.xlu1 %7560  ;;  %v7331_v55 = vadd.f32 %v13897_v56, %v7253_v34  ;;  %v7441_v57 = vadd.f32 %v13960_v4, %v7395_v2  ;;  %v8011_v56 = vmul.f32 %v14097_v52, %v14043_v63  ;;  %v7355_v4 = vadd.f32 %v13907_v5, %v7277_v40 }
 0x392   :  { %7696 = vrot.lane.b32.xlu0 %v7688_v59, %s11397_s4  ;;  %v7225_v5 = vadd.f32 %v13804_v16, %v13735_v8  ;;  %v14160_v8 = vstv %s14113_s1  ;;  %s14658_s1 = sld [smem:[#allocation8 + $0x69]] }
 0x393   :  { %7996 = vrot.lane.b32.xlu1 %v7985_v23, %s11397_s4  ;;  %v7397_v50 = vadd.f32 %v7393_v43, %v7331_v55  ;;  %v7519_v1 = vadd.f32 %v14033_v30, %v7441_v57  ;;  %v7403_v55 = vmul.f32 %v14119_v35, %v13552_v37  ;;  %v7716_v57 = vmul.f32 %v14100_v11, %v13854_v39 }
 0x394   :  { %v14111_v59 = vpop.permute.xlu0 %7264  ;;  %v7405_v30 = vadd.f32 %v7401_v12, %v7355_v4 }
 0x395   :  { %v14115_v23 = vpop.permute.xlu1 %7564  ;;  %v7443_v2 = vadd.f32 %v13975_v21, %v7397_v50 }
 0x396   :  { %7700 = vrot.lane.b32.xlu0 %v7690_v15, %s11397_s4  ;;  %v14135_v15 = vstv %s10156_s13  ;;  %s14634_s13 = sld [smem:[#allocation8 + $0x5b]] }
 0x397   :  { %8018 = vrot.lane.b32.xlu1 %v8009_v32, %s11397_s4  ;;  %v7279_v32 = vadd.f32 %v13858_v42, %v7201_v62  ;;  %v8035_v42 = vmul.f32 %v14135_v15, %v14027_v24  ;;  %v7521_v43 = vadd.f32 %v14049_v41, %v7443_v2  ;;  %v7467_v62 = vadd.f32 %v13986_v19, %v7405_v30 }
 0x398   :  { %v14133_v3 = vpop.permute.xlu0 %7268  ;;  %v7227_v41 = vadd.f32 %v13815_v44, %v13747_v45  ;;  %v8037_v19 = vmul.f32 %v14135_v15, %v14043_v63  ;;  %v14185_v44 = vstv %s14137_s3  ;;  %v7390_v30 = vmul.f32 %v14077_v13, %v13856_v49  ;;  %s14662_s3 = sld [smem:[#allocation8 + $0x6f]] }
 0x399   :  { %v7587_v34 = vpop.permute.xlu1 %7586  ;;  %v7357_v21 = vadd.f32 %v13919_v61, %v7279_v32  ;;  %v7661_v61 = vmul.f32 %v16178_v60, %v13841_v28  ;;  %v7545_v50 = vadd.f32 %v14059_v14, %v7467_v62  ;;  %v16180_v62 = vld [vmem:[#allocation41_spill] sm:$0xff] }
 0x39a   :  { %v7597_v52 = vadd.f32 %v7587_v34, %v7519_v1  ;;  %7722 = vrot.lane.b32.xlu0 %v7714_v17, %s11397_s4  ;;  %v7305_v32 = vadd.f32 %v13879_v26, %v7227_v41  ;;  %v7742_v26 = vmul.f32 %v14100_v11, %v13877_v46 }
 0x39b   :  { %8022 = vrot.lane.b32.xlu1 %v8011_v56, %s11397_s4  ;;  %v7303_v56 = vadd.f32 %v13869_v53, %v7225_v5  ;;  %v7740_v53 = vmul.f32 %v14089_v18, %v13877_v46  ;;  %v7407_v4 = vadd.f32 %v7403_v55, %v7357_v21 }
 0x39c   :  { %v14155_v40 = vpop.permute.xlu0 %7290  ;;  %v14157_v17 = vadd.f32 %v7659_v25, %v7597_v52  ;;  %v7411_v52 = vmul.f32 %v14160_v8, %v13536_v47  ;;  %v7172_v47 = vadd.f32 %v13995_v51, %v13926_v54  ;;  %v7413_v25 = vmul.f32 %v14160_v8, %v13552_v37 }
 0x39d   :  { %v7591_v16 = vpop.permute.xlu1 %7590  ;;  %v7381_v12 = vadd.f32 %v13932_v29, %v7303_v56  ;;  %v7469_v2 = vadd.f32 %v14001_v58, %v7407_v4  ;;  %v16179_v29 = vld [vmem:[#allocation85_spill] sm:$0xff]  ;;  %v8061_v51 = vmul.f32 %v14185_v44, %v14027_v24  ;;  %v7383_v58 = vadd.f32 %v13947_v36, %v7305_v32  ;;  %v16181_v4 = vld [vmem:[#allocation86_spill] sm:$0xff] }
 0x39e   :  { %v7599_v39 = vadd.f32 %v7591_v16, %v7521_v43  ;;  %7726 = vrot.lane.b32.xlu0 %v7716_v57, %s11397_s4  ;;  %v7669_v14 = vmul.f32 %v16179_v29, %v13827_v27  ;;  %v7250_v54 = vadd.f32 %v14069_v48, %v7172_v47  ;;  %v7174_v37 = vadd.f32 %v14007_v38, %v13939_v31 }
 0x39f   :  { %8044 = vrot.lane.b32.xlu1 %v8035_v42, %s11398_s28  ;;  %v7415_v5 = vadd.f32 %v7411_v52, %v7381_v12  ;;  %v7547_v55 = vadd.f32 %v14073_v7, %v7469_v2  ;;  %v7671_v36 = vmul.f32 %v16179_v29, %v13841_v28  ;;  %v8063_v31 = vmul.f32 %v14185_v44, %v14043_v63  ;;  %v16182_v2 = vld [vmem:[#allocation39_spill] sm:$0xff] }
 0x3a0   :  { %v14178_v1 = vpop.permute.xlu0 %7294  ;;  %v14180_v34 = vadd.f32 %v7661_v61, %v7599_v39  ;;  %v7252_v7 = vadd.f32 %v14087_v6, %v7174_v37  ;;  %v7417_v16 = vadd.f32 %v7413_v25, %v7383_v58  ;;  %v7766_v39 = vmul.f32 %v14089_v18, %v16180_v62  ;;  %v16185_v37 = vld [vmem:[#allocation45_spill] sm:$0xff] }
 0x3a1   :  { %v7613_v45 = vpop.permute.xlu1 %7612  ;;  %v7493_v46 = vadd.f32 %v14011_v10, %v7415_v5  ;;  %v7198_v6 = vadd.f32 %v14017_v0, %v13954_v33  ;;  %v16184_v5 = vld [vmem:[#allocation24_spill] sm:$0xff] }
 0x3a2   :  { %v7623_v60 = vadd.f32 %v7613_v45, %v7545_v50  ;;  %7748 = vrot.lane.b32.xlu0 %v7740_v53, %s11397_s4  ;;  %v7392_v53 = vmul.f32 %v14077_v13, %v13867_v20  ;;  %v7679_v50 = vmul.f32 %v16181_v4, %v13827_v27  ;;  %v7768_v45 = vmul.f32 %v14100_v11, %v16180_v62 }
 0x3a3   :  { %8048 = vrot.lane.b32.xlu1 %v8037_v19, %s11398_s28  ;;  %v7571_v56 = vadd.f32 %v14093_v9, %v7493_v46  ;;  %v7495_v19 = vadd.f32 %v14021_v22, %v7417_v16  ;;  %v14232_v9 = vstv %s14190_s5  ;;  %v7276_v47 = vadd.f32 %v14111_v59, %v7198_v6  ;;  %s14715_s5 = sld [smem:[#allocation8 + $0x77]] }
 0x3a4   :  { %v7317_v57 = vpop.permute.xlu0 %7316  ;;  %v14204_v42 = vadd.f32 %v7669_v14, %v7623_v60  ;;  %v8087_v33 = vmul.f32 %v14232_v9, %v14027_v24  ;;  %v16183_v60 = vld [vmem:[#allocation32_spill] sm:$0xff]  ;;  %v7400_v14 = vmul.f32 %v14119_v35, %v13856_v49  ;;  %v14271_v46 = vstv %s10159_s0  ;;  %s14720_s0 = sld [smem:[#allocation8 + $0x71]] }
 0x3a5   :  { %v7328_v48 = vadd.f32 %v7317_v57, %v7250_v54  ;;  %v7617_v21 = vpop.permute.xlu1 %7616  ;;  %v7573_v22 = vadd.f32 %v14115_v23, %v7495_v19  ;;  %v7200_v27 = vadd.f32 %v16183_v60, %v16182_v2  ;;  %v7681_v23 = vmul.f32 %v16181_v4, %v13841_v28  ;;  %v16189_v19 = vld [vmem:[#allocation20_spill] sm:$0xff]  ;;  %v16190_v2 = vld [vmem:[#allocation30_spill] sm:$0xff] }
 0x3a6   :  { %v7625_v43 = vadd.f32 %v7617_v21, %v7547_v55  ;;  %7752 = vrot.lane.b32.xlu0 %v7742_v26, %s11397_s4  ;;  %v8089_v26 = vmul.f32 %v14232_v9, %v14043_v63  ;;  %v7792_v55 = vmul.f32 %v14089_v18, %v16184_v5  ;;  %v7794_v16 = vmul.f32 %v14100_v11, %v16184_v5 }
 0x3a7   :  { %8070 = vrot.lane.b32.xlu1 %v8061_v51, %s11398_s28  ;;  %v14218_v38 = vadd.f32 %v7390_v30, %v7328_v48  ;;  %v7278_v54 = vadd.f32 %v14133_v3, %v7200_v27  ;;  %v16186_v48 = vld [vmem:[#allocation93_spill] sm:$0xff]  ;;  %v7402_v3 = vmul.f32 %v14119_v35, %v13867_v20  ;;  %v16188_v35 = vld [vmem:[#allocation38_spill] sm:$0xff]  ;;  %v7844_v60 = vmul.f32 %v14089_v18, %v16190_v2 }
 0x3a8   :  { %v7321_v10 = vpop.permute.xlu0 %7320  ;;  %v14223_v61 = vadd.f32 %v7671_v36, %v7625_v43  ;;  %v7224_v21 = vadd.f32 %v16186_v48, %v16185_v37  ;;  %v8113_v36 = vmul.f32 %v14271_v46, %v14027_v24  ;;  %v14346_v37 = vld [vmem:[#allocation2 + $0x48] sm:$0x1] }
 0x3a9   :  { %v7330_v41 = vadd.f32 %v7321_v10, %v7252_v7  ;;  %v7639_v52 = vpop.permute.xlu1 %7638 }
 0x3aa   :  { %v7649_v12 = vadd.f32 %v7639_v52, %v7571_v56  ;;  %7774 = vrot.lane.b32.xlu0 %v7766_v39, %s11398_s28  ;;  %v7302_v43 = vadd.f32 %v14155_v40, %v7224_v21  ;;  %v16187_v56 = vld [vmem:[#allocation26_spill] sm:$0xff]  ;;  %v7410_v40 = vmul.f32 %v14160_v8, %v13856_v49  ;;  %v7412_v49 = vmul.f32 %v14160_v8, %v13867_v20 }
 0x3ab   :  { %8074 = vrot.lane.b32.xlu1 %v8063_v31, %s11398_s28  ;;  %v14240_v0 = vadd.f32 %v7392_v53, %v7330_v41  ;;  %v7226_v10 = vadd.f32 %v16188_v35, %v16187_v56  ;;  %v8115_v41 = vmul.f32 %v14271_v46, %v14043_v63  ;;  %v14373_v35 = vstv %s10166_s17  ;;  %s10189_s17 = sld [smem:[#allocation8 + $0x7e]] }
 0x3ac   :  { %v7343_v13 = vpop.permute.xlu0 %7342  ;;  %v14245_v32 = vadd.f32 %v7679_v50, %v7649_v12  ;;  %v7818_v12 = vmul.f32 %v14089_v18, %v16189_v19 }
 0x3ad   :  { %v7354_v29 = vadd.f32 %v7343_v13, %v7276_v47  ;;  %v7643_v59 = vpop.permute.xlu1 %7642  ;;  %v7304_v6 = vadd.f32 %v14178_v1, %v7226_v10  ;;  %v14301_v1 = vstv %s10160_s14  ;;  %v7820_v13 = vmul.f32 %v14100_v11, %v16189_v19  ;;  %v14375_v10 = vld [vmem:[#allocation2 + $0x31] sm:$0xff]  ;;  %s10183_s14 = sld [smem:[#allocation8 + $0x60]] }
 0x3ae   :  { %v7651_v25 = vadd.f32 %v7643_v59, %v7573_v22  ;;  %7778 = vrot.lane.b32.xlu0 %v7768_v45, %s11398_s28  ;;  %v8139_v47 = vmul.f32 %v14301_v1, %v14027_v24  ;;  %v8141_v20 = vmul.f32 %v14301_v1, %v14043_v63 }
 0x3af   :  { %8096 = vrot.lane.b32.xlu1 %v8087_v33, %s11398_s28  ;;  %v14258_v51 = vadd.f32 %v7400_v14, %v7354_v29  ;;  %v14325_v29 = vstv %s10161_s15  ;;  %s10184_s15 = sld [smem:[#allocation8 + $0x68]] }
 0x3b0   :  { %v7347_v58 = vpop.permute.xlu0 %7346  ;;  %v14262_v57 = vadd.f32 %v7681_v23, %v7651_v25  ;;  %v8165_v59 = vmul.f32 %v14325_v29, %v14027_v24  ;;  %v7846_v25 = vmul.f32 %v14100_v11, %v16190_v2 }
 0x3b1   :  { %v7356_v30 = vadd.f32 %v7347_v58, %v7278_v54  ;;  %v14266_v28 = vpop.permute.xlu1 %7698  ;;  %v8167_v54 = vmul.f32 %v14325_v29, %v14043_v63  ;;  %v16191_v58 = vld [vmem:[#allocation40_spill] sm:$0xff] }
 0x3b2   :  { %7800 = vrot.lane.b32.xlu0 %v7792_v55, %s11398_s28  ;;  %v7870_v5 = vmul.f32 %v14089_v18, %v16191_v58  ;;  %v7872_v21 = vmul.f32 %v14100_v11, %v16191_v58 }
 0x3b3   :  { %8100 = vrot.lane.b32.xlu1 %v8089_v26, %s11398_s28  ;;  %v14277_v7 = vadd.f32 %v7402_v3, %v7356_v30  ;;  %v14354_v30 = vstv %s10165_s16  ;;  %s10185_s16 = sld [smem:[#allocation8 + $0x70]] }
 0x3b4   :  { %v7369_v31 = vpop.permute.xlu0 %7368  ;;  %v8225_v18 = vmul.f32 %v14354_v30, %v14346_v37 }
 0x3b5   :  { %v7380_v62 = vadd.f32 %v7369_v31, %v7302_v43  ;;  %v14283_v39 = vpop.permute.xlu1 %7702  ;;  %v14360_v43 = vld [vmem:[#allocation2 + $0xa8] sm:$0x1] }
 0x3b6   :  { %7804 = vrot.lane.b32.xlu0 %v7794_v16, %s11398_s28  ;;  %v8227_v11 = vmul.f32 %v14354_v30, %v14360_v43  ;;  %v16192_v16 = vld [vmem:[#allocation82_spill] sm:$0xff] }
 0x3b7   :  { %8122 = vrot.lane.b32.xlu1 %v8113_v36, %s11399_s11  ;;  %v14292_v52 = vadd.f32 %v7410_v40, %v7380_v62  ;;  %v8251_v40 = vmul.f32 %v14373_v35, %v14346_v37 }
 0x3b8   :  { %v7373_v53 = vpop.permute.xlu0 %7372 }
 0x3b9   :  { %v7382_v4 = vadd.f32 %v7373_v53, %v7304_v6  ;;  %v14296_v50 = vpop.permute.xlu1 %7724  ;;  %v16193_v6 = vld [vmem:[#allocation84_spill] sm:$0xff] }
 0x3ba   :  { %7826 = vrot.lane.b32.xlu0 %v7818_v12, %s11398_s28  ;;  %v16194_v53 = vld [vmem:[#allocation52_spill] sm:$0xff]  ;;  %v14386_v12 = vld [vmem:[#allocation2 + $0x91] sm:$0xff] }
 0x3bb   :  { %8126 = vrot.lane.b32.xlu1 %v8115_v41, %s11399_s11  ;;  %v14306_v33 = vadd.f32 %v7412_v49, %v7382_v4  ;;  %v7956_v19 = vmul.f32 %v16194_v53, %v14375_v10  ;;  %v8253_v49 = vmul.f32 %v14373_v35, %v14360_v43 }
 0x3bc   :  { %v14308_v22 = vpop.permute.xlu0 %7428 }
 0x3bd   :  { %v14312_v45 = vpop.permute.xlu1 %7728 }
 0x3be   :  { %7830 = vrot.lane.b32.xlu0 %v7820_v13, %s11398_s28  ;;  %v7958_v13 = vmul.f32 %v16194_v53, %v14386_v12  ;;  %v16197_v53 = vld [vmem:[#allocation17_spill] sm:$0xff] }
 0x3bf   :  { %8148 = vrot.lane.b32.xlu1 %v8139_v47, %s11399_s11 }
 0x3c0   :  { %v14318_v8 = vpop.permute.xlu0 %7432 }
 0x3c1   :  { %v14322_v27 = vpop.permute.xlu1 %7750 }
 0x3c2   :  { %7852 = vrot.lane.b32.xlu0 %v7844_v60, %s11399_s11 }
 0x3c3   :  { %8152 = vrot.lane.b32.xlu1 %v8141_v20, %s11399_s11  ;;  %v14396_v20 = vstv %s10167_s18  ;;  %s10190_s18 = sld [smem:[#allocation8 + $0x86]] }
 0x3c4   :  { %v14330_v14 = vpop.permute.xlu0 %7454  ;;  %v8277_v60 = vmul.f32 %v14396_v20, %v14346_v37 }
 0x3c5   :  { %v14334_v23 = vpop.permute.xlu1 %7754 }
 0x3c6   :  { %7856 = vrot.lane.b32.xlu0 %v7846_v25, %s11399_s11  ;;  %v16195_v25 = vld [vmem:[#allocation42_spill] sm:$0xff] }
 0x3c7   :  { %8174 = vrot.lane.b32.xlu1 %v8165_v59, %s11399_s11 }
 0x3c8   :  { %v14340_v26 = vpop.permute.xlu0 %7458 }
 0x3c9   :  { %v14344_v55 = vpop.permute.xlu1 %7776 }
 0x3ca   :  { %7878 = vrot.lane.b32.xlu0 %v7870_v5, %s11399_s11  ;;  %v8279_v5 = vmul.f32 %v14396_v20, %v14360_v43 }
 0x3cb   :  { %8178 = vrot.lane.b32.xlu1 %v8167_v54, %s11399_s11  ;;  %v7982_v54 = vmul.f32 %v16195_v25, %v14375_v10 }
 0x3cc   :  { %v14350_v48 = vpop.permute.xlu0 %7480 }
 0x3cd   :  { %v14356_v3 = vpop.permute.xlu1 %7780 }
 0x3ce   :  { %7882 = vrot.lane.b32.xlu0 %v7872_v21, %s11399_s11 }
 0x3cf   :  { %8234 = vrot.lane.b32.xlu1 %v8225_v18, %s11397_s4  ;;  %v7984_v18 = vmul.f32 %v16195_v25, %v14386_v12 }
 0x3d0   :  { %v14364_v36 = vpop.permute.xlu0 %7484 }
 0x3d1   :  { %v14366_v31 = vpop.permute.xlu1 %7802 }
 0x3d2   :  { %7904 = vrot.lane.b32.xlu0 %v16192_v16, %s11399_s11 }
 0x3d3   :  { %8238 = vrot.lane.b32.xlu1 %v8227_v11, %s11397_s4  ;;  %v14414_v11 = vstv %s10168_s19  ;;  %s10191_s19 = sld [smem:[#allocation8 + $0x8e]] }
 0x3d4   :  { %v7507_v56 = vpop.permute.xlu0 %7506  ;;  %16196 = vst [vmem:[#allocation43_spill] sm:$0xff] %v14414_v11 }
 0x3d5   :  { %v14377_v62 = vpop.permute.xlu1 %7806 }
 0x3d6   :  { %7908 = vrot.lane.b32.xlu0 %v16193_v6, %s11399_s11 }
 0x3d7   :  { %8260 = vrot.lane.b32.xlu1 %v8251_v40, %s11397_s4  ;;  %v8303_v40 = vmul.f32 %v14414_v11, %v14346_v37 }
 0x3d8   :  { %v7511_v41 = vpop.permute.xlu0 %7510 }
 0x3d9   :  { %v14388_v4 = vpop.permute.xlu1 %7828 }
 0x3da   :  { %7964 = vrot.lane.b32.xlu0 %v7956_v19, %s11397_s4  ;;  %v8008_v19 = vmul.f32 %v16197_v53, %v14375_v10 }
 0x3db   :  { %8264 = vrot.lane.b32.xlu1 %v8253_v49, %s11397_s4  ;;  %v7440_v49 = vadd.f32 %v14308_v22, %v14218_v38  ;;  %v7442_v38 = vadd.f32 %v14318_v8, %v14240_v0  ;;  %v7466_v0 = vadd.f32 %v14330_v14, %v14258_v51  ;;  %v7468_v51 = vadd.f32 %v14340_v26, %v14277_v7 }
 0x3dc   :  { %v7533_v47 = vpop.permute.xlu0 %7532  ;;  %v7492_v7 = vadd.f32 %v14350_v48, %v14292_v52  ;;  %v7494_v52 = vadd.f32 %v14364_v36, %v14306_v33 }
 0x3dd   :  { %v14398_v2 = vpop.permute.xlu1 %7832  ;;  %v7518_v25 = vadd.f32 %v7507_v56, %v7440_v49  ;;  %v7520_v56 = vadd.f32 %v7511_v41, %v7442_v38  ;;  %v7544_v41 = vadd.f32 %v7533_v47, %v7466_v0 }
 0x3de   :  { %7968 = vrot.lane.b32.xlu0 %v7958_v13, %s11397_s4 }
 0x3df   :  { %8286 = vrot.lane.b32.xlu1 %v8277_v60, %s11397_s4  ;;  %v8305_v60 = vmul.f32 %v14414_v11, %v14360_v43 }
 0x3e0   :  { %v7537_v59 = vpop.permute.xlu0 %7536 }
 0x3e1   :  { %v14406_v58 = vpop.permute.xlu1 %7854 }
 0x3e2   :  { %7990 = vrot.lane.b32.xlu0 %v7982_v54, %s11397_s4 }
 0x3e3   :  { %8290 = vrot.lane.b32.xlu1 %v8279_v5, %s11397_s4  ;;  %v8010_v5 = vmul.f32 %v16197_v53, %v14386_v12 }
 0x3e4   :  { %v7559_v21 = vpop.permute.xlu0 %7558 }
 0x3e5   :  { %v14416_v16 = vpop.permute.xlu1 %7858 }
 0x3e6   :  { %7994 = vrot.lane.b32.xlu0 %v7984_v18, %s11397_s4  ;;  %v14434_v18 = vstv %s10169_s20  ;;  %s10192_s20 = sld [smem:[#allocation8 + $0x7d]] }
 0x3e7   :  { %8312 = vrot.lane.b32.xlu1 %v8303_v40, %s11398_s28  ;;  %16198 = vst [vmem:[#allocation16_spill] sm:$0xff] %v14434_v18  ;;  %v8329_v11 = vmul.f32 %v14434_v18, %v14346_v37 }
 0x3e8   :  { %v7563_v6 = vpop.permute.xlu0 %7562 }
 0x3e9   :  { %v14426_v13 = vpop.permute.xlu1 %7880 }
 0x3ea   :  { %8016 = vrot.lane.b32.xlu0 %v8008_v19, %s11397_s4  ;;  %v16199_v19 = vld [vmem:[#allocation87_spill] sm:$0xff] }
 0x3eb   :  { %8316 = vrot.lane.b32.xlu1 %v8305_v60, %s11398_s28  ;;  %v8034_v60 = vmul.f32 %v14135_v15, %v14375_v10 }
 0x3ec   :  { %v7585_v54 = vpop.permute.xlu0 %7584 }
 0x3ed   :  { %v7596_v22 = vadd.f32 %v7585_v54, %v7518_v25  ;;  %v14438_v40 = vpop.permute.xlu1 %7884  ;;  %v8331_v54 = vmul.f32 %v14434_v18, %v14360_v43 }
 0x3ee   :  { %8020 = vrot.lane.b32.xlu0 %v8010_v5, %s11397_s4 }
 0x3ef   :  { %8338 = vrot.lane.b32.xlu1 %v8329_v11, %s11398_s28  ;;  %v14445_v49 = vadd.f32 %v16199_v19, %v7596_v22  ;;  %v16200_v11 = vld [vmem:[#allocation88_spill] sm:$0xff]  ;;  %v8036_v22 = vmul.f32 %v14135_v15, %v14386_v12  ;;  %v14462_v19 = vstv %s10170_s2  ;;  %s10193_s2 = sld [smem:[#allocation8 + $0x85]] }
 0x3f0   :  { %v7589_v53 = vpop.permute.xlu0 %7588  ;;  %16201 = vst [vmem:[#allocation23_spill] sm:$0xff] %v14462_v19  ;;  %v8355_v47 = vmul.f32 %v14462_v19, %v14346_v37 }
 0x3f1   :  { %v7598_v8 = vadd.f32 %v7589_v53, %v7520_v56  ;;  %v14451_v25 = vpop.permute.xlu1 %7906  ;;  %v7546_v53 = vadd.f32 %v7537_v59, %v7468_v51  ;;  %v7570_v59 = vadd.f32 %v7559_v21, %v7492_v7  ;;  %v8062_v51 = vmul.f32 %v14185_v44, %v14386_v12 }
 0x3f2   :  { %8042 = vrot.lane.b32.xlu0 %v8034_v60, %s11398_s28  ;;  %v16202_v60 = vld [vmem:[#allocation89_spill] sm:$0xff] }
 0x3f3   :  { %8342 = vrot.lane.b32.xlu1 %v8331_v54, %s11398_s28  ;;  %v14458_v5 = vadd.f32 %v16200_v11, %v7598_v8  ;;  %v8060_v8 = vmul.f32 %v14185_v44, %v14375_v10  ;;  %v16203_v11 = vld [vmem:[#allocation90_spill] sm:$0xff] }
 0x3f4   :  { %v7611_v38 = vpop.permute.xlu0 %7610 }
 0x3f5   :  { %v7622_v14 = vadd.f32 %v7611_v38, %v7544_v41  ;;  %v14466_v56 = vpop.permute.xlu1 %7910  ;;  %v8357_v41 = vmul.f32 %v14462_v19, %v14360_v43 }
 0x3f6   :  { %8046 = vrot.lane.b32.xlu0 %v8036_v22, %s11398_s28 }
 0x3f7   :  { %8364 = vrot.lane.b32.xlu1 %v8355_v47, %s11398_s28  ;;  %v14473_v0 = vadd.f32 %v16202_v60, %v7622_v14  ;;  %v14490_v14 = vstv %s10171_s22  ;;  %v16206_v60 = vld [vmem:[#allocation91_spill] sm:$0xff]  ;;  %s10194_s22 = sld [smem:[#allocation8 + $0x8d]] }
 0x3f8   :  { %v7615_v15 = vpop.permute.xlu0 %7614  ;;  %16205 = vst [vmem:[#allocation29_spill] sm:$0xff] %v14490_v14  ;;  %v8381_v21 = vmul.f32 %v14490_v14, %v14346_v37  ;;  %v8383_v36 = vmul.f32 %v14490_v14, %v14360_v43 }
 0x3f9   :  { %v7624_v26 = vadd.f32 %v7615_v15, %v7546_v53  ;;  %v14479_v54 = vpop.permute.xlu1 %7966  ;;  %v7572_v53 = vadd.f32 %v7563_v6, %v7494_v52  ;;  %v16208_v6 = vld [vmem:[#allocation92_spill] sm:$0xff] }
 0x3fa   :  { %8068 = vrot.lane.b32.xlu0 %v8060_v8, %s11398_s28  ;;  %v8086_v8 = vmul.f32 %v14232_v9, %v14375_v10 }
 0x3fb   :  { %8368 = vrot.lane.b32.xlu1 %v8357_v41, %s11398_s28  ;;  %v14486_v38 = vadd.f32 %v16203_v11, %v7624_v26  ;;  %v14518_v11 = vstv %s10172_s23  ;;  %s10195_s23 = sld [smem:[#allocation8 + $0x7c]] }
 0x3fc   :  { %v7637_v22 = vpop.permute.xlu0 %7636  ;;  %16210 = vst [vmem:[#allocation21_spill] sm:$0xff] %v14518_v11 }
 0x3fd   :  { %16204 = vst [vmem:[#allocation19_spill] sm:$0xff] %v14486_v38  ;;  %v7648_v48 = vadd.f32 %v7637_v22, %v7570_v59  ;;  %v14494_v47 = vpop.permute.xlu1 %7970  ;;  %v8088_v59 = vmul.f32 %v14232_v9, %v14386_v12  ;;  %v8409_v9 = vmul.f32 %v14518_v11, %v14360_v43  ;;  %v14640_v38 = vstv %s10151_s30  ;;  %s10207_s30 = sld [smem:[#allocation8 + $0x78]] }
 0x3fe   :  { %8072 = vrot.lane.b32.xlu0 %v8062_v51, %s11398_s28  ;;  %v8407_v51 = vmul.f32 %v14518_v11, %v14346_v37  ;;  %v8140_v11 = vmul.f32 %v14301_v1, %v14386_v12 }
 0x3ff   :  { %8390 = vrot.lane.b32.xlu1 %v8381_v21, %s11399_s11  ;;  %v14501_v15 = vadd.f32 %v16206_v60, %v7648_v48  ;;  %v8112_v48 = vmul.f32 %v14271_v46, %v14375_v10  ;;  %v8114_v60 = vmul.f32 %v14271_v46, %v14386_v12 }
 0x400   :  { %v7641_v44 = vpop.permute.xlu0 %7640 }
 0x401   :  { %16207 = vst [vmem:[#allocation44_spill] sm:$0xff] %v14501_v15  ;;  %v7650_v7 = vadd.f32 %v7641_v44, %v7572_v53  ;;  %v14505_v33 = vpop.permute.xlu1 %7992  ;;  %v14540_v44 = vstv %s10173_s24  ;;  %s10196_s24 = sld [smem:[#allocation8 + $0x84]] }
 0x402   :  { %8094 = vrot.lane.b32.xlu0 %v8086_v8, %s11398_s28  ;;  %16211 = vst [vmem:[#allocation31_spill] sm:$0xff] %v14540_v44  ;;  %v8435_v46 = vmul.f32 %v14540_v44, %v14360_v43 }
 0x403   :  { %8394 = vrot.lane.b32.xlu1 %v8383_v36, %s11399_s11  ;;  %v14512_v26 = vadd.f32 %v16208_v6, %v7650_v7  ;;  %v8433_v7 = vmul.f32 %v14540_v44, %v14346_v37  ;;  %v14548_v36 = vld [vmem:[#allocation2 + $0x49] sm:$0x1]  ;;  %v8164_v44 = vmul.f32 %v14325_v29, %v14375_v10 }
 0x404   :  { %v14514_v41 = vpop.permute.xlu0 %7696 }
 0x405   :  { %16209 = vst [vmem:[#allocation25_spill] sm:$0xff] %v14512_v26  ;;  %v14520_v22 = vpop.permute.xlu1 %7996  ;;  %v14594_v26 = vld [vmem:[#allocation2 + $0x40] sm:$0xff] }
 0x406   :  { %8098 = vrot.lane.b32.xlu0 %v8088_v59, %s11398_s28  ;;  %v8138_v59 = vmul.f32 %v14301_v1, %v14375_v10  ;;  %v14583_v1 = vstv %s10178_s26  ;;  %s10201_s26 = sld [smem:[#allocation8 + $0x7a]] }
 0x407   :  { %8416 = vrot.lane.b32.xlu1 %v8407_v51, %s11399_s11  ;;  %16216 = vst [vmem:[#allocation46_spill] sm:$0xff] %v14583_v1 }
 0x408   :  { %v14526_v52 = vpop.permute.xlu0 %7700 }
 0x409   :  { %v14530_v21 = vpop.permute.xlu1 %8018 }
 0x40a   :  { %8120 = vrot.lane.b32.xlu0 %v8112_v48, %s11399_s11  ;;  %v14559_v48 = vstv %s10177_s25  ;;  %s10197_s25 = sld [smem:[#allocation8 + $0x8c]] }
 0x40b   :  { %8420 = vrot.lane.b32.xlu1 %v8409_v9, %s11399_s11  ;;  %16213 = vst [vmem:[#allocation33_spill] sm:$0xff] %v14559_v48  ;;  %v8493_v9 = vmul.f32 %v14559_v48, %v14548_v36 }
 0x40c   :  { %v14536_v53 = vpop.permute.xlu0 %7722 }
 0x40d   :  { %v14542_v8 = vpop.permute.xlu1 %8022 }
 0x40e   :  { %8124 = vrot.lane.b32.xlu0 %v8114_v60, %s11399_s11  ;;  %v14564_v60 = vld [vmem:[#allocation2 + $0xa9] sm:$0x1] }
 0x40f   :  { %8442 = vrot.lane.b32.xlu1 %v8433_v7, %s11399_s11 }
 0x410   :  { %v14550_v6 = vpop.permute.xlu0 %7726 }
 0x411   :  { %16212 = vst [vmem:[#allocation27_spill] sm:$0xff] %v14550_v6  ;;  %v14554_v51 = vpop.permute.xlu1 %8044 }
 0x412   :  { %8146 = vrot.lane.b32.xlu0 %v8138_v59, %s11399_s11  ;;  %v8495_v59 = vmul.f32 %v14559_v48, %v14564_v60 }
 0x413   :  { %8446 = vrot.lane.b32.xlu1 %v8435_v46, %s11399_s11 }
 0x414   :  { %v14566_v7 = vpop.permute.xlu0 %7748 }
 0x415   :  { %16214 = vst [vmem:[#allocation55_spill] sm:$0xff] %v14566_v7  ;;  %v14570_v14 = vpop.permute.xlu1 %8048 }
 0x416   :  { %8150 = vrot.lane.b32.xlu0 %v8140_v11, %s11399_s11  ;;  %v8519_v11 = vmul.f32 %v14583_v1, %v14548_v36 }
 0x417   :  { %8502 = vrot.lane.b32.xlu1 %v8493_v9, %s11397_s4  ;;  %v7709_v9 = vadd.f32 %v14266_v28, %v14157_v17  ;;  %v8521_v17 = vmul.f32 %v14583_v1, %v14564_v60  ;;  %v14605_v28 = vld [vmem:[#allocation2 + $0xa0] sm:$0xff]  ;;  %v14620_v1 = vstv %s10179_s29  ;;  %s10174_s29 = sld [smem:[#allocation8 + $0x63]] }
 0x418   :  { %v14576_v46 = vpop.permute.xlu0 %7752 }
 0x419   :  { %16215 = vst [vmem:[#allocation57_spill] sm:$0xff] %v14576_v46  ;;  %v14580_v19 = vpop.permute.xlu1 %8070  ;;  %v8166_v46 = vmul.f32 %v14325_v29, %v14386_v12  ;;  %v7711_v29 = vadd.f32 %v14283_v39, %v14180_v34  ;;  %v8226_v34 = vmul.f32 %v14354_v30, %v14605_v28  ;;  %v8545_v39 = vmul.f32 %v14620_v1, %v14548_v36 }
 0x41a   :  { %8172 = vrot.lane.b32.xlu0 %v8164_v44, %s11399_s11  ;;  %v7787_v44 = vadd.f32 %v14344_v55, %v7709_v9 }
 0x41b   :  { %8506 = vrot.lane.b32.xlu1 %v8495_v59, %s11397_s4  ;;  %v14600_v59 = vstv %s10150_s27  ;;  %s10204_s27 = sld [smem:[#allocation8 + $0x79]] }
 0x41c   :  { %v14590_v48 = vpop.permute.xlu0 %7774  ;;  %v7865_v15 = vadd.f32 %v14406_v58, %v7787_v44  ;;  %v7927_v55 = vmul.f32 %v14600_v59, %v14027_v24  ;;  %v7735_v58 = vadd.f32 %v14296_v50, %v14204_v42  ;;  %v7937_v42 = vmul.f32 %v14640_v38, %v14027_v24 }
 0x41d   :  { %v14596_v7 = vpop.permute.xlu1 %8074  ;;  %v8250_v50 = vmul.f32 %v14373_v35, %v14594_v26 }
 0x41e   :  { %8176 = vrot.lane.b32.xlu0 %v8166_v46, %s11399_s11  ;;  %v8224_v46 = vmul.f32 %v14354_v30, %v14594_v26  ;;  %v7931_v6 = vadd.f32 %v7927_v55, %v7865_v15  ;;  %v7813_v30 = vadd.f32 %v14366_v31, %v7735_v58  ;;  %v7737_v31 = vadd.f32 %v14312_v45, %v14223_v61 }
 0x41f   :  { %8528 = vrot.lane.b32.xlu1 %v8519_v11, %s11397_s4  ;;  %v7789_v11 = vadd.f32 %v14356_v3, %v7711_v29  ;;  %v7929_v3 = vmul.f32 %v14600_v59, %v14043_v63 }
 0x420   :  { %v14612_v9 = vpop.permute.xlu0 %7778  ;;  %v7815_v58 = vadd.f32 %v14377_v62, %v7737_v31 }
 0x421   :  { %v14616_v18 = vpop.permute.xlu1 %8096  ;;  %v7867_v44 = vadd.f32 %v14416_v16, %v7789_v11  ;;  %v8547_v16 = vmul.f32 %v14620_v1, %v14564_v60 }
 0x422   :  { %8232 = vrot.lane.b32.xlu0 %v8224_v46, %s11397_s4  ;;  %v7977_v46 = vadd.f32 %v14479_v54, %v7931_v6  ;;  %v7891_v54 = vadd.f32 %v14426_v13, %v7813_v30 }
 0x423   :  { %8532 = vrot.lane.b32.xlu1 %v8521_v17, %s11397_s4  ;;  %v7933_v15 = vadd.f32 %v7929_v3, %v7867_v44  ;;  %v7939_v44 = vmul.f32 %v14640_v38, %v14043_v63  ;;  %v8252_v3 = vmul.f32 %v14373_v35, %v14605_v28 }
 0x424   :  { %v14632_v29 = vpop.permute.xlu0 %7800  ;;  %v8055_v6 = vadd.f32 %v14554_v51, %v7977_v46  ;;  %v7761_v51 = vadd.f32 %v14322_v27, %v14245_v32  ;;  %v7941_v30 = vadd.f32 %v7937_v42, %v7891_v54  ;;  %v14685_v32 = vstv %s14634_s13  ;;  %s10186_s13 = sld [smem:[#allocation8 + $0x7f]] }
 0x425   :  { %v14636_v17 = vpop.permute.xlu1 %8100  ;;  %v7979_v61 = vadd.f32 %v14494_v47, %v7933_v15  ;;  %v7893_v47 = vadd.f32 %v14438_v40, %v7815_v58  ;;  %v7947_v42 = vmul.f32 %v14685_v32, %v14027_v24  ;;  %v7708_v24 = vadd.f32 %v14514_v41, %v14445_v49 }
 0x426   :  { %8236 = vrot.lane.b32.xlu0 %v8226_v34, %s11397_s4  ;;  %v14656_v34 = vstv %s10180_s10  ;;  %v8003_v15 = vadd.f32 %v14505_v33, %v7941_v30  ;;  %v7949_v49 = vmul.f32 %v14685_v32, %v14043_v63  ;;  %v7710_v63 = vadd.f32 %v14526_v52, %v14458_v5  ;;  %s10175_s10 = sld [smem:[#allocation8 + $0x6b]] }
 0x427   :  { %8554 = vrot.lane.b32.xlu1 %v8545_v39, %s11397_s4  ;;  %v14660_v39 = vstv %s10162_s12  ;;  %v8571_v62 = vmul.f32 %v14656_v34, %v14548_v36  ;;  %v8057_v46 = vadd.f32 %v14570_v14, %v7979_v61  ;;  %v7763_v14 = vadd.f32 %v14334_v23, %v14262_v57  ;;  %s10202_s12 = sld [smem:[#allocation8 + $0x82]] }
 0x428   :  { %v14654_v55 = vpop.permute.xlu0 %7804  ;;  %v8195_v13 = vmul.f32 %v14660_v39, %v14346_v37  ;;  %v8197_v40 = vmul.f32 %v14660_v39, %v14360_v43  ;;  %v8573_v33 = vmul.f32 %v14656_v34, %v14564_v60  ;;  %v14710_v23 = vstv %s14658_s1  ;;  %s15178_s1 = sld [smem:[#allocation8 + $0x73]] }
 0x429   :  { %v8123_v11 = vpop.permute.xlu1 %8122  ;;  %v7786_v41 = vadd.f32 %v14590_v48, %v7708_v24  ;;  %v8599_v5 = vmul.f32 %v14710_v23, %v14564_v60 }
 0x42a   :  { %v8133_v45 = vadd.f32 %v8123_v11, %v8055_v6  ;;  %8258 = vrot.lane.b32.xlu0 %v8250_v50, %s11397_s4  ;;  %v7943_v6 = vadd.f32 %v7939_v44, %v7893_v47  ;;  %v8081_v11 = vadd.f32 %v14580_v19, %v8003_v15 }
 0x42b   :  { %8558 = vrot.lane.b32.xlu1 %v8547_v16, %s11397_s4  ;;  %v7839_v16 = vadd.f32 %v14388_v4, %v7761_v51  ;;  %v8276_v4 = vmul.f32 %v14396_v20, %v14594_v26 }
 0x42c   :  { %v14680_v50 = vpop.permute.xlu0 %7826  ;;  %v14682_v31 = vadd.f32 %v8195_v13, %v8133_v45  ;;  %v14713_v45 = vstv %s14662_s3  ;;  %v7841_v13 = vadd.f32 %v14398_v2, %v7763_v14  ;;  %v8278_v2 = vmul.f32 %v14396_v20, %v14605_v28  ;;  %s15202_s3 = sld [smem:[#allocation8 + $0x81]] }
 0x42d   :  { %v8127_v27 = vpop.permute.xlu1 %8126  ;;  %v7917_v54 = vadd.f32 %v14451_v25, %v7839_v16  ;;  %v8005_v25 = vadd.f32 %v14520_v22, %v7943_v6  ;;  %v8205_v19 = vmul.f32 %v14713_v45, %v14346_v37  ;;  %v8597_v22 = vmul.f32 %v14710_v23, %v14548_v36 }
 0x42e   :  { %v8135_v35 = vadd.f32 %v8127_v27, %v8057_v46  ;;  %8262 = vrot.lane.b32.xlu0 %v8252_v3, %s11397_s4  ;;  %v7919_v44 = vadd.f32 %v14466_v56, %v7841_v13  ;;  %v7926_v27 = vmul.f32 %v14600_v59, %v14375_v10  ;;  %v8207_v56 = vmul.f32 %v14713_v45, %v14360_v43 }
 0x42f   :  { %8580 = vrot.lane.b32.xlu1 %v8571_v62, %s11398_s28  ;;  %v7951_v3 = vadd.f32 %v7947_v42, %v7917_v54  ;;  %v8083_v62 = vadd.f32 %v14596_v7, %v8005_v25  ;;  %v7788_v7 = vadd.f32 %v14612_v9, %v7710_v63  ;;  %v7734_v9 = vadd.f32 %v14536_v53, %v14473_v0  ;;  %v16220_v63 = vld [vmem:[#allocation16_spill] sm:$0xff] }
 0x430   :  { %v14703_v58 = vpop.permute.xlu0 %7830  ;;  %v14705_v61 = vadd.f32 %v8197_v40, %v8135_v35  ;;  %v7953_v15 = vadd.f32 %v7949_v49, %v7919_v44  ;;  %v16217_v40 = vld [vmem:[#allocation43_spill] sm:$0xff]  ;;  %v7928_v54 = vmul.f32 %v14600_v59, %v14386_v12  ;;  %v14760_v6 = vstv %s14715_s5  ;;  %s15206_s5 = sld [smem:[#allocation8 + $0x87]] }
 0x431   :  { %v8149_v57 = vpop.permute.xlu1 %8148  ;;  %v8029_v20 = vadd.f32 %v14530_v21, %v7951_v3  ;;  %v8302_v14 = vmul.f32 %v16217_v40, %v14594_v26  ;;  %v7812_v0 = vadd.f32 %v14632_v29, %v7734_v9  ;;  %v8304_v25 = vmul.f32 %v16217_v40, %v14605_v28  ;;  %v16219_v49 = vld [vmem:[#allocation27_spill] sm:$0xff] }
 0x432   :  { %v8159_v51 = vadd.f32 %v8149_v57, %v8081_v11  ;;  %8284 = vrot.lane.b32.xlu0 %v8276_v4, %s11397_s4  ;;  %v8031_v11 = vadd.f32 %v14542_v8, %v7953_v15  ;;  %v8215_v57 = vmul.f32 %v14760_v6, %v14346_v37  ;;  %v8330_v40 = vmul.f32 %v16220_v63, %v14605_v28 }
 0x433   :  { %8584 = vrot.lane.b32.xlu1 %v8573_v33, %s11398_s28  ;;  %v8107_v21 = vadd.f32 %v14616_v18, %v8029_v20  ;;  %v14765_v18 = vstv %s14720_s0  ;;  %v16223_v20 = vld [vmem:[#allocation55_spill] sm:$0xff]  ;;  %s15259_s0 = sld [smem:[#allocation8 + $0x8f]] }
 0x434   :  { %v7853_v47 = vpop.permute.xlu0 %7852  ;;  %v14734_v30 = vadd.f32 %v8205_v19, %v8159_v51  ;;  %v8623_v53 = vmul.f32 %v14765_v18, %v14548_v36  ;;  %v8109_v8 = vadd.f32 %v14636_v17, %v8031_v11  ;;  %v16218_v19 = vld [vmem:[#allocation19_spill] sm:$0xff]  ;;  %v8217_v17 = vmul.f32 %v14760_v6, %v14360_v43 }
 0x435   :  { %v7864_v48 = vadd.f32 %v7853_v47, %v7786_v41  ;;  %v8153_v46 = vpop.permute.xlu1 %8152  ;;  %v7736_v37 = vadd.f32 %v16219_v49, %v16218_v19  ;;  %v8625_v3 = vmul.f32 %v14765_v18, %v14564_v60 }
 0x436   :  { %v8161_v16 = vadd.f32 %v8153_v46, %v8083_v62  ;;  %8288 = vrot.lane.b32.xlu0 %v8278_v2, %s11397_s4  ;;  %v7936_v2 = vmul.f32 %v14640_v38, %v14375_v10 }
 0x437   :  { %8606 = vrot.lane.b32.xlu1 %v8597_v22, %s11398_s28  ;;  %v14748_v52 = vadd.f32 %v7926_v27, %v7864_v48  ;;  %v7814_v44 = vadd.f32 %v14654_v55, %v7736_v37  ;;  %v8328_v48 = vmul.f32 %v16220_v63, %v14594_v26  ;;  %v16222_v27 = vld [vmem:[#allocation44_spill] sm:$0xff]  ;;  %v7938_v55 = vmul.f32 %v14640_v38, %v14386_v12  ;;  %v16225_v38 = vld [vmem:[#allocation57_spill] sm:$0xff] }
 0x438   :  { %v7857_v35 = vpop.permute.xlu0 %7856  ;;  %v14753_v42 = vadd.f32 %v8207_v56, %v8161_v16  ;;  %v7760_v16 = vadd.f32 %v16223_v20, %v16222_v27  ;;  %v16229_v20 = vld [vmem:[#allocation21_spill] sm:$0xff] }
 0x439   :  { %v7866_v4 = vadd.f32 %v7857_v35, %v7788_v7  ;;  %v8175_v33 = vpop.permute.xlu1 %8174  ;;  %v14804_v7 = vstv %s10183_s14  ;;  %s15264_s14 = sld [smem:[#allocation8 + $0x80]] }
 0x43a   :  { %v8185_v24 = vadd.f32 %v8175_v33, %v8107_v21  ;;  %8310 = vrot.lane.b32.xlu0 %v8302_v14, %s11398_s28  ;;  %v8649_v15 = vmul.f32 %v14804_v7, %v14548_v36  ;;  %v16224_v14 = vld [vmem:[#allocation25_spill] sm:$0xff]  ;;  %v8651_v11 = vmul.f32 %v14804_v7, %v14564_v60 }
 0x43b   :  { %8610 = vrot.lane.b32.xlu1 %v8599_v5, %s11398_s28  ;;  %v14773_v59 = vadd.f32 %v7928_v54, %v7866_v4  ;;  %v7838_v5 = vadd.f32 %v14680_v50, %v7760_v16  ;;  %v7762_v9 = vadd.f32 %v16225_v38, %v16224_v14  ;;  %v7946_v50 = vmul.f32 %v14685_v32, %v14375_v10  ;;  %v14893_v38 = vld [vmem:[#allocation2 + $0xb8] sm:$0x1] }
 0x43c   :  { %v7879_v13 = vpop.permute.xlu0 %7878  ;;  %v14778_v51 = vadd.f32 %v8215_v57, %v8185_v24  ;;  %v7948_v10 = vmul.f32 %v14685_v32, %v14386_v12  ;;  %v8406_v16 = vmul.f32 %v16229_v20, %v14594_v26 }
 0x43d   :  { %v7890_v41 = vadd.f32 %v7879_v13, %v7812_v0  ;;  %v8179_v29 = vpop.permute.xlu1 %8178  ;;  %v7840_v54 = vadd.f32 %v14703_v58, %v7762_v9  ;;  %v16226_v0 = vld [vmem:[#allocation23_spill] sm:$0xff]  ;;  %v14834_v58 = vstv %s10184_s15  ;;  %s10203_s15 = sld [smem:[#allocation8 + $0x8a]] }
 0x43e   :  { %v8187_v22 = vadd.f32 %v8179_v29, %v8109_v8  ;;  %8314 = vrot.lane.b32.xlu0 %v8304_v25, %s11398_s28  ;;  %v8675_v25 = vmul.f32 %v14834_v58, %v14548_v36  ;;  %v8356_v37 = vmul.f32 %v16226_v0, %v14605_v28  ;;  %v8677_v12 = vmul.f32 %v14834_v58, %v14564_v60  ;;  %v16227_v29 = vld [vmem:[#allocation29_spill] sm:$0xff] }
 0x43f   :  { %8632 = vrot.lane.b32.xlu1 %v8623_v53, %s11398_s28  ;;  %v14791_v62 = vadd.f32 %v7936_v2, %v7890_v41  ;;  %v8354_v53 = vmul.f32 %v16226_v0, %v14594_v26  ;;  %v8380_v2 = vmul.f32 %v16227_v29, %v14594_v26 }
 0x440   :  { %v7883_v47 = vpop.permute.xlu0 %7882  ;;  %v14795_v46 = vadd.f32 %v8217_v17, %v8187_v22  ;;  %v14858_v17 = vstv %s10185_s16  ;;  %s10206_s16 = sld [smem:[#allocation8 + $0x89]] }
 0x441   :  { %v7892_v56 = vadd.f32 %v7883_v47, %v7814_v44  ;;  %v14799_v43 = vpop.permute.xlu1 %8234  ;;  %v8701_v44 = vmul.f32 %v14858_v17, %v14548_v36  ;;  %v8382_v47 = vmul.f32 %v16227_v29, %v14605_v28 }
 0x442   :  { %16221 = vst [vmem:[#allocation58_spill] sm:$0xff] %v14795_v46  ;;  %8336 = vrot.lane.b32.xlu0 %v8328_v48, %s11398_s28  ;;  %v8703_v48 = vmul.f32 %v14858_v17, %v14564_v60  ;;  %v14971_v46 = vstv %s10193_s2  ;;  %s10211_s2 = sld [smem:[#allocation11 + $0x6]] }
 0x443   :  { %8636 = vrot.lane.b32.xlu1 %v8625_v3, %s11398_s28  ;;  %v14810_v21 = vadd.f32 %v7938_v55, %v7892_v56  ;;  %v14879_v55 = vld [vmem:[#allocation2 + $0x58] sm:$0x1] }
 0x444   :  { %v7905_v35 = vpop.permute.xlu0 %7904 }
 0x445   :  { %v7916_v4 = vadd.f32 %v7905_v35, %v7838_v5  ;;  %v14816_v33 = vpop.permute.xlu1 %8238  ;;  %v14887_v35 = vstv %s10189_s17  ;;  %s10209_s17 = sld [smem:[#allocation8 + $0x88]] }
 0x446   :  { %8340 = vrot.lane.b32.xlu0 %v8330_v40, %s11398_s28  ;;  %v8761_v14 = vmul.f32 %v14887_v35, %v14879_v55 }
 0x447   :  { %8658 = vrot.lane.b32.xlu1 %v8649_v15, %s11399_s11  ;;  %v14825_v24 = vadd.f32 %v7946_v50, %v7916_v4  ;;  %v8408_v15 = vmul.f32 %v16229_v20, %v14605_v28  ;;  %v16230_v4 = vld [vmem:[#allocation31_spill] sm:$0xff] }
 0x448   :  { %v7909_v57 = vpop.permute.xlu0 %7908  ;;  %v8432_v50 = vmul.f32 %v16230_v4, %v14594_v26  ;;  %v8434_v0 = vmul.f32 %v16230_v4, %v14605_v28 }
 0x449   :  { %v7918_v8 = vadd.f32 %v7909_v57, %v7840_v54  ;;  %v14829_v13 = vpop.permute.xlu1 %8260 }
 0x44a   :  { %8362 = vrot.lane.b32.xlu0 %v8354_v53, %s11398_s28  ;;  %v14909_v53 = vstv %s10190_s18  ;;  %s10198_s18 = sld [smem:[#allocation8 + $0x7b]] }
 0x44b   :  { %8662 = vrot.lane.b32.xlu1 %v8651_v11, %s11399_s11  ;;  %v14839_v19 = vadd.f32 %v7948_v10, %v7918_v8  ;;  %v8763_v11 = vmul.f32 %v14887_v35, %v14893_v38  ;;  %v14911_v8 = vld [vmem:[#allocation2 + $0x41] sm:$0xff] }
 0x44c   :  { %v14841_v49 = vpop.permute.xlu0 %7964 }
 0x44d   :  { %v14845_v41 = vpop.permute.xlu1 %8264 }
 0x44e   :  { %8366 = vrot.lane.b32.xlu0 %v8356_v37, %s11398_s28 }
 0x44f   :  { %8684 = vrot.lane.b32.xlu1 %v8675_v25, %s11399_s11  ;;  %v8787_v25 = vmul.f32 %v14909_v53, %v14879_v55 }
 0x450   :  { %v14851_v32 = vpop.permute.xlu0 %7968 }
 0x451   :  { %v14855_v22 = vpop.permute.xlu1 %8286 }
 0x452   :  { %8388 = vrot.lane.b32.xlu0 %v8380_v2, %s11399_s11  ;;  %v14921_v2 = vld [vmem:[#allocation2 + $0xa1] sm:$0xff] }
 0x453   :  { %8688 = vrot.lane.b32.xlu1 %v8677_v12, %s11399_s11  ;;  %v16231_v12 = vld [vmem:[#allocation33_spill] sm:$0xff] }
 0x454   :  { %v14863_v3 = vpop.permute.xlu0 %7990  ;;  %v8492_v29 = vmul.f32 %v16231_v12, %v14911_v8  ;;  %v8494_v20 = vmul.f32 %v16231_v12, %v14921_v2 }
 0x455   :  { %v14867_v63 = vpop.permute.xlu1 %8290 }
 0x456   :  { %16228 = vst [vmem:[#allocation15_spill] sm:$0xff] %v14867_v63  ;;  %8392 = vrot.lane.b32.xlu0 %v8382_v47, %s11399_s11  ;;  %v8789_v47 = vmul.f32 %v14909_v53, %v14893_v38 }
 0x457   :  { %8710 = vrot.lane.b32.xlu1 %v8701_v44, %s11399_s11 }
 0x458   :  { %v14873_v27 = vpop.permute.xlu0 %7994 }
 0x459   :  { %v14877_v56 = vpop.permute.xlu1 %8312 }
 0x45a   :  { %8414 = vrot.lane.b32.xlu0 %v8406_v16, %s11399_s11  ;;  %v14931_v16 = vstv %s10191_s19  ;;  %s10199_s19 = sld [smem:[#allocation8 + $0x83]] }
 0x45b   :  { %8714 = vrot.lane.b32.xlu1 %v8703_v48, %s11399_s11  ;;  %16233 = vst [vmem:[#allocation49_spill] sm:$0xff] %v14931_v16 }
 0x45c   :  { %v14883_v5 = vpop.permute.xlu0 %8016 }
 0x45d   :  { %v14889_v40 = vpop.permute.xlu1 %8316 }
 0x45e   :  { %8418 = vrot.lane.b32.xlu0 %v8408_v15, %s11399_s11 }
 0x45f   :  { %8770 = vrot.lane.b32.xlu1 %v8761_v14, %s11397_s4  ;;  %v8813_v14 = vmul.f32 %v14931_v16, %v14879_v55 }
 0x460   :  { %v14897_v9 = vpop.permute.xlu0 %8020 }
 0x461   :  { %v14901_v54 = vpop.permute.xlu1 %8338 }
 0x462   :  { %8440 = vrot.lane.b32.xlu0 %v8432_v50, %s11399_s11  ;;  %v16235_v50 = vld [vmem:[#allocation46_spill] sm:$0xff] }
 0x463   :  { %8774 = vrot.lane.b32.xlu1 %v8763_v11, %s11397_s4  ;;  %v8518_v11 = vmul.f32 %v16235_v50, %v14911_v8 }
 0x464   :  { %v8043_v57 = vpop.permute.xlu0 %8042 }
 0x465   :  { %v14913_v10 = vpop.permute.xlu1 %8342 }
 0x466   :  { %8444 = vrot.lane.b32.xlu0 %v8434_v0, %s11399_s11 }
 0x467   :  { %8796 = vrot.lane.b32.xlu1 %v8787_v25, %s11397_s4  ;;  %v8815_v25 = vmul.f32 %v14931_v16, %v14893_v38 }
 0x468   :  { %v8047_v37 = vpop.permute.xlu0 %8046 }
 0x469   :  { %v14923_v44 = vpop.permute.xlu1 %8364 }
 0x46a   :  { %16232 = vst [vmem:[#allocation47_spill] sm:$0xff] %v14923_v44  ;;  %8500 = vrot.lane.b32.xlu0 %v8492_v29, %s11397_s4  ;;  %v8520_v29 = vmul.f32 %v16235_v50, %v14921_v2  ;;  %v7976_v50 = vadd.f32 %v14841_v49, %v14748_v52  ;;  %v7978_v52 = vadd.f32 %v14851_v32, %v14773_v59 }
 0x46b   :  { %8800 = vrot.lane.b32.xlu1 %v8789_v47, %s11397_s4  ;;  %v14949_v47 = vstv %s10192_s20  ;;  %v8570_v59 = vmul.f32 %v14656_v34, %v14911_v8  ;;  %v8002_v32 = vadd.f32 %v14863_v3, %v14791_v62  ;;  %v8572_v62 = vmul.f32 %v14656_v34, %v14921_v2  ;;  %s10200_s20 = sld [smem:[#allocation8 + $0x8b]] }
 0x46c   :  { %v8069_v48 = vpop.permute.xlu0 %8068  ;;  %16236 = vst [vmem:[#allocation50_spill] sm:$0xff] %v14949_v47  ;;  %v8841_v16 = vmul.f32 %v14949_v47, %v14893_v38  ;;  %v8054_v63 = vadd.f32 %v8043_v57, %v7976_v50  ;;  %v8194_v57 = vmul.f32 %v14660_v39, %v14594_v26  ;;  %v15001_v3 = vstv %s10194_s22  ;;  %s10213_s22 = sld [smem:[#allocation11 + $0x4]] }
 0x46d   :  { %v14933_v15 = vpop.permute.xlu1 %8368  ;;  %16237 = vst [vmem:[#allocation59_spill] sm:$0xff] %v15001_v3 }
 0x46e   :  { %16234 = vst [vmem:[#allocation48_spill] sm:$0xff] %v14933_v15  ;;  %8504 = vrot.lane.b32.xlu0 %v8494_v20, %s11397_s4 }
 0x46f   :  { %8822 = vrot.lane.b32.xlu1 %v8813_v14, %s11397_s4  ;;  %v8839_v14 = vmul.f32 %v14949_v47, %v14879_v55  ;;  %v8865_v47 = vmul.f32 %v14971_v46, %v14879_v55 }
 0x470   :  { %v8073_v4 = vpop.permute.xlu0 %8072 }
 0x471   :  { %v14941_v0 = vpop.permute.xlu1 %8390 }
 0x472   :  { %8526 = vrot.lane.b32.xlu0 %v8518_v11, %s11397_s4  ;;  %v8544_v11 = vmul.f32 %v14620_v1, %v14911_v8 }
 0x473   :  { %8826 = vrot.lane.b32.xlu1 %v8815_v25, %s11397_s4 }
 0x474   :  { %v8095_v12 = vpop.permute.xlu0 %8094 }
 0x475   :  { %v14951_v20 = vpop.permute.xlu1 %8394 }
 0x476   :  { %8530 = vrot.lane.b32.xlu0 %v8520_v29, %s11397_s4 }
 0x477   :  { %8848 = vrot.lane.b32.xlu1 %v8839_v14, %s11398_s28  ;;  %v8546_v14 = vmul.f32 %v14620_v1, %v14921_v2 }
 0x478   :  { %v14957_v15 = vpop.permute.xlu0 %8098 }
 0x479   :  { %v14963_v25 = vpop.permute.xlu1 %8416 }
 0x47a   :  { %8552 = vrot.lane.b32.xlu0 %v8544_v11, %s11397_s4 }
 0x47b   :  { %8852 = vrot.lane.b32.xlu1 %v8841_v16, %s11398_s28  ;;  %v8056_v16 = vadd.f32 %v8047_v37, %v7978_v52  ;;  %v8196_v37 = vmul.f32 %v14660_v39, %v14605_v28  ;;  %v8891_v39 = vmul.f32 %v15001_v3, %v14879_v55 }
 0x47c   :  { %v8121_v29 = vpop.permute.xlu0 %8120 }
 0x47d   :  { %v8132_v49 = vadd.f32 %v8121_v29, %v8054_v63  ;;  %v14975_v44 = vpop.permute.xlu1 %8420  ;;  %v8867_v29 = vmul.f32 %v14971_v46, %v14893_v38 }
 0x47e   :  { %8556 = vrot.lane.b32.xlu0 %v8546_v14, %s11397_s4 }
 0x47f   :  { %8874 = vrot.lane.b32.xlu1 %v8865_v47, %s11398_s28  ;;  %v14983_v1 = vadd.f32 %v8194_v57, %v8132_v49  ;;  %v8080_v47 = vadd.f32 %v8069_v48, %v8002_v32  ;;  %v8004_v49 = vadd.f32 %v14873_v27, %v14810_v21  ;;  %v8204_v48 = vmul.f32 %v14713_v45, %v14594_v26 }
 0x480   :  { %v8125_v11 = vpop.permute.xlu0 %8124  ;;  %v8596_v21 = vmul.f32 %v14710_v23, %v14911_v8  ;;  %v8028_v27 = vadd.f32 %v14883_v5, %v14825_v24  ;;  %v8598_v24 = vmul.f32 %v14710_v23, %v14921_v2  ;;  %v15031_v5 = vstv %s10195_s23  ;;  %s10215_s23 = sld [smem:[#allocation11 + $0x2]] }
 0x481   :  { %v8134_v63 = vadd.f32 %v8125_v11, %v8056_v16  ;;  %v14989_v50 = vpop.permute.xlu1 %8442  ;;  %v8082_v11 = vadd.f32 %v8073_v4, %v8004_v49  ;;  %v8206_v4 = vmul.f32 %v14713_v45, %v14605_v28  ;;  %16238 = vst [vmem:[#allocation51_spill] sm:$0xff] %v15031_v5  ;;  %v8917_v45 = vmul.f32 %v15031_v5, %v14879_v55 }
 0x482   :  { %8578 = vrot.lane.b32.xlu0 %v8570_v59, %s11398_s28 }
 0x483   :  { %8878 = vrot.lane.b32.xlu1 %v8867_v29, %s11398_s28  ;;  %v14997_v14 = vadd.f32 %v8196_v37, %v8134_v63  ;;  %v8893_v29 = vmul.f32 %v15001_v3, %v14893_v38  ;;  %v8106_v37 = vadd.f32 %v8095_v12, %v8028_v27  ;;  %v8214_v12 = vmul.f32 %v14760_v6, %v14594_v26 }
 0x484   :  { %v8147_v52 = vpop.permute.xlu0 %8146  ;;  %v8216_v26 = vmul.f32 %v14760_v6, %v14605_v28  ;;  %v8624_v27 = vmul.f32 %v14765_v18, %v14921_v2  ;;  %v8648_v6 = vmul.f32 %v14804_v7, %v14911_v8 }
 0x485   :  { %v8158_v57 = vadd.f32 %v8147_v52, %v8080_v47  ;;  %v15005_v16 = vpop.permute.xlu1 %8446 }
 0x486   :  { %8582 = vrot.lane.b32.xlu0 %v8572_v62, %s11398_s28  ;;  %v8030_v62 = vadd.f32 %v14897_v9, %v14839_v19  ;;  %v8622_v19 = vmul.f32 %v14765_v18, %v14911_v8 }
 0x487   :  { %8900 = vrot.lane.b32.xlu1 %v8891_v39, %s11398_s28  ;;  %v15013_v34 = vadd.f32 %v8204_v48, %v8158_v57 }
 0x488   :  { %v8151_v59 = vpop.permute.xlu0 %8150  ;;  %v8108_v39 = vadd.f32 %v14957_v15, %v8030_v62  ;;  %v15084_v62 = vstv %s10197_s25  ;;  %s9497_s25 = sld [smem:[#allocation11]] }
 0x489   :  { %v8160_v32 = vadd.f32 %v8151_v59, %v8082_v11  ;;  %v15019_v63 = vpop.permute.xlu1 %8502  ;;  %v8919_v59 = vmul.f32 %v15031_v5, %v14893_v38  ;;  %16241 = vst [vmem:[#allocation53_spill] sm:$0xff] %v15084_v62 }
 0x48a   :  { %8604 = vrot.lane.b32.xlu0 %v8596_v21, %s11398_s28 }
 0x48b   :  { %8904 = vrot.lane.b32.xlu1 %v8893_v29, %s11398_s28  ;;  %v15027_v47 = vadd.f32 %v8206_v4, %v8160_v32  ;;  %v15062_v32 = vstv %s10196_s24  ;;  %s10216_s24 = sld [smem:[#allocation11 + $0x1]] }
 0x48c   :  { %v8173_v52 = vpop.permute.xlu0 %8172  ;;  %16240 = vst [vmem:[#allocation62_spill] sm:$0xff] %v15062_v32  ;;  %v8943_v4 = vmul.f32 %v15062_v32, %v14879_v55  ;;  %v8945_v18 = vmul.f32 %v15062_v32, %v14893_v38 }
 0x48d   :  { %v8184_v49 = vadd.f32 %v8173_v52, %v8106_v37  ;;  %v15035_v57 = vpop.permute.xlu1 %8506 }
 0x48e   :  { %8608 = vrot.lane.b32.xlu0 %v8598_v24, %s11398_s28  ;;  %v8650_v24 = vmul.f32 %v14804_v7, %v14921_v2  ;;  %v8971_v7 = vmul.f32 %v15084_v62, %v14893_v38 }
 0x48f   :  { %8926 = vrot.lane.b32.xlu1 %v8917_v45, %s11399_s11  ;;  %v15044_v23 = vadd.f32 %v8214_v12, %v8184_v49  ;;  %v8969_v45 = vmul.f32 %v15084_v62, %v14879_v55  ;;  %v15092_v12 = vld [vmem:[#allocation2 + $0x59] sm:$0x1]  ;;  %v15138_v62 = vld [vmem:[#allocation2 + $0x50] sm:$0xff] }
 0x490   :  { %v8177_v48 = vpop.permute.xlu0 %8176 }
 0x491   :  { %v8186_v9 = vadd.f32 %v8177_v48, %v8108_v39  ;;  %v15048_v11 = vpop.permute.xlu1 %8528  ;;  %v8674_v48 = vmul.f32 %v14834_v58, %v14911_v8 }
 0x492   :  { %8630 = vrot.lane.b32.xlu0 %v8622_v19, %s11398_s28 }
 0x493   :  { %8930 = vrot.lane.b32.xlu1 %v8919_v59, %s11399_s11  ;;  %v15056_v15 = vadd.f32 %v8216_v26, %v8186_v9  ;;  %v15103_v9 = vstv %s10201_s26  ;;  %v15108_v26 = vld [vmem:[#allocation2 + $0xb9] sm:$0x1]  ;;  %s10218_s26 = sld [smem:[#allocation11 + $0xe]] }
 0x494   :  { %v15058_v21 = vpop.permute.xlu0 %8232  ;;  %16242 = vst [vmem:[#allocation54_spill] sm:$0xff] %v15103_v9  ;;  %v9029_v59 = vmul.f32 %v15103_v9, %v15092_v12 }
 0x495   :  { %16239 = vst [vmem:[#allocation60_spill] sm:$0xff] %v15056_v15  ;;  %v15064_v29 = vpop.permute.xlu1 %8532  ;;  %v15184_v15 = vstv %s10175_s10  ;;  %s10223_s10 = sld [smem:[#allocation11 + $0x9]] }
 0x496   :  { %8634 = vrot.lane.b32.xlu0 %v8624_v27, %s11398_s28 }
 0x497   :  { %8952 = vrot.lane.b32.xlu1 %v8943_v4, %s11399_s11  ;;  %v8676_v4 = vmul.f32 %v14834_v58, %v14921_v2  ;;  %v15127_v58 = vstv %s10204_s27  ;;  %s10219_s27 = sld [smem:[#allocation11 + $0xd]] }
 0x498   :  { %v15070_v28 = vpop.permute.xlu0 %8236  ;;  %16244 = vst [vmem:[#allocation61_spill] sm:$0xff] %v15127_v58 }
 0x499   :  { %v15074_v37 = vpop.permute.xlu1 %8554 }
 0x49a   :  { %8656 = vrot.lane.b32.xlu0 %v8648_v6, %s11399_s11 }
 0x49b   :  { %8956 = vrot.lane.b32.xlu1 %v8945_v18, %s11399_s11  ;;  %v9031_v18 = vmul.f32 %v15103_v9, %v15108_v26  ;;  %v8702_v9 = vmul.f32 %v14858_v17, %v14921_v2 }
 0x49c   :  { %v15080_v52 = vpop.permute.xlu0 %8258 }
 0x49d   :  { %v15086_v49 = vpop.permute.xlu1 %8558 }
 0x49e   :  { %8660 = vrot.lane.b32.xlu0 %v8650_v24, %s11399_s11 }
 0x49f   :  { %8978 = vrot.lane.b32.xlu1 %v8969_v45, %s11399_s11  ;;  %v8700_v45 = vmul.f32 %v14858_v17, %v14911_v8  ;;  %v8247_v17 = vadd.f32 %v14816_v33, %v14705_v61 }
 0x4a0   :  { %v15094_v39 = vpop.permute.xlu0 %8262 }
 0x4a1   :  { %v15098_v19 = vpop.permute.xlu1 %8580 }
 0x4a2   :  { %8682 = vrot.lane.b32.xlu0 %v8674_v48, %s11399_s11 }
 0x4a3   :  { %8982 = vrot.lane.b32.xlu1 %v8971_v7, %s11399_s11  ;;  %v9107_v7 = vmul.f32 %v15127_v58, %v15092_v12 }
 0x4a4   :  { %v15110_v27 = vpop.permute.xlu0 %8284 }
 0x4a5   :  { %v15114_v6 = vpop.permute.xlu1 %8584 }
 0x4a6   :  { %8686 = vrot.lane.b32.xlu0 %v8676_v4, %s11399_s11 }
 0x4a7   :  { %9038 = vrot.lane.b32.xlu1 %v9029_v59, %s11397_s4  ;;  %v8245_v59 = vadd.f32 %v14799_v43, %v14682_v31  ;;  %v9109_v31 = vmul.f32 %v15127_v58, %v15108_v26  ;;  %v15149_v43 = vld [vmem:[#allocation2 + $0xb0] sm:$0xff]  ;;  %v15164_v58 = vstv %s10207_s30  ;;  %s10222_s30 = sld [smem:[#allocation11 + $0xa]] }
 0x4a8   :  { %v15120_v24 = vpop.permute.xlu0 %8288  ;;  %v8762_v61 = vmul.f32 %v14887_v35, %v15149_v43  ;;  %v9185_v33 = vmul.f32 %v15164_v58, %v15092_v12 }
 0x4a9   :  { %16243 = vst [vmem:[#allocation56_spill] sm:$0xff] %v15120_v24  ;;  %v15124_v48 = vpop.permute.xlu1 %8606 }
 0x4aa   :  { %8708 = vrot.lane.b32.xlu0 %v8700_v45, %s11399_s11  ;;  %v8323_v45 = vadd.f32 %v14877_v56, %v8245_v59 }
 0x4ab   :  { %9042 = vrot.lane.b32.xlu1 %v9031_v18, %s11397_s4  ;;  %v15144_v18 = vstv %s10174_s29  ;;  %s10220_s29 = sld [smem:[#allocation11 + $0xc]] }
 0x4ac   :  { %v15134_v4 = vpop.permute.xlu0 %8310  ;;  %v8401_v5 = vadd.f32 %v14941_v0, %v8323_v45  ;;  %v8463_v56 = vmul.f32 %v15144_v18, %v14548_v36  ;;  %v8271_v0 = vadd.f32 %v14829_v13, %v14734_v30  ;;  %v8473_v30 = vmul.f32 %v15184_v15, %v14548_v36 }
 0x4ad   :  { %v15140_v32 = vpop.permute.xlu1 %8610  ;;  %v8786_v13 = vmul.f32 %v14909_v53, %v15138_v62 }
 0x4ae   :  { %8712 = vrot.lane.b32.xlu0 %v8702_v9, %s11399_s11  ;;  %v8760_v9 = vmul.f32 %v14887_v35, %v15138_v62  ;;  %v8467_v24 = vadd.f32 %v8463_v56, %v8401_v5  ;;  %v8349_v35 = vadd.f32 %v14901_v54, %v8271_v0  ;;  %v8273_v54 = vadd.f32 %v14845_v41, %v14753_v42 }
 0x4af   :  { %9116 = vrot.lane.b32.xlu1 %v9107_v7, %s11398_s28  ;;  %v8325_v7 = vadd.f32 %v14889_v40, %v8247_v17  ;;  %v8465_v40 = vmul.f32 %v15144_v18, %v14564_v60 }
 0x4b0   :  { %v15156_v59 = vpop.permute.xlu0 %8314  ;;  %v8351_v0 = vadd.f32 %v14913_v10, %v8273_v54 }
 0x4b1   :  { %v15160_v3 = vpop.permute.xlu1 %8632  ;;  %v8403_v45 = vadd.f32 %v14951_v20, %v8325_v7  ;;  %v9187_v20 = vmul.f32 %v15164_v58, %v15108_v26 }
 0x4b2   :  { %8768 = vrot.lane.b32.xlu0 %v8760_v9, %s11397_s4  ;;  %v8513_v9 = vadd.f32 %v15019_v63, %v8467_v24  ;;  %v8427_v63 = vadd.f32 %v14963_v25, %v8349_v35 }
 0x4b3   :  { %9120 = vrot.lane.b32.xlu1 %v9109_v31, %s11398_s28  ;;  %v8469_v5 = vadd.f32 %v8465_v40, %v8403_v45  ;;  %v8475_v45 = vmul.f32 %v15184_v15, %v14564_v60  ;;  %v8788_v40 = vmul.f32 %v14909_v53, %v15149_v43 }
 0x4b4   :  { %v15176_v17 = vpop.permute.xlu0 %8336  ;;  %v8591_v24 = vadd.f32 %v15098_v19, %v8513_v9  ;;  %v8297_v19 = vadd.f32 %v14855_v22, %v14778_v51  ;;  %v8477_v35 = vadd.f32 %v8473_v30, %v8427_v63  ;;  %v15229_v51 = vstv %s15178_s1  ;;  %v16247_v30 = vld [vmem:[#allocation15_spill] sm:$0xff]  ;;  %s10227_s1 = sld [smem:[#allocation11 + $0x15]] }
 0x4b5   :  { %v15180_v31 = vpop.permute.xlu1 %8636  ;;  %v8515_v42 = vadd.f32 %v15035_v57, %v8469_v5  ;;  %v8429_v57 = vadd.f32 %v14975_v44, %v8351_v0  ;;  %v16245_v5 = vld [vmem:[#allocation47_spill] sm:$0xff]  ;;  %v16248_v0 = vld [vmem:[#allocation49_spill] sm:$0xff] }
 0x4b6   :  { %8772 = vrot.lane.b32.xlu0 %v8762_v61, %s11397_s4  ;;  %v15200_v61 = vstv %s10202_s12  ;;  %s10224_s12 = sld [smem:[#allocation11 + $0x8]] }
 0x4b7   :  { %9194 = vrot.lane.b32.xlu1 %v9185_v33, %s11399_s11  ;;  %v15204_v33 = vstv %s10186_s13  ;;  %v9055_v10 = vmul.f32 %v15200_v61, %v15092_v12  ;;  %v8593_v9 = vadd.f32 %v15114_v6, %v8515_v42  ;;  %v16246_v6 = vld [vmem:[#allocation58_spill] sm:$0xff]  ;;  %v8812_v42 = vmul.f32 %v16248_v0, %v15138_v62  ;;  %s10226_s13 = sld [smem:[#allocation11 + $0x16]] }
 0x4b8   :  { %v15198_v56 = vpop.permute.xlu0 %8340  ;;  %v8731_v25 = vmul.f32 %v15204_v33, %v14879_v55  ;;  %v8733_v44 = vmul.f32 %v15204_v33, %v14893_v38  ;;  %v8299_v63 = vadd.f32 %v16247_v30, %v16246_v6 }
 0x4b9   :  { %v8659_v7 = vpop.permute.xlu1 %8658 }
 0x4ba   :  { %v8669_v41 = vadd.f32 %v8659_v7, %v8591_v24  ;;  %8794 = vrot.lane.b32.xlu0 %v8786_v13, %s11397_s4  ;;  %v8539_v24 = vadd.f32 %v15048_v11, %v8477_v35  ;;  %v8483_v7 = vmul.f32 %v15229_v51, %v14548_v36  ;;  %v9057_v11 = vmul.f32 %v15200_v61, %v15108_v26 }
 0x4bb   :  { %9198 = vrot.lane.b32.xlu1 %v9187_v20, %s11399_s11  ;;  %v8375_v20 = vadd.f32 %v16245_v5, %v8297_v19  ;;  %v8244_v36 = vadd.f32 %v15058_v21, %v14983_v1  ;;  %v16249_v5 = vld [vmem:[#allocation48_spill] sm:$0xff]  ;;  %v8485_v1 = vmul.f32 %v15229_v51, %v14564_v60  ;;  %v8246_v60 = vadd.f32 %v15070_v28, %v14997_v14 }
 0x4bc   :  { %v15224_v13 = vpop.permute.xlu0 %8362  ;;  %v15226_v54 = vadd.f32 %v8731_v25, %v8669_v41  ;;  %v8479_v25 = vadd.f32 %v8475_v45, %v8429_v57  ;;  %v8617_v19 = vadd.f32 %v15124_v48, %v8539_v24  ;;  %v8377_v6 = vadd.f32 %v16249_v5, %v8299_v63 }
 0x4bd   :  { %v8663_v22 = vpop.permute.xlu1 %8662  ;;  %v8453_v41 = vadd.f32 %v14989_v50, %v8375_v20  ;;  %v8322_v21 = vadd.f32 %v15134_v4, %v8244_v36  ;;  %v8814_v57 = vmul.f32 %v16248_v0, %v15149_v43 }
 0x4be   :  { %v8671_v53 = vadd.f32 %v8663_v22, %v8593_v9  ;;  %8798 = vrot.lane.b32.xlu0 %v8788_v40, %s11397_s4  ;;  %v15257_v22 = vstv %s15206_s5  ;;  %v8541_v50 = vadd.f32 %v15064_v29, %v8479_v25  ;;  %v8455_v20 = vadd.f32 %v15005_v16, %v8377_v6  ;;  %v16250_v25 = vld [vmem:[#allocation50_spill] sm:$0xff]  ;;  %s10228_s5 = sld [smem:[#allocation11 + $0x14]] }
 0x4bf   :  { %9064 = vrot.lane.b32.xlu1 %v9055_v10, %s11397_s4  ;;  %v15254_v10 = vstv %s15202_s3  ;;  %v8741_v48 = vmul.f32 %v15257_v22, %v14879_v55  ;;  %v8487_v24 = vadd.f32 %v8483_v7, %v8453_v41  ;;  %v8743_v16 = vmul.f32 %v15257_v22, %v14893_v38  ;;  %s10210_s3 = sld [smem:[#allocation11 + $0x7]] }
 0x4c0   :  { %v15247_v40 = vpop.permute.xlu0 %8366  ;;  %v15249_v35 = vadd.f32 %v8733_v44, %v8671_v53  ;;  %v9133_v29 = vmul.f32 %v15254_v10, %v15092_v12  ;;  %v8619_v53 = vadd.f32 %v15140_v32, %v8541_v50  ;;  %v8324_v32 = vadd.f32 %v15156_v59, %v8246_v60 }
 0x4c1   :  { %v8685_v9 = vpop.permute.xlu1 %8684  ;;  %v8565_v0 = vadd.f32 %v15074_v37, %v8487_v24  ;;  %v9135_v14 = vmul.f32 %v15254_v10, %v15108_v26  ;;  %v8489_v7 = vadd.f32 %v8485_v1, %v8455_v20  ;;  %v8270_v59 = vadd.f32 %v15080_v52, %v15013_v34 }
 0x4c2   :  { %v8695_v45 = vadd.f32 %v8685_v9, %v8617_v19  ;;  %8820 = vrot.lane.b32.xlu0 %v8812_v42, %s11397_s4  ;;  %v8462_v42 = vmul.f32 %v15144_v18, %v14911_v8  ;;  %v8838_v19 = vmul.f32 %v16250_v25, %v15138_v62  ;;  %v8464_v6 = vmul.f32 %v15144_v18, %v14921_v2 }
 0x4c3   :  { %9068 = vrot.lane.b32.xlu1 %v9057_v11, %s11397_s4  ;;  %v8643_v37 = vadd.f32 %v15160_v3, %v8565_v0  ;;  %v15304_v50 = vstv %s15259_s0  ;;  %v15309_v3 = vstv %s15264_s14  ;;  %v8348_v34 = vadd.f32 %v15176_v17, %v8270_v59  ;;  %s10230_s0 = sld [smem:[#allocation11 + $0x12]] }
 0x4c4   :  { %v8389_v44 = vpop.permute.xlu0 %8388  ;;  %v15278_v30 = vadd.f32 %v8741_v48, %v8695_v45  ;;  %v8567_v45 = vadd.f32 %v15086_v49, %v8489_v7  ;;  %v8751_v1 = vmul.f32 %v15304_v50, %v14879_v55  ;;  %v9211_v52 = vmul.f32 %v15309_v3, %v15092_v12  ;;  %v16251_v7 = vld [vmem:[#allocation60_spill] sm:$0xff] }
 0x4c5   :  { %v8400_v4 = vadd.f32 %v8389_v44, %v8322_v21  ;;  %v8689_v63 = vpop.permute.xlu1 %8688  ;;  %v8272_v55 = vadd.f32 %v15094_v39, %v15027_v47  ;;  %v8472_v24 = vmul.f32 %v15184_v15, %v14911_v8  ;;  %v9213_v60 = vmul.f32 %v15309_v3, %v15108_v26 }
 0x4c6   :  { %v8697_v11 = vadd.f32 %v8689_v63, %v8619_v53  ;;  %8824 = vrot.lane.b32.xlu0 %v8814_v57, %s11397_s4  ;;  %v8645_v49 = vadd.f32 %v15180_v31, %v8567_v45  ;;  %v8840_v57 = vmul.f32 %v16250_v25, %v15149_v43  ;;  %v8753_v31 = vmul.f32 %v15304_v50, %v14893_v38 }
 0x4c7   :  { %9142 = vrot.lane.b32.xlu1 %v9133_v29, %s11398_s28  ;;  %v15292_v28 = vadd.f32 %v8462_v42, %v8400_v4  ;;  %v8350_v44 = vadd.f32 %v15198_v56, %v8272_v55  ;;  %v8864_v39 = vmul.f32 %v14971_v46, %v15138_v62  ;;  %v8296_v42 = vadd.f32 %v15110_v27, %v15044_v23 }
 0x4c8   :  { %v8393_v41 = vpop.permute.xlu0 %8392  ;;  %v15297_v36 = vadd.f32 %v8743_v16, %v8697_v11  ;;  %v8474_v56 = vmul.f32 %v15184_v15, %v14921_v2  ;;  %v15348_v11 = vstv %s10203_s15  ;;  %v8866_v27 = vmul.f32 %v14971_v46, %v15149_v43  ;;  %v16252_v15 = vld [vmem:[#allocation56_spill] sm:$0xff] }
 0x4c9   :  { %v8402_v9 = vadd.f32 %v8393_v41, %v8324_v32  ;;  %v8711_v5 = vpop.permute.xlu1 %8710  ;;  %v8374_v16 = vadd.f32 %v15224_v13, %v8296_v42  ;;  %v9081_v32 = vmul.f32 %v15348_v11, %v15092_v12  ;;  %v8482_v13 = vmul.f32 %v15229_v51, %v14911_v8 }
 0x4ca   :  { %v8721_v48 = vadd.f32 %v8711_v5, %v8643_v37  ;;  %8846 = vrot.lane.b32.xlu0 %v8838_v19, %s11398_s28  ;;  %v8298_v37 = vadd.f32 %v16252_v15, %v16251_v7  ;;  %v9083_v59 = vmul.f32 %v15348_v11, %v15108_v26  ;;  %v16253_v5 = vld [vmem:[#allocation59_spill] sm:$0xff]  ;;  %v8484_v8 = vmul.f32 %v15229_v51, %v14921_v2 }
 0x4cb   :  { %9146 = vrot.lane.b32.xlu1 %v9135_v14, %s11398_s28  ;;  %v15317_v18 = vadd.f32 %v8464_v6, %v8402_v9  ;;  %v8890_v6 = vmul.f32 %v16253_v5, %v15138_v62 }
 0x4cc   :  { %v8415_v21 = vpop.permute.xlu0 %8414  ;;  %v15322_v29 = vadd.f32 %v8751_v1, %v8721_v48  ;;  %v8376_v19 = vadd.f32 %v15247_v40, %v8298_v37  ;;  %v15378_v40 = vstv %s10206_s16  ;;  %s10214_s16 = sld [smem:[#allocation11 + $0x3]] }
 0x4cd   :  { %v8426_v20 = vadd.f32 %v8415_v21, %v8348_v34  ;;  %v8715_v17 = vpop.permute.xlu1 %8714  ;;  %v9159_v1 = vmul.f32 %v15378_v40, %v15092_v12  ;;  %v9161_v2 = vmul.f32 %v15378_v40, %v15108_v26 }
 0x4ce   :  { %v8723_v53 = vadd.f32 %v8715_v17, %v8645_v49  ;;  %8850 = vrot.lane.b32.xlu0 %v8840_v57, %s11398_s28  ;;  %v8892_v49 = vmul.f32 %v16253_v5, %v15149_v43  ;;  %v16254_v57 = vld [vmem:[#allocation51_spill] sm:$0xff]  ;;  %v15398_v17 = vstv %s10209_s17  ;;  %s10232_s17 = sld [smem:[#allocation11 + $0x10]] }
 0x4cf   :  { %9220 = vrot.lane.b32.xlu1 %v9211_v52, %s11399_s11  ;;  %v15335_v4 = vadd.f32 %v8472_v24, %v8426_v20  ;;  %v8916_v55 = vmul.f32 %v16254_v57, %v15138_v62  ;;  %v9237_v24 = vmul.f32 %v15398_v17, %v15092_v12 }
 0x4d0   :  { %v8419_v47 = vpop.permute.xlu0 %8418  ;;  %v15339_v63 = vadd.f32 %v8753_v31, %v8723_v53  ;;  %v8918_v31 = vmul.f32 %v16254_v57, %v15149_v43  ;;  %v16259_v57 = vld [vmem:[#allocation61_spill] sm:$0xff] }
 0x4d1   :  { %v8428_v0 = vadd.f32 %v8419_v47, %v8350_v44  ;;  %v15343_v38 = vpop.permute.xlu1 %8770 }
 0x4d2   :  { %8872 = vrot.lane.b32.xlu0 %v8864_v39, %s11398_s28  ;;  %v16255_v39 = vld [vmem:[#allocation62_spill] sm:$0xff] }
 0x4d3   :  { %9224 = vrot.lane.b32.xlu1 %v9213_v60, %s11399_s11  ;;  %v15354_v14 = vadd.f32 %v8474_v56, %v8428_v0  ;;  %v9239_v60 = vmul.f32 %v15398_v17, %v15108_v26  ;;  %v8942_v42 = vmul.f32 %v16255_v39, %v15138_v62 }
 0x4d4   :  { %v8441_v23 = vpop.permute.xlu0 %8440 }
 0x4d5   :  { %v8452_v41 = vadd.f32 %v8441_v23, %v8374_v16  ;;  %v15360_v25 = vpop.permute.xlu1 %8774  ;;  %v8944_v16 = vmul.f32 %v16255_v39, %v15149_v43 }
 0x4d6   :  { %8876 = vrot.lane.b32.xlu0 %v8866_v27, %s11398_s28  ;;  %v16256_v27 = vld [vmem:[#allocation53_spill] sm:$0xff] }
 0x4d7   :  { %9090 = vrot.lane.b32.xlu1 %v9081_v32, %s11397_s4  ;;  %v15369_v9 = vadd.f32 %v8482_v13, %v8452_v41  ;;  %v8968_v7 = vmul.f32 %v16256_v27, %v15138_v62  ;;  %v8970_v41 = vmul.f32 %v16256_v27, %v15149_v43  ;;  %v15433_v13 = vld [vmem:[#allocation2 + $0x51] sm:$0xff] }
 0x4d8   :  { %v8445_v46 = vpop.permute.xlu0 %8444 }
 0x4d9   :  { %v8454_v45 = vadd.f32 %v8445_v46, %v8376_v19  ;;  %v15373_v48 = vpop.permute.xlu1 %8796  ;;  %v16257_v46 = vld [vmem:[#allocation54_spill] sm:$0xff] }
 0x4da   :  { %8898 = vrot.lane.b32.xlu0 %v8890_v6, %s11398_s28  ;;  %v9028_v5 = vmul.f32 %v16257_v46, %v15433_v13  ;;  %v15440_v6 = vld [vmem:[#allocation2 + $0xb1] sm:$0xff] }
 0x4db   :  { %9094 = vrot.lane.b32.xlu1 %v9083_v59, %s11397_s4  ;;  %v15383_v34 = vadd.f32 %v8484_v8, %v8454_v45 }
 0x4dc   :  { %v8501_v52 = vpop.permute.xlu0 %8500 }
 0x4dd   :  { %v15387_v21 = vpop.permute.xlu1 %8800  ;;  %v8512_v27 = vadd.f32 %v8501_v52, %v15292_v28 }
 0x4de   :  { %8902 = vrot.lane.b32.xlu0 %v8892_v49, %s11398_s28 }
 0x4df   :  { %9168 = vrot.lane.b32.xlu1 %v9159_v1, %s11398_s28  ;;  %v9030_v1 = vmul.f32 %v16257_v46, %v15440_v6 }
 0x4e0   :  { %v8505_v51 = vpop.permute.xlu0 %8504 }
 0x4e1   :  { %v15395_v20 = vpop.permute.xlu1 %8822 }
 0x4e2   :  { %8924 = vrot.lane.b32.xlu0 %v8916_v55, %s11399_s11  ;;  %v9106_v55 = vmul.f32 %v16259_v57, %v15433_v13 }
 0x4e3   :  { %9172 = vrot.lane.b32.xlu1 %v9161_v2, %s11398_s28 }
 0x4e4   :  { %v8527_v53 = vpop.permute.xlu0 %8526 }
 0x4e5   :  { %v15405_v44 = vpop.permute.xlu1 %8826 }
 0x4e6   :  { %8928 = vrot.lane.b32.xlu0 %v8918_v31, %s11399_s11 }
 0x4e7   :  { %9246 = vrot.lane.b32.xlu1 %v9237_v24, %s11399_s11 }
 0x4e8   :  { %v8531_v47 = vpop.permute.xlu0 %8530 }
 0x4e9   :  { %v15413_v0 = vpop.permute.xlu1 %8848 }
 0x4ea   :  { %8950 = vrot.lane.b32.xlu0 %v8942_v42, %s11399_s11 }
 0x4eb   :  { %9250 = vrot.lane.b32.xlu1 %v9239_v60, %s11399_s11  ;;  %v9108_v60 = vmul.f32 %v16259_v57, %v15440_v6 }
 0x4ec   :  { %v15417_v56 = vpop.permute.xlu0 %8552 }
 0x4ed   :  { %v15421_v32 = vpop.permute.xlu1 %8852 }
 0x4ee   :  { %8954 = vrot.lane.b32.xlu0 %v8944_v16, %s11399_s11  ;;  %v9184_v16 = vmul.f32 %v15164_v58, %v15433_v13 }
 0x4f0   :  { %v15424_v23 = vpop.permute.xlu0 %8556 }
 0x4f1   :  { %v15428_v15 = vpop.permute.xlu1 %8874 }
 0x4f2   :  { %8976 = vrot.lane.b32.xlu0 %v8968_v7, %s11399_s11 }
 0x4f4   :  { %v8579_v37 = vpop.permute.xlu0 %8578 }
 0x4f5   :  { %v15435_v19 = vpop.permute.xlu1 %8878 }
 0x4f6   :  { %8980 = vrot.lane.b32.xlu0 %v8970_v41, %s11399_s11  ;;  %v8590_v41 = vadd.f32 %v8579_v37, %v8512_v27  ;;  %v9054_v37 = vmul.f32 %v15200_v61, %v15433_v13 }
 0x4f8   :  { %v8583_v59 = vpop.permute.xlu0 %8582 }
 0x4f9   :  { %v15442_v45 = vpop.permute.xlu1 %8900 }
 0x4fa   :  { %9036 = vrot.lane.b32.xlu0 %v9028_v5, %s11397_s4  ;;  %v9186_v5 = vmul.f32 %v15164_v58, %v15440_v6 }
 0x4fc   :  { %v8605_v8 = vpop.permute.xlu0 %8604 }
 0x4fd   :  { %v15447_v49 = vpop.permute.xlu1 %8904 }
 0x4fe   :  { %16258 = vst [vmem:[#allocation63_spill] sm:$0xff] %v15447_v49  ;;  %9040 = vrot.lane.b32.xlu0 %v9030_v1, %s11397_s4  ;;  %v8514_v1 = vadd.f32 %v8505_v51, %v15317_v18  ;;  %v8732_v18 = vmul.f32 %v15204_v33, %v15149_v43 }
 0x500   :  { %v8609_v2 = vpop.permute.xlu0 %8608  ;;  %v8592_v28 = vadd.f32 %v8583_v59, %v8514_v1 }
 0x501   :  { %v8927_v24 = vpop.permute.xlu1 %8926 }
 0x502   :  { %9114 = vrot.lane.b32.xlu0 %v9106_v55, %s11398_s28 }
 0x504   :  { %v8631_v31 = vpop.permute.xlu0 %8630 }
 0x505   :  { %v15455_v39 = vpop.permute.xlu1 %8930 }
 0x506   :  { %9118 = vrot.lane.b32.xlu0 %v9108_v60, %s11398_s28  ;;  %v8730_v60 = vmul.f32 %v15204_v33, %v15138_v62 }
 0x508   :  { %v8635_v42 = vpop.permute.xlu0 %8634 }
 0x509   :  { %v15461_v7 = vpop.permute.xlu1 %8952 }
 0x50a   :  { %9192 = vrot.lane.b32.xlu0 %v9184_v16, %s11399_s11  ;;  %v8538_v16 = vadd.f32 %v8527_v53, %v15335_v4  ;;  %v8740_v4 = vmul.f32 %v15257_v22, %v15138_v62 }
 0x50c   :  { %v8657_v46 = vpop.permute.xlu0 %8656  ;;  %v8616_v51 = vadd.f32 %v8605_v8, %v8538_v16 }
 0x50d   :  { %v8668_v57 = vadd.f32 %v8657_v46, %v8590_v41  ;;  %v15467_v55 = vpop.permute.xlu1 %8956  ;;  %v9056_v46 = vmul.f32 %v15200_v61, %v15440_v6  ;;  %v8564_v61 = vadd.f32 %v15417_v56, %v15369_v9  ;;  %v8566_v9 = vadd.f32 %v15424_v23, %v15383_v34 }
 0x50e   :  { %9196 = vrot.lane.b32.xlu0 %v9186_v5, %s11399_s11  ;;  %v8540_v5 = vadd.f32 %v8531_v47, %v15354_v14 }
 0x50f   :  { %v15472_v52 = vadd.f32 %v8730_v60, %v8668_v57  ;;  %v8742_v60 = vmul.f32 %v15257_v22, %v15149_v43  ;;  %v8750_v22 = vmul.f32 %v15304_v50, %v15138_v62  ;;  %v9210_v62 = vmul.f32 %v15309_v3, %v15433_v13 }
 0x510   :  { %v8661_v49 = vpop.permute.xlu0 %8660  ;;  %v8618_v33 = vadd.f32 %v8609_v2, %v8540_v5  ;;  %v8781_v2 = vadd.f32 %v15343_v38, %v15226_v54 }
 0x511   :  { %v8670_v58 = vadd.f32 %v8661_v49, %v8592_v28  ;;  %v15477_v27 = vpop.permute.xlu1 %8978  ;;  %v9132_v49 = vmul.f32 %v15254_v10, %v15433_v13  ;;  %v8642_v28 = vadd.f32 %v8631_v31, %v8564_v61  ;;  %v8644_v31 = vadd.f32 %v8635_v42, %v8566_v9 }
 0x512   :  { %9062 = vrot.lane.b32.xlu0 %v9054_v37, %s11397_s4  ;;  %v8752_v42 = vmul.f32 %v15304_v50, %v15149_v43 }
 0x513   :  { %v15482_v41 = vadd.f32 %v8732_v18, %v8670_v58  ;;  %v9134_v58 = vmul.f32 %v15254_v10, %v15440_v6  ;;  %v8783_v10 = vadd.f32 %v15360_v25, %v15249_v35 }
 0x514   :  { %v8683_v59 = vpop.permute.xlu0 %8682 }
 0x515   :  { %v8694_v1 = vadd.f32 %v8683_v59, %v8616_v51  ;;  %v15487_v57 = vpop.permute.xlu1 %8982  ;;  %v8859_v51 = vadd.f32 %v15413_v0, %v8781_v2  ;;  %v15513_v59 = vstv %s10198_s18  ;;  %v8861_v5 = vadd.f32 %v15421_v32, %v8783_v10 }
 0x516   :  { %9066 = vrot.lane.b32.xlu0 %v9056_v46, %s11397_s4  ;;  %v8999_v34 = vmul.f32 %v15513_v59, %v15092_v12  ;;  %v9001_v25 = vmul.f32 %v15513_v59, %v15108_v26  ;;  %v9160_v10 = vmul.f32 %v15378_v40, %v15440_v6 }
 0x517   :  { %v15492_v53 = vadd.f32 %v8740_v4, %v8694_v1  ;;  %v8937_v38 = vadd.f32 %v8927_v24, %v8859_v51  ;;  %v16260_v1 = vmov 0.0   ;;  %v8939_v43 = vadd.f32 %v15455_v39, %v8861_v5 }
 0x518   :  { %v8687_v8 = vpop.permute.xlu0 %8686  ;;  %111 = vst.msk [vmem:[#allocation3 + $0x8] sm:$0x7] %vm110_vm5, %v16260_v1  ;;  %113 = vst.msk [vmem:[#allocation3 + $0x18] sm:$0x7] %vm110_vm5, %v16260_v1  ;;  %v9212_v24 = vmul.f32 %v15309_v3, %v15440_v6  ;;  %v9080_v39 = vmul.f32 %v15348_v11, %v15433_v13  ;;  %v9082_v3 = vmul.f32 %v15348_v11, %v15440_v6 }
 0x519   :  { %v8696_v14 = vadd.f32 %v8687_v8, %v8618_v33  ;;  %v9039_v47 = vpop.permute.xlu1 %9038  ;;  %115 = vst.msk [vmem:[#allocation3 + $0x28] sm:$0x7] %vm110_vm5, %v16260_v1  ;;  %117 = vst.msk [vmem:[#allocation3 + $0x38] sm:$0x7] %vm110_vm5, %v16260_v1  ;;  %v9003_v50 = vadd.f32 %v8999_v34, %v8937_v38  ;;  %v9005_v8 = vadd.f32 %v9001_v25, %v8939_v43 }
 0x51a   :  { %9140 = vrot.lane.b32.xlu0 %v9132_v49, %s11398_s28  ;;  %119 = vst.msk [vmem:[#allocation3 + $0x48] sm:$0x7] %vm110_vm5, %v16260_v1  ;;  %121 = vst.msk [vmem:[#allocation3 + $0x58] sm:$0x7] %vm110_vm5, %v16260_v1  ;;  %v8807_v11 = vadd.f32 %v15373_v48, %v15278_v30 }
 0x51b   :  { %v15501_v37 = vadd.f32 %v8742_v60, %v8696_v14  ;;  %v9049_v33 = vadd.f32 %v9039_v47, %v9003_v50  ;;  %109 = vst.msk [vmem:[#allocation3] sm:$0xff] %vm108_vm6, %v16260_v1  ;;  %112 = vst.msk [vmem:[#allocation3 + $0x10] sm:$0xff] %vm108_vm6, %v16260_v1 }
 0x51c   :  { %v8709_v16 = vpop.permute.xlu0 %8708  ;;  %v8885_v34 = vadd.f32 %v15428_v15, %v8807_v11  ;;  %114 = vst.msk [vmem:[#allocation3 + $0x20] sm:$0xff] %vm108_vm6, %v16260_v1  ;;  %116 = vst.msk [vmem:[#allocation3 + $0x30] sm:$0xff] %vm108_vm6, %v16260_v1 }
 0x51d   :  { %v8720_v56 = vadd.f32 %v8709_v16, %v8642_v28  ;;  %v9043_v18 = vpop.permute.xlu1 %9042  ;;  %118 = vst.msk [vmem:[#allocation3 + $0x40] sm:$0xff] %vm108_vm6, %v16260_v1  ;;  %120 = vst.msk [vmem:[#allocation3 + $0x50] sm:$0xff] %vm108_vm6, %v16260_v1 }
 0x51e   :  { %9144 = vrot.lane.b32.xlu0 %v9134_v58, %s11398_s28  ;;  %v9051_v60 = vadd.f32 %v9043_v18, %v9005_v8  ;;  %v9158_v18 = vmul.f32 %v15378_v40, %v15433_v13  ;;  %v9236_v40 = vmul.f32 %v15398_v17, %v15433_v13 }
 0x51f   :  { %v15515_v54 = vadd.f32 %v8750_v22, %v8720_v56 }
 0x520   :  { %v8713_v23 = vpop.permute.xlu0 %8712 }
 0x521   :  { %v8722_v46 = vadd.f32 %v8713_v23, %v8644_v31  ;;  %v9117_v0 = vpop.permute.xlu1 %9116  ;;  %v15568_v23 = vstv %s10199_s19 }
 0x522   :  { %9218 = vrot.lane.b32.xlu0 %v9210_v62, %s11399_s11  ;;  %v9127_v49 = vadd.f32 %v9117_v0, %v9049_v33  ;;  %v8809_v62 = vadd.f32 %v15387_v21, %v15297_v36  ;;  %v9009_v30 = vmul.f32 %v15568_v23, %v15092_v12  ;;  %v9011_v36 = vmul.f32 %v15568_v23, %v15108_v26 }
 0x523   :  { %v15533_v35 = vadd.f32 %v8752_v42, %v8722_v46  ;;  %v8963_v46 = vadd.f32 %v15461_v7, %v8885_v34  ;;  %v9238_v7 = vmul.f32 %v15398_v17, %v15440_v6 }
 0x524   :  { %v15538_v32 = vpop.permute.xlu0 %8768  ;;  %v8887_v15 = vadd.f32 %v15435_v19, %v8809_v62 }
 0x525   :  { %v9121_v4 = vpop.permute.xlu1 %9120  ;;  %v9013_v5 = vadd.f32 %v9009_v30, %v8963_v46 }
 0x526   :  { %9222 = vrot.lane.b32.xlu0 %v9212_v24, %s11399_s11  ;;  %v9129_v2 = vadd.f32 %v9121_v4, %v9051_v60  ;;  %v8965_v42 = vadd.f32 %v15467_v55, %v8887_v15 }
 0x528   :  { %v15543_v61 = vpop.permute.xlu0 %8772  ;;  %v9015_v25 = vadd.f32 %v9011_v36, %v8965_v42 }
 0x529   :  { %v9195_v14 = vpop.permute.xlu1 %9194 }
 0x52a   :  { %v9205_v28 = vadd.f32 %v9195_v14, %v9127_v49  ;;  %9088 = vrot.lane.b32.xlu0 %v9080_v39, %s11397_s4 }
 0x52c   :  { %v9261_v16 = vmax.f32 %v9205_v28, 0.0  ;;  %v15548_v58 = vpop.permute.xlu0 %8794 }
 0x52d   :  { %v9199_v47 = vpop.permute.xlu1 %9198 }
 0x52e   :  { %v9207_v9 = vadd.f32 %v9199_v47, %v9129_v2  ;;  %9092 = vrot.lane.b32.xlu0 %v9082_v3, %s11397_s4  ;;  %9270 = vrot.lane.b32.xlu1 %v9261_v16, %s11401_s21  ;;  %v8833_v16 = vadd.f32 %v15395_v20, %v15322_v29  ;;  %v16261_v29 = vld [vmem:[#allocation63_spill] sm:$0xff] }
 0x530   :  { %v9263_v56 = vmax.f32 %v9207_v9, 0.0  ;;  %v15554_v22 = vpop.permute.xlu0 %8798  ;;  %v8911_v9 = vadd.f32 %v15442_v45, %v8833_v16 }
 0x531   :  { %v9065_v51 = vpop.permute.xlu1 %9064 }
 0x532   :  { %9166 = vrot.lane.b32.xlu0 %v9158_v18, %s11398_s28  ;;  %9274 = vrot.lane.b32.xlu1 %v9263_v56, %s11401_s21  ;;  %v9075_v50 = vadd.f32 %v9065_v51, %v9013_v5  ;;  %v15592_v56 = vstv %s10200_s20  ;;  %v8835_v18 = vadd.f32 %v15405_v44, %v15339_v63  ;;  %v8989_v51 = vadd.f32 %v15477_v27, %v8911_v9 }
 0x533   :  { %v9019_v11 = vmul.f32 %v15592_v56, %v15092_v12  ;;  %v9021_v30 = vmul.f32 %v15592_v56, %v15108_v26  ;;  %v8782_v44 = vadd.f32 %v15543_v61, %v15482_v41  ;;  %v9000_v5 = vmul.f32 %v15513_v59, %v15440_v6 }
 0x534   :  { %v15562_v31 = vpop.permute.xlu0 %8820  ;;  %v8913_v20 = vadd.f32 %v16261_v29, %v8835_v18 }
 0x535   :  { %v9069_v38 = vpop.permute.xlu1 %9068  ;;  %v9023_v46 = vadd.f32 %v9019_v11, %v8989_v51 }
 0x536   :  { %9170 = vrot.lane.b32.xlu0 %v9160_v10, %s11398_s28  ;;  %v9077_v33 = vadd.f32 %v9069_v38, %v9015_v25  ;;  %v8780_v38 = vadd.f32 %v15538_v32, %v15472_v52  ;;  %v8991_v45 = vadd.f32 %v15487_v57, %v8913_v20 }
 0x538   :  { %v15575_v48 = vpop.permute.xlu0 %8824  ;;  %v9025_v57 = vadd.f32 %v9021_v30, %v8991_v45 }
 0x539   :  { %v9143_v0 = vpop.permute.xlu1 %9142 }
 0x53a   :  { %9244 = vrot.lane.b32.xlu0 %v9236_v40, %s11399_s11  ;;  %v9153_v24 = vadd.f32 %v9143_v0, %v9075_v50  ;;  %v8998_v40 = vmul.f32 %v15513_v59, %v15433_v13  ;;  %v8806_v0 = vadd.f32 %v15548_v58, %v15492_v53  ;;  %v9008_v53 = vmul.f32 %v15568_v23, %v15433_v13 }
 0x53c   :  { %v8847_v21 = vpop.permute.xlu0 %8846 }
 0x53d   :  { %v9147_v43 = vpop.permute.xlu1 %9146  ;;  %v8858_v62 = vadd.f32 %v8847_v21, %v8780_v38 }
 0x53e   :  { %9248 = vrot.lane.b32.xlu0 %v9238_v7, %s11399_s11  ;;  %v9155_v49 = vadd.f32 %v9147_v43, %v9077_v33 }
 0x540   :  { %v8851_v4 = vpop.permute.xlu0 %8850 }
 0x541   :  { %v9221_v19 = vpop.permute.xlu1 %9220  ;;  %v8860_v26 = vadd.f32 %v8851_v4, %v8782_v44 }
 0x542   :  { %v9231_v8 = vadd.f32 %v9221_v19, %v9153_v24  ;;  %v8808_v24 = vadd.f32 %v15554_v22, %v15501_v37 }
 0x544   :  { %v9287_v55 = vmax.f32 %v9231_v8, 0.0  ;;  %v8873_v39 = vpop.permute.xlu0 %8872 }
 0x545   :  { %v9225_v14 = vpop.permute.xlu1 %9224  ;;  %v8884_v7 = vadd.f32 %v8873_v39, %v8806_v0 }
 0x546   :  { %v9233_v60 = vadd.f32 %v9225_v14, %v9155_v49  ;;  %9296 = vrot.lane.b32.xlu1 %v9287_v55, %s11401_s21  ;;  %v8832_v55 = vadd.f32 %v15562_v31, %v15515_v54  ;;  %v9010_v14 = vmul.f32 %v15568_v23, %v15440_v6  ;;  %v9020_v31 = vmul.f32 %v15592_v56, %v15440_v6 }
 0x548   :  { %v9289_v28 = vmax.f32 %v9233_v60, 0.0  ;;  %v8877_v17 = vpop.permute.xlu0 %8876 }
 0x549   :  { %v9091_v2 = vpop.permute.xlu1 %9090  ;;  %v8886_v33 = vadd.f32 %v8877_v17, %v8808_v24  ;;  %v9018_v17 = vmul.f32 %v15592_v56, %v15433_v13 }
 0x54a   :  { %9300 = vrot.lane.b32.xlu1 %v9289_v28, %s11401_s21  ;;  %v9101_v52 = vadd.f32 %v9091_v2, %v9023_v46  ;;  %v8834_v28 = vadd.f32 %v15575_v48, %v15533_v35 }
 0x54c   :  { %v8899_v3 = vpop.permute.xlu0 %8898 }
 0x54d   :  { %v9095_v47 = vpop.permute.xlu1 %9094  ;;  %v8910_v37 = vadd.f32 %v8899_v3, %v8832_v55 }
 0x54e   :  { %v9103_v36 = vadd.f32 %v9095_v47, %v9025_v57 }
 0x550   :  { %v8903_v10 = vpop.permute.xlu0 %8902 }
 0x551   :  { %v9169_v34 = vpop.permute.xlu1 %9168  ;;  %v8912_v16 = vadd.f32 %v8903_v10, %v8834_v28 }
 0x552   :  { %v9179_v32 = vadd.f32 %v9169_v34, %v9101_v52 }
 0x554   :  { %v8925_v63 = vpop.permute.xlu0 %8924 }
 0x555   :  { %v8936_v27 = vadd.f32 %v8925_v63, %v8858_v62  ;;  %v9173_v12 = vpop.permute.xlu1 %9172 }
 0x556   :  { %v9181_v50 = vadd.f32 %v9173_v12, %v9103_v36 }
 0x557   :  { %v9002_v41 = vadd.f32 %v8998_v40, %v8936_v27 }
 0x558   :  { %v8929_v61 = vpop.permute.xlu0 %8928 }
 0x559   :  { %v8938_v15 = vadd.f32 %v8929_v61, %v8860_v26  ;;  %v9247_v42 = vpop.permute.xlu1 %9246 }
 0x55a   :  { %v9257_v21 = vadd.f32 %v9247_v42, %v9179_v32 }
 0x55b   :  { %v9004_v43 = vadd.f32 %v9000_v5, %v8938_v15 }
 0x55c   :  { %v9312_v25 = vmax.f32 %v9257_v21, 0.0  ;;  %v8951_v1 = vpop.permute.xlu0 %8950 }
 0x55d   :  { %v8962_v4 = vadd.f32 %v8951_v1, %v8884_v7  ;;  %v9251_v19 = vpop.permute.xlu1 %9250 }
 0x55e   :  { %v9259_v58 = vadd.f32 %v9251_v19, %v9181_v50  ;;  %9321 = vrot.lane.b32.xlu1 %v9312_v25, %s11401_s21 }
 0x55f   :  { %v9012_v59 = vadd.f32 %v9008_v53, %v8962_v4 }
 0x560   :  { %v9314_v8 = vmax.f32 %v9259_v58, 0.0  ;;  %v8955_v49 = vpop.permute.xlu0 %8954 }
 0x561   :  { %v8964_v39 = vadd.f32 %v8955_v49, %v8886_v33 }
 0x562   :  { %9325 = vrot.lane.b32.xlu1 %v9314_v8, %s11401_s21 }
 0x563   :  { %v9014_v22 = vadd.f32 %v9010_v14, %v8964_v39  ;;  %v9354_v39 = vstv %s10211_s2  ;;  %s10217_s2 = sld [smem:[#allocation11 + $0xf]] }
 0x564   :  { %v8977_v60 = vpop.permute.xlu0 %8976 }
 0x565   :  { %v8988_v2 = vadd.f32 %v8977_v60, %v8910_v37 }
 0x567   :  { %v9022_v47 = vadd.f32 %v9018_v17, %v8988_v2 }
 0x568   :  { %v8981_v9 = vpop.permute.xlu0 %8980 }
 0x569   :  { %v8990_v54 = vadd.f32 %v8981_v9, %v8912_v16 }
 0x56b   :  { %v9024_v23 = vadd.f32 %v9020_v31, %v8990_v54 }
 0x56c   :  { %v9037_v18 = vpop.permute.xlu0 %9036 }
 0x56d   :  { %v9048_v38 = vadd.f32 %v9037_v18, %v9002_v41  ;;  %v9406_v18 = vstv %s10213_s22 }
 0x570   :  { %v9041_v51 = vpop.permute.xlu0 %9040 }
 0x571   :  { %v9050_v35 = vadd.f32 %v9041_v51, %v9004_v43 }
 0x574   :  { %v9115_v3 = vpop.permute.xlu0 %9114 }
 0x575   :  { %v9126_v34 = vadd.f32 %v9115_v3, %v9048_v38 }
 0x578   :  { %v9119_v11 = vpop.permute.xlu0 %9118 }
 0x579   :  { %v9128_v20 = vadd.f32 %v9119_v11, %v9050_v35 }
 0x57c   :  { %v9193_v29 = vpop.permute.xlu0 %9192 }
 0x57d   :  { %v9204_v48 = vadd.f32 %v9193_v29, %v9126_v34 }
 0x57f   :  { %v9260_v62 = vmax.f32 %v9204_v48, 0.0  ;;  %v9446_v48 = vstv %s10215_s23  ;;  %s10229_s23 = sld [smem:[#allocation11 + $0x13]] }
 0x580   :  { %v9197_v13 = vpop.permute.xlu0 %9196 }
 0x581   :  { %v9206_v10 = vadd.f32 %v9197_v13, %v9128_v20  ;;  %9268 = vrot.lane.b32.xlu0 %v9260_v62, %s11401_s21 }
 0x583   :  { %v9262_v45 = vmax.f32 %v9206_v10, 0.0 }
 0x584   :  { %v9063_v46 = vpop.permute.xlu0 %9062 }
 0x585   :  { %9272 = vrot.lane.b32.xlu0 %v9262_v45, %s11401_s21  ;;  %v9074_v63 = vadd.f32 %v9063_v46, %v9012_v59 }
 0x588   :  { %v9067_v6 = vpop.permute.xlu0 %9066 }
 0x589   :  { %v9076_v12 = vadd.f32 %v9067_v6, %v9014_v22 }
 0x58c   :  { %v9141_v56 = vpop.permute.xlu0 %9140 }
 0x58d   :  { %v9152_v44 = vadd.f32 %v9141_v56, %v9074_v63  ;;  %v9472_v56 = vstv %s10216_s24 }
 0x590   :  { %v9145_v30 = vpop.permute.xlu0 %9144 }
 0x591   :  { %v9154_v52 = vadd.f32 %v9145_v30, %v9076_v12  ;;  %v9498_v12 = vstv %s9497_s25 }
 0x594   :  { %v9219_v27 = vpop.permute.xlu0 %9218 }
 0x595   :  { %v9230_v40 = vadd.f32 %v9219_v27, %v9152_v44 }
 0x597   :  { %v9286_v26 = vmax.f32 %v9230_v40, 0.0 }
 0x598   :  { %v9223_v41 = vpop.permute.xlu0 %9222 }
 0x599   :  { %v9232_v57 = vadd.f32 %v9223_v41, %v9154_v52  ;;  %9294 = vrot.lane.b32.xlu0 %v9286_v26, %s11401_s21 }
 0x59b   :  { %v9288_v32 = vmax.f32 %v9232_v57, 0.0 }
 0x59c   :  { %v9089_v61 = vpop.permute.xlu0 %9088 }
 0x59d   :  { %9298 = vrot.lane.b32.xlu0 %v9288_v32, %s11401_s21  ;;  %v9100_v21 = vadd.f32 %v9089_v61, %v9022_v47 }
 0x5a0   :  { %v9093_v0 = vpop.permute.xlu0 %9092  ;;  %v9271_v15 = vpop.permute.xlu1 %9270 }
 0x5a1   :  { %9283 = vst.msk [vmem:[#allocation3 + $0x9] sm:$0x1] %vm9282_vm7, %v9271_v15  ;;  %v9102_v50 = vadd.f32 %v9093_v0, %v9024_v23  ;;  %v9538_v0 = vstv %s10218_s26 }
 0x5a4   :  { %v9167_v42 = vpop.permute.xlu0 %9166  ;;  %v9275_v5 = vpop.permute.xlu1 %9274 }
 0x5a5   :  { %9285 = vst.msk [vmem:[#allocation3 + $0x39] sm:$0x1] %vm9282_vm7, %v9275_v5  ;;  %v9178_v7 = vadd.f32 %v9167_v42, %v9100_v21 }
 0x5a8   :  { %v9171_v36 = vpop.permute.xlu0 %9170  ;;  %v15681_v35 = vld [vmem:[#allocation3 + $0x9] sm:$0x3] }
 0x5a9   :  { %v9180_v1 = vadd.f32 %v9171_v36, %v9102_v50  ;;  %v9448_v62 = vmul.f32 %v9446_v48, %v15681_v35  ;;  %v9474_v30 = vmul.f32 %v9472_v56, %v15681_v35  ;;  %v9500_v52 = vmul.f32 %v9498_v12, %v15681_v35 }
 0x5aa   :  { %v9564_v50 = vstv %s10219_s27 }
 0x5ac   :  { %v9245_v43 = vpop.permute.xlu0 %9244  ;;  %v15689_v10 = vld [vmem:[#allocation3 + $0x39] sm:$0x3] }
 0x5ad   :  { %v9256_v25 = vadd.f32 %v9245_v43, %v9178_v7  ;;  %v9450_v46 = vmul.f32 %v9446_v48, %v15689_v10  ;;  %v9476_v44 = vmul.f32 %v9472_v56, %v15689_v10  ;;  %v9502_v57 = vmul.f32 %v9498_v12, %v15689_v10 }
 0x5af   :  { %v9311_v24 = vmax.f32 %v9256_v25, 0.0 }
 0x5b0   :  { %v9249_v4 = vpop.permute.xlu0 %9248 }
 0x5b1   :  { %v9258_v19 = vadd.f32 %v9249_v4, %v9180_v1  ;;  %9319 = vrot.lane.b32.xlu0 %v9311_v24, %s11401_s21 }
 0x5b3   :  { %v9313_v53 = vmax.f32 %v9258_v19, 0.0  ;;  %v9590_v19 = vstv %s10220_s29 }
 0x5b5   :  { %9323 = vrot.lane.b32.xlu0 %v9313_v53, %s11401_s21  ;;  %s10212_s21 = sld [smem:[#allocation11 + $0x5]] }
 0x5b8   :  { %v9297_v58 = vpop.permute.xlu1 %9296 }
 0x5b9   :  { %9308 = vst.msk [vmem:[#allocation3 + $0x19] sm:$0x1] %vm9282_vm7, %v9297_v58 }
 0x5bb   :  { %v9380_v47 = vstv %s10212_s21 }
 0x5bc   :  { %v9301_v33 = vpop.permute.xlu1 %9300 }
 0x5bd   :  { %9310 = vst.msk [vmem:[#allocation3 + $0x49] sm:$0x1] %vm9282_vm7, %v9301_v33 }
 0x5d0   :  { %v9322_v59 = vpop.permute.xlu1 %9321 }
 0x5d1   :  { %9333 = vst.msk [vmem:[#allocation3 + $0x29] sm:$0x1] %vm9282_vm7, %v9322_v59 }
 0x5d4   :  { %v9326_v8 = vpop.permute.xlu1 %9325 }
 0x5d5   :  { %9335 = vst.msk [vmem:[#allocation3 + $0x59] sm:$0x1] %vm9282_vm7, %v9326_v8  ;;  %v15747_v8 = vld [vmem:[#allocation3 + $0x19] sm:$0x3] }
 0x5f3   :  { %v9269_v49 = vpop.permute.xlu0 %9268 }
 0x5f4   :  { %9281 = vst.msk [vmem:[#allocation3 + $0x1] sm:$0xff] %vm9280_vm8, %v9269_v49  ;;  %v9630_v49 = vstv %s10222_s30 }
 0x5f7   :  { %v9273_v55 = vpop.permute.xlu0 %9272 }
 0x5f8   :  { %9284 = vst.msk [vmem:[#allocation3 + $0x31] sm:$0xff] %vm9280_vm8, %v9273_v55 }
 0x5fb   :  { %v15649_v14 = vld [vmem:[#allocation3 + $0x8] sm:$0x3]  ;;  %v15651_v37 = vld [vmem:[#allocation3] sm:$0xff] }
 0x5fc   :  { %v9356_v22 = vmul.f32 %v9354_v39, %v15649_v14  ;;  %v9355_v60 = vmul.f32 %v9354_v39, %v15651_v37  ;;  %v9382_v9 = vmul.f32 %v9380_v47, %v15649_v14  ;;  %v9381_v54 = vmul.f32 %v9380_v47, %v15651_v37  ;;  %v15683_v20 = vld [vmem:[#allocation3 + $0x1] sm:$0xff] }
 0x5fd   :  { %v9408_v3 = vmul.f32 %v9406_v18, %v15649_v14  ;;  %v9407_v11 = vmul.f32 %v9406_v18, %v15651_v37  ;;  %v9447_v13 = vmul.f32 %v9446_v48, %v15683_v20  ;;  %v9473_v63 = vmul.f32 %v9472_v56, %v15683_v20 }
 0x5fe   :  { %9365 = vrot.lane.b32.xlu1 %v9356_v22, %s11397_s4  ;;  %9363 = vrot.lane.b32.xlu0 %v9355_v60, %s11397_s4  ;;  %v9499_v26 = vmul.f32 %v9498_v12, %v15683_v20  ;;  %v15755_v60 = vld [vmem:[#allocation3 + $0x49] sm:$0x3] }
 0x5ff   :  { %v15657_v28 = vld [vmem:[#allocation3 + $0x38] sm:$0x3]  ;;  %v15659_v2 = vld [vmem:[#allocation3 + $0x30] sm:$0xff] }
 0x600   :  { %v9358_v17 = vmul.f32 %v9354_v39, %v15657_v28  ;;  %v9357_v16 = vmul.f32 %v9354_v39, %v15659_v2  ;;  %v9384_v31 = vmul.f32 %v9380_v47, %v15657_v28  ;;  %v9383_v23 = vmul.f32 %v9380_v47, %v15659_v2  ;;  %v15691_v45 = vld [vmem:[#allocation3 + $0x31] sm:$0xff] }
 0x601   :  { %v9410_v34 = vmul.f32 %v9406_v18, %v15657_v28  ;;  %v9409_v29 = vmul.f32 %v9406_v18, %v15659_v2  ;;  %v9449_v6 = vmul.f32 %v9446_v48, %v15691_v45  ;;  %v9475_v27 = vmul.f32 %v9472_v56, %v15691_v45 }
 0x602   :  { %9369 = vrot.lane.b32.xlu1 %v9358_v17, %s11397_s4  ;;  %9367 = vrot.lane.b32.xlu0 %v9357_v16, %s11397_s4  ;;  %v9501_v32 = vmul.f32 %v9498_v12, %v15691_v45  ;;  %v9632_v39 = vmul.f32 %v9630_v49, %v15747_v8  ;;  %v9634_v16 = vmul.f32 %v9630_v49, %v15755_v60  ;;  %v9722_v48 = vstv %s10226_s13 }
 0x606   :  { %9391 = vrot.lane.b32.xlu1 %v9382_v9, %s11398_s28  ;;  %9389 = vrot.lane.b32.xlu0 %v9381_v54, %s11398_s28  ;;  %v9656_v9 = vstv %s10223_s10 }
 0x607   :  { %v9658_v54 = vmul.f32 %v9656_v9, %v15747_v8 }
 0x60a   :  { %9395 = vrot.lane.b32.xlu1 %v9384_v31, %s11398_s28  ;;  %9393 = vrot.lane.b32.xlu0 %v9383_v23, %s11398_s28  ;;  %v9660_v23 = vmul.f32 %v9656_v9, %v15755_v60 }
 0x60b   :  { %v9295_v51 = vpop.permute.xlu0 %9294 }
 0x60c   :  { %9307 = vst.msk [vmem:[#allocation3 + $0x11] sm:$0xff] %vm9280_vm8, %v9295_v51  ;;  %v9682_v51 = vstv %s10224_s12 }
 0x60e   :  { %9417 = vrot.lane.b32.xlu1 %v9408_v3, %s11399_s11  ;;  %9415 = vrot.lane.b32.xlu0 %v9407_v11, %s11399_s11  ;;  %v9684_v3 = vmul.f32 %v9682_v51, %v15747_v8 }
 0x60f   :  { %v9299_v38 = vpop.permute.xlu0 %9298 }
 0x610   :  { %9309 = vst.msk [vmem:[#allocation3 + $0x41] sm:$0xff] %vm9280_vm8, %v9299_v38  ;;  %v9686_v38 = vmul.f32 %v9682_v51, %v15755_v60 }
 0x612   :  { %9421 = vrot.lane.b32.xlu1 %v9410_v34, %s11399_s11  ;;  %9419 = vrot.lane.b32.xlu0 %v9409_v29, %s11399_s11 }
 0x613   :  { %v15715_v61 = vld [vmem:[#allocation3 + $0x18] sm:$0x3]  ;;  %v15717_v15 = vld [vmem:[#allocation3 + $0x10] sm:$0xff] }
 0x614   :  { %v9540_v42 = vmul.f32 %v9538_v0, %v15715_v61  ;;  %v9539_v5 = vmul.f32 %v9538_v0, %v15717_v15  ;;  %v9566_v25 = vmul.f32 %v9564_v50, %v15715_v61  ;;  %v9565_v1 = vmul.f32 %v9564_v50, %v15717_v15  ;;  %v15749_v55 = vld [vmem:[#allocation3 + $0x11] sm:$0xff] }
 0x615   :  { %v9592_v53 = vmul.f32 %v9590_v19, %v15715_v61  ;;  %v9591_v58 = vmul.f32 %v9590_v19, %v15717_v15  ;;  %v9631_v22 = vmul.f32 %v9630_v49, %v15749_v55  ;;  %v9657_v31 = vmul.f32 %v9656_v9, %v15749_v55 }
 0x616   :  { %9457 = vrot.lane.b32.xlu1 %v9448_v62, %s11397_s4  ;;  %9455 = vrot.lane.b32.xlu0 %v9447_v13, %s11397_s4  ;;  %v9683_v11 = vmul.f32 %v9682_v51, %v15749_v55 }
 0x617   :  { %v15723_v36 = vld [vmem:[#allocation3 + $0x48] sm:$0x3]  ;;  %v15725_v21 = vld [vmem:[#allocation3 + $0x40] sm:$0xff] }
 0x618   :  { %v9542_v7 = vmul.f32 %v9538_v0, %v15723_v36  ;;  %v9541_v43 = vmul.f32 %v9538_v0, %v15725_v21  ;;  %v9568_v24 = vmul.f32 %v9564_v50, %v15723_v36  ;;  %v9567_v4 = vmul.f32 %v9564_v50, %v15725_v21  ;;  %v15757_v17 = vld [vmem:[#allocation3 + $0x41] sm:$0xff] }
 0x619   :  { %v9594_v33 = vmul.f32 %v9590_v19, %v15723_v36  ;;  %v9593_v59 = vmul.f32 %v9590_v19, %v15725_v21  ;;  %v9633_v47 = vmul.f32 %v9630_v49, %v15757_v17  ;;  %v9659_v18 = vmul.f32 %v9656_v9, %v15757_v17  ;;  %v15826_v9 = vld [vmem:[#allocation3 + $0x59] sm:$0x3] }
 0x61a   :  { %9461 = vrot.lane.b32.xlu1 %v9450_v46, %s11397_s4  ;;  %9459 = vrot.lane.b32.xlu0 %v9449_v6, %s11397_s4  ;;  %v9685_v34 = vmul.f32 %v9682_v51, %v15757_v17 }
 0x61e   :  { %9483 = vrot.lane.b32.xlu1 %v9474_v30, %s11398_s28  ;;  %9481 = vrot.lane.b32.xlu0 %v9473_v63, %s11398_s28 }
 0x622   :  { %9487 = vrot.lane.b32.xlu1 %v9476_v44, %s11398_s28  ;;  %9485 = vrot.lane.b32.xlu0 %v9475_v27, %s11398_s28  ;;  %v9748_v44 = vstv %s10227_s1 }
 0x623   :  { %v9320_v40 = vpop.permute.xlu0 %9319 }
 0x624   :  { %9332 = vst.msk [vmem:[#allocation3 + $0x21] sm:$0xff] %vm9280_vm8, %v9320_v40 }
 0x626   :  { %9509 = vrot.lane.b32.xlu1 %v9500_v52, %s11399_s11  ;;  %9507 = vrot.lane.b32.xlu0 %v9499_v26, %s11399_s11  ;;  %v9344_v26 = vstv %s10210_s3 }
 0x627   :  { %v9324_v41 = vpop.permute.xlu0 %9323  ;;  %v9348_v50 = vmul.f32 %v9344_v26, %v15657_v28 }
 0x628   :  { %9334 = vst.msk [vmem:[#allocation3 + $0x51] sm:$0xff] %vm9280_vm8, %v9324_v41  ;;  %v9774_v41 = vstv %s10228_s5 }
 0x62a   :  { %9513 = vrot.lane.b32.xlu1 %v9502_v57, %s11399_s11  ;;  %9511 = vrot.lane.b32.xlu0 %v9501_v32, %s11399_s11  ;;  %v9346_v57 = vmul.f32 %v9344_v26, %v15649_v14  ;;  %v9345_v32 = vmul.f32 %v9344_v26, %v15651_v37  ;;  %v9347_v14 = vmul.f32 %v9344_v26, %v15659_v2 }
 0x62b   :  { %v15779_v29 = vld [vmem:[#allocation3 + $0x28] sm:$0x3]  ;;  %v15781_v62 = vld [vmem:[#allocation3 + $0x20] sm:$0xff] }
 0x62c   :  { %v9724_v13 = vmul.f32 %v9722_v48, %v15779_v29  ;;  %v9723_v46 = vmul.f32 %v9722_v48, %v15781_v62  ;;  %v9750_v27 = vmul.f32 %v9748_v44, %v15779_v29  ;;  %v9749_v12 = vmul.f32 %v9748_v44, %v15781_v62 }
 0x62d   :  { %v9776_v0 = vmul.f32 %v9774_v41, %v15779_v29 }
 0x62e   :  { %9549 = vrot.lane.b32.xlu1 %v9540_v42, %s11397_s4  ;;  %9547 = vrot.lane.b32.xlu0 %v9539_v5, %s11397_s4  ;;  %v9775_v42 = vmul.f32 %v9774_v41, %v15781_v62  ;;  %v9337_v5 = vstv %s15908_s6  ;;  %s10231_s6 = sld [smem:[#allocation11 + $0x11]] }
 0x62f   :  { %v15787_v6 = vld [vmem:[#allocation3 + $0x58] sm:$0x3]  ;;  %v15789_v56 = vld [vmem:[#allocation3 + $0x50] sm:$0xff]  ;;  %v9352_v28 = vadd.f32 %v9348_v50, %v9337_v5  ;;  %v9351_v2 = vadd.f32 %v9347_v14, %v9337_v5 }
 0x630   :  { %v9726_v30 = vmul.f32 %v9722_v48, %v15787_v6  ;;  %v9725_v63 = vmul.f32 %v9722_v48, %v15789_v56  ;;  %v9752_v40 = vmul.f32 %v9748_v44, %v15787_v6  ;;  %v9751_v52 = vmul.f32 %v9748_v44, %v15789_v56 }
 0x631   :  { %v9436_v44 = vstv %s10214_s16 }
 0x632   :  { %9553 = vrot.lane.b32.xlu1 %v9542_v7, %s11397_s4  ;;  %9551 = vrot.lane.b32.xlu0 %v9541_v43, %s11397_s4  ;;  %v9350_v7 = vadd.f32 %v9346_v57, %v9337_v5  ;;  %v9349_v43 = vadd.f32 %v9345_v32, %v9337_v5 }
 0x636   :  { %9575 = vrot.lane.b32.xlu1 %v9566_v25, %s11398_s28  ;;  %9573 = vrot.lane.b32.xlu0 %v9565_v1, %s11398_s28  ;;  %v9778_v1 = vmul.f32 %v9774_v41, %v15787_v6 }
 0x63a   :  { %9579 = vrot.lane.b32.xlu1 %v9568_v24, %s11398_s28  ;;  %9577 = vrot.lane.b32.xlu0 %v9567_v4, %s11398_s28  ;;  %v9777_v24 = vmul.f32 %v9774_v41, %v15789_v56 }
 0x63e   :  { %9601 = vrot.lane.b32.xlu1 %v9592_v53, %s11399_s11  ;;  %9599 = vrot.lane.b32.xlu0 %v9591_v58, %s11399_s11  ;;  %v15818_v53 = vld [vmem:[#allocation3 + $0x29] sm:$0x3]  ;;  %v9814_v58 = vstv %s10230_s0 }
 0x642   :  { %9605 = vrot.lane.b32.xlu1 %v9594_v33, %s11399_s11  ;;  %9603 = vrot.lane.b32.xlu0 %v9593_v59, %s11399_s11  ;;  %v15820_v33 = vld [vmem:[#allocation3 + $0x21] sm:$0xff] }
 0x646   :  { %9641 = vrot.lane.b32.xlu1 %v9632_v39, %s11397_s4  ;;  %9639 = vrot.lane.b32.xlu0 %v9631_v22, %s11397_s4  ;;  %v9816_v39 = vmul.f32 %v9814_v58, %v15818_v53  ;;  %v9815_v22 = vmul.f32 %v9814_v58, %v15820_v33 }
 0x64a   :  { %9645 = vrot.lane.b32.xlu1 %v9634_v16, %s11397_s4  ;;  %9643 = vrot.lane.b32.xlu0 %v9633_v47, %s11397_s4 }
 0x64e   :  { %9667 = vrot.lane.b32.xlu1 %v9658_v54, %s11398_s28  ;;  %9665 = vrot.lane.b32.xlu0 %v9657_v31, %s11398_s28  ;;  %v15828_v54 = vld [vmem:[#allocation3 + $0x51] sm:$0xff] }
 0x64f   :  { %v9817_v51 = vmul.f32 %v9814_v58, %v15828_v54 }
 0x652   :  { %9671 = vrot.lane.b32.xlu1 %v9660_v23, %s11398_s28  ;;  %9669 = vrot.lane.b32.xlu0 %v9659_v18, %s11398_s28  ;;  %v9818_v18 = vmul.f32 %v9814_v58, %v15826_v9 }
 0x656   :  { %9693 = vrot.lane.b32.xlu1 %v9684_v3, %s11399_s11  ;;  %9691 = vrot.lane.b32.xlu0 %v9683_v11, %s11399_s11 }
 0x65a   :  { %9697 = vrot.lane.b32.xlu1 %v9686_v38, %s11399_s11  ;;  %9695 = vrot.lane.b32.xlu0 %v9685_v34, %s11399_s11  ;;  %v9840_v38 = vstv %s10231_s6 }
 0x65b   :  { %v9844_v41 = vmul.f32 %v9840_v38, %v15826_v9  ;;  %v9843_v57 = vmul.f32 %v9840_v38, %v15828_v54 }
 0x65e   :  { %9733 = vrot.lane.b32.xlu1 %v9724_v13, %s11397_s4  ;;  %9731 = vrot.lane.b32.xlu0 %v9723_v46, %s11397_s4  ;;  %v9842_v13 = vmul.f32 %v9840_v38, %v15818_v53  ;;  %v9841_v46 = vmul.f32 %v9840_v38, %v15820_v33 }
 0x662   :  { %9737 = vrot.lane.b32.xlu1 %v9726_v30, %s11397_s4  ;;  %9735 = vrot.lane.b32.xlu0 %v9725_v63, %s11397_s4 }
 0x666   :  { %9759 = vrot.lane.b32.xlu1 %v9750_v27, %s11398_s28  ;;  %9757 = vrot.lane.b32.xlu0 %v9749_v12, %s11398_s28  ;;  %v9866_v27 = vstv %s10232_s17  ;;  %v9895_v12 = vld [vmem:[%s15909_s7] sm:$0xff] }
 0x667   :  { %v9899_v32 = vmul.f32 1.442695, %v9895_v12 }
 0x669   :  { %11307 = vpow2.f32 %v9899_v32 }
 0x66a   :  { %9763 = vrot.lane.b32.xlu1 %v9752_v40, %s11398_s28  ;;  %9761 = vrot.lane.b32.xlu0 %v9751_v52, %s11398_s28  ;;  %v9897_v40 = vld [vmem:[%s15909_s7 + $0x10] sm:$0xff] }
 0x66e   :  { %9785 = vrot.lane.b32.xlu1 %v9776_v0, %s11399_s11  ;;  %9783 = vrot.lane.b32.xlu0 %v9775_v42, %s11399_s11  ;;  %v9903_v0 = vmul.f32 1.442695, %v9897_v40 }
 0x670   :  { %v9366_v25 = vpop.permute.xlu1 %9365  ;;  %v9364_v37 = vpop.permute.xlu0 %9363  ;;  %11309 = vpow2.f32 %v9903_v0 }
 0x671   :  { %v9376_v4 = vadd.f32 %v9366_v25, %v9350_v7  ;;  %v9375_v19 = vadd.f32 %v9364_v37, %v9349_v43  ;;  %v9438_v7 = vmul.f32 %v9436_v44, %v15681_v35  ;;  %v9437_v43 = vmul.f32 %v9436_v44, %v15683_v20 }
 0x672   :  { %9789 = vrot.lane.b32.xlu1 %v9778_v1, %s11399_s11  ;;  %9787 = vrot.lane.b32.xlu0 %v9777_v24, %s11399_s11  ;;  %v9868_v1 = vmul.f32 %v9866_v27, %v15818_v53  ;;  %v9867_v24 = vmul.f32 %v9866_v27, %v15820_v33  ;;  %v9440_v35 = vmul.f32 %v9436_v44, %v15689_v10 }
 0x673   :  { %v9439_v20 = vmul.f32 %v9436_v44, %v15691_v45  ;;  %v11308_v10 = vpop.eup %11307 }
 0x674   :  { %v9370_v59 = vpop.permute.xlu1 %9369  ;;  %v9368_v49 = vpop.permute.xlu0 %9367  ;;  %9907 = vst.msk [vmem:[%s15911_s9] sm:$0xff] %vm82_vm3, %v11308_v10 }
 0x675   :  { %v9378_v16 = vadd.f32 %v9370_v59, %v9352_v28  ;;  %v9377_v47 = vadd.f32 %v9368_v49, %v9351_v2  ;;  %v9870_v49 = vmul.f32 %v9866_v27, %v15826_v9 }
 0x676   :  { %9825 = vrot.lane.b32.xlu1 %v9816_v39, %s11397_s4  ;;  %9823 = vrot.lane.b32.xlu0 %v9815_v22, %s11397_s4  ;;  %v9869_v39 = vmul.f32 %v9866_v27, %v15828_v54 }
 0x678   :  { %v9392_v31 = vpop.permute.xlu1 %9391  ;;  %v9390_v23 = vpop.permute.xlu0 %9389 }
 0x679   :  { %v9402_v3 = vadd.f32 %v9392_v31, %v9376_v4  ;;  %v9401_v11 = vadd.f32 %v9390_v23, %v9375_v19 }
 0x67a   :  { %9829 = vrot.lane.b32.xlu1 %v9818_v18, %s11397_s4  ;;  %9827 = vrot.lane.b32.xlu0 %v9817_v51, %s11397_s4  ;;  %v11310_v31 = vpop.eup %11309 }
 0x67b   :  { %9909 = vst.msk [vmem:[%s15911_s9 + $0x10] sm:$0xff] %vm82_vm3, %v11310_v31  ;;  %s10221_s9 = sld [smem:[#allocation11 + $0xb]] }
 0x67c   :  { %v9396_v34 = vpop.permute.xlu1 %9395  ;;  %v9394_v48 = vpop.permute.xlu0 %9393 }
 0x67d   :  { %v9404_v30 = vadd.f32 %v9396_v34, %v9378_v16  ;;  %v9403_v63 = vadd.f32 %v9394_v48, %v9377_v47 }
 0x67e   :  { %9851 = vrot.lane.b32.xlu1 %v9842_v13, %s11398_s28  ;;  %9849 = vrot.lane.b32.xlu0 %v9841_v46, %s11398_s28 }
 0x680   :  { %v9418_v52 = vpop.permute.xlu1 %9417  ;;  %v9416_v26 = vpop.permute.xlu0 %9415 }
 0x681   :  { %v9428_v42 = vadd.f32 %v9418_v52, %v9402_v3  ;;  %v9427_v5 = vadd.f32 %v9416_v26, %v9401_v11 }
 0x682   :  { %9855 = vrot.lane.b32.xlu1 %v9844_v41, %s11398_s28  ;;  %9853 = vrot.lane.b32.xlu0 %v9843_v57, %s11398_s28 }
 0x683   :  { %v9442_v50 = vadd.f32 %v9438_v7, %v9428_v42  ;;  %v9441_v14 = vadd.f32 %v9437_v43, %v9427_v5 }
 0x684   :  { %v9422_v25 = vpop.permute.xlu1 %9421  ;;  %v9420_v37 = vpop.permute.xlu0 %9419 }
 0x685   :  { %v9430_v4 = vadd.f32 %v9422_v25, %v9404_v30  ;;  %v9429_v19 = vadd.f32 %v9420_v37, %v9403_v63  ;;  %v9528_v30 = vstv %s10217_s2 }
 0x686   :  { %9877 = vrot.lane.b32.xlu1 %v9868_v1, %s11399_s11  ;;  %9875 = vrot.lane.b32.xlu0 %v9867_v24, %s11399_s11  ;;  %v9530_v40 = vmul.f32 %v9528_v30, %v15715_v61  ;;  %v9529_v52 = vmul.f32 %v9528_v30, %v15717_v15  ;;  %v9532_v5 = vmul.f32 %v9528_v30, %v15723_v36 }
 0x687   :  { %v9444_v58 = vadd.f32 %v9440_v35, %v9430_v4  ;;  %v9443_v28 = vadd.f32 %v9439_v20, %v9429_v19  ;;  %v9531_v7 = vmul.f32 %v9528_v30, %v15725_v21  ;;  %v9620_v20 = vstv %s10221_s9 }
 0x688   :  { %v9458_v2 = vpop.permute.xlu1 %9457  ;;  %v9456_v59 = vpop.permute.xlu0 %9455  ;;  %v9622_v21 = vmul.f32 %v9620_v20, %v15747_v8 }
 0x689   :  { %v9468_v22 = vadd.f32 %v9458_v2, %v9442_v50  ;;  %v9467_v16 = vadd.f32 %v9456_v59, %v9441_v14  ;;  %v9621_v59 = vmul.f32 %v9620_v20, %v15749_v55 }
 0x68a   :  { %9881 = vrot.lane.b32.xlu1 %v9870_v49, %s11399_s11  ;;  %9879 = vrot.lane.b32.xlu0 %v9869_v39, %s11399_s11  ;;  %s10225_s11 = sld [smem:[#allocation11 + $0x17]] }
 0x68c   :  { %v9462_v45 = vpop.permute.xlu1 %9461  ;;  %v9460_v47 = vpop.permute.xlu0 %9459 }
 0x68d   :  { %v9470_v23 = vadd.f32 %v9462_v45, %v9444_v58  ;;  %v9469_v18 = vadd.f32 %v9460_v47, %v9443_v28 }
 0x690   :  { %v9484_v51 = vpop.permute.xlu1 %9483  ;;  %v9482_v3 = vpop.permute.xlu0 %9481 }
 0x691   :  { %v9494_v11 = vadd.f32 %v9484_v51, %v9468_v22  ;;  %v9493_v38 = vadd.f32 %v9482_v3, %v9467_v16 }
 0x694   :  { %v9488_v34 = vpop.permute.xlu1 %9487  ;;  %v9486_v48 = vpop.permute.xlu0 %9485 }
 0x695   :  { %v9496_v13 = vadd.f32 %v9488_v34, %v9470_v23  ;;  %v9495_v46 = vadd.f32 %v9486_v48, %v9469_v18 }
 0x698   :  { %v9510_v63 = vpop.permute.xlu1 %9509  ;;  %v9508_v44 = vpop.permute.xlu0 %9507 }
 0x699   :  { %v9520_v27 = vadd.f32 %v9510_v63, %v9494_v11  ;;  %v9519_v12 = vadd.f32 %v9508_v44, %v9493_v38  ;;  %v9624_v11 = vmul.f32 %v9620_v20, %v15755_v60  ;;  %v9623_v38 = vmul.f32 %v9620_v20, %v15757_v17 }
 0x69b   :  { %v9534_v26 = vadd.f32 %v9530_v40, %v9520_v27  ;;  %v9533_v41 = vadd.f32 %v9529_v52, %v9519_v12  ;;  %v9712_v52 = vstv %s10225_s11 }
 0x69c   :  { %v9514_v57 = vpop.permute.xlu1 %9513  ;;  %v9512_v32 = vpop.permute.xlu0 %9511  ;;  %v9714_v17 = vmul.f32 %v9712_v52, %v15779_v29 }
 0x69d   :  { %v9522_v0 = vadd.f32 %v9514_v57, %v9496_v13  ;;  %v9521_v42 = vadd.f32 %v9512_v32, %v9495_v46  ;;  %v9713_v32 = vmul.f32 %v9712_v52, %v15781_v62 }
 0x69f   :  { %v9536_v43 = vadd.f32 %v9532_v5, %v9522_v0  ;;  %v9535_v50 = vadd.f32 %v9531_v7, %v9521_v42 }
 0x6a0   :  { %v9550_v14 = vpop.permute.xlu1 %9549  ;;  %v9548_v25 = vpop.permute.xlu0 %9547 }
 0x6a1   :  { %v9560_v19 = vadd.f32 %v9550_v14, %v9534_v26  ;;  %v9559_v35 = vadd.f32 %v9548_v25, %v9533_v41 }
 0x6a4   :  { %v9554_v37 = vpop.permute.xlu1 %9553  ;;  %v9552_v1 = vpop.permute.xlu0 %9551 }
 0x6a5   :  { %v9562_v49 = vadd.f32 %v9554_v37, %v9536_v43  ;;  %v9561_v39 = vadd.f32 %v9552_v1, %v9535_v50 }
 0x6a8   :  { %v9576_v61 = vpop.permute.xlu1 %9575  ;;  %v9574_v24 = vpop.permute.xlu0 %9573 }
 0x6a9   :  { %v9586_v58 = vadd.f32 %v9576_v61, %v9560_v19  ;;  %v9585_v28 = vadd.f32 %v9574_v24, %v9559_v35 }
 0x6ac   :  { %v9580_v15 = vpop.permute.xlu1 %9579  ;;  %v9578_v4 = vpop.permute.xlu0 %9577 }
 0x6ad   :  { %v9588_v10 = vadd.f32 %v9580_v15, %v9562_v49  ;;  %v9587_v45 = vadd.f32 %v9578_v4, %v9561_v39  ;;  %v9716_v15 = vmul.f32 %v9712_v52, %v15787_v6  ;;  %v9715_v4 = vmul.f32 %v9712_v52, %v15789_v56 }
 0x6ae   :  { %v9804_v39 = vstv %s10229_s23 }
 0x6af   :  { %v9806_v56 = vmul.f32 %v9804_v39, %v15818_v53 }
 0x6b0   :  { %v9602_v2 = vpop.permute.xlu1 %9601  ;;  %v9600_v36 = vpop.permute.xlu0 %9599 }
 0x6b1   :  { %v9612_v22 = vadd.f32 %v9602_v2, %v9586_v58  ;;  %v9611_v16 = vadd.f32 %v9600_v36, %v9585_v28 }
 0x6b3   :  { %v9626_v47 = vadd.f32 %v9622_v21, %v9612_v22  ;;  %v9625_v31 = vadd.f32 %v9621_v59, %v9611_v16 }
 0x6b4   :  { %v9606_v23 = vpop.permute.xlu1 %9605  ;;  %v9604_v18 = vpop.permute.xlu0 %9603 }
 0x6b5   :  { %v9614_v51 = vadd.f32 %v9606_v23, %v9588_v10  ;;  %v9613_v3 = vadd.f32 %v9604_v18, %v9587_v45  ;;  %v9805_v45 = vmul.f32 %v9804_v39, %v15820_v33 }
 0x6b7   :  { %v9628_v34 = vadd.f32 %v9624_v11, %v9614_v51  ;;  %v9627_v8 = vadd.f32 %v9623_v38, %v9613_v3 }
 0x6b8   :  { %v9642_v48 = vpop.permute.xlu1 %9641  ;;  %v9640_v55 = vpop.permute.xlu0 %9639 }
 0x6b9   :  { %v9652_v12 = vadd.f32 %v9642_v48, %v9626_v47  ;;  %v9651_v40 = vadd.f32 %v9640_v55, %v9625_v31 }
 0x6bc   :  { %v9646_v13 = vpop.permute.xlu1 %9645  ;;  %v9644_v46 = vpop.permute.xlu0 %9643 }
 0x6bd   :  { %v9654_v0 = vadd.f32 %v9646_v13, %v9628_v34  ;;  %v9653_v42 = vadd.f32 %v9644_v46, %v9627_v8  ;;  %v9808_v13 = vmul.f32 %v9804_v39, %v15826_v9  ;;  %v9807_v46 = vmul.f32 %v9804_v39, %v15828_v54 }
 0x6c0   :  { %v9668_v30 = vpop.permute.xlu1 %9667  ;;  %v9666_v63 = vpop.permute.xlu0 %9665 }
 0x6c1   :  { %v9678_v26 = vadd.f32 %v9668_v30, %v9652_v12  ;;  %v9677_v41 = vadd.f32 %v9666_v63, %v9651_v40 }
 0x6c4   :  { %v9672_v44 = vpop.permute.xlu1 %9671  ;;  %v9670_v27 = vpop.permute.xlu0 %9669 }
 0x6c5   :  { %v9680_v43 = vadd.f32 %v9672_v44, %v9654_v0  ;;  %v9679_v50 = vadd.f32 %v9670_v27, %v9653_v42 }
 0x6c8   :  { %v9694_v57 = vpop.permute.xlu1 %9693  ;;  %v9692_v60 = vpop.permute.xlu0 %9691 }
 0x6c9   :  { %v9704_v5 = vadd.f32 %v9694_v57, %v9678_v26  ;;  %v9703_v7 = vadd.f32 %v9692_v60, %v9677_v41 }
 0x6cb   :  { %v9718_v14 = vadd.f32 %v9714_v17, %v9704_v5  ;;  %v9717_v25 = vadd.f32 %v9713_v32, %v9703_v7 }
 0x6cc   :  { %v9698_v37 = vpop.permute.xlu1 %9697  ;;  %v9696_v1 = vpop.permute.xlu0 %9695 }
 0x6cd   :  { %v9706_v61 = vadd.f32 %v9698_v37, %v9680_v43  ;;  %v9705_v24 = vadd.f32 %v9696_v1, %v9679_v50 }
 0x6cf   :  { %v9720_v19 = vadd.f32 %v9716_v15, %v9706_v61  ;;  %v9719_v29 = vadd.f32 %v9715_v4, %v9705_v24 }
 0x6d0   :  { %v9734_v35 = vpop.permute.xlu1 %9733  ;;  %v9732_v62 = vpop.permute.xlu0 %9731 }
 0x6d1   :  { %v9744_v59 = vadd.f32 %v9734_v35, %v9718_v14  ;;  %v9743_v49 = vadd.f32 %v9732_v62, %v9717_v25 }
 0x6d4   :  { %v9738_v20 = vpop.permute.xlu1 %9737  ;;  %v9736_v58 = vpop.permute.xlu0 %9735 }
 0x6d5   :  { %v9746_v47 = vadd.f32 %v9738_v20, %v9720_v19  ;;  %v9745_v31 = vadd.f32 %v9736_v58, %v9719_v29 }
 0x6d8   :  { %v9760_v28 = vpop.permute.xlu1 %9759  ;;  %v9758_v2 = vpop.permute.xlu0 %9757 }
 0x6d9   :  { %v9770_v22 = vadd.f32 %v9760_v28, %v9744_v59  ;;  %v9769_v16 = vadd.f32 %v9758_v2, %v9743_v49 }
 0x6dc   :  { %v9764_v36 = vpop.permute.xlu1 %9763  ;;  %v9762_v21 = vpop.permute.xlu0 %9761 }
 0x6dd   :  { %v9772_v51 = vadd.f32 %v9764_v36, %v9746_v47  ;;  %v9771_v3 = vadd.f32 %v9762_v21, %v9745_v31 }
 0x6e0   :  { %v9786_v10 = vpop.permute.xlu1 %9785  ;;  %v9784_v6 = vpop.permute.xlu0 %9783 }
 0x6e1   :  { %v9796_v23 = vadd.f32 %v9786_v10, %v9770_v22  ;;  %v9795_v18 = vadd.f32 %v9784_v6, %v9769_v16 }
 0x6e3   :  { %v9810_v11 = vadd.f32 %v9806_v56, %v9796_v23  ;;  %v9809_v38 = vadd.f32 %v9805_v45, %v9795_v18 }
 0x6e4   :  { %v9790_v34 = vpop.permute.xlu1 %9789  ;;  %v9788_v8 = vpop.permute.xlu0 %9787 }
 0x6e5   :  { %v9798_v48 = vadd.f32 %v9790_v34, %v9772_v51  ;;  %v9797_v55 = vadd.f32 %v9788_v8, %v9771_v3 }
 0x6e7   :  { %v9812_v30 = vadd.f32 %v9808_v13, %v9798_v48  ;;  %v9811_v53 = vadd.f32 %v9807_v46, %v9797_v55 }
 0x6e8   :  { %v9826_v63 = vpop.permute.xlu1 %9825  ;;  %v9824_v33 = vpop.permute.xlu0 %9823 }
 0x6e9   :  { %v9836_v41 = vadd.f32 %v9826_v63, %v9810_v11  ;;  %v9835_v57 = vadd.f32 %v9824_v33, %v9809_v38 }
 0x6ec   :  { %v9830_v44 = vpop.permute.xlu1 %9829  ;;  %v9828_v27 = vpop.permute.xlu0 %9827 }
 0x6ed   :  { %v9838_v42 = vadd.f32 %v9830_v44, %v9812_v30  ;;  %v9837_v9 = vadd.f32 %v9828_v27, %v9811_v53 }
 0x6f0   :  { %v9852_v12 = vpop.permute.xlu1 %9851  ;;  %v9850_v40 = vpop.permute.xlu0 %9849 }
 0x6f1   :  { %v9862_v60 = vadd.f32 %v9852_v12, %v9836_v41  ;;  %v9861_v17 = vadd.f32 %v9850_v40, %v9835_v57 }
 0x6f4   :  { %v9856_v52 = vpop.permute.xlu1 %9855  ;;  %v9854_v26 = vpop.permute.xlu0 %9853 }
 0x6f5   :  { %v9864_v7 = vadd.f32 %v9856_v52, %v9838_v42  ;;  %v9863_v43 = vadd.f32 %v9854_v26, %v9837_v9 }
 0x6f8   :  { %v9878_v32 = vpop.permute.xlu1 %9877  ;;  %v9876_v0 = vpop.permute.xlu0 %9875 }
 0x6f9   :  { %v9888_v5 = vadd.f32 %v9878_v32, %v9862_v60  ;;  %v9887_v54 = vadd.f32 %v9876_v0, %v9861_v17 }
 0x6fb   :  { %9892 = vst.msk [vmem:[%s15910_s8 + $0x8] sm:$0x3] %vm84_vm2, %v9888_v5 }
 0x6fc   :  { %9891 = vst.msk [vmem:[%s15910_s8] sm:$0xff] %vm82_vm3, %v9887_v54  ;;  %v9882_v50 = vpop.permute.xlu1 %9881  ;;  %v9880_v14 = vpop.permute.xlu0 %9879 }
 0x6fd   :  { %v9890_v25 = vadd.f32 %v9882_v50, %v9864_v7  ;;  %v9889_v37 = vadd.f32 %v9880_v14, %v9863_v43 }
 0x6ff   :  { %9894 = vst.msk [vmem:[%s15910_s8 + $0x18] sm:$0x3] %vm84_vm2, %v9890_v25 }
 0x700   :  { %9893 = vst.msk [vmem:[%s15910_s8 + $0x10] sm:$0xff] %vm82_vm3, %v9889_v37 }
 0x701   :  { %9919 = vsyncpa [#allocation6], 1 }
 0x702   :  { %9920 = vsyncpa [#allocation7], 1 }
 0x703   :  { %9921 = vsyncpa [#allocation10], 1 }

</bundles_post_ra>
